<compile_context>
chip_gen: v7x
topology: tpu7x:2x2x1
jax: 0.10.0
libtpu: 0.0.40
codegen_flags: <defaults>
</compile_context>

<pallas_src>
import math
import functools

import jax
import jax.numpy as jnp
from jax import lax
from jax.experimental import pallas as pl
from jax.experimental.pallas import tpu as pltpu

_VMEM_LIMIT = 32 * 1024 * 1024  # explicit scoped-VMEM limit (v5e default is only 16 MiB)


# ----------------------------- in-kernel helpers -----------------------------

def _ln(x, g, b, eps=1e-5):
    """Row-wise LayerNorm in f32 (PyTorch default eps)."""
    mu = jnp.mean(x, axis=-1, keepdims=True)
    c = x - mu
    var = jnp.mean(c * c, axis=-1, keepdims=True)
    return c * lax.rsqrt(var + eps) * g + b


def _mha(q, k, v, wo, bo, num_heads):
    """Multi-head attention with a SINGLE fused output projection.

    q:(Lq,E) f32 (already scaled), k/v:(Lk,E) f32, wo:(E,E) bf16, bo:(1,E) f32 -> (Lq,E) f32.
    Per-head contexts are written at their static lane offsets (concat) and hit wo with one
    full-contraction (K=E) matmul instead of num_heads K=dh matmuls + accumulation adds.
    """
    E = q.shape[-1]
    dh = E // num_heads
    ctx = []
    for h in range(num_heads):                      # static loop; nh is small here
        sl = slice(h * dh, (h + 1) * dh)
        qh = q[:, sl].astype(jnp.bfloat16)
        kh = k[:, sl].astype(jnp.bfloat16)
        vh = v[:, sl].astype(jnp.bfloat16)
        s = lax.dot_general(qh, kh, (((1,), (1,)), ((), ())),
                            preferred_element_type=jnp.float32)        # (Lq, Lk)
        s = s - jnp.max(s, axis=-1, keepdims=True)
        p = jnp.exp(s)
        p = p * pl.reciprocal(jnp.sum(p, axis=-1, keepdims=True), approx=True)
        ctx.append(jnp.dot(p.astype(jnp.bfloat16), vh,
                           preferred_element_type=jnp.float32))        # (Lq, dh)
    o = jnp.concatenate(ctx, axis=-1)                                   # (Lq, E)
    return jnp.dot(o.astype(jnp.bfloat16), wo,
                   preferred_element_type=jnp.float32) + bo


def _enc_layer_body(x, wqkv, bqkv, wo, bo, ln1g, ln1b, w1, b1, w2, b2, ln2g, ln2b, num_heads):
    """Post-LN nn.TransformerEncoderLayer (relu FFN) on one (L,E) slab, f32 in/out."""
    E = x.shape[-1]
    qk_scale = 1.0 / math.sqrt(E // num_heads)
    qkv = jnp.dot(x.astype(jnp.bfloat16), wqkv,
                  preferred_element_type=jnp.float32) + bqkv            # (L, 3E)
    a = _mha(qkv[:, :E] * qk_scale, qkv[:, E:2 * E], qkv[:, 2 * E:], wo, bo, num_heads)
    x = _ln(x + a, ln1g, ln1b)
    h = jnp.maximum(jnp.dot(x.astype(jnp.bfloat16), w1,
                            preferred_element_type=jnp.float32) + b1, 0.0)
    h = jnp.dot(h.astype(jnp.bfloat16), w2,
                preferred_element_type=jnp.float32) + b2
    return _ln(x + h, ln2g, ln2b)


# ----------------------------- fused stack kernels -----------------------------

def _patch_embed_kernel(x_ref, w_ref, b_ref, pe_ref, o_ref):
    """Patch projection (conv-as-matmul) + ReLU + positional encoding, fused."""
    x = x_ref[0].astype(jnp.bfloat16)                                   # (S, C*P*P)
    y = jnp.dot(x, w_ref[...], preferred_element_type=jnp.float32) + b_ref[...]
    o_ref[0] = (jnp.maximum(y, 0.0) + pe_ref[0]).astype(o_ref.dtype)


def _enc_stack_kernel(*refs, num_heads, final_ln):
    """Whole encoder stack: grid = (rows, layers).  Activation resident in VMEM scratch;
    weights for layer l are selected by the layer grid index (prefetched while l-1 computes)."""
    if final_ln:
        (x_ref, wqkv, bqkv, wo, bo, ln1g, ln1b,
         w1, b1, w2, b2, ln2g, ln2b, fg, fb, o_ref, acc_ref) = refs
    else:
        (x_ref, wqkv, bqkv, wo, bo, ln1g, ln1b,
         w1, b1, w2, b2, ln2g, ln2b, o_ref, acc_ref) = refs
        fg = fb = None

    l = pl.program_id(1)

    @pl.when(l == 0)
    def _():
        acc_ref[...] = x_ref[0].astype(jnp.float32)

    x = _enc_layer_body(acc_ref[...], wqkv[0], bqkv[0], wo[0], bo[0],
                        ln1g[0], ln1b[0], w1[0], b1[0], w2[0], b2[0],
                        ln2g[0], ln2b[0], num_heads)
    acc_ref[...] = x

    @pl.when(l == pl.num_programs(1) - 1)
    def _():
        y = _ln(x, fg[...], fb[...]) if final_ln else x
        o_ref[0] = y.astype(o_ref.dtype)


def _dec_stack_kernel(x_ref, mem_ref,
                      s_wqkv, s_bqkv, s_wo, s_bo, ln1g, ln1b,
                      c_wq, c_bq, c_wkv, c_bkv, c_wo, c_bo, ln2g, ln2b,
                      w1, b1, w2, b2, ln3g, ln3b,
                      o_ref, acc_ref, *, num_heads, scale_factor):
    """Whole decoder stack (no masks, as in the reference call): grid = (batch, layers).
    memory * scale_factor folded into the l==0 load."""
    l = pl.program_id(1)

    @pl.when(l == 0)
    def _():
        acc_ref[...] = x_ref[0].astype(jnp.float32) * scale_factor

    x = acc_ref[...]
    m = mem_ref[0].astype(jnp.float32)
    E = x.shape[-1]
    qk_scale = 1.0 / math.sqrt(E // num_heads)

    # self-attention
    qkv = jnp.dot(x.astype(jnp.bfloat16), s_wqkv[0],
                  preferred_element_type=jnp.float32) + s_bqkv[0]
    a = _mha(qkv[:, :E] * qk_scale, qkv[:, E:2 * E], qkv[:, 2 * E:],
             s_wo[0], s_bo[0], num_heads)
    x = _ln(x + a, ln1g[0], ln1b[0])

    # cross-attention (K/V from memory, fused (E,2E) weight)
    q = (jnp.dot(x.astype(jnp.bfloat16), c_wq[0],
                 preferred_element_type=jnp.float32) + c_bq[0]) * qk_scale
    kv = jnp.dot(m.astype(jnp.bfloat16), c_wkv[0],
                 preferred_element_type=jnp.float32) + c_bkv[0]
    a = _mha(q, kv[:, :E], kv[:, E:], c_wo[0], c_bo[0], num_heads)
    x = _ln(x + a, ln2g[0], ln2b[0])

    # FFN
    h = jnp.maximum(jnp.dot(x.astype(jnp.bfloat16), w1[0],
                            preferred_element_type=jnp.float32) + b1[0], 0.0)
    h = jnp.dot(h.astype(jnp.bfloat16), w2[0],
                preferred_element_type=jnp.float32) + b2[0]
    x = _ln(x + h, ln3g[0], ln3b[0])

    acc_ref[...] = x

    @pl.when(l == pl.num_programs(1) - 1)
    def _():
        o_ref[0] = x.astype(o_ref.dtype)


def _ln_fcout_kernel(x_ref, g_ref, b_ref, w_ref, fb_ref, o_ref, xln_ref):
    """Final decoder LayerNorm + vocab projection.  LN computed ONCE per batch row into a VMEM
    scratch (pl.when(j==0)) and reused for every vocab tile; bf16 logits store."""
    @pl.when(pl.program_id(1) == 0)
    def _():
        xln_ref[...] = _ln(x_ref[0].astype(jnp.float32),
                           g_ref[...], b_ref[...]).astype(jnp.bfloat16)
    y = jnp.dot(xln_ref[...], w_ref[...],
                preferred_element_type=jnp.float32) + fb_ref[...]
    o_ref[0] = y.astype(o_ref.dtype)


# ----------------------------- pallas_call wrappers -----------------------------

_ENC_KEYS = ("wqkv", "bqkv", "wo", "bo", "ln1_g", "ln1_b",
             "w1", "b1", "w2", "b2", "ln2_g", "ln2_b")
_DEC_KEYS = ("s_wqkv", "s_bqkv", "s_wo", "s_bo", "ln1_g", "ln1_b",
             "c_wq", "c_bq", "c_wkv", "c_bkv", "c_wo", "c_bo", "ln2_g", "ln2_b",
             "w1", "b1", "w2", "b2", "ln3_g", "ln3_b")


def _stacked_spec(arr):
    """Spec for a (num_layers, ...) stacked weight: the layer grid index selects the slice."""
    nd = arr.ndim
    return pl.BlockSpec((1,) + tuple(arr.shape[1:]),
                        lambda n, l, _nd=nd: (l,) + (0,) * (_nd - 1))


def patch_embed(x, w, b, pe):
    """x:(B,S,CPP) f32, w:(CPP,D) bf16, b:(1,D), pe:(1,S,D) -> (B,S,D) f32."""
    B, S, CPP = x.shape
    D = w.shape[1]
    return pl.pallas_call(
        _patch_embed_kernel,
        grid=(B,),
        in_specs=[pl.BlockSpec((1, S, CPP), lambda i: (i, 0, 0)),
                  pl.BlockSpec((CPP, D), lambda i: (0, 0)),
                  pl.BlockSpec((1, D), lambda i: (0, 0)),
                  pl.BlockSpec((1, S, D), lambda i: (0, 0, 0))],
        out_specs=pl.BlockSpec((1, S, D), lambda i: (i, 0, 0)),
        out_shape=jax.ShapeDtypeStruct((B, S, D), jnp.float32),
        compiler_params=pltpu.CompilerParams(
            dimension_semantics=("parallel",), vmem_limit_bytes=_VMEM_LIMIT),
    )(x, w, b, pe)


def encoder_stack(x, p, num_heads, final_ln=None):
    """Full encoder stack over (N, L, E): grid = (N rows [parallel], layers [arbitrary])."""
    N, L, E = x.shape
    nl = p["wqkv"].shape[0]
    args = [x] + [p[k] for k in _ENC_KEYS]
    in_specs = [pl.BlockSpec((1, L, E), lambda n, l: (n, 0, 0))]
    in_specs += [_stacked_spec(p[k]) for k in _ENC_KEYS]
    if final_ln is not None:
        fg, fb = final_ln
        args += [fg, fb]
        in_specs += [pl.BlockSpec((1, E), lambda n, l: (0, 0)),
                     pl.BlockSpec((1, E), lambda n, l: (0, 0))]
    return pl.pallas_call(
        functools.partial(_enc_stack_kernel, num_heads=num_heads,
                          final_ln=final_ln is not None),
        grid=(N, nl),
        in_specs=in_specs,
        out_specs=pl.BlockSpec((1, L, E), lambda n, l: (n, 0, 0)),
        out_shape=jax.ShapeDtypeStruct((N, L, E), jnp.float32),
        scratch_shapes=[pltpu.VMEM((L, E), jnp.float32)],
        compiler_params=pltpu.CompilerParams(
            dimension_semantics=("parallel", "arbitrary"),
            vmem_limit_bytes=_VMEM_LIMIT),
    )(*args)


def decoder_stack(x, mem, p, num_heads, scale_factor):
    """Full decoder stack: x:(B,Lq,E) queries, mem:(B,Lk,E); grid = (batch, layers)."""
    B, Lq, E = x.shape
    Lk = mem.shape[1]
    nl = p["s_wqkv"].shape[0]
    args = [x, mem] + [p[k] for k in _DEC_KEYS]
    in_specs = [pl.BlockSpec((1, Lq, E), lambda n, l: (n, 0, 0)),
                pl.BlockSpec((1, Lk, E), lambda n, l: (n, 0, 0))]
    in_specs += [_stacked_spec(p[k]) for k in _DEC_KEYS]
    return pl.pallas_call(
        functools.partial(_dec_stack_kernel, num_heads=num_heads,
                          scale_factor=scale_factor),
        grid=(B, nl),
        in_specs=in_specs,
        out_specs=pl.BlockSpec((1, Lq, E), lambda n, l: (n, 0, 0)),
        out_shape=jax.ShapeDtypeStruct((B, Lq, E), jnp.float32),
        scratch_shapes=[pltpu.VMEM((Lq, E), jnp.float32)],
        compiler_params=pltpu.CompilerParams(
            dimension_semantics=("parallel", "arbitrary"),
            vmem_limit_bytes=_VMEM_LIMIT),
    )(*args)


def ln_fc_out(x, g, b, w_pad, b_pad):
    """Fused final LayerNorm + vocab projection.  Vocab padded to a 128 multiple, tiled along N
    with as large a tile as divides cleanly; LN hoisted via scratch; bf16 logits."""
    B, S, D = x.shape
    Vp = w_pad.shape[1]
    tile_n = next(t for t in (4096, 2048, 1024, 512, 256, 128) if Vp % t == 0)
    return pl.pallas_call(
        _ln_fcout_kernel,
        grid=(B, Vp // tile_n),
        in_specs=[pl.BlockSpec((1, S, D), lambda i, j: (i, 0, 0)),
                  pl.BlockSpec((1, D), lambda i, j: (0, 0)),
                  pl.BlockSpec((1, D), lambda i, j: (0, 0)),
                  pl.BlockSpec((D, tile_n), lambda i, j: (0, j)),
                  pl.BlockSpec((1, tile_n), lambda i, j: (0, j))],
        out_specs=pl.BlockSpec((1, S, tile_n), lambda i, j: (i, 0, j)),
        out_shape=jax.ShapeDtypeStruct((B, S, Vp), jnp.bfloat16),
        scratch_shapes=[pltpu.VMEM((S, D), jnp.bfloat16)],
        compiler_params=pltpu.CompilerParams(
            dimension_semantics=("parallel", "arbitrary"),
            vmem_limit_bytes=_VMEM_LIMIT),
    )(x, g, b, w_pad, b_pad)


# ----------------------------- parameter init (deterministic, synthetic) -----------------------------

def _dense_init(key, fan_in, fan_out):
    # weights stored bf16 (MXU-native, half the DMA bytes); biases f32, shaped (1, N).
    w = (jax.random.normal(key, (fan_in, fan_out), jnp.float32) / math.sqrt(fan_in)
         ).astype(jnp.bfloat16)
    b = jnp.zeros((1, fan_out), jnp.float32)
    return w, b


def _ln_init(d):
    return jnp.ones((1, d), jnp.float32), jnp.zeros((1, d), jnp.float32)


def _enc_layer_init(key, d, ff):
    ks = jax.random.split(key, 4)
    p = {}
    p["wqkv"], p["bqkv"] = _dense_init(ks[0], d, 3 * d)   # fused Q,K,V projection
    p["wo"], p["bo"] = _dense_init(ks[1], d, d)
    p["w1"], p["b1"] = _dense_init(ks[2], d, ff)
    p["w2"], p["b2"] = _dense_init(ks[3], ff, d)
    p["ln1_g"], p["ln1_b"] = _ln_init(d)
    p["ln2_g"], p["ln2_b"] = _ln_init(d)
    return p


def _dec_layer_init(key, d, ff):
    ks = jax.random.split(key, 7)
    p = {}
    p["s_wqkv"], p["s_bqkv"] = _dense_init(ks[0], d, 3 * d)
    p["s_wo"], p["s_bo"] = _dense_init(ks[1], d, d)
    p["c_wq"], p["c_bq"] = _dense_init(ks[2], d, d)
    p["c_wkv"], p["c_bkv"] = _dense_init(ks[3], d, 2 * d)  # fused K,V for cross-attention
    p["c_wo"], p["c_bo"] = _dense_init(ks[4], d, d)
    p["w1"], p["b1"] = _dense_init(ks[5], d, ff)
    p["w2"], p["b2"] = _dense_init(ks[6], ff, d)
    p["ln1_g"], p["ln1_b"] = _ln_init(d)
    p["ln2_g"], p["ln2_b"] = _ln_init(d)
    p["ln3_g"], p["ln3_b"] = _ln_init(d)
    return p


def _stack_layers(layers):
    """Stack per-layer param dicts along a leading (num_layers) axis for the layer grid axis."""
    return {k: jnp.stack([lp[k] for lp in layers]) for k in layers[0]}


def sinusoidal_position_encoding(max_len, d_model):
    position = jnp.arange(max_len, dtype=jnp.float32)[:, None]
    div_term = jnp.exp(jnp.arange(0, d_model, 2, dtype=jnp.float32)
                       * (-math.log(10000.0) / d_model))
    pe = jnp.zeros((max_len, d_model), jnp.float32)
    pe = pe.at[:, 0::2].set(jnp.sin(position * div_term))
    pe = pe.at[:, 1::2].set(jnp.cos(position * div_term))
    return pe[None]


def init_params(key, cfg):
    d = cfg["d_model"]
    vs = cfg["vocab_size"]
    C, P = cfg["in_channels"], cfg["patch"]
    keys = jax.random.split(key, 8)
    params = {}
    # ImageEncoder stand-in: patch projection (conv-as-matmul) to image_code_dim channels.
    params["patch_w"], params["patch_b"] = _dense_init(keys[0], C * P * P, d)
    params["pos_enc"] = sinusoidal_position_encoding(cfg["max_len"], d)
    params["enc_layers"] = _stack_layers(
        [_enc_layer_init(k, d, cfg["enc_ff"])
         for k in jax.random.split(keys[1], cfg["num_layers"])])
    params["embedding"] = jax.random.normal(keys[2], (vs, d), jnp.float32) * 0.02
    params["t_enc_layers"] = _stack_layers(
        [_enc_layer_init(k, d, cfg["hidden_size"])
         for k in jax.random.split(keys[3], cfg["t_num_encoder_layers"])])
    params["t_dec_layers"] = _stack_layers(
        [_dec_layer_init(k, d, cfg["hidden_size"])
         for k in jax.random.split(keys[4], cfg["num_layers"])])
    params["t_enc_norm_g"], params["t_enc_norm_b"] = _ln_init(d)
    params["t_dec_norm_g"], params["t_dec_norm_b"] = _ln_init(d)
    # fc_out: pad vocab to a multiple of 128 so stores are lane-dense; slice logits afterwards.
    vpad = ((vs + 127) // 128) * 128
    fc_w = jax.random.normal(keys[5], (d, vs), jnp.float32) / math.sqrt(d)
    params["fc_w"] = jnp.pad(fc_w, ((0, 0), (0, vpad - vs))).astype(jnp.bfloat16)
    params["fc_b"] = jnp.zeros((1, vpad), jnp.float32)
    return params


# ----------------------------- full forward (single jit, no host syncs) -----------------------------

def make_forward(cfg):
    P = cfg["patch"]
    nh = cfg["num_heads"]
    vs = cfg["vocab_size"]
    scale_factor = float(cfg["scale_factor"])  # TODO(synk): Config.scale_factor undefined in reference; fixed to 1.0.

    @jax.jit
    def forward(params, imgs, caps):
        B, C, H, W = imgs.shape
        # --- ImageEncoder ---
        # TODO(synk): pretrained ResNet101 grid-feature extractor has no clean Pallas equivalent;
        # replaced by a strided patch projection (conv-as-matmul + ReLU) producing D-channel grid
        # features in the flatten(2).permute(0,2,1) layout (B, S_img, D).
        x = imgs.reshape(B, C, H // P, P, W // P, P)
        x = x.transpose(0, 2, 4, 1, 3, 5).reshape(B, (H // P) * (W // P), C * P * P)
        S = x.shape[1]
        pe = params["pos_enc"][:, :S, :]
        mem = patch_embed(x, params["patch_w"], params["patch_b"], pe)   # embed+ReLU+posenc fused

        # --- custom TransformerEncoder (batch_first=False in reference -> attend over axis 0) ---
        mem_t = mem.transpose(1, 0, 2)                                   # (S, B, D)
        mem_t = encoder_stack(mem_t, params["enc_layers"], nh)           # all layers, one call
        memory = mem_t.transpose(1, 0, 2)                                # (B, S, D)

        # --- TransformerDecoder (embedding + nn.Transformer + fc_out) ---
        cap_lens = jnp.sum(caps != 0, axis=-1)
        tgt_emb = params["embedding"][caps]                              # (B, T, D) gather (glue)
        # transformer(src=tgt_emb, tgt=memory*scale): caption-side encoder stack + final norm, fused
        src = encoder_stack(tgt_emb, params["t_enc_layers"], nh,
                            final_ln=(params["t_enc_norm_g"], params["t_enc_norm_b"]))
        # decoder stack; memory*scale_factor folded into the kernel's l==0 load
        y = decoder_stack(memory, src, params["t_dec_layers"], nh, scale_factor)

        # --- fc_out only over rows that are kept (static Tmax), bf16 logits ---
        Tmax = min(caps.shape[1], S)
        logits = ln_fc_out(y[:, :Tmax, :],
                           params["t_dec_norm_g"], params["t_dec_norm_b"],
                           params["fc_w"], params["fc_b"])[:, :, :vs]    # (B, Tmax, vocab) bf16

        mask = jnp.arange(Tmax)[None, :] < cap_lens[:, None]
        return jnp.where(mask[:, :, None], logits.astype(jnp.float32), 0.0)

    return forward


# ----------------------------- demo -----------------------------

if __name__ == "__main__":
    cfg = dict(
        in_channels=4,          # small stand-in for RGB
        patch=4,                # 16x16 image -> 4x4 grid -> S_img = 16
        d_model=128,            # image_code_dim == word_dim; padded to a lane multiple (128)
        num_heads=4,
        hidden_size=256,        # nn.Transformer dim_feedforward (multiple of 128)
        num_layers=2,           # custom-encoder layers and nn.Transformer decoder layers
        t_num_encoder_layers=6, # nn.Transformer default num_encoder_layers
        enc_ff=256,             # custom nn.TransformerEncoderLayer FFN width (multiple of 128)
        vocab_size=50,
        max_len=64,
        scale_factor=1.0,
    )
    key = jax.random.PRNGKey(0)
    pkey, ikey = jax.random.split(key)
    params = init_params(pkey, cfg)

    imgs = jax.random.normal(ikey, (2, 4, 16, 16), jnp.float32)  # NCHW
    caps = jnp.array([[1, 5, 7, 9, 3, 2, 0, 0],
                      [1, 4, 6, 2, 0, 0, 0, 0]], dtype=jnp.int32)  # (B, T), 0 = pad

    forward = make_forward(cfg)
    out = jax.block_until_ready(forward(params, imgs, caps))
    assert out.shape == (2, caps.shape[1], cfg["vocab_size"]) and out.dtype == jnp.float32
    assert bool(jnp.all(jnp.isfinite(out)))
    print("KERNEL_OK")
</pallas_src>

<mosaic_0001>
module attributes {stable_mosaic.version = 11 : i64} {
  func.func @_patch_embed_kernel(%arg0: i32, %arg1: memref<1x16x64xf32, #tpu.memory_space<vmem>>, %arg2: memref<64x128xbf16, #tpu.memory_space<vmem>>, %arg3: memref<1x128xf32, #tpu.memory_space<vmem>>, %arg4: memref<1x16x128xf32, #tpu.memory_space<vmem>>, %arg5: memref<1x16x128xf32, #tpu.memory_space<vmem>>) attributes {dimension_semantics = [#tpu.dimension_semantics<parallel>], iteration_bounds = array<i64: 2>, scalar_prefetch = 0 : i64, scratch_operands = 0 : i64, tpu.core_type = #tpu.core_type<tc>, window_params = [{transform_indices = @transform_0, window_bounds = array<i64: 1, 16, 64>}, {pipeline_mode = #tpu.pipeline_mode<synchronous>, transform_indices = @transform_1, window_bounds = array<i64: 64, 128>}, {pipeline_mode = #tpu.pipeline_mode<synchronous>, transform_indices = @transform_2, window_bounds = array<i64: 1, 128>}, {pipeline_mode = #tpu.pipeline_mode<synchronous>, transform_indices = @transform_3, window_bounds = array<i64: 1, 16, 128>}, {transform_indices = @transform_4, window_bounds = array<i64: 1, 16, 128>}]} {
    %c0 = arith.constant 0 : index
    %c0_0 = arith.constant 0 : index
    %c0_1 = arith.constant 0 : index
    %0 = vector.load %arg1[%c0, %c0_0, %c0_1] : memref<1x16x64xf32, #tpu.memory_space<vmem>>, vector<1x16x64xf32>
    %1 = vector.shape_cast %0 : vector<1x16x64xf32> to vector<16x64xf32>
    %2 = arith.truncf %1 : vector<16x64xf32> to vector<16x64xbf16>
    %c0_2 = arith.constant 0 : index
    %c0_3 = arith.constant 0 : index
    %3 = vector.load %arg2[%c0_2, %c0_3] : memref<64x128xbf16, #tpu.memory_space<vmem>>, vector<64x128xbf16>
    %cst = arith.constant dense<0.000000e+00> : vector<16x128xf32>
    %4 = tpu.matmul %2, %3, %cst {dimension_numbers = #tpu.dot_dimension_numbers<[1], [0], [0], [1], [0, 0, 1, 1], [], []>} : vector<16x64xbf16>, vector<64x128xbf16>, vector<16x128xf32> -> vector<16x128xf32>
    %c0_4 = arith.constant 0 : index
    %c0_5 = arith.constant 0 : index
    %5 = vector.load %arg3[%c0_4, %c0_5] : memref<1x128xf32, #tpu.memory_space<vmem>>, vector<1x128xf32>
    %6 = vector.broadcast %5 : vector<1x128xf32> to vector<16x128xf32>
    %7 = arith.addf %4, %6 : vector<16x128xf32>
    %cst_6 = arith.constant 0.000000e+00 : f32
    %8 = vector.broadcast %cst_6 : f32 to vector<16x128xf32>
    %9 = arith.maximumf %7, %8 : vector<16x128xf32>
    %c0_7 = arith.constant 0 : index
    %c0_8 = arith.constant 0 : index
    %c0_9 = arith.constant 0 : index
    %10 = vector.load %arg4[%c0_7, %c0_8, %c0_9] : memref<1x16x128xf32, #tpu.memory_space<vmem>>, vector<1x16x128xf32>
    %11 = vector.shape_cast %10 : vector<1x16x128xf32> to vector<16x128xf32>
    %12 = arith.addf %9, %11 : vector<16x128xf32>
    %c0_10 = arith.constant 0 : index
    %c0_11 = arith.constant 0 : index
    %c0_12 = arith.constant 0 : index
    %13 = vector.load %arg5[%c0_10, %c0_11, %c0_12] : memref<1x16x128xf32, #tpu.memory_space<vmem>>, vector<1x16x128xf32>
    %14 = vector.shape_cast %13 : vector<1x16x128xf32> to vector<16x128xf32>
    %15 = vector.shape_cast %12 : vector<16x128xf32> to vector<1x16x128xf32>
    tpu.vector_store %arg5[%c0_10, %c0_11, %c0_12], %15 {strides = array<i32>} : memref<1x16x128xf32, #tpu.memory_space<vmem>>, vector<1x16x128xf32>,
    return
  }
  func.func @transform_0(%arg0: i32) -> (i32, i32, i32) {
    %c0_i32 = arith.constant 0 : i32
    %c0_i32_0 = arith.constant 0 : i32
    %c0_i32_1 = arith.constant 0 : i32
    return %arg0, %c0_i32, %c0_i32_0 : i32, i32, i32
  }
  func.func @transform_1(%arg0: i32) -> (i32, i32) {
    %c0_i32 = arith.constant 0 : i32
    %c0_i32_0 = arith.constant 0 : i32
    %c0_i32_1 = arith.constant 0 : i32
    return %c0_i32, %c0_i32_0 : i32, i32
  }
  func.func @transform_2(%arg0: i32) -> (i32, i32) {
    %c0_i32 = arith.constant 0 : i32
    %c0_i32_0 = arith.constant 0 : i32
    %c0_i32_1 = arith.constant 0 : i32
    return %c0_i32, %c0_i32_0 : i32, i32
  }
  func.func @transform_3(%arg0: i32) -> (i32, i32, i32) {
    %c0_i32 = arith.constant 0 : i32
    %c0_i32_0 = arith.constant 0 : i32
    %c0_i32_1 = arith.constant 0 : i32
    %c0_i32_2 = arith.constant 0 : i32
    return %c0_i32, %c0_i32_0, %c0_i32_1 : i32, i32, i32
  }
  func.func @transform_4(%arg0: i32) -> (i32, i32, i32) {
    %c0_i32 = arith.constant 0 : i32
    %c0_i32_0 = arith.constant 0 : i32
    %c0_i32_1 = arith.constant 0 : i32
    return %arg0, %c0_i32, %c0_i32_0 : i32, i32, i32
  }
}

module attributes {stable_mosaic.version = 11 : i64} {
  func.func @_enc_stack_kernel(%arg0: i32, %arg1: i32, %arg2: memref<1x2x128xf32, #tpu.memory_space<vmem>>, %arg3: memref<1x128x384xbf16, #tpu.memory_space<vmem>>, %arg4: memref<1x1x384xf32, #tpu.memory_space<vmem>>, %arg5: memref<1x128x128xbf16, #tpu.memory_space<vmem>>, %arg6: memref<1x1x128xf32, #tpu.memory_space<vmem>>, %arg7: memref<1x1x128xf32, #tpu.memory_space<vmem>>, %arg8: memref<1x1x128xf32, #tpu.memory_space<vmem>>, %arg9: memref<1x128x256xbf16, #tpu.memory_space<vmem>>, %arg10: memref<1x1x256xf32, #tpu.memory_space<vmem>>, %arg11: memref<1x256x128xbf16, #tpu.memory_space<vmem>>, %arg12: memref<1x1x128xf32, #tpu.memory_space<vmem>>, %arg13: memref<1x1x128xf32, #tpu.memory_space<vmem>>, %arg14: memref<1x1x128xf32, #tpu.memory_space<vmem>>, %arg15: memref<1x2x128xf32, #tpu.memory_space<vmem>>, %arg16: memref<2x128xf32, #tpu.memory_space<vmem>>) attributes {dimension_semantics = [#tpu.dimension_semantics<parallel>, #tpu.dimension_semantics<arbitrary>], iteration_bounds = array<i64: 16, 2>, scalar_prefetch = 0 : i64, scratch_operands = 1 : i64, tpu.core_type = #tpu.core_type<tc>, window_params = [{transform_indices = @transform_0, window_bounds = array<i64: 1, 2, 128>}, {transform_indices = @transform_1, window_bounds = array<i64: 1, 128, 384>}, {transform_indices = @transform_2, window_bounds = array<i64: 1, 1, 384>}, {transform_indices = @transform_3, window_bounds = array<i64: 1, 128, 128>}, {transform_indices = @transform_4, window_bounds = array<i64: 1, 1, 128>}, {transform_indices = @transform_5, window_bounds = array<i64: 1, 1, 128>}, {transform_indices = @transform_6, window_bounds = array<i64: 1, 1, 128>}, {transform_indices = @transform_7, window_bounds = array<i64: 1, 128, 256>}, {transform_indices = @transform_8, window_bounds = array<i64: 1, 1, 256>}, {transform_indices = @transform_9, window_bounds = array<i64: 1, 256, 128>}, {transform_indices = @transform_10, window_bounds = array<i64: 1, 1, 128>}, {transform_indices = @transform_11, window_bounds = array<i64: 1, 1, 128>}, {transform_indices = @transform_12, window_bounds = array<i64: 1, 1, 128>}, {transform_indices = @transform_13, window_bounds = array<i64: 1, 2, 128>}]} {
    %c0_i32 = arith.constant 0 : i32
    %0 = arith.cmpi eq, %arg1, %c0_i32 : i32
    %1 = arith.extui %0 : i1 to i32
    %c0_i32_0 = arith.constant 0 : i32
    %2 = arith.cmpi ne, %1, %c0_i32_0 : i32
    scf.if %2 {
      %c0_72 = arith.constant 0 : index
      %c0_73 = arith.constant 0 : index
      %c0_74 = arith.constant 0 : index
      %174 = vector.load %arg2[%c0_72, %c0_73, %c0_74] : memref<1x2x128xf32, #tpu.memory_space<vmem>>, vector<1x2x128xf32>
      %175 = vector.shape_cast %174 : vector<1x2x128xf32> to vector<2x128xf32>
      %c0_75 = arith.constant 0 : index
      %c0_76 = arith.constant 0 : index
      %176 = vector.load %arg16[%c0_75, %c0_76] : memref<2x128xf32, #tpu.memory_space<vmem>>, vector<2x128xf32>
      tpu.vector_store %arg16[%c0_75, %c0_76], %175 {strides = array<i32>} : memref<2x128xf32, #tpu.memory_space<vmem>>, vector<2x128xf32>,
    } else {
    }
    %c0 = arith.constant 0 : index
    %c0_1 = arith.constant 0 : index
    %3 = vector.load %arg16[%c0, %c0_1] : memref<2x128xf32, #tpu.memory_space<vmem>>, vector<2x128xf32>
    %c0_2 = arith.constant 0 : index
    %c0_3 = arith.constant 0 : index
    %c0_4 = arith.constant 0 : index
    %4 = vector.load %arg3[%c0_2, %c0_3, %c0_4] : memref<1x128x384xbf16, #tpu.memory_space<vmem>>, vector<1x128x384xbf16>
    %5 = vector.shape_cast %4 : vector<1x128x384xbf16> to vector<128x384xbf16>
    %c0_5 = arith.constant 0 : index
    %c0_6 = arith.constant 0 : index
    %c0_7 = arith.constant 0 : index
    %6 = vector.load %arg4[%c0_5, %c0_6, %c0_7] : memref<1x1x384xf32, #tpu.memory_space<vmem>>, vector<1x1x384xf32>
    %7 = vector.shape_cast %6 : vector<1x1x384xf32> to vector<1x384xf32>
    %c0_8 = arith.constant 0 : index
    %c0_9 = arith.constant 0 : index
    %c0_10 = arith.constant 0 : index
    %8 = vector.load %arg5[%c0_8, %c0_9, %c0_10] : memref<1x128x128xbf16, #tpu.memory_space<vmem>>, vector<1x128x128xbf16>
    %9 = vector.shape_cast %8 : vector<1x128x128xbf16> to vector<128x128xbf16>
    %c0_11 = arith.constant 0 : index
    %c0_12 = arith.constant 0 : index
    %c0_13 = arith.constant 0 : index
    %10 = vector.load %arg6[%c0_11, %c0_12, %c0_13] : memref<1x1x128xf32, #tpu.memory_space<vmem>>, vector<1x1x128xf32>
    %11 = vector.shape_cast %10 : vector<1x1x128xf32> to vector<1x128xf32>
    %c0_14 = arith.constant 0 : index
    %c0_15 = arith.constant 0 : index
    %c0_16 = arith.constant 0 : index
    %12 = vector.load %arg7[%c0_14, %c0_15, %c0_16] : memref<1x1x128xf32, #tpu.memory_space<vmem>>, vector<1x1x128xf32>
    %13 = vector.shape_cast %12 : vector<1x1x128xf32> to vector<1x128xf32>
    %c0_17 = arith.constant 0 : index
    %c0_18 = arith.constant 0 : index
    %c0_19 = arith.constant 0 : index
    %14 = vector.load %arg8[%c0_17, %c0_18, %c0_19] : memref<1x1x128xf32, #tpu.memory_space<vmem>>, vector<1x1x128xf32>
    %15 = vector.shape_cast %14 : vector<1x1x128xf32> to vector<1x128xf32>
    %c0_20 = arith.constant 0 : index
    %c0_21 = arith.constant 0 : index
    %c0_22 = arith.constant 0 : index
    %16 = vector.load %arg9[%c0_20, %c0_21, %c0_22] : memref<1x128x256xbf16, #tpu.memory_space<vmem>>, vector<1x128x256xbf16>
    %17 = vector.shape_cast %16 : vector<1x128x256xbf16> to vector<128x256xbf16>
    %c0_23 = arith.constant 0 : index
    %c0_24 = arith.constant 0 : index
    %c0_25 = arith.constant 0 : index
    %18 = vector.load %arg10[%c0_23, %c0_24, %c0_25] : memref<1x1x256xf32, #tpu.memory_space<vmem>>, vector<1x1x256xf32>
    %19 = vector.shape_cast %18 : vector<1x1x256xf32> to vector<1x256xf32>
    %c0_26 = arith.constant 0 : index
    %c0_27 = arith.constant 0 : index
    %c0_28 = arith.constant 0 : index
    %20 = vector.load %arg11[%c0_26, %c0_27, %c0_28] : memref<1x256x128xbf16, #tpu.memory_space<vmem>>, vector<1x256x128xbf16>
    %21 = vector.shape_cast %20 : vector<1x256x128xbf16> to vector<256x128xbf16>
    %c0_29 = arith.constant 0 : index
    %c0_30 = arith.constant 0 : index
    %c0_31 = arith.constant 0 : index
    %22 = vector.load %arg12[%c0_29, %c0_30, %c0_31] : memref<1x1x128xf32, #tpu.memory_space<vmem>>, vector<1x1x128xf32>
    %23 = vector.shape_cast %22 : vector<1x1x128xf32> to vector<1x128xf32>
    %c0_32 = arith.constant 0 : index
    %c0_33 = arith.constant 0 : index
    %c0_34 = arith.constant 0 : index
    %24 = vector.load %arg13[%c0_32, %c0_33, %c0_34] : memref<1x1x128xf32, #tpu.memory_space<vmem>>, vector<1x1x128xf32>
    %25 = vector.shape_cast %24 : vector<1x1x128xf32> to vector<1x128xf32>
    %c0_35 = arith.constant 0 : index
    %c0_36 = arith.constant 0 : index
    %c0_37 = arith.constant 0 : index
    %26 = vector.load %arg14[%c0_35, %c0_36, %c0_37] : memref<1x1x128xf32, #tpu.memory_space<vmem>>, vector<1x1x128xf32>
    %27 = vector.shape_cast %26 : vector<1x1x128xf32> to vector<1x128xf32>
    %28 = arith.truncf %3 : vector<2x128xf32> to vector<2x128xbf16>
    %cst = arith.constant dense<0.000000e+00> : vector<2x384xf32>
    %29 = tpu.matmul %28, %5, %cst {dimension_numbers = #tpu.dot_dimension_numbers<[1], [0], [0], [1], [0, 0, 1, 1], [], []>} : vector<2x128xbf16>, vector<128x384xbf16>, vector<2x384xf32> -> vector<2x384xf32>
    %30 = vector.broadcast %7 : vector<1x384xf32> to vector<2x384xf32>
    %31 = arith.addf %29, %30 : vector<2x384xf32>
    %32 = vector.extract_strided_slice %31 {offsets = [0, 0], sizes = [2, 128], strides = [1, 1]} : vector<2x384xf32> to vector<2x128xf32>
    %cst_38 = arith.constant 0.176776692 : f32
    %33 = vector.broadcast %cst_38 : f32 to vector<2x128xf32>
    %34 = arith.mulf %32, %33 : vector<2x128xf32>
    %35 = vector.extract_strided_slice %31 {offsets = [0, 128], sizes = [2, 128], strides = [1, 1]} : vector<2x384xf32> to vector<2x128xf32>
    %36 = vector.extract_strided_slice %31 {offsets = [0, 256], sizes = [2, 128], strides = [1, 1]} : vector<2x384xf32> to vector<2x128xf32>
    %37 = vector.extract_strided_slice %34 {offsets = [0, 0], sizes = [2, 32], strides = [1, 1]} : vector<2x128xf32> to vector<2x32xf32>
    %38 = arith.truncf %37 : vector<2x32xf32> to vector<2x32xbf16>
    %39 = vector.extract_strided_slice %35 {offsets = [0, 0], sizes = [2, 32], strides = [1, 1]} : vector<2x128xf32> to vector<2x32xf32>
    %40 = arith.truncf %39 : vector<2x32xf32> to vector<2x32xbf16>
    %41 = vector.extract_strided_slice %36 {offsets = [0, 0], sizes = [2, 32], strides = [1, 1]} : vector<2x128xf32> to vector<2x32xf32>
    %42 = arith.truncf %41 : vector<2x32xf32> to vector<2x32xbf16>
    %cst_39 = arith.constant dense<0.000000e+00> : vector<2x2xf32>
    %43 = tpu.matmul %38, %40, %cst_39 {dimension_numbers = #tpu.dot_dimension_numbers<[1], [1], [0], [0], [0, 0, 1, 0], [], []>} : vector<2x32xbf16>, vector<2x32xbf16>, vector<2x2xf32> -> vector<2x2xf32>
    %cst_40 = arith.constant dense<0xFF800000> : vector<2xf32>
    %44 = vector.multi_reduction <maximumf>, %43, %cst_40 [1] : vector<2x2xf32> to vector<2xf32>
    %45 = vector.shape_cast %44 : vector<2xf32> to vector<2x1xf32>
    %46 = vector.broadcast %45 : vector<2x1xf32> to vector<2x2xf32>
    %47 = arith.subf %43, %46 : vector<2x2xf32>
    %48 = math.exp %47 : vector<2x2xf32>
    %cst_41 = arith.constant dense<0.000000e+00> : vector<2xf32>
    %49 = vector.multi_reduction <add>, %48, %cst_41 [1] : vector<2x2xf32> to vector<2xf32>
    %50 = vector.shape_cast %49 : vector<2xf32> to vector<2x1xf32>
    %51 = tpu.reciprocal %50 {approx = true} : vector<2x1xf32> -> vector<2x1xf32>
    %52 = vector.broadcast %51 : vector<2x1xf32> to vector<2x2xf32>
    %53 = arith.mulf %48, %52 : vector<2x2xf32>
    %54 = arith.truncf %53 : vector<2x2xf32> to vector<2x2xbf16>
    %cst_42 = arith.constant dense<0.000000e+00> : vector<2x32xf32>
    %55 = tpu.matmul %54, %42, %cst_42 {dimension_numbers = #tpu.dot_dimension_numbers<[1], [0], [0], [1], [0, 0, 1, 1], [], []>} : vector<2x2xbf16>, vector<2x32xbf16>, vector<2x32xf32> -> vector<2x32xf32>
    %56 = vector.extract_strided_slice %34 {offsets = [0, 32], sizes = [2, 32], strides = [1, 1]} : vector<2x128xf32> to vector<2x32xf32>
    %57 = arith.truncf %56 : vector<2x32xf32> to vector<2x32xbf16>
    %58 = vector.extract_strided_slice %35 {offsets = [0, 32], sizes = [2, 32], strides = [1, 1]} : vector<2x128xf32> to vector<2x32xf32>
    %59 = arith.truncf %58 : vector<2x32xf32> to vector<2x32xbf16>
    %60 = vector.extract_strided_slice %36 {offsets = [0, 32], sizes = [2, 32], strides = [1, 1]} : vector<2x128xf32> to vector<2x32xf32>
    %61 = arith.truncf %60 : vector<2x32xf32> to vector<2x32xbf16>
    %cst_43 = arith.constant dense<0.000000e+00> : vector<2x2xf32>
    %62 = tpu.matmul %57, %59, %cst_43 {dimension_numbers = #tpu.dot_dimension_numbers<[1], [1], [0], [0], [0, 0, 1, 0], [], []>} : vector<2x32xbf16>, vector<2x32xbf16>, vector<2x2xf32> -> vector<2x2xf32>
    %cst_44 = arith.constant dense<0xFF800000> : vector<2xf32>
    %63 = vector.multi_reduction <maximumf>, %62, %cst_44 [1] : vector<2x2xf32> to vector<2xf32>
    %64 = vector.shape_cast %63 : vector<2xf32> to vector<2x1xf32>
    %65 = vector.broadcast %64 : vector<2x1xf32> to vector<2x2xf32>
    %66 = arith.subf %62, %65 : vector<2x2xf32>
    %67 = math.exp %66 : vector<2x2xf32>
    %cst_45 = arith.constant dense<0.000000e+00> : vector<2xf32>
    %68 = vector.multi_reduction <add>, %67, %cst_45 [1] : vector<2x2xf32> to vector<2xf32>
    %69 = vector.shape_cast %68 : vector<2xf32> to vector<2x1xf32>
    %70 = tpu.reciprocal %69 {approx = true} : vector<2x1xf32> -> vector<2x1xf32>
    %71 = vector.broadcast %70 : vector<2x1xf32> to vector<2x2xf32>
    %72 = arith.mulf %67, %71 : vector<2x2xf32>
    %73 = arith.truncf %72 : vector<2x2xf32> to vector<2x2xbf16>
    %cst_46 = arith.constant dense<0.000000e+00> : vector<2x32xf32>
    %74 = tpu.matmul %73, %61, %cst_46 {dimension_numbers = #tpu.dot_dimension_numbers<[1], [0], [0], [1], [0, 0, 1, 1], [], []>} : vector<2x2xbf16>, vector<2x32xbf16>, vector<2x32xf32> -> vector<2x32xf32>
    %75 = vector.extract_strided_slice %34 {offsets = [0, 64], sizes = [2, 32], strides = [1, 1]} : vector<2x128xf32> to vector<2x32xf32>
    %76 = arith.truncf %75 : vector<2x32xf32> to vector<2x32xbf16>
    %77 = vector.extract_strided_slice %35 {offsets = [0, 64], sizes = [2, 32], strides = [1, 1]} : vector<2x128xf32> to vector<2x32xf32>
    %78 = arith.truncf %77 : vector<2x32xf32> to vector<2x32xbf16>
    %79 = vector.extract_strided_slice %36 {offsets = [0, 64], sizes = [2, 32], strides = [1, 1]} : vector<2x128xf32> to vector<2x32xf32>
    %80 = arith.truncf %79 : vector<2x32xf32> to vector<2x32xbf16>
    %cst_47 = arith.constant dense<0.000000e+00> : vector<2x2xf32>
    %81 = tpu.matmul %76, %78, %cst_47 {dimension_numbers = #tpu.dot_dimension_numbers<[1], [1], [0], [0], [0, 0, 1, 0], [], []>} : vector<2x32xbf16>, vector<2x32xbf16>, vector<2x2xf32> -> vector<2x2xf32>
    %cst_48 = arith.constant dense<0xFF800000> : vector<2xf32>
    %82 = vector.multi_reduction <maximumf>, %81, %cst_48 [1] : vector<2x2xf32> to vector<2xf32>
    %83 = vector.shape_cast %82 : vector<2xf32> to vector<2x1xf32>
    %84 = vector.broadcast %83 : vector<2x1xf32> to vector<2x2xf32>
    %85 = arith.subf %81, %84 : vector<2x2xf32>
    %86 = math.exp %85 : vector<2x2xf32>
    %cst_49 = arith.constant dense<0.000000e+00> : vector<2xf32>
    %87 = vector.multi_reduction <add>, %86, %cst_49 [1] : vector<2x2xf32> to vector<2xf32>
    %88 = vector.shape_cast %87 : vector<2xf32> to vector<2x1xf32>
    %89 = tpu.reciprocal %88 {approx = true} : vector<2x1xf32> -> vector<2x1xf32>
    %90 = vector.broadcast %89 : vector<2x1xf32> to vector<2x2xf32>
    %91 = arith.mulf %86, %90 : vector<2x2xf32>
    %92 = arith.truncf %91 : vector<2x2xf32> to vector<2x2xbf16>
    %cst_50 = arith.constant dense<0.000000e+00> : vector<2x32xf32>
    %93 = tpu.matmul %92, %80, %cst_50 {dimension_numbers = #tpu.dot_dimension_numbers<[1], [0], [0], [1], [0, 0, 1, 1], [], []>} : vector<2x2xbf16>, vector<2x32xbf16>, vector<2x32xf32> -> vector<2x32xf32>
    %94 = vector.extract_strided_slice %34 {offsets = [0, 96], sizes = [2, 32], strides = [1, 1]} : vector<2x128xf32> to vector<2x32xf32>
    %95 = arith.truncf %94 : vector<2x32xf32> to vector<2x32xbf16>
    %96 = vector.extract_strided_slice %35 {offsets = [0, 96], sizes = [2, 32], strides = [1, 1]} : vector<2x128xf32> to vector<2x32xf32>
    %97 = arith.truncf %96 : vector<2x32xf32> to vector<2x32xbf16>
    %98 = vector.extract_strided_slice %36 {offsets = [0, 96], sizes = [2, 32], strides = [1, 1]} : vector<2x128xf32> to vector<2x32xf32>
    %99 = arith.truncf %98 : vector<2x32xf32> to vector<2x32xbf16>
    %cst_51 = arith.constant dense<0.000000e+00> : vector<2x2xf32>
    %100 = tpu.matmul %95, %97, %cst_51 {dimension_numbers = #tpu.dot_dimension_numbers<[1], [1], [0], [0], [0, 0, 1, 0], [], []>} : vector<2x32xbf16>, vector<2x32xbf16>, vector<2x2xf32> -> vector<2x2xf32>
    %cst_52 = arith.constant dense<0xFF800000> : vector<2xf32>
    %101 = vector.multi_reduction <maximumf>, %100, %cst_52 [1] : vector<2x2xf32> to vector<2xf32>
    %102 = vector.shape_cast %101 : vector<2xf32> to vector<2x1xf32>
    %103 = vector.broadcast %102 : vector<2x1xf32> to vector<2x2xf32>
    %104 = arith.subf %100, %103 : vector<2x2xf32>
    %105 = math.exp %104 : vector<2x2xf32>
    %cst_53 = arith.constant dense<0.000000e+00> : vector<2xf32>
    %106 = vector.multi_reduction <add>, %105, %cst_53 [1] : vector<2x2xf32> to vector<2xf32>
    %107 = vector.shape_cast %106 : vector<2xf32> to vector<2x1xf32>
    %108 = tpu.reciprocal %107 {approx = true} : vector<2x1xf32> -> vector<2x1xf32>
    %109 = vector.broadcast %108 : vector<2x1xf32> to vector<2x2xf32>
    %110 = arith.mulf %105, %109 : vector<2x2xf32>
    %111 = arith.truncf %110 : vector<2x2xf32> to vector<2x2xbf16>
    %cst_54 = arith.constant dense<0.000000e+00> : vector<2x32xf32>
    %112 = tpu.matmul %111, %99, %cst_54 {dimension_numbers = #tpu.dot_dimension_numbers<[1], [0], [0], [1], [0, 0, 1, 1], [], []>} : vector<2x2xbf16>, vector<2x32xbf16>, vector<2x32xf32> -> vector<2x32xf32>
    %113 = tpu.concatenate %55, %74, %93, %112 in 1 : vector<2x32xf32>, vector<2x32xf32>, vector<2x32xf32>, vector<2x32xf32> -> vector<2x128xf32>
    %114 = arith.truncf %113 : vector<2x128xf32> to vector<2x128xbf16>
    %cst_55 = arith.constant dense<0.000000e+00> : vector<2x128xf32>
    %115 = tpu.matmul %114, %9, %cst_55 {dimension_numbers = #tpu.dot_dimension_numbers<[1], [0], [0], [1], [0, 0, 1, 1], [], []>} : vector<2x128xbf16>, vector<128x128xbf16>, vector<2x128xf32> -> vector<2x128xf32>
    %116 = vector.broadcast %11 : vector<1x128xf32> to vector<2x128xf32>
    %117 = arith.addf %115, %116 : vector<2x128xf32>
    %118 = arith.addf %3, %117 : vector<2x128xf32>
    %cst_56 = arith.constant dense<0.000000e+00> : vector<2xf32>
    %119 = vector.multi_reduction <add>, %118, %cst_56 [1] : vector<2x128xf32> to vector<2xf32>
    %120 = vector.shape_cast %119 : vector<2xf32> to vector<2x1xf32>
    %cst_57 = arith.constant 1.280000e+02 : f32
    %121 = vector.broadcast %cst_57 : f32 to vector<2x1xf32>
    %122 = arith.divf %120, %121 : vector<2x1xf32>
    %123 = vector.broadcast %122 : vector<2x1xf32> to vector<2x128xf32>
    %124 = arith.subf %118, %123 : vector<2x128xf32>
    %125 = arith.mulf %124, %124 : vector<2x128xf32>
    %cst_58 = arith.constant dense<0.000000e+00> : vector<2xf32>
    %126 = vector.multi_reduction <add>, %125, %cst_58 [1] : vector<2x128xf32> to vector<2xf32>
    %127 = vector.shape_cast %126 : vector<2xf32> to vector<2x1xf32>
    %cst_59 = arith.constant 1.280000e+02 : f32
    %128 = vector.broadcast %cst_59 : f32 to vector<2x1xf32>
    %129 = arith.divf %127, %128 : vector<2x1xf32>
    %cst_60 = arith.constant 9.99999974E-6 : f32
    %130 = vector.broadcast %cst_60 : f32 to vector<2x1xf32>
    %131 = arith.addf %129, %130 : vector<2x1xf32>
    %132 = math.rsqrt %131 : vector<2x1xf32>
    %133 = vector.broadcast %132 : vector<2x1xf32> to vector<2x128xf32>
    %134 = arith.mulf %124, %133 : vector<2x128xf32>
    %135 = vector.broadcast %13 : vector<1x128xf32> to vector<2x128xf32>
    %136 = arith.mulf %134, %135 : vector<2x128xf32>
    %137 = vector.broadcast %15 : vector<1x128xf32> to vector<2x128xf32>
    %138 = arith.addf %136, %137 : vector<2x128xf32>
    %139 = arith.truncf %138 : vector<2x128xf32> to vector<2x128xbf16>
    %cst_61 = arith.constant dense<0.000000e+00> : vector<2x256xf32>
    %140 = tpu.matmul %139, %17, %cst_61 {dimension_numbers = #tpu.dot_dimension_numbers<[1], [0], [0], [1], [0, 0, 1, 1], [], []>} : vector<2x128xbf16>, vector<128x256xbf16>, vector<2x256xf32> -> vector<2x256xf32>
    %141 = vector.broadcast %19 : vector<1x256xf32> to vector<2x256xf32>
    %142 = arith.addf %140, %141 : vector<2x256xf32>
    %cst_62 = arith.constant 0.000000e+00 : f32
    %143 = vector.broadcast %cst_62 : f32 to vector<2x256xf32>
    %144 = arith.maximumf %142, %143 : vector<2x256xf32>
    %145 = arith.truncf %144 : vector<2x256xf32> to vector<2x256xbf16>
    %cst_63 = arith.constant dense<0.000000e+00> : vector<2x128xf32>
    %146 = tpu.matmul %145, %21, %cst_63 {dimension_numbers = #tpu.dot_dimension_numbers<[1], [0], [0], [1], [0, 0, 1, 1], [], []>} : vector<2x256xbf16>, vector<256x128xbf16>, vector<2x128xf32> -> vector<2x128xf32>
    %147 = vector.broadcast %23 : vector<1x128xf32> to vector<2x128xf32>
    %148 = arith.addf %146, %147 : vector<2x128xf32>
    %149 = arith.addf %138, %148 : vector<2x128xf32>
    %cst_64 = arith.constant dense<0.000000e+00> : vector<2xf32>
    %150 = vector.multi_reduction <add>, %149, %cst_64 [1] : vector<2x128xf32> to vector<2xf32>
    %151 = vector.shape_cast %150 : vector<2xf32> to vector<2x1xf32>
    %cst_65 = arith.constant 1.280000e+02 : f32
    %152 = vector.broadcast %cst_65 : f32 to vector<2x1xf32>
    %153 = arith.divf %151, %152 : vector<2x1xf32>
    %154 = vector.broadcast %153 : vector<2x1xf32> to vector<2x128xf32>
    %155 = arith.subf %149, %154 : vector<2x128xf32>
    %156 = arith.mulf %155, %155 : vector<2x128xf32>
    %cst_66 = arith.constant dense<0.000000e+00> : vector<2xf32>
    %157 = vector.multi_reduction <add>, %156, %cst_66 [1] : vector<2x128xf32> to vector<2xf32>
    %158 = vector.shape_cast %157 : vector<2xf32> to vector<2x1xf32>
    %cst_67 = arith.constant 1.280000e+02 : f32
    %159 = vector.broadcast %cst_67 : f32 to vector<2x1xf32>
    %160 = arith.divf %158, %159 : vector<2x1xf32>
    %cst_68 = arith.constant 9.99999974E-6 : f32
    %161 = vector.broadcast %cst_68 : f32 to vector<2x1xf32>
    %162 = arith.addf %160, %161 : vector<2x1xf32>
    %163 = math.rsqrt %162 : vector<2x1xf32>
    %164 = vector.broadcast %163 : vector<2x1xf32> to vector<2x128xf32>
    %165 = arith.mulf %155, %164 : vector<2x128xf32>
    %166 = vector.broadcast %25 : vector<1x128xf32> to vector<2x128xf32>
    %167 = arith.mulf %165, %166 : vector<2x128xf32>
    %168 = vector.broadcast %27 : vector<1x128xf32> to vector<2x128xf32>
    %169 = arith.addf %167, %168 : vector<2x128xf32>
    %c0_69 = arith.constant 0 : index
    %c0_70 = arith.constant 0 : index
    %170 = vector.load %arg16[%c0_69, %c0_70] : memref<2x128xf32, #tpu.memory_space<vmem>>, vector<2x128xf32>
    tpu.vector_store %arg16[%c0_69, %c0_70], %169 {strides = array<i32>} : memref<2x128xf32, #tpu.memory_space<vmem>>, vector<2x128xf32>,
    %c1_i32 = arith.constant 1 : i32
    %171 = arith.cmpi eq, %arg1, %c1_i32 : i32
    %172 = arith.extui %171 : i1 to i32
    %c0_i32_71 = arith.constant 0 : i32
    %173 = arith.cmpi ne, %172, %c0_i32_71 : i32
    scf.if %173 {
      %c0_72 = arith.constant 0 : index
      %c0_73 = arith.constant 0 : index
      %c0_74 = arith.constant 0 : index
      %174 = vector.load %arg15[%c0_72, %c0_73, %c0_74] : memref<1x2x128xf32, #tpu.memory_space<vmem>>, vector<1x2x128xf32>
      %175 = vector.shape_cast %174 : vector<1x2x128xf32> to vector<2x128xf32>
      %176 = vector.shape_cast %169 : vector<2x128xf32> to vector<1x2x128xf32>
      tpu.vector_store %arg15[%c0_72, %c0_73, %c0_74], %176 {strides = array<i32>} : memref<1x2x128xf32, #tpu.memory_space<vmem>>, vector<1x2x128xf32>,
    } else {
    }
    return
  }
  func.func @transform_0(%arg0: i32, %arg1: i32) -> (i32, i32, i32) {
    %c0_i32 = arith.constant 0 : i32
    %c0_i32_0 = arith.constant 0 : i32
    %c0_i32_1 = arith.constant 0 : i32
    return %arg0, %c0_i32, %c0_i32_0 : i32, i32, i32
  }
  func.func @transform_1(%arg0: i32, %arg1: i32) -> (i32, i32, i32) {
    %c0_i32 = arith.constant 0 : i32
    %c0_i32_0 = arith.constant 0 : i32
    %c0_i32_1 = arith.constant 0 : i32
    return %arg1, %c0_i32, %c0_i32_0 : i32, i32, i32
  }
  func.func @transform_2(%arg0: i32, %arg1: i32) -> (i32, i32, i32) {
    %c0_i32 = arith.constant 0 : i32
    %c0_i32_0 = arith.constant 0 : i32
    %c0_i32_1 = arith.constant 0 : i32
    return %arg1, %c0_i32, %c0_i32_0 : i32, i32, i32
  }
  func.func @transform_3(%arg0: i32, %arg1: i32) -> (i32, i32, i32) {
    %c0_i32 = arith.constant 0 : i32
    %c0_i32_0 = arith.constant 0 : i32
    %c0_i32_1 = arith.constant 0 : i32
    return %arg1, %c0_i32, %c0_i32_0 : i32, i32, i32
  }
  func.func @transform_4(%arg0: i32, %arg1: i32) -> (i32, i32, i32) {
    %c0_i32 = arith.constant 0 : i32
    %c0_i32_0 = arith.constant 0 : i32
    %c0_i32_1 = arith.constant 0 : i32
    return %arg1, %c0_i32, %c0_i32_0 : i32, i32, i32
  }
  func.func @transform_5(%arg0: i32, %arg1: i32) -> (i32, i32, i32) {
    %c0_i32 = arith.constant 0 : i32
    %c0_i32_0 = arith.constant 0 : i32
    %c0_i32_1 = arith.constant 0 : i32
    return %arg1, %c0_i32, %c0_i32_0 : i32, i32, i32
  }
  func.func @transform_6(%arg0: i32, %arg1: i32) -> (i32, i32, i32) {
    %c0_i32 = arith.constant 0 : i32
    %c0_i32_0 = arith.constant 0 : i32
    %c0_i32_1 = arith.constant 0 : i32
    return %arg1, %c0_i32, %c0_i32_0 : i32, i32, i32
  }
  func.func @transform_7(%arg0: i32, %arg1: i32) -> (i32, i32, i32) {
    %c0_i32 = arith.constant 0 : i32
    %c0_i32_0 = arith.constant 0 : i32
    %c0_i32_1 = arith.constant 0 : i32
    return %arg1, %c0_i32, %c0_i32_0 : i32, i32, i32
  }
  func.func @transform_8(%arg0: i32, %arg1: i32) -> (i32, i32, i32) {
    %c0_i32 = arith.constant 0 : i32
    %c0_i32_0 = arith.constant 0 : i32
    %c0_i32_1 = arith.constant 0 : i32
    return %arg1, %c0_i32, %c0_i32_0 : i32, i32, i32
  }
  func.func @transform_9(%arg0: i32, %arg1: i32) -> (i32, i32, i32) {
    %c0_i32 = arith.constant 0 : i32
    %c0_i32_0 = arith.constant 0 : i32
    %c0_i32_1 = arith.constant 0 : i32
    return %arg1, %c0_i32, %c0_i32_0 : i32, i32, i32
  }
  func.func @transform_10(%arg0: i32, %arg1: i32) -> (i32, i32, i32) {
    %c0_i32 = arith.constant 0 : i32
    %c0_i32_0 = arith.constant 0 : i32
    %c0_i32_1 = arith.constant 0 : i32
    return %arg1, %c0_i32, %c0_i32_0 : i32, i32, i32
  }
  func.func @transform_11(%arg0: i32, %arg1: i32) -> (i32, i32, i32) {
    %c0_i32 = arith.constant 0 : i32
    %c0_i32_0 = arith.constant 0 : i32
    %c0_i32_1 = arith.constant 0 : i32
    return %arg1, %c0_i32, %c0_i32_0 : i32, i32, i32
  }
  func.func @transform_12(%arg0: i32, %arg1: i32) -> (i32, i32, i32) {
    %c0_i32 = arith.constant 0 : i32
    %c0_i32_0 = arith.constant 0 : i32
    %c0_i32_1 = arith.constant 0 : i32
    return %arg1, %c0_i32, %c0_i32_0 : i32, i32, i32
  }
  func.func @transform_13(%arg0: i32, %arg1: i32) -> (i32, i32, i32) {
    %c0_i32 = arith.constant 0 : i32
    %c0_i32_0 = arith.constant 0 : i32
    %c0_i32_1 = arith.constant 0 : i32
    return %arg0, %c0_i32, %c0_i32_0 : i32, i32, i32
  }
}

module attributes {stable_mosaic.version = 11 : i64} {
  func.func @_enc_stack_kernel(%arg0: i32, %arg1: i32, %arg2: memref<1x8x128xf32, #tpu.memory_space<vmem>>, %arg3: memref<1x128x384xbf16, #tpu.memory_space<vmem>>, %arg4: memref<1x1x384xf32, #tpu.memory_space<vmem>>, %arg5: memref<1x128x128xbf16, #tpu.memory_space<vmem>>, %arg6: memref<1x1x128xf32, #tpu.memory_space<vmem>>, %arg7: memref<1x1x128xf32, #tpu.memory_space<vmem>>, %arg8: memref<1x1x128xf32, #tpu.memory_space<vmem>>, %arg9: memref<1x128x256xbf16, #tpu.memory_space<vmem>>, %arg10: memref<1x1x256xf32, #tpu.memory_space<vmem>>, %arg11: memref<1x256x128xbf16, #tpu.memory_space<vmem>>, %arg12: memref<1x1x128xf32, #tpu.memory_space<vmem>>, %arg13: memref<1x1x128xf32, #tpu.memory_space<vmem>>, %arg14: memref<1x1x128xf32, #tpu.memory_space<vmem>>, %arg15: memref<1x128xf32, #tpu.memory_space<vmem>>, %arg16: memref<1x128xf32, #tpu.memory_space<vmem>>, %arg17: memref<1x8x128xf32, #tpu.memory_space<vmem>>, %arg18: memref<8x128xf32, #tpu.memory_space<vmem>>) attributes {dimension_semantics = [#tpu.dimension_semantics<parallel>, #tpu.dimension_semantics<arbitrary>], iteration_bounds = array<i64: 2, 6>, scalar_prefetch = 0 : i64, scratch_operands = 1 : i64, tpu.core_type = #tpu.core_type<tc>, window_params = [{transform_indices = @transform_0, window_bounds = array<i64: 1, 8, 128>}, {transform_indices = @transform_1, window_bounds = array<i64: 1, 128, 384>}, {transform_indices = @transform_2, window_bounds = array<i64: 1, 1, 384>}, {transform_indices = @transform_3, window_bounds = array<i64: 1, 128, 128>}, {transform_indices = @transform_4, window_bounds = array<i64: 1, 1, 128>}, {transform_indices = @transform_5, window_bounds = array<i64: 1, 1, 128>}, {transform_indices = @transform_6, window_bounds = array<i64: 1, 1, 128>}, {transform_indices = @transform_7, window_bounds = array<i64: 1, 128, 256>}, {transform_indices = @transform_8, window_bounds = array<i64: 1, 1, 256>}, {transform_indices = @transform_9, window_bounds = array<i64: 1, 256, 128>}, {transform_indices = @transform_10, window_bounds = array<i64: 1, 1, 128>}, {transform_indices = @transform_11, window_bounds = array<i64: 1, 1, 128>}, {transform_indices = @transform_12, window_bounds = array<i64: 1, 1, 128>}, {pipeline_mode = #tpu.pipeline_mode<synchronous>, transform_indices = @transform_13, window_bounds = array<i64: 1, 128>}, {pipeline_mode = #tpu.pipeline_mode<synchronous>, transform_indices = @transform_14, window_bounds = array<i64: 1, 128>}, {transform_indices = @transform_15, window_bounds = array<i64: 1, 8, 128>}]} {
    %c0_i32 = arith.constant 0 : i32
    %0 = arith.cmpi eq, %arg1, %c0_i32 : i32
    %1 = arith.extui %0 : i1 to i32
    %c0_i32_0 = arith.constant 0 : i32
    %2 = arith.cmpi ne, %1, %c0_i32_0 : i32
    scf.if %2 {
      %c0_72 = arith.constant 0 : index
      %c0_73 = arith.constant 0 : index
      %c0_74 = arith.constant 0 : index
      %174 = vector.load %arg2[%c0_72, %c0_73, %c0_74] : memref<1x8x128xf32, #tpu.memory_space<vmem>>, vector<1x8x128xf32>
      %175 = vector.shape_cast %174 : vector<1x8x128xf32> to vector<8x128xf32>
      %c0_75 = arith.constant 0 : index
      %c0_76 = arith.constant 0 : index
      %176 = vector.load %arg18[%c0_75, %c0_76] : memref<8x128xf32, #tpu.memory_space<vmem>>, vector<8x128xf32>
      tpu.vector_store %arg18[%c0_75, %c0_76], %175 {strides = array<i32>} : memref<8x128xf32, #tpu.memory_space<vmem>>, vector<8x128xf32>,
    } else {
    }
    %c0 = arith.constant 0 : index
    %c0_1 = arith.constant 0 : index
    %3 = vector.load %arg18[%c0, %c0_1] : memref<8x128xf32, #tpu.memory_space<vmem>>, vector<8x128xf32>
    %c0_2 = arith.constant 0 : index
    %c0_3 = arith.constant 0 : index
    %c0_4 = arith.constant 0 : index
    %4 = vector.load %arg3[%c0_2, %c0_3, %c0_4] : memref<1x128x384xbf16, #tpu.memory_space<vmem>>, vector<1x128x384xbf16>
    %5 = vector.shape_cast %4 : vector<1x128x384xbf16> to vector<128x384xbf16>
    %c0_5 = arith.constant 0 : index
    %c0_6 = arith.constant 0 : index
    %c0_7 = arith.constant 0 : index
    %6 = vector.load %arg4[%c0_5, %c0_6, %c0_7] : memref<1x1x384xf32, #tpu.memory_space<vmem>>, vector<1x1x384xf32>
    %7 = vector.shape_cast %6 : vector<1x1x384xf32> to vector<1x384xf32>
    %c0_8 = arith.constant 0 : index
    %c0_9 = arith.constant 0 : index
    %c0_10 = arith.constant 0 : index
    %8 = vector.load %arg5[%c0_8, %c0_9, %c0_10] : memref<1x128x128xbf16, #tpu.memory_space<vmem>>, vector<1x128x128xbf16>
    %9 = vector.shape_cast %8 : vector<1x128x128xbf16> to vector<128x128xbf16>
    %c0_11 = arith.constant 0 : index
    %c0_12 = arith.constant 0 : index
    %c0_13 = arith.constant 0 : index
    %10 = vector.load %arg6[%c0_11, %c0_12, %c0_13] : memref<1x1x128xf32, #tpu.memory_space<vmem>>, vector<1x1x128xf32>
    %11 = vector.shape_cast %10 : vector<1x1x128xf32> to vector<1x128xf32>
    %c0_14 = arith.constant 0 : index
    %c0_15 = arith.constant 0 : index
    %c0_16 = arith.constant 0 : index
    %12 = vector.load %arg7[%c0_14, %c0_15, %c0_16] : memref<1x1x128xf32, #tpu.memory_space<vmem>>, vector<1x1x128xf32>
    %13 = vector.shape_cast %12 : vector<1x1x128xf32> to vector<1x128xf32>
    %c0_17 = arith.constant 0 : index
    %c0_18 = arith.constant 0 : index
    %c0_19 = arith.constant 0 : index
    %14 = vector.load %arg8[%c0_17, %c0_18, %c0_19] : memref<1x1x128xf32, #tpu.memory_space<vmem>>, vector<1x1x128xf32>
    %15 = vector.shape_cast %14 : vector<1x1x128xf32> to vector<1x128xf32>
    %c0_20 = arith.constant 0 : index
    %c0_21 = arith.constant 0 : index
    %c0_22 = arith.constant 0 : index
    %16 = vector.load %arg9[%c0_20, %c0_21, %c0_22] : memref<1x128x256xbf16, #tpu.memory_space<vmem>>, vector<1x128x256xbf16>
    %17 = vector.shape_cast %16 : vector<1x128x256xbf16> to vector<128x256xbf16>
    %c0_23 = arith.constant 0 : index
    %c0_24 = arith.constant 0 : index
    %c0_25 = arith.constant 0 : index
    %18 = vector.load %arg10[%c0_23, %c0_24, %c0_25] : memref<1x1x256xf32, #tpu.memory_space<vmem>>, vector<1x1x256xf32>
    %19 = vector.shape_cast %18 : vector<1x1x256xf32> to vector<1x256xf32>
    %c0_26 = arith.constant 0 : index
    %c0_27 = arith.constant 0 : index
    %c0_28 = arith.constant 0 : index
    %20 = vector.load %arg11[%c0_26, %c0_27, %c0_28] : memref<1x256x128xbf16, #tpu.memory_space<vmem>>, vector<1x256x128xbf16>
    %21 = vector.shape_cast %20 : vector<1x256x128xbf16> to vector<256x128xbf16>
    %c0_29 = arith.constant 0 : index
    %c0_30 = arith.constant 0 : index
    %c0_31 = arith.constant 0 : index
    %22 = vector.load %arg12[%c0_29, %c0_30, %c0_31] : memref<1x1x128xf32, #tpu.memory_space<vmem>>, vector<1x1x128xf32>
    %23 = vector.shape_cast %22 : vector<1x1x128xf32> to vector<1x128xf32>
    %c0_32 = arith.constant 0 : index
    %c0_33 = arith.constant 0 : index
    %c0_34 = arith.constant 0 : index
    %24 = vector.load %arg13[%c0_32, %c0_33, %c0_34] : memref<1x1x128xf32, #tpu.memory_space<vmem>>, vector<1x1x128xf32>
    %25 = vector.shape_cast %24 : vector<1x1x128xf32> to vector<1x128xf32>
    %c0_35 = arith.constant 0 : index
    %c0_36 = arith.constant 0 : index
    %c0_37 = arith.constant 0 : index
    %26 = vector.load %arg14[%c0_35, %c0_36, %c0_37] : memref<1x1x128xf32, #tpu.memory_space<vmem>>, vector<1x1x128xf32>
    %27 = vector.shape_cast %26 : vector<1x1x128xf32> to vector<1x128xf32>
    %28 = arith.truncf %3 : vector<8x128xf32> to vector<8x128xbf16>
    %cst = arith.constant dense<0.000000e+00> : vector<8x384xf32>
    %29 = tpu.matmul %28, %5, %cst {dimension_numbers = #tpu.dot_dimension_numbers<[1], [0], [0], [1], [0, 0, 1, 1], [], []>} : vector<8x128xbf16>, vector<128x384xbf16>, vector<8x384xf32> -> vector<8x384xf32>
    %30 = vector.broadcast %7 : vector<1x384xf32> to vector<8x384xf32>
    %31 = arith.addf %29, %30 : vector<8x384xf32>
    %32 = vector.extract_strided_slice %31 {offsets = [0, 0], sizes = [8, 128], strides = [1, 1]} : vector<8x384xf32> to vector<8x128xf32>
    %cst_38 = arith.constant 0.176776692 : f32
    %33 = vector.broadcast %cst_38 : f32 to vector<8x128xf32>
    %34 = arith.mulf %32, %33 : vector<8x128xf32>
    %35 = vector.extract_strided_slice %31 {offsets = [0, 128], sizes = [8, 128], strides = [1, 1]} : vector<8x384xf32> to vector<8x128xf32>
    %36 = vector.extract_strided_slice %31 {offsets = [0, 256], sizes = [8, 128], strides = [1, 1]} : vector<8x384xf32> to vector<8x128xf32>
    %37 = vector.extract_strided_slice %34 {offsets = [0, 0], sizes = [8, 32], strides = [1, 1]} : vector<8x128xf32> to vector<8x32xf32>
    %38 = arith.truncf %37 : vector<8x32xf32> to vector<8x32xbf16>
    %39 = vector.extract_strided_slice %35 {offsets = [0, 0], sizes = [8, 32], strides = [1, 1]} : vector<8x128xf32> to vector<8x32xf32>
    %40 = arith.truncf %39 : vector<8x32xf32> to vector<8x32xbf16>
    %41 = vector.extract_strided_slice %36 {offsets = [0, 0], sizes = [8, 32], strides = [1, 1]} : vector<8x128xf32> to vector<8x32xf32>
    %42 = arith.truncf %41 : vector<8x32xf32> to vector<8x32xbf16>
    %cst_39 = arith.constant dense<0.000000e+00> : vector<8x8xf32>
    %43 = tpu.matmul %38, %40, %cst_39 {dimension_numbers = #tpu.dot_dimension_numbers<[1], [1], [0], [0], [0, 0, 1, 0], [], []>} : vector<8x32xbf16>, vector<8x32xbf16>, vector<8x8xf32> -> vector<8x8xf32>
    %cst_40 = arith.constant dense<0xFF800000> : vector<8xf32>
    %44 = vector.multi_reduction <maximumf>, %43, %cst_40 [1] : vector<8x8xf32> to vector<8xf32>
    %45 = vector.shape_cast %44 : vector<8xf32> to vector<8x1xf32>
    %46 = vector.broadcast %45 : vector<8x1xf32> to vector<8x8xf32>
    %47 = arith.subf %43, %46 : vector<8x8xf32>
    %48 = math.exp %47 : vector<8x8xf32>
    %cst_41 = arith.constant dense<0.000000e+00> : vector<8xf32>
    %49 = vector.multi_reduction <add>, %48, %cst_41 [1] : vector<8x8xf32> to vector<8xf32>
    %50 = vector.shape_cast %49 : vector<8xf32> to vector<8x1xf32>
    %51 = tpu.reciprocal %50 {approx = true} : vector<8x1xf32> -> vector<8x1xf32>
    %52 = vector.broadcast %51 : vector<8x1xf32> to vector<8x8xf32>
    %53 = arith.mulf %48, %52 : vector<8x8xf32>
    %54 = arith.truncf %53 : vector<8x8xf32> to vector<8x8xbf16>
    %cst_42 = arith.constant dense<0.000000e+00> : vector<8x32xf32>
    %55 = tpu.matmul %54, %42, %cst_42 {dimension_numbers = #tpu.dot_dimension_numbers<[1], [0], [0], [1], [0, 0, 1, 1], [], []>} : vector<8x8xbf16>, vector<8x32xbf16>, vector<8x32xf32> -> vector<8x32xf32>
    %56 = vector.extract_strided_slice %34 {offsets = [0, 32], sizes = [8, 32], strides = [1, 1]} : vector<8x128xf32> to vector<8x32xf32>
    %57 = arith.truncf %56 : vector<8x32xf32> to vector<8x32xbf16>
    %58 = vector.extract_strided_slice %35 {offsets = [0, 32], sizes = [8, 32], strides = [1, 1]} : vector<8x128xf32> to vector<8x32xf32>
    %59 = arith.truncf %58 : vector<8x32xf32> to vector<8x32xbf16>
    %60 = vector.extract_strided_slice %36 {offsets = [0, 32], sizes = [8, 32], strides = [1, 1]} : vector<8x128xf32> to vector<8x32xf32>
    %61 = arith.truncf %60 : vector<8x32xf32> to vector<8x32xbf16>
    %cst_43 = arith.constant dense<0.000000e+00> : vector<8x8xf32>
    %62 = tpu.matmul %57, %59, %cst_43 {dimension_numbers = #tpu.dot_dimension_numbers<[1], [1], [0], [0], [0, 0, 1, 0], [], []>} : vector<8x32xbf16>, vector<8x32xbf16>, vector<8x8xf32> -> vector<8x8xf32>
    %cst_44 = arith.constant dense<0xFF800000> : vector<8xf32>
    %63 = vector.multi_reduction <maximumf>, %62, %cst_44 [1] : vector<8x8xf32> to vector<8xf32>
    %64 = vector.shape_cast %63 : vector<8xf32> to vector<8x1xf32>
    %65 = vector.broadcast %64 : vector<8x1xf32> to vector<8x8xf32>
    %66 = arith.subf %62, %65 : vector<8x8xf32>
    %67 = math.exp %66 : vector<8x8xf32>
    %cst_45 = arith.constant dense<0.000000e+00> : vector<8xf32>
    %68 = vector.multi_reduction <add>, %67, %cst_45 [1] : vector<8x8xf32> to vector<8xf32>
    %69 = vector.shape_cast %68 : vector<8xf32> to vector<8x1xf32>
    %70 = tpu.reciprocal %69 {approx = true} : vector<8x1xf32> -> vector<8x1xf32>
    %71 = vector.broadcast %70 : vector<8x1xf32> to vector<8x8xf32>
    %72 = arith.mulf %67, %71 : vector<8x8xf32>
    %73 = arith.truncf %72 : vector<8x8xf32> to vector<8x8xbf16>
    %cst_46 = arith.constant dense<0.000000e+00> : vector<8x32xf32>
    %74 = tpu.matmul %73, %61, %cst_46 {dimension_numbers = #tpu.dot_dimension_numbers<[1], [0], [0], [1], [0, 0, 1, 1], [], []>} : vector<8x8xbf16>, vector<8x32xbf16>, vector<8x32xf32> -> vector<8x32xf32>
    %75 = vector.extract_strided_slice %34 {offsets = [0, 64], sizes = [8, 32], strides = [1, 1]} : vector<8x128xf32> to vector<8x32xf32>
    %76 = arith.truncf %75 : vector<8x32xf32> to vector<8x32xbf16>
    %77 = vector.extract_strided_slice %35 {offsets = [0, 64], sizes = [8, 32], strides = [1, 1]} : vector<8x128xf32> to vector<8x32xf32>
    %78 = arith.truncf %77 : vector<8x32xf32> to vector<8x32xbf16>
    %79 = vector.extract_strided_slice %36 {offsets = [0, 64], sizes = [8, 32], strides = [1, 1]} : vector<8x128xf32> to vector<8x32xf32>
    %80 = arith.truncf %79 : vector<8x32xf32> to vector<8x32xbf16>
    %cst_47 = arith.constant dense<0.000000e+00> : vector<8x8xf32>
    %81 = tpu.matmul %76, %78, %cst_47 {dimension_numbers = #tpu.dot_dimension_numbers<[1], [1], [0], [0], [0, 0, 1, 0], [], []>} : vector<8x32xbf16>, vector<8x32xbf16>, vector<8x8xf32> -> vector<8x8xf32>
    %cst_48 = arith.constant dense<0xFF800000> : vector<8xf32>
    %82 = vector.multi_reduction <maximumf>, %81, %cst_48 [1] : vector<8x8xf32> to vector<8xf32>
    %83 = vector.shape_cast %82 : vector<8xf32> to vector<8x1xf32>
    %84 = vector.broadcast %83 : vector<8x1xf32> to vector<8x8xf32>
    %85 = arith.subf %81, %84 : vector<8x8xf32>
    %86 = math.exp %85 : vector<8x8xf32>
    %cst_49 = arith.constant dense<0.000000e+00> : vector<8xf32>
    %87 = vector.multi_reduction <add>, %86, %cst_49 [1] : vector<8x8xf32> to vector<8xf32>
    %88 = vector.shape_cast %87 : vector<8xf32> to vector<8x1xf32>
    %89 = tpu.reciprocal %88 {approx = true} : vector<8x1xf32> -> vector<8x1xf32>
    %90 = vector.broadcast %89 : vector<8x1xf32> to vector<8x8xf32>
    %91 = arith.mulf %86, %90 : vector<8x8xf32>
    %92 = arith.truncf %91 : vector<8x8xf32> to vector<8x8xbf16>
    %cst_50 = arith.constant dense<0.000000e+00> : vector<8x32xf32>
    %93 = tpu.matmul %92, %80, %cst_50 {dimension_numbers = #tpu.dot_dimension_numbers<[1], [0], [0], [1], [0, 0, 1, 1], [], []>} : vector<8x8xbf16>, vector<8x32xbf16>, vector<8x32xf32> -> vector<8x32xf32>
    %94 = vector.extract_strided_slice %34 {offsets = [0, 96], sizes = [8, 32], strides = [1, 1]} : vector<8x128xf32> to vector<8x32xf32>
    %95 = arith.truncf %94 : vector<8x32xf32> to vector<8x32xbf16>
    %96 = vector.extract_strided_slice %35 {offsets = [0, 96], sizes = [8, 32], strides = [1, 1]} : vector<8x128xf32> to vector<8x32xf32>
    %97 = arith.truncf %96 : vector<8x32xf32> to vector<8x32xbf16>
    %98 = vector.extract_strided_slice %36 {offsets = [0, 96], sizes = [8, 32], strides = [1, 1]} : vector<8x128xf32> to vector<8x32xf32>
    %99 = arith.truncf %98 : vector<8x32xf32> to vector<8x32xbf16>
    %cst_51 = arith.constant dense<0.000000e+00> : vector<8x8xf32>
    %100 = tpu.matmul %95, %97, %cst_51 {dimension_numbers = #tpu.dot_dimension_numbers<[1], [1], [0], [0], [0, 0, 1, 0], [], []>} : vector<8x32xbf16>, vector<8x32xbf16>, vector<8x8xf32> -> vector<8x8xf32>
    %cst_52 = arith.constant dense<0xFF800000> : vector<8xf32>
    %101 = vector.multi_reduction <maximumf>, %100, %cst_52 [1] : vector<8x8xf32> to vector<8xf32>
    %102 = vector.shape_cast %101 : vector<8xf32> to vector<8x1xf32>
    %103 = vector.broadcast %102 : vector<8x1xf32> to vector<8x8xf32>
    %104 = arith.subf %100, %103 : vector<8x8xf32>
    %105 = math.exp %104 : vector<8x8xf32>
    %cst_53 = arith.constant dense<0.000000e+00> : vector<8xf32>
    %106 = vector.multi_reduction <add>, %105, %cst_53 [1] : vector<8x8xf32> to vector<8xf32>
    %107 = vector.shape_cast %106 : vector<8xf32> to vector<8x1xf32>
    %108 = tpu.reciprocal %107 {approx = true} : vector<8x1xf32> -> vector<8x1xf32>
    %109 = vector.broadcast %108 : vector<8x1xf32> to vector<8x8xf32>
    %110 = arith.mulf %105, %109 : vector<8x8xf32>
    %111 = arith.truncf %110 : vector<8x8xf32> to vector<8x8xbf16>
    %cst_54 = arith.constant dense<0.000000e+00> : vector<8x32xf32>
    %112 = tpu.matmul %111, %99, %cst_54 {dimension_numbers = #tpu.dot_dimension_numbers<[1], [0], [0], [1], [0, 0, 1, 1], [], []>} : vector<8x8xbf16>, vector<8x32xbf16>, vector<8x32xf32> -> vector<8x32xf32>
    %113 = tpu.concatenate %55, %74, %93, %112 in 1 : vector<8x32xf32>, vector<8x32xf32>, vector<8x32xf32>, vector<8x32xf32> -> vector<8x128xf32>
    %114 = arith.truncf %113 : vector<8x128xf32> to vector<8x128xbf16>
    %cst_55 = arith.constant dense<0.000000e+00> : vector<8x128xf32>
    %115 = tpu.matmul %114, %9, %cst_55 {dimension_numbers = #tpu.dot_dimension_numbers<[1], [0], [0], [1], [0, 0, 1, 1], [], []>} : vector<8x128xbf16>, vector<128x128xbf16>, vector<8x128xf32> -> vector<8x128xf32>
    %116 = vector.broadcast %11 : vector<1x128xf32> to vector<8x128xf32>
    %117 = arith.addf %115, %116 : vector<8x128xf32>
    %118 = arith.addf %3, %117 : vector<8x128xf32>
    %cst_56 = arith.constant dense<0.000000e+00> : vector<8xf32>
    %119 = vector.multi_reduction <add>, %118, %cst_56 [1] : vector<8x128xf32> to vector<8xf32>
    %120 = vector.shape_cast %119 : vector<8xf32> to vector<8x1xf32>
    %cst_57 = arith.constant 1.280000e+02 : f32
    %121 = vector.broadcast %cst_57 : f32 to vector<8x1xf32>
    %122 = arith.divf %120, %121 : vector<8x1xf32>
    %123 = vector.broadcast %122 : vector<8x1xf32> to vector<8x128xf32>
    %124 = arith.subf %118, %123 : vector<8x128xf32>
    %125 = arith.mulf %124, %124 : vector<8x128xf32>
    %cst_58 = arith.constant dense<0.000000e+00> : vector<8xf32>
    %126 = vector.multi_reduction <add>, %125, %cst_58 [1] : vector<8x128xf32> to vector<8xf32>
    %127 = vector.shape_cast %126 : vector<8xf32> to vector<8x1xf32>
    %cst_59 = arith.constant 1.280000e+02 : f32
    %128 = vector.broadcast %cst_59 : f32 to vector<8x1xf32>
    %129 = arith.divf %127, %128 : vector<8x1xf32>
    %cst_60 = arith.constant 9.99999974E-6 : f32
    %130 = vector.broadcast %cst_60 : f32 to vector<8x1xf32>
    %131 = arith.addf %129, %130 : vector<8x1xf32>
    %132 = math.rsqrt %131 : vector<8x1xf32>
    %133 = vector.broadcast %132 : vector<8x1xf32> to vector<8x128xf32>
    %134 = arith.mulf %124, %133 : vector<8x128xf32>
    %135 = vector.broadcast %13 : vector<1x128xf32> to vector<8x128xf32>
    %136 = arith.mulf %134, %135 : vector<8x128xf32>
    %137 = vector.broadcast %15 : vector<1x128xf32> to vector<8x128xf32>
    %138 = arith.addf %136, %137 : vector<8x128xf32>
    %139 = arith.truncf %138 : vector<8x128xf32> to vector<8x128xbf16>
    %cst_61 = arith.constant dense<0.000000e+00> : vector<8x256xf32>
    %140 = tpu.matmul %139, %17, %cst_61 {dimension_numbers = #tpu.dot_dimension_numbers<[1], [0], [0], [1], [0, 0, 1, 1], [], []>} : vector<8x128xbf16>, vector<128x256xbf16>, vector<8x256xf32> -> vector<8x256xf32>
    %141 = vector.broadcast %19 : vector<1x256xf32> to vector<8x256xf32>
    %142 = arith.addf %140, %141 : vector<8x256xf32>
    %cst_62 = arith.constant 0.000000e+00 : f32
    %143 = vector.broadcast %cst_62 : f32 to vector<8x256xf32>
    %144 = arith.maximumf %142, %143 : vector<8x256xf32>
    %145 = arith.truncf %144 : vector<8x256xf32> to vector<8x256xbf16>
    %cst_63 = arith.constant dense<0.000000e+00> : vector<8x128xf32>
    %146 = tpu.matmul %145, %21, %cst_63 {dimension_numbers = #tpu.dot_dimension_numbers<[1], [0], [0], [1], [0, 0, 1, 1], [], []>} : vector<8x256xbf16>, vector<256x128xbf16>, vector<8x128xf32> -> vector<8x128xf32>
    %147 = vector.broadcast %23 : vector<1x128xf32> to vector<8x128xf32>
    %148 = arith.addf %146, %147 : vector<8x128xf32>
    %149 = arith.addf %138, %148 : vector<8x128xf32>
    %cst_64 = arith.constant dense<0.000000e+00> : vector<8xf32>
    %150 = vector.multi_reduction <add>, %149, %cst_64 [1] : vector<8x128xf32> to vector<8xf32>
    %151 = vector.shape_cast %150 : vector<8xf32> to vector<8x1xf32>
    %cst_65 = arith.constant 1.280000e+02 : f32
    %152 = vector.broadcast %cst_65 : f32 to vector<8x1xf32>
    %153 = arith.divf %151, %152 : vector<8x1xf32>
    %154 = vector.broadcast %153 : vector<8x1xf32> to vector<8x128xf32>
    %155 = arith.subf %149, %154 : vector<8x128xf32>
    %156 = arith.mulf %155, %155 : vector<8x128xf32>
    %cst_66 = arith.constant dense<0.000000e+00> : vector<8xf32>
    %157 = vector.multi_reduction <add>, %156, %cst_66 [1] : vector<8x128xf32> to vector<8xf32>
    %158 = vector.shape_cast %157 : vector<8xf32> to vector<8x1xf32>
    %cst_67 = arith.constant 1.280000e+02 : f32
    %159 = vector.broadcast %cst_67 : f32 to vector<8x1xf32>
    %160 = arith.divf %158, %159 : vector<8x1xf32>
    %cst_68 = arith.constant 9.99999974E-6 : f32
    %161 = vector.broadcast %cst_68 : f32 to vector<8x1xf32>
    %162 = arith.addf %160, %161 : vector<8x1xf32>
    %163 = math.rsqrt %162 : vector<8x1xf32>
    %164 = vector.broadcast %163 : vector<8x1xf32> to vector<8x128xf32>
    %165 = arith.mulf %155, %164 : vector<8x128xf32>
    %166 = vector.broadcast %25 : vector<1x128xf32> to vector<8x128xf32>
    %167 = arith.mulf %165, %166 : vector<8x128xf32>
    %168 = vector.broadcast %27 : vector<1x128xf32> to vector<8x128xf32>
    %169 = arith.addf %167, %168 : vector<8x128xf32>
    %c0_69 = arith.constant 0 : index
    %c0_70 = arith.constant 0 : index
    %170 = vector.load %arg18[%c0_69, %c0_70] : memref<8x128xf32, #tpu.memory_space<vmem>>, vector<8x128xf32>
    tpu.vector_store %arg18[%c0_69, %c0_70], %169 {strides = array<i32>} : memref<8x128xf32, #tpu.memory_space<vmem>>, vector<8x128xf32>,
    %c5_i32 = arith.constant 5 : i32
    %171 = arith.cmpi eq, %arg1, %c5_i32 : i32
    %172 = arith.extui %171 : i1 to i32
    %c0_i32_71 = arith.constant 0 : i32
    %173 = arith.cmpi ne, %172, %c0_i32_71 : i32
    scf.if %173 {
      %c0_72 = arith.constant 0 : index
      %c0_73 = arith.constant 0 : index
      %174 = vector.load %arg15[%c0_72, %c0_73] : memref<1x128xf32, #tpu.memory_space<vmem>>, vector<1x128xf32>
      %c0_74 = arith.constant 0 : index
      %c0_75 = arith.constant 0 : index
      %175 = vector.load %arg16[%c0_74, %c0_75] : memref<1x128xf32, #tpu.memory_space<vmem>>, vector<1x128xf32>
      %cst_76 = arith.constant dense<0.000000e+00> : vector<8xf32>
      %176 = vector.multi_reduction <add>, %169, %cst_76 [1] : vector<8x128xf32> to vector<8xf32>
      %177 = vector.shape_cast %176 : vector<8xf32> to vector<8x1xf32>
      %cst_77 = arith.constant 1.280000e+02 : f32
      %178 = vector.broadcast %cst_77 : f32 to vector<8x1xf32>
      %179 = arith.divf %177, %178 : vector<8x1xf32>
      %180 = vector.broadcast %179 : vector<8x1xf32> to vector<8x128xf32>
      %181 = arith.subf %169, %180 : vector<8x128xf32>
      %182 = arith.mulf %181, %181 : vector<8x128xf32>
      %cst_78 = arith.constant dense<0.000000e+00> : vector<8xf32>
      %183 = vector.multi_reduction <add>, %182, %cst_78 [1] : vector<8x128xf32> to vector<8xf32>
      %184 = vector.shape_cast %183 : vector<8xf32> to vector<8x1xf32>
      %cst_79 = arith.constant 1.280000e+02 : f32
      %185 = vector.broadcast %cst_79 : f32 to vector<8x1xf32>
      %186 = arith.divf %184, %185 : vector<8x1xf32>
      %cst_80 = arith.constant 9.99999974E-6 : f32
      %187 = vector.broadcast %cst_80 : f32 to vector<8x1xf32>
      %188 = arith.addf %186, %187 : vector<8x1xf32>
      %189 = math.rsqrt %188 : vector<8x1xf32>
      %190 = vector.broadcast %189 : vector<8x1xf32> to vector<8x128xf32>
      %191 = arith.mulf %181, %190 : vector<8x128xf32>
      %192 = vector.broadcast %174 : vector<1x128xf32> to vector<8x128xf32>
      %193 = arith.mulf %191, %192 : vector<8x128xf32>
      %194 = vector.broadcast %175 : vector<1x128xf32> to vector<8x128xf32>
      %195 = arith.addf %193, %194 : vector<8x128xf32>
      %c0_81 = arith.constant 0 : index
      %c0_82 = arith.constant 0 : index
      %c0_83 = arith.constant 0 : index
      %196 = vector.load %arg17[%c0_81, %c0_82, %c0_83] : memref<1x8x128xf32, #tpu.memory_space<vmem>>, vector<1x8x128xf32>
      %197 = vector.shape_cast %196 : vector<1x8x128xf32> to vector<8x128xf32>
      %198 = vector.shape_cast %195 : vector<8x128xf32> to vector<1x8x128xf32>
      tpu.vector_store %arg17[%c0_81, %c0_82, %c0_83], %198 {strides = array<i32>} : memref<1x8x128xf32, #tpu.memory_space<vmem>>, vector<1x8x128xf32>,
    } else {
    }
    return
  }
  func.func @transform_0(%arg0: i32, %arg1: i32) -> (i32, i32, i32) {
    %c0_i32 = arith.constant 0 : i32
    %c0_i32_0 = arith.constant 0 : i32
    %c0_i32_1 = arith.constant 0 : i32
    return %arg0, %c0_i32, %c0_i32_0 : i32, i32, i32
  }
  func.func @transform_1(%arg0: i32, %arg1: i32) -> (i32, i32, i32) {
    %c0_i32 = arith.constant 0 : i32
    %c0_i32_0 = arith.constant 0 : i32
    %c0_i32_1 = arith.constant 0 : i32
    return %arg1, %c0_i32, %c0_i32_0 : i32, i32, i32
  }
  func.func @transform_2(%arg0: i32, %arg1: i32) -> (i32, i32, i32) {
    %c0_i32 = arith.constant 0 : i32
    %c0_i32_0 = arith.constant 0 : i32
    %c0_i32_1 = arith.constant 0 : i32
    return %arg1, %c0_i32, %c0_i32_0 : i32, i32, i32
  }
  func.func @transform_3(%arg0: i32, %arg1: i32) -> (i32, i32, i32) {
    %c0_i32 = arith.constant 0 : i32
    %c0_i32_0 = arith.constant 0 : i32
    %c0_i32_1 = arith.constant 0 : i32
    return %arg1, %c0_i32, %c0_i32_0 : i32, i32, i32
  }
  func.func @transform_4(%arg0: i32, %arg1: i32) -> (i32, i32, i32) {
    %c0_i32 = arith.constant 0 : i32
    %c0_i32_0 = arith.constant 0 : i32
    %c0_i32_1 = arith.constant 0 : i32
    return %arg1, %c0_i32, %c0_i32_0 : i32, i32, i32
  }
  func.func @transform_5(%arg0: i32, %arg1: i32) -> (i32, i32, i32) {
    %c0_i32 = arith.constant 0 : i32
    %c0_i32_0 = arith.constant 0 : i32
    %c0_i32_1 = arith.constant 0 : i32
    return %arg1, %c0_i32, %c0_i32_0 : i32, i32, i32
  }
  func.func @transform_6(%arg0: i32, %arg1: i32) -> (i32, i32, i32) {
    %c0_i32 = arith.constant 0 : i32
    %c0_i32_0 = arith.constant 0 : i32
    %c0_i32_1 = arith.constant 0 : i32
    return %arg1, %c0_i32, %c0_i32_0 : i32, i32, i32
  }
  func.func @transform_7(%arg0: i32, %arg1: i32) -> (i32, i32, i32) {
    %c0_i32 = arith.constant 0 : i32
    %c0_i32_0 = arith.constant 0 : i32
    %c0_i32_1 = arith.constant 0 : i32
    return %arg1, %c0_i32, %c0_i32_0 : i32, i32, i32
  }
  func.func @transform_8(%arg0: i32, %arg1: i32) -> (i32, i32, i32) {
    %c0_i32 = arith.constant 0 : i32
    %c0_i32_0 = arith.constant 0 : i32
    %c0_i32_1 = arith.constant 0 : i32
    return %arg1, %c0_i32, %c0_i32_0 : i32, i32, i32
  }
  func.func @transform_9(%arg0: i32, %arg1: i32) -> (i32, i32, i32) {
    %c0_i32 = arith.constant 0 : i32
    %c0_i32_0 = arith.constant 0 : i32
    %c0_i32_1 = arith.constant 0 : i32
    return %arg1, %c0_i32, %c0_i32_0 : i32, i32, i32
  }
  func.func @transform_10(%arg0: i32, %arg1: i32) -> (i32, i32, i32) {
    %c0_i32 = arith.constant 0 : i32
    %c0_i32_0 = arith.constant 0 : i32
    %c0_i32_1 = arith.constant 0 : i32
    return %arg1, %c0_i32, %c0_i32_0 : i32, i32, i32
  }
  func.func @transform_11(%arg0: i32, %arg1: i32) -> (i32, i32, i32) {
    %c0_i32 = arith.constant 0 : i32
    %c0_i32_0 = arith.constant 0 : i32
    %c0_i32_1 = arith.constant 0 : i32
    return %arg1, %c0_i32, %c0_i32_0 : i32, i32, i32
  }
  func.func @transform_12(%arg0: i32, %arg1: i32) -> (i32, i32, i32) {
    %c0_i32 = arith.constant 0 : i32
    %c0_i32_0 = arith.constant 0 : i32
    %c0_i32_1 = arith.constant 0 : i32
    return %arg1, %c0_i32, %c0_i32_0 : i32, i32, i32
  }
  func.func @transform_13(%arg0: i32, %arg1: i32) -> (i32, i32) {
    %c0_i32 = arith.constant 0 : i32
    %c0_i32_0 = arith.constant 0 : i32
    %c0_i32_1 = arith.constant 0 : i32
    return %c0_i32, %c0_i32_0 : i32, i32
  }
  func.func @transform_14(%arg0: i32, %arg1: i32) -> (i32, i32) {
    %c0_i32 = arith.constant 0 : i32
    %c0_i32_0 = arith.constant 0 : i32
    %c0_i32_1 = arith.constant 0 : i32
    return %c0_i32, %c0_i32_0 : i32, i32
  }
  func.func @transform_15(%arg0: i32, %arg1: i32) -> (i32, i32, i32) {
    %c0_i32 = arith.constant 0 : i32
    %c0_i32_0 = arith.constant 0 : i32
    %c0_i32_1 = arith.constant 0 : i32
    return %arg0, %c0_i32, %c0_i32_0 : i32, i32, i32
  }
}

module attributes {stable_mosaic.version = 11 : i64} {
  func.func @_ln_fcout_kernel(%arg0: i32, %arg1: i32, %arg2: memref<1x8x128xf32, #tpu.memory_space<vmem>>, %arg3: memref<1x128xf32, #tpu.memory_space<vmem>>, %arg4: memref<1x128xf32, #tpu.memory_space<vmem>>, %arg5: memref<128x128xbf16, #tpu.memory_space<vmem>>, %arg6: memref<1x128xf32, #tpu.memory_space<vmem>>, %arg7: memref<1x8x128xbf16, #tpu.memory_space<vmem>>, %arg8: memref<8x128xbf16, #tpu.memory_space<vmem>>) attributes {dimension_semantics = [#tpu.dimension_semantics<parallel>, #tpu.dimension_semantics<arbitrary>], iteration_bounds = array<i64: 2, 1>, scalar_prefetch = 0 : i64, scratch_operands = 1 : i64, tpu.core_type = #tpu.core_type<tc>, window_params = [{transform_indices = @transform_0, window_bounds = array<i64: 1, 8, 128>}, {pipeline_mode = #tpu.pipeline_mode<synchronous>, transform_indices = @transform_1, window_bounds = array<i64: 1, 128>}, {pipeline_mode = #tpu.pipeline_mode<synchronous>, transform_indices = @transform_2, window_bounds = array<i64: 1, 128>}, {transform_indices = @transform_3, window_bounds = array<i64: 128, 128>}, {transform_indices = @transform_4, window_bounds = array<i64: 1, 128>}, {transform_indices = @transform_5, window_bounds = array<i64: 1, 8, 128>}]} {
    %c0_i32 = arith.constant 0 : i32
    %0 = arith.cmpi eq, %arg1, %c0_i32 : i32
    %1 = arith.extui %0 : i1 to i32
    %c0_i32_0 = arith.constant 0 : i32
    %2 = arith.cmpi ne, %1, %c0_i32_0 : i32
    scf.if %2 {
      %c0_9 = arith.constant 0 : index
      %c0_10 = arith.constant 0 : index
      %c0_11 = arith.constant 0 : index
      %13 = vector.load %arg2[%c0_9, %c0_10, %c0_11] : memref<1x8x128xf32, #tpu.memory_space<vmem>>, vector<1x8x128xf32>
      %14 = vector.shape_cast %13 : vector<1x8x128xf32> to vector<8x128xf32>
      %c0_12 = arith.constant 0 : index
      %c0_13 = arith.constant 0 : index
      %15 = vector.load %arg3[%c0_12, %c0_13] : memref<1x128xf32, #tpu.memory_space<vmem>>, vector<1x128xf32>
      %c0_14 = arith.constant 0 : index
      %c0_15 = arith.constant 0 : index
      %16 = vector.load %arg4[%c0_14, %c0_15] : memref<1x128xf32, #tpu.memory_space<vmem>>, vector<1x128xf32>
      %cst_16 = arith.constant dense<0.000000e+00> : vector<8xf32>
      %17 = vector.multi_reduction <add>, %14, %cst_16 [1] : vector<8x128xf32> to vector<8xf32>
      %18 = vector.shape_cast %17 : vector<8xf32> to vector<8x1xf32>
      %cst_17 = arith.constant 1.280000e+02 : f32
      %19 = vector.broadcast %cst_17 : f32 to vector<8x1xf32>
      %20 = arith.divf %18, %19 : vector<8x1xf32>
      %21 = vector.broadcast %20 : vector<8x1xf32> to vector<8x128xf32>
      %22 = arith.subf %14, %21 : vector<8x128xf32>
      %23 = arith.mulf %22, %22 : vector<8x128xf32>
      %cst_18 = arith.constant dense<0.000000e+00> : vector<8xf32>
      %24 = vector.multi_reduction <add>, %23, %cst_18 [1] : vector<8x128xf32> to vector<8xf32>
      %25 = vector.shape_cast %24 : vector<8xf32> to vector<8x1xf32>
      %cst_19 = arith.constant 1.280000e+02 : f32
      %26 = vector.broadcast %cst_19 : f32 to vector<8x1xf32>
      %27 = arith.divf %25, %26 : vector<8x1xf32>
      %cst_20 = arith.constant 9.99999974E-6 : f32
      %28 = vector.broadcast %cst_20 : f32 to vector<8x1xf32>
      %29 = arith.addf %27, %28 : vector<8x1xf32>
      %30 = math.rsqrt %29 : vector<8x1xf32>
      %31 = vector.broadcast %30 : vector<8x1xf32> to vector<8x128xf32>
      %32 = arith.mulf %22, %31 : vector<8x128xf32>
      %33 = vector.broadcast %15 : vector<1x128xf32> to vector<8x128xf32>
      %34 = arith.mulf %32, %33 : vector<8x128xf32>
      %35 = vector.broadcast %16 : vector<1x128xf32> to vector<8x128xf32>
      %36 = arith.addf %34, %35 : vector<8x128xf32>
      %37 = arith.truncf %36 : vector<8x128xf32> to vector<8x128xbf16>
      %c0_21 = arith.constant 0 : index
      %c0_22 = arith.constant 0 : index
      %38 = vector.load %arg8[%c0_21, %c0_22] : memref<8x128xbf16, #tpu.memory_space<vmem>>, vector<8x128xbf16>
      tpu.vector_store %arg8[%c0_21, %c0_22], %37 {strides = array<i32>} : memref<8x128xbf16, #tpu.memory_space<vmem>>, vector<8x128xbf16>,
    } else {
    }
    %c0 = arith.constant 0 : index
    %c0_1 = arith.constant 0 : index
    %3 = vector.load %arg8[%c0, %c0_1] : memref<8x128xbf16, #tpu.memory_space<vmem>>, vector<8x128xbf16>
    %c0_2 = arith.constant 0 : index
    %c0_3 = arith.constant 0 : index
    %4 = vector.load %arg5[%c0_2, %c0_3] : memref<128x128xbf16, #tpu.memory_space<vmem>>, vector<128x128xbf16>
    %cst = arith.constant dense<0.000000e+00> : vector<8x128xf32>
    %5 = tpu.matmul %3, %4, %cst {dimension_numbers = #tpu.dot_dimension_numbers<[1], [0], [0], [1], [0, 0, 1, 1], [], []>} : vector<8x128xbf16>, vector<128x128xbf16>, vector<8x128xf32> -> vector<8x128xf32>
    %c0_4 = arith.constant 0 : index
    %c0_5 = arith.constant 0 : index
    %6 = vector.load %arg6[%c0_4, %c0_5] : memref<1x128xf32, #tpu.memory_space<vmem>>, vector<1x128xf32>
    %7 = vector.broadcast %6 : vector<1x128xf32> to vector<8x128xf32>
    %8 = arith.addf %5, %7 : vector<8x128xf32>
    %9 = arith.truncf %8 : vector<8x128xf32> to vector<8x128xbf16>
    %c0_6 = arith.constant 0 : index
    %c0_7 = arith.constant 0 : index
    %c0_8 = arith.constant 0 : index
    %10 = vector.load %arg7[%c0_6, %c0_7, %c0_8] : memref<1x8x128xbf16, #tpu.memory_space<vmem>>, vector<1x8x128xbf16>
    %11 = vector.shape_cast %10 : vector<1x8x128xbf16> to vector<8x128xbf16>
    %12 = vector.shape_cast %9 : vector<8x128xbf16> to vector<1x8x128xbf16>
    tpu.vector_store %arg7[%c0_6, %c0_7, %c0_8], %12 {strides = array<i32>} : memref<1x8x128xbf16, #tpu.memory_space<vmem>>, vector<1x8x128xbf16>,
    return
  }
  func.func @transform_0(%arg0: i32, %arg1: i32) -> (i32, i32, i32) {
    %c0_i32 = arith.constant 0 : i32
    %c0_i32_0 = arith.constant 0 : i32
    %c0_i32_1 = arith.constant 0 : i32
    return %arg0, %c0_i32, %c0_i32_0 : i32, i32, i32
  }
  func.func @transform_1(%arg0: i32, %arg1: i32) -> (i32, i32) {
    %c0_i32 = arith.constant 0 : i32
    %c0_i32_0 = arith.constant 0 : i32
    %c0_i32_1 = arith.constant 0 : i32
    return %c0_i32, %c0_i32_0 : i32, i32
  }
  func.func @transform_2(%arg0: i32, %arg1: i32) -> (i32, i32) {
    %c0_i32 = arith.constant 0 : i32
    %c0_i32_0 = arith.constant 0 : i32
    %c0_i32_1 = arith.constant 0 : i32
    return %c0_i32, %c0_i32_0 : i32, i32
  }
  func.func @transform_3(%arg0: i32, %arg1: i32) -> (i32, i32) {
    %c0_i32 = arith.constant 0 : i32
    %c0_i32_0 = arith.constant 0 : i32
    return %c0_i32, %arg1 : i32, i32
  }
  func.func @transform_4(%arg0: i32, %arg1: i32) -> (i32, i32) {
    %c0_i32 = arith.constant 0 : i32
    %c0_i32_0 = arith.constant 0 : i32
    return %c0_i32, %arg1 : i32, i32
  }
  func.func @transform_5(%arg0: i32, %arg1: i32) -> (i32, i32, i32) {
    %c0_i32 = arith.constant 0 : i32
    %c0_i32_0 = arith.constant 0 : i32
    return %arg0, %c0_i32, %arg1 : i32, i32, i32
  }
}

module attributes {stable_mosaic.version = 11 : i64} {
  func.func @_dec_stack_kernel(%arg0: i32, %arg1: i32, %arg2: memref<1x16x128xf32, #tpu.memory_space<vmem>>, %arg3: memref<1x8x128xf32, #tpu.memory_space<vmem>>, %arg4: memref<1x128x384xbf16, #tpu.memory_space<vmem>>, %arg5: memref<1x1x384xf32, #tpu.memory_space<vmem>>, %arg6: memref<1x128x128xbf16, #tpu.memory_space<vmem>>, %arg7: memref<1x1x128xf32, #tpu.memory_space<vmem>>, %arg8: memref<1x1x128xf32, #tpu.memory_space<vmem>>, %arg9: memref<1x1x128xf32, #tpu.memory_space<vmem>>, %arg10: memref<1x128x128xbf16, #tpu.memory_space<vmem>>, %arg11: memref<1x1x128xf32, #tpu.memory_space<vmem>>, %arg12: memref<1x128x256xbf16, #tpu.memory_space<vmem>>, %arg13: memref<1x1x256xf32, #tpu.memory_space<vmem>>, %arg14: memref<1x128x128xbf16, #tpu.memory_space<vmem>>, %arg15: memref<1x1x128xf32, #tpu.memory_space<vmem>>, %arg16: memref<1x1x128xf32, #tpu.memory_space<vmem>>, %arg17: memref<1x1x128xf32, #tpu.memory_space<vmem>>, %arg18: memref<1x128x256xbf16, #tpu.memory_space<vmem>>, %arg19: memref<1x1x256xf32, #tpu.memory_space<vmem>>, %arg20: memref<1x256x128xbf16, #tpu.memory_space<vmem>>, %arg21: memref<1x1x128xf32, #tpu.memory_space<vmem>>, %arg22: memref<1x1x128xf32, #tpu.memory_space<vmem>>, %arg23: memref<1x1x128xf32, #tpu.memory_space<vmem>>, %arg24: memref<1x16x128xf32, #tpu.memory_space<vmem>>, %arg25: memref<16x128xf32, #tpu.memory_space<vmem>>) attributes {dimension_semantics = [#tpu.dimension_semantics<parallel>, #tpu.dimension_semantics<arbitrary>], iteration_bounds = array<i64: 2, 2>, scalar_prefetch = 0 : i64, scratch_operands = 1 : i64, tpu.core_type = #tpu.core_type<tc>, window_params = [{transform_indices = @transform_0, window_bounds = array<i64: 1, 16, 128>}, {transform_indices = @transform_1, window_bounds = array<i64: 1, 8, 128>}, {transform_indices = @transform_2, window_bounds = array<i64: 1, 128, 384>}, {transform_indices = @transform_3, window_bounds = array<i64: 1, 1, 384>}, {transform_indices = @transform_4, window_bounds = array<i64: 1, 128, 128>}, {transform_indices = @transform_5, window_bounds = array<i64: 1, 1, 128>}, {transform_indices = @transform_6, window_bounds = array<i64: 1, 1, 128>}, {transform_indices = @transform_7, window_bounds = array<i64: 1, 1, 128>}, {transform_indices = @transform_8, window_bounds = array<i64: 1, 128, 128>}, {transform_indices = @transform_9, window_bounds = array<i64: 1, 1, 128>}, {transform_indices = @transform_10, window_bounds = array<i64: 1, 128, 256>}, {transform_indices = @transform_11, window_bounds = array<i64: 1, 1, 256>}, {transform_indices = @transform_12, window_bounds = array<i64: 1, 128, 128>}, {transform_indices = @transform_13, window_bounds = array<i64: 1, 1, 128>}, {transform_indices = @transform_14, window_bounds = array<i64: 1, 1, 128>}, {transform_indices = @transform_15, window_bounds = array<i64: 1, 1, 128>}, {transform_indices = @transform_16, window_bounds = array<i64: 1, 128, 256>}, {transform_indices = @transform_17, window_bounds = array<i64: 1, 1, 256>}, {transform_indices = @transform_18, window_bounds = array<i64: 1, 256, 128>}, {transform_indices = @transform_19, window_bounds = array<i64: 1, 1, 128>}, {transform_indices = @transform_20, window_bounds = array<i64: 1, 1, 128>}, {transform_indices = @transform_21, window_bounds = array<i64: 1, 1, 128>}, {transform_indices = @transform_22, window_bounds = array<i64: 1, 16, 128>}]} {
    %c0_i32 = arith.constant 0 : i32
    %0 = arith.cmpi eq, %arg1, %c0_i32 : i32
    %1 = arith.extui %0 : i1 to i32
    %c0_i32_0 = arith.constant 0 : i32
    %2 = arith.cmpi ne, %1, %c0_i32_0 : i32
    scf.if %2 {
      %c0_124 = arith.constant 0 : index
      %c0_125 = arith.constant 0 : index
      %c0_126 = arith.constant 0 : index
      %306 = vector.load %arg2[%c0_124, %c0_125, %c0_126] : memref<1x16x128xf32, #tpu.memory_space<vmem>>, vector<1x16x128xf32>
      %307 = vector.shape_cast %306 : vector<1x16x128xf32> to vector<16x128xf32>
      %cst_127 = arith.constant 1.000000e+00 : f32
      %308 = vector.broadcast %cst_127 : f32 to vector<16x128xf32>
      %309 = arith.mulf %307, %308 : vector<16x128xf32>
      %c0_128 = arith.constant 0 : index
      %c0_129 = arith.constant 0 : index
      %310 = vector.load %arg25[%c0_128, %c0_129] : memref<16x128xf32, #tpu.memory_space<vmem>>, vector<16x128xf32>
      tpu.vector_store %arg25[%c0_128, %c0_129], %309 {strides = array<i32>} : memref<16x128xf32, #tpu.memory_space<vmem>>, vector<16x128xf32>,
    } else {
    }
    %c0 = arith.constant 0 : index
    %c0_1 = arith.constant 0 : index
    %3 = vector.load %arg25[%c0, %c0_1] : memref<16x128xf32, #tpu.memory_space<vmem>>, vector<16x128xf32>
    %c0_2 = arith.constant 0 : index
    %c0_3 = arith.constant 0 : index
    %c0_4 = arith.constant 0 : index
    %4 = vector.load %arg3[%c0_2, %c0_3, %c0_4] : memref<1x8x128xf32, #tpu.memory_space<vmem>>, vector<1x8x128xf32>
    %5 = vector.shape_cast %4 : vector<1x8x128xf32> to vector<8x128xf32>
    %6 = arith.truncf %3 : vector<16x128xf32> to vector<16x128xbf16>
    %c0_5 = arith.constant 0 : index
    %c0_6 = arith.constant 0 : index
    %c0_7 = arith.constant 0 : index
    %7 = vector.load %arg4[%c0_5, %c0_6, %c0_7] : memref<1x128x384xbf16, #tpu.memory_space<vmem>>, vector<1x128x384xbf16>
    %8 = vector.shape_cast %7 : vector<1x128x384xbf16> to vector<128x384xbf16>
    %cst = arith.constant dense<0.000000e+00> : vector<16x384xf32>
    %9 = tpu.matmul %6, %8, %cst {dimension_numbers = #tpu.dot_dimension_numbers<[1], [0], [0], [1], [0, 0, 1, 1], [], []>} : vector<16x128xbf16>, vector<128x384xbf16>, vector<16x384xf32> -> vector<16x384xf32>
    %c0_8 = arith.constant 0 : index
    %c0_9 = arith.constant 0 : index
    %c0_10 = arith.constant 0 : index
    %10 = vector.load %arg5[%c0_8, %c0_9, %c0_10] : memref<1x1x384xf32, #tpu.memory_space<vmem>>, vector<1x1x384xf32>
    %11 = vector.shape_cast %10 : vector<1x1x384xf32> to vector<1x384xf32>
    %12 = vector.broadcast %11 : vector<1x384xf32> to vector<16x384xf32>
    %13 = arith.addf %9, %12 : vector<16x384xf32>
    %14 = vector.extract_strided_slice %13 {offsets = [0, 0], sizes = [16, 128], strides = [1, 1]} : vector<16x384xf32> to vector<16x128xf32>
    %cst_11 = arith.constant 0.176776692 : f32
    %15 = vector.broadcast %cst_11 : f32 to vector<16x128xf32>
    %16 = arith.mulf %14, %15 : vector<16x128xf32>
    %17 = vector.extract_strided_slice %13 {offsets = [0, 128], sizes = [16, 128], strides = [1, 1]} : vector<16x384xf32> to vector<16x128xf32>
    %18 = vector.extract_strided_slice %13 {offsets = [0, 256], sizes = [16, 128], strides = [1, 1]} : vector<16x384xf32> to vector<16x128xf32>
    %c0_12 = arith.constant 0 : index
    %c0_13 = arith.constant 0 : index
    %c0_14 = arith.constant 0 : index
    %19 = vector.load %arg6[%c0_12, %c0_13, %c0_14] : memref<1x128x128xbf16, #tpu.memory_space<vmem>>, vector<1x128x128xbf16>
    %20 = vector.shape_cast %19 : vector<1x128x128xbf16> to vector<128x128xbf16>
    %c0_15 = arith.constant 0 : index
    %c0_16 = arith.constant 0 : index
    %c0_17 = arith.constant 0 : index
    %21 = vector.load %arg7[%c0_15, %c0_16, %c0_17] : memref<1x1x128xf32, #tpu.memory_space<vmem>>, vector<1x1x128xf32>
    %22 = vector.shape_cast %21 : vector<1x1x128xf32> to vector<1x128xf32>
    %23 = vector.extract_strided_slice %16 {offsets = [0, 0], sizes = [16, 32], strides = [1, 1]} : vector<16x128xf32> to vector<16x32xf32>
    %24 = arith.truncf %23 : vector<16x32xf32> to vector<16x32xbf16>
    %25 = vector.extract_strided_slice %17 {offsets = [0, 0], sizes = [16, 32], strides = [1, 1]} : vector<16x128xf32> to vector<16x32xf32>
    %26 = arith.truncf %25 : vector<16x32xf32> to vector<16x32xbf16>
    %27 = vector.extract_strided_slice %18 {offsets = [0, 0], sizes = [16, 32], strides = [1, 1]} : vector<16x128xf32> to vector<16x32xf32>
    %28 = arith.truncf %27 : vector<16x32xf32> to vector<16x32xbf16>
    %cst_18 = arith.constant dense<0.000000e+00> : vector<16x16xf32>
    %29 = tpu.matmul %24, %26, %cst_18 {dimension_numbers = #tpu.dot_dimension_numbers<[1], [1], [0], [0], [0, 0, 1, 0], [], []>} : vector<16x32xbf16>, vector<16x32xbf16>, vector<16x16xf32> -> vector<16x16xf32>
    %cst_19 = arith.constant dense<0xFF800000> : vector<16xf32>
    %30 = vector.multi_reduction <maximumf>, %29, %cst_19 [1] : vector<16x16xf32> to vector<16xf32>
    %31 = vector.shape_cast %30 : vector<16xf32> to vector<16x1xf32>
    %32 = vector.broadcast %31 : vector<16x1xf32> to vector<16x16xf32>
    %33 = arith.subf %29, %32 : vector<16x16xf32>
    %34 = math.exp %33 : vector<16x16xf32>
    %cst_20 = arith.constant dense<0.000000e+00> : vector<16xf32>
    %35 = vector.multi_reduction <add>, %34, %cst_20 [1] : vector<16x16xf32> to vector<16xf32>
    %36 = vector.shape_cast %35 : vector<16xf32> to vector<16x1xf32>
    %37 = tpu.reciprocal %36 {approx = true} : vector<16x1xf32> -> vector<16x1xf32>
    %38 = vector.broadcast %37 : vector<16x1xf32> to vector<16x16xf32>
    %39 = arith.mulf %34, %38 : vector<16x16xf32>
    %40 = arith.truncf %39 : vector<16x16xf32> to vector<16x16xbf16>
    %cst_21 = arith.constant dense<0.000000e+00> : vector<16x32xf32>
    %41 = tpu.matmul %40, %28, %cst_21 {dimension_numbers = #tpu.dot_dimension_numbers<[1], [0], [0], [1], [0, 0, 1, 1], [], []>} : vector<16x16xbf16>, vector<16x32xbf16>, vector<16x32xf32> -> vector<16x32xf32>
    %42 = vector.extract_strided_slice %16 {offsets = [0, 32], sizes = [16, 32], strides = [1, 1]} : vector<16x128xf32> to vector<16x32xf32>
    %43 = arith.truncf %42 : vector<16x32xf32> to vector<16x32xbf16>
    %44 = vector.extract_strided_slice %17 {offsets = [0, 32], sizes = [16, 32], strides = [1, 1]} : vector<16x128xf32> to vector<16x32xf32>
    %45 = arith.truncf %44 : vector<16x32xf32> to vector<16x32xbf16>
    %46 = vector.extract_strided_slice %18 {offsets = [0, 32], sizes = [16, 32], strides = [1, 1]} : vector<16x128xf32> to vector<16x32xf32>
    %47 = arith.truncf %46 : vector<16x32xf32> to vector<16x32xbf16>
    %cst_22 = arith.constant dense<0.000000e+00> : vector<16x16xf32>
    %48 = tpu.matmul %43, %45, %cst_22 {dimension_numbers = #tpu.dot_dimension_numbers<[1], [1], [0], [0], [0, 0, 1, 0], [], []>} : vector<16x32xbf16>, vector<16x32xbf16>, vector<16x16xf32> -> vector<16x16xf32>
    %cst_23 = arith.constant dense<0xFF800000> : vector<16xf32>
    %49 = vector.multi_reduction <maximumf>, %48, %cst_23 [1] : vector<16x16xf32> to vector<16xf32>
    %50 = vector.shape_cast %49 : vector<16xf32> to vector<16x1xf32>
    %51 = vector.broadcast %50 : vector<16x1xf32> to vector<16x16xf32>
    %52 = arith.subf %48, %51 : vector<16x16xf32>
    %53 = math.exp %52 : vector<16x16xf32>
    %cst_24 = arith.constant dense<0.000000e+00> : vector<16xf32>
    %54 = vector.multi_reduction <add>, %53, %cst_24 [1] : vector<16x16xf32> to vector<16xf32>
    %55 = vector.shape_cast %54 : vector<16xf32> to vector<16x1xf32>
    %56 = tpu.reciprocal %55 {approx = true} : vector<16x1xf32> -> vector<16x1xf32>
    %57 = vector.broadcast %56 : vector<16x1xf32> to vector<16x16xf32>
    %58 = arith.mulf %53, %57 : vector<16x16xf32>
    %59 = arith.truncf %58 : vector<16x16xf32> to vector<16x16xbf16>
    %cst_25 = arith.constant dense<0.000000e+00> : vector<16x32xf32>
    %60 = tpu.matmul %59, %47, %cst_25 {dimension_numbers = #tpu.dot_dimension_numbers<[1], [0], [0], [1], [0, 0, 1, 1], [], []>} : vector<16x16xbf16>, vector<16x32xbf16>, vector<16x32xf32> -> vector<16x32xf32>
    %61 = vector.extract_strided_slice %16 {offsets = [0, 64], sizes = [16, 32], strides = [1, 1]} : vector<16x128xf32> to vector<16x32xf32>
    %62 = arith.truncf %61 : vector<16x32xf32> to vector<16x32xbf16>
    %63 = vector.extract_strided_slice %17 {offsets = [0, 64], sizes = [16, 32], strides = [1, 1]} : vector<16x128xf32> to vector<16x32xf32>
    %64 = arith.truncf %63 : vector<16x32xf32> to vector<16x32xbf16>
    %65 = vector.extract_strided_slice %18 {offsets = [0, 64], sizes = [16, 32], strides = [1, 1]} : vector<16x128xf32> to vector<16x32xf32>
    %66 = arith.truncf %65 : vector<16x32xf32> to vector<16x32xbf16>
    %cst_26 = arith.constant dense<0.000000e+00> : vector<16x16xf32>
    %67 = tpu.matmul %62, %64, %cst_26 {dimension_numbers = #tpu.dot_dimension_numbers<[1], [1], [0], [0], [0, 0, 1, 0], [], []>} : vector<16x32xbf16>, vector<16x32xbf16>, vector<16x16xf32> -> vector<16x16xf32>
    %cst_27 = arith.constant dense<0xFF800000> : vector<16xf32>
    %68 = vector.multi_reduction <maximumf>, %67, %cst_27 [1] : vector<16x16xf32> to vector<16xf32>
    %69 = vector.shape_cast %68 : vector<16xf32> to vector<16x1xf32>
    %70 = vector.broadcast %69 : vector<16x1xf32> to vector<16x16xf32>
    %71 = arith.subf %67, %70 : vector<16x16xf32>
    %72 = math.exp %71 : vector<16x16xf32>
    %cst_28 = arith.constant dense<0.000000e+00> : vector<16xf32>
    %73 = vector.multi_reduction <add>, %72, %cst_28 [1] : vector<16x16xf32> to vector<16xf32>
    %74 = vector.shape_cast %73 : vector<16xf32> to vector<16x1xf32>
    %75 = tpu.reciprocal %74 {approx = true} : vector<16x1xf32> -> vector<16x1xf32>
    %76 = vector.broadcast %75 : vector<16x1xf32> to vector<16x16xf32>
    %77 = arith.mulf %72, %76 : vector<16x16xf32>
    %78 = arith.truncf %77 : vector<16x16xf32> to vector<16x16xbf16>
    %cst_29 = arith.constant dense<0.000000e+00> : vector<16x32xf32>
    %79 = tpu.matmul %78, %66, %cst_29 {dimension_numbers = #tpu.dot_dimension_numbers<[1], [0], [0], [1], [0, 0, 1, 1], [], []>} : vector<16x16xbf16>, vector<16x32xbf16>, vector<16x32xf32> -> vector<16x32xf32>
    %80 = vector.extract_strided_slice %16 {offsets = [0, 96], sizes = [16, 32], strides = [1, 1]} : vector<16x128xf32> to vector<16x32xf32>
    %81 = arith.truncf %80 : vector<16x32xf32> to vector<16x32xbf16>
    %82 = vector.extract_strided_slice %17 {offsets = [0, 96], sizes = [16, 32], strides = [1, 1]} : vector<16x128xf32> to vector<16x32xf32>
    %83 = arith.truncf %82 : vector<16x32xf32> to vector<16x32xbf16>
    %84 = vector.extract_strided_slice %18 {offsets = [0, 96], sizes = [16, 32], strides = [1, 1]} : vector<16x128xf32> to vector<16x32xf32>
    %85 = arith.truncf %84 : vector<16x32xf32> to vector<16x32xbf16>
    %cst_30 = arith.constant dense<0.000000e+00> : vector<16x16xf32>
    %86 = tpu.matmul %81, %83, %cst_30 {dimension_numbers = #tpu.dot_dimension_numbers<[1], [1], [0], [0], [0, 0, 1, 0], [], []>} : vector<16x32xbf16>, vector<16x32xbf16>, vector<16x16xf32> -> vector<16x16xf32>
    %cst_31 = arith.constant dense<0xFF800000> : vector<16xf32>
    %87 = vector.multi_reduction <maximumf>, %86, %cst_31 [1] : vector<16x16xf32> to vector<16xf32>
    %88 = vector.shape_cast %87 : vector<16xf32> to vector<16x1xf32>
    %89 = vector.broadcast %88 : vector<16x1xf32> to vector<16x16xf32>
    %90 = arith.subf %86, %89 : vector<16x16xf32>
    %91 = math.exp %90 : vector<16x16xf32>
    %cst_32 = arith.constant dense<0.000000e+00> : vector<16xf32>
    %92 = vector.multi_reduction <add>, %91, %cst_32 [1] : vector<16x16xf32> to vector<16xf32>
    %93 = vector.shape_cast %92 : vector<16xf32> to vector<16x1xf32>
    %94 = tpu.reciprocal %93 {approx = true} : vector<16x1xf32> -> vector<16x1xf32>
    %95 = vector.broadcast %94 : vector<16x1xf32> to vector<16x16xf32>
    %96 = arith.mulf %91, %95 : vector<16x16xf32>
    %97 = arith.truncf %96 : vector<16x16xf32> to vector<16x16xbf16>
    %cst_33 = arith.constant dense<0.000000e+00> : vector<16x32xf32>
    %98 = tpu.matmul %97, %85, %cst_33 {dimension_numbers = #tpu.dot_dimension_numbers<[1], [0], [0], [1], [0, 0, 1, 1], [], []>} : vector<16x16xbf16>, vector<16x32xbf16>, vector<16x32xf32> -> vector<16x32xf32>
    %99 = tpu.concatenate %41, %60, %79, %98 in 1 : vector<16x32xf32>, vector<16x32xf32>, vector<16x32xf32>, vector<16x32xf32> -> vector<16x128xf32>
    %100 = arith.truncf %99 : vector<16x128xf32> to vector<16x128xbf16>
    %cst_34 = arith.constant dense<0.000000e+00> : vector<16x128xf32>
    %101 = tpu.matmul %100, %20, %cst_34 {dimension_numbers = #tpu.dot_dimension_numbers<[1], [0], [0], [1], [0, 0, 1, 1], [], []>} : vector<16x128xbf16>, vector<128x128xbf16>, vector<16x128xf32> -> vector<16x128xf32>
    %102 = vector.broadcast %22 : vector<1x128xf32> to vector<16x128xf32>
    %103 = arith.addf %101, %102 : vector<16x128xf32>
    %104 = arith.addf %3, %103 : vector<16x128xf32>
    %c0_35 = arith.constant 0 : index
    %c0_36 = arith.constant 0 : index
    %c0_37 = arith.constant 0 : index
    %105 = vector.load %arg8[%c0_35, %c0_36, %c0_37] : memref<1x1x128xf32, #tpu.memory_space<vmem>>, vector<1x1x128xf32>
    %106 = vector.shape_cast %105 : vector<1x1x128xf32> to vector<1x128xf32>
    %c0_38 = arith.constant 0 : index
    %c0_39 = arith.constant 0 : index
    %c0_40 = arith.constant 0 : index
    %107 = vector.load %arg9[%c0_38, %c0_39, %c0_40] : memref<1x1x128xf32, #tpu.memory_space<vmem>>, vector<1x1x128xf32>
    %108 = vector.shape_cast %107 : vector<1x1x128xf32> to vector<1x128xf32>
    %cst_41 = arith.constant dense<0.000000e+00> : vector<16xf32>
    %109 = vector.multi_reduction <add>, %104, %cst_41 [1] : vector<16x128xf32> to vector<16xf32>
    %110 = vector.shape_cast %109 : vector<16xf32> to vector<16x1xf32>
    %cst_42 = arith.constant 1.280000e+02 : f32
    %111 = vector.broadcast %cst_42 : f32 to vector<16x1xf32>
    %112 = arith.divf %110, %111 : vector<16x1xf32>
    %113 = vector.broadcast %112 : vector<16x1xf32> to vector<16x128xf32>
    %114 = arith.subf %104, %113 : vector<16x128xf32>
    %115 = arith.mulf %114, %114 : vector<16x128xf32>
    %cst_43 = arith.constant dense<0.000000e+00> : vector<16xf32>
    %116 = vector.multi_reduction <add>, %115, %cst_43 [1] : vector<16x128xf32> to vector<16xf32>
    %117 = vector.shape_cast %116 : vector<16xf32> to vector<16x1xf32>
    %cst_44 = arith.constant 1.280000e+02 : f32
    %118 = vector.broadcast %cst_44 : f32 to vector<16x1xf32>
    %119 = arith.divf %117, %118 : vector<16x1xf32>
    %cst_45 = arith.constant 9.99999974E-6 : f32
    %120 = vector.broadcast %cst_45 : f32 to vector<16x1xf32>
    %121 = arith.addf %119, %120 : vector<16x1xf32>
    %122 = math.rsqrt %121 : vector<16x1xf32>
    %123 = vector.broadcast %122 : vector<16x1xf32> to vector<16x128xf32>
    %124 = arith.mulf %114, %123 : vector<16x128xf32>
    %125 = vector.broadcast %106 : vector<1x128xf32> to vector<16x128xf32>
    %126 = arith.mulf %124, %125 : vector<16x128xf32>
    %127 = vector.broadcast %108 : vector<1x128xf32> to vector<16x128xf32>
    %128 = arith.addf %126, %127 : vector<16x128xf32>
    %129 = arith.truncf %128 : vector<16x128xf32> to vector<16x128xbf16>
    %c0_46 = arith.constant 0 : index
    %c0_47 = arith.constant 0 : index
    %c0_48 = arith.constant 0 : index
    %130 = vector.load %arg10[%c0_46, %c0_47, %c0_48] : memref<1x128x128xbf16, #tpu.memory_space<vmem>>, vector<1x128x128xbf16>
    %131 = vector.shape_cast %130 : vector<1x128x128xbf16> to vector<128x128xbf16>
    %cst_49 = arith.constant dense<0.000000e+00> : vector<16x128xf32>
    %132 = tpu.matmul %129, %131, %cst_49 {dimension_numbers = #tpu.dot_dimension_numbers<[1], [0], [0], [1], [0, 0, 1, 1], [], []>} : vector<16x128xbf16>, vector<128x128xbf16>, vector<16x128xf32> -> vector<16x128xf32>
    %c0_50 = arith.constant 0 : index
    %c0_51 = arith.constant 0 : index
    %c0_52 = arith.constant 0 : index
    %133 = vector.load %arg11[%c0_50, %c0_51, %c0_52] : memref<1x1x128xf32, #tpu.memory_space<vmem>>, vector<1x1x128xf32>
    %134 = vector.shape_cast %133 : vector<1x1x128xf32> to vector<1x128xf32>
    %135 = vector.broadcast %134 : vector<1x128xf32> to vector<16x128xf32>
    %136 = arith.addf %132, %135 : vector<16x128xf32>
    %cst_53 = arith.constant 0.176776692 : f32
    %137 = vector.broadcast %cst_53 : f32 to vector<16x128xf32>
    %138 = arith.mulf %136, %137 : vector<16x128xf32>
    %139 = arith.truncf %5 : vector<8x128xf32> to vector<8x128xbf16>
    %c0_54 = arith.constant 0 : index
    %c0_55 = arith.constant 0 : index
    %c0_56 = arith.constant 0 : index
    %140 = vector.load %arg12[%c0_54, %c0_55, %c0_56] : memref<1x128x256xbf16, #tpu.memory_space<vmem>>, vector<1x128x256xbf16>
    %141 = vector.shape_cast %140 : vector<1x128x256xbf16> to vector<128x256xbf16>
    %cst_57 = arith.constant dense<0.000000e+00> : vector<8x256xf32>
    %142 = tpu.matmul %139, %141, %cst_57 {dimension_numbers = #tpu.dot_dimension_numbers<[1], [0], [0], [1], [0, 0, 1, 1], [], []>} : vector<8x128xbf16>, vector<128x256xbf16>, vector<8x256xf32> -> vector<8x256xf32>
    %c0_58 = arith.constant 0 : index
    %c0_59 = arith.constant 0 : index
    %c0_60 = arith.constant 0 : index
    %143 = vector.load %arg13[%c0_58, %c0_59, %c0_60] : memref<1x1x256xf32, #tpu.memory_space<vmem>>, vector<1x1x256xf32>
    %144 = vector.shape_cast %143 : vector<1x1x256xf32> to vector<1x256xf32>
    %145 = vector.broadcast %144 : vector<1x256xf32> to vector<8x256xf32>
    %146 = arith.addf %142, %145 : vector<8x256xf32>
    %147 = vector.extract_strided_slice %146 {offsets = [0, 0], sizes = [8, 128], strides = [1, 1]} : vector<8x256xf32> to vector<8x128xf32>
    %148 = vector.extract_strided_slice %146 {offsets = [0, 128], sizes = [8, 128], strides = [1, 1]} : vector<8x256xf32> to vector<8x128xf32>
    %c0_61 = arith.constant 0 : index
    %c0_62 = arith.constant 0 : index
    %c0_63 = arith.constant 0 : index
    %149 = vector.load %arg14[%c0_61, %c0_62, %c0_63] : memref<1x128x128xbf16, #tpu.memory_space<vmem>>, vector<1x128x128xbf16>
    %150 = vector.shape_cast %149 : vector<1x128x128xbf16> to vector<128x128xbf16>
    %c0_64 = arith.constant 0 : index
    %c0_65 = arith.constant 0 : index
    %c0_66 = arith.constant 0 : index
    %151 = vector.load %arg15[%c0_64, %c0_65, %c0_66] : memref<1x1x128xf32, #tpu.memory_space<vmem>>, vector<1x1x128xf32>
    %152 = vector.shape_cast %151 : vector<1x1x128xf32> to vector<1x128xf32>
    %153 = vector.extract_strided_slice %138 {offsets = [0, 0], sizes = [16, 32], strides = [1, 1]} : vector<16x128xf32> to vector<16x32xf32>
    %154 = arith.truncf %153 : vector<16x32xf32> to vector<16x32xbf16>
    %155 = vector.extract_strided_slice %147 {offsets = [0, 0], sizes = [8, 32], strides = [1, 1]} : vector<8x128xf32> to vector<8x32xf32>
    %156 = arith.truncf %155 : vector<8x32xf32> to vector<8x32xbf16>
    %157 = vector.extract_strided_slice %148 {offsets = [0, 0], sizes = [8, 32], strides = [1, 1]} : vector<8x128xf32> to vector<8x32xf32>
    %158 = arith.truncf %157 : vector<8x32xf32> to vector<8x32xbf16>
    %cst_67 = arith.constant dense<0.000000e+00> : vector<16x8xf32>
    %159 = tpu.matmul %154, %156, %cst_67 {dimension_numbers = #tpu.dot_dimension_numbers<[1], [1], [0], [0], [0, 0, 1, 0], [], []>} : vector<16x32xbf16>, vector<8x32xbf16>, vector<16x8xf32> -> vector<16x8xf32>
    %cst_68 = arith.constant dense<0xFF800000> : vector<16xf32>
    %160 = vector.multi_reduction <maximumf>, %159, %cst_68 [1] : vector<16x8xf32> to vector<16xf32>
    %161 = vector.shape_cast %160 : vector<16xf32> to vector<16x1xf32>
    %162 = vector.broadcast %161 : vector<16x1xf32> to vector<16x8xf32>
    %163 = arith.subf %159, %162 : vector<16x8xf32>
    %164 = math.exp %163 : vector<16x8xf32>
    %cst_69 = arith.constant dense<0.000000e+00> : vector<16xf32>
    %165 = vector.multi_reduction <add>, %164, %cst_69 [1] : vector<16x8xf32> to vector<16xf32>
    %166 = vector.shape_cast %165 : vector<16xf32> to vector<16x1xf32>
    %167 = tpu.reciprocal %166 {approx = true} : vector<16x1xf32> -> vector<16x1xf32>
    %168 = vector.broadcast %167 : vector<16x1xf32> to vector<16x8xf32>
    %169 = arith.mulf %164, %168 : vector<16x8xf32>
    %170 = arith.truncf %169 : vector<16x8xf32> to vector<16x8xbf16>
    %cst_70 = arith.constant dense<0.000000e+00> : vector<16x32xf32>
    %171 = tpu.matmul %170, %158, %cst_70 {dimension_numbers = #tpu.dot_dimension_numbers<[1], [0], [0], [1], [0, 0, 1, 1], [], []>} : vector<16x8xbf16>, vector<8x32xbf16>, vector<16x32xf32> -> vector<16x32xf32>
    %172 = vector.extract_strided_slice %138 {offsets = [0, 32], sizes = [16, 32], strides = [1, 1]} : vector<16x128xf32> to vector<16x32xf32>
    %173 = arith.truncf %172 : vector<16x32xf32> to vector<16x32xbf16>
    %174 = vector.extract_strided_slice %147 {offsets = [0, 32], sizes = [8, 32], strides = [1, 1]} : vector<8x128xf32> to vector<8x32xf32>
    %175 = arith.truncf %174 : vector<8x32xf32> to vector<8x32xbf16>
    %176 = vector.extract_strided_slice %148 {offsets = [0, 32], sizes = [8, 32], strides = [1, 1]} : vector<8x128xf32> to vector<8x32xf32>
    %177 = arith.truncf %176 : vector<8x32xf32> to vector<8x32xbf16>
    %cst_71 = arith.constant dense<0.000000e+00> : vector<16x8xf32>
    %178 = tpu.matmul %173, %175, %cst_71 {dimension_numbers = #tpu.dot_dimension_numbers<[1], [1], [0], [0], [0, 0, 1, 0], [], []>} : vector<16x32xbf16>, vector<8x32xbf16>, vector<16x8xf32> -> vector<16x8xf32>
    %cst_72 = arith.constant dense<0xFF800000> : vector<16xf32>
    %179 = vector.multi_reduction <maximumf>, %178, %cst_72 [1] : vector<16x8xf32> to vector<16xf32>
    %180 = vector.shape_cast %179 : vector<16xf32> to vector<16x1xf32>
    %181 = vector.broadcast %180 : vector<16x1xf32> to vector<16x8xf32>
    %182 = arith.subf %178, %181 : vector<16x8xf32>
    %183 = math.exp %182 : vector<16x8xf32>
    %cst_73 = arith.constant dense<0.000000e+00> : vector<16xf32>
    %184 = vector.multi_reduction <add>, %183, %cst_73 [1] : vector<16x8xf32> to vector<16xf32>
    %185 = vector.shape_cast %184 : vector<16xf32> to vector<16x1xf32>
    %186 = tpu.reciprocal %185 {approx = true} : vector<16x1xf32> -> vector<16x1xf32>
    %187 = vector.broadcast %186 : vector<16x1xf32> to vector<16x8xf32>
    %188 = arith.mulf %183, %187 : vector<16x8xf32>
    %189 = arith.truncf %188 : vector<16x8xf32> to vector<16x8xbf16>
    %cst_74 = arith.constant dense<0.000000e+00> : vector<16x32xf32>
    %190 = tpu.matmul %189, %177, %cst_74 {dimension_numbers = #tpu.dot_dimension_numbers<[1], [0], [0], [1], [0, 0, 1, 1], [], []>} : vector<16x8xbf16>, vector<8x32xbf16>, vector<16x32xf32> -> vector<16x32xf32>
    %191 = vector.extract_strided_slice %138 {offsets = [0, 64], sizes = [16, 32], strides = [1, 1]} : vector<16x128xf32> to vector<16x32xf32>
    %192 = arith.truncf %191 : vector<16x32xf32> to vector<16x32xbf16>
    %193 = vector.extract_strided_slice %147 {offsets = [0, 64], sizes = [8, 32], strides = [1, 1]} : vector<8x128xf32> to vector<8x32xf32>
    %194 = arith.truncf %193 : vector<8x32xf32> to vector<8x32xbf16>
    %195 = vector.extract_strided_slice %148 {offsets = [0, 64], sizes = [8, 32], strides = [1, 1]} : vector<8x128xf32> to vector<8x32xf32>
    %196 = arith.truncf %195 : vector<8x32xf32> to vector<8x32xbf16>
    %cst_75 = arith.constant dense<0.000000e+00> : vector<16x8xf32>
    %197 = tpu.matmul %192, %194, %cst_75 {dimension_numbers = #tpu.dot_dimension_numbers<[1], [1], [0], [0], [0, 0, 1, 0], [], []>} : vector<16x32xbf16>, vector<8x32xbf16>, vector<16x8xf32> -> vector<16x8xf32>
    %cst_76 = arith.constant dense<0xFF800000> : vector<16xf32>
    %198 = vector.multi_reduction <maximumf>, %197, %cst_76 [1] : vector<16x8xf32> to vector<16xf32>
    %199 = vector.shape_cast %198 : vector<16xf32> to vector<16x1xf32>
    %200 = vector.broadcast %199 : vector<16x1xf32> to vector<16x8xf32>
    %201 = arith.subf %197, %200 : vector<16x8xf32>
    %202 = math.exp %201 : vector<16x8xf32>
    %cst_77 = arith.constant dense<0.000000e+00> : vector<16xf32>
    %203 = vector.multi_reduction <add>, %202, %cst_77 [1] : vector<16x8xf32> to vector<16xf32>
    %204 = vector.shape_cast %203 : vector<16xf32> to vector<16x1xf32>
    %205 = tpu.reciprocal %204 {approx = true} : vector<16x1xf32> -> vector<16x1xf32>
    %206 = vector.broadcast %205 : vector<16x1xf32> to vector<16x8xf32>
    %207 = arith.mulf %202, %206 : vector<16x8xf32>
    %208 = arith.truncf %207 : vector<16x8xf32> to vector<16x8xbf16>
    %cst_78 = arith.constant dense<0.000000e+00> : vector<16x32xf32>
    %209 = tpu.matmul %208, %196, %cst_78 {dimension_numbers = #tpu.dot_dimension_numbers<[1], [0], [0], [1], [0, 0, 1, 1], [], []>} : vector<16x8xbf16>, vector<8x32xbf16>, vector<16x32xf32> -> vector<16x32xf32>
    %210 = vector.extract_strided_slice %138 {offsets = [0, 96], sizes = [16, 32], strides = [1, 1]} : vector<16x128xf32> to vector<16x32xf32>
    %211 = arith.truncf %210 : vector<16x32xf32> to vector<16x32xbf16>
    %212 = vector.extract_strided_slice %147 {offsets = [0, 96], sizes = [8, 32], strides = [1, 1]} : vector<8x128xf32> to vector<8x32xf32>
    %213 = arith.truncf %212 : vector<8x32xf32> to vector<8x32xbf16>
    %214 = vector.extract_strided_slice %148 {offsets = [0, 96], sizes = [8, 32], strides = [1, 1]} : vector<8x128xf32> to vector<8x32xf32>
    %215 = arith.truncf %214 : vector<8x32xf32> to vector<8x32xbf16>
    %cst_79 = arith.constant dense<0.000000e+00> : vector<16x8xf32>
    %216 = tpu.matmul %211, %213, %cst_79 {dimension_numbers = #tpu.dot_dimension_numbers<[1], [1], [0], [0], [0, 0, 1, 0], [], []>} : vector<16x32xbf16>, vector<8x32xbf16>, vector<16x8xf32> -> vector<16x8xf32>
    %cst_80 = arith.constant dense<0xFF800000> : vector<16xf32>
    %217 = vector.multi_reduction <maximumf>, %216, %cst_80 [1] : vector<16x8xf32> to vector<16xf32>
    %218 = vector.shape_cast %217 : vector<16xf32> to vector<16x1xf32>
    %219 = vector.broadcast %218 : vector<16x1xf32> to vector<16x8xf32>
    %220 = arith.subf %216, %219 : vector<16x8xf32>
    %221 = math.exp %220 : vector<16x8xf32>
    %cst_81 = arith.constant dense<0.000000e+00> : vector<16xf32>
    %222 = vector.multi_reduction <add>, %221, %cst_81 [1] : vector<16x8xf32> to vector<16xf32>
    %223 = vector.shape_cast %222 : vector<16xf32> to vector<16x1xf32>
    %224 = tpu.reciprocal %223 {approx = true} : vector<16x1xf32> -> vector<16x1xf32>
    %225 = vector.broadcast %224 : vector<16x1xf32> to vector<16x8xf32>
    %226 = arith.mulf %221, %225 : vector<16x8xf32>
    %227 = arith.truncf %226 : vector<16x8xf32> to vector<16x8xbf16>
    %cst_82 = arith.constant dense<0.000000e+00> : vector<16x32xf32>
    %228 = tpu.matmul %227, %215, %cst_82 {dimension_numbers = #tpu.dot_dimension_numbers<[1], [0], [0], [1], [0, 0, 1, 1], [], []>} : vector<16x8xbf16>, vector<8x32xbf16>, vector<16x32xf32> -> vector<16x32xf32>
    %229 = tpu.concatenate %171, %190, %209, %228 in 1 : vector<16x32xf32>, vector<16x32xf32>, vector<16x32xf32>, vector<16x32xf32> -> vector<16x128xf32>
    %230 = arith.truncf %229 : vector<16x128xf32> to vector<16x128xbf16>
    %cst_83 = arith.constant dense<0.000000e+00> : vector<16x128xf32>
    %231 = tpu.matmul %230, %150, %cst_83 {dimension_numbers = #tpu.dot_dimension_numbers<[1], [0], [0], [1], [0, 0, 1, 1], [], []>} : vector<16x128xbf16>, vector<128x128xbf16>, vector<16x128xf32> -> vector<16x128xf32>
    %232 = vector.broadcast %152 : vector<1x128xf32> to vector<16x128xf32>
    %233 = arith.addf %231, %232 : vector<16x128xf32>
    %234 = arith.addf %128, %233 : vector<16x128xf32>
    %c0_84 = arith.constant 0 : index
    %c0_85 = arith.constant 0 : index
    %c0_86 = arith.constant 0 : index
    %235 = vector.load %arg16[%c0_84, %c0_85, %c0_86] : memref<1x1x128xf32, #tpu.memory_space<vmem>>, vector<1x1x128xf32>
    %236 = vector.shape_cast %235 : vector<1x1x128xf32> to vector<1x128xf32>
    %c0_87 = arith.constant 0 : index
    %c0_88 = arith.constant 0 : index
    %c0_89 = arith.constant 0 : index
    %237 = vector.load %arg17[%c0_87, %c0_88, %c0_89] : memref<1x1x128xf32, #tpu.memory_space<vmem>>, vector<1x1x128xf32>
    %238 = vector.shape_cast %237 : vector<1x1x128xf32> to vector<1x128xf32>
    %cst_90 = arith.constant dense<0.000000e+00> : vector<16xf32>
    %239 = vector.multi_reduction <add>, %234, %cst_90 [1] : vector<16x128xf32> to vector<16xf32>
    %240 = vector.shape_cast %239 : vector<16xf32> to vector<16x1xf32>
    %cst_91 = arith.constant 1.280000e+02 : f32
    %241 = vector.broadcast %cst_91 : f32 to vector<16x1xf32>
    %242 = arith.divf %240, %241 : vector<16x1xf32>
    %243 = vector.broadcast %242 : vector<16x1xf32> to vector<16x128xf32>
    %244 = arith.subf %234, %243 : vector<16x128xf32>
    %245 = arith.mulf %244, %244 : vector<16x128xf32>
    %cst_92 = arith.constant dense<0.000000e+00> : vector<16xf32>
    %246 = vector.multi_reduction <add>, %245, %cst_92 [1] : vector<16x128xf32> to vector<16xf32>
    %247 = vector.shape_cast %246 : vector<16xf32> to vector<16x1xf32>
    %cst_93 = arith.constant 1.280000e+02 : f32
    %248 = vector.broadcast %cst_93 : f32 to vector<16x1xf32>
    %249 = arith.divf %247, %248 : vector<16x1xf32>
    %cst_94 = arith.constant 9.99999974E-6 : f32
    %250 = vector.broadcast %cst_94 : f32 to vector<16x1xf32>
    %251 = arith.addf %249, %250 : vector<16x1xf32>
    %252 = math.rsqrt %251 : vector<16x1xf32>
    %253 = vector.broadcast %252 : vector<16x1xf32> to vector<16x128xf32>
    %254 = arith.mulf %244, %253 : vector<16x128xf32>
    %255 = vector.broadcast %236 : vector<1x128xf32> to vector<16x128xf32>
    %256 = arith.mulf %254, %255 : vector<16x128xf32>
    %257 = vector.broadcast %238 : vector<1x128xf32> to vector<16x128xf32>
    %258 = arith.addf %256, %257 : vector<16x128xf32>
    %259 = arith.truncf %258 : vector<16x128xf32> to vector<16x128xbf16>
    %c0_95 = arith.constant 0 : index
    %c0_96 = arith.constant 0 : index
    %c0_97 = arith.constant 0 : index
    %260 = vector.load %arg18[%c0_95, %c0_96, %c0_97] : memref<1x128x256xbf16, #tpu.memory_space<vmem>>, vector<1x128x256xbf16>
    %261 = vector.shape_cast %260 : vector<1x128x256xbf16> to vector<128x256xbf16>
    %cst_98 = arith.constant dense<0.000000e+00> : vector<16x256xf32>
    %262 = tpu.matmul %259, %261, %cst_98 {dimension_numbers = #tpu.dot_dimension_numbers<[1], [0], [0], [1], [0, 0, 1, 1], [], []>} : vector<16x128xbf16>, vector<128x256xbf16>, vector<16x256xf32> -> vector<16x256xf32>
    %c0_99 = arith.constant 0 : index
    %c0_100 = arith.constant 0 : index
    %c0_101 = arith.constant 0 : index
    %263 = vector.load %arg19[%c0_99, %c0_100, %c0_101] : memref<1x1x256xf32, #tpu.memory_space<vmem>>, vector<1x1x256xf32>
    %264 = vector.shape_cast %263 : vector<1x1x256xf32> to vector<1x256xf32>
    %265 = vector.broadcast %264 : vector<1x256xf32> to vector<16x256xf32>
    %266 = arith.addf %262, %265 : vector<16x256xf32>
    %cst_102 = arith.constant 0.000000e+00 : f32
    %267 = vector.broadcast %cst_102 : f32 to vector<16x256xf32>
    %268 = arith.maximumf %266, %267 : vector<16x256xf32>
    %269 = arith.truncf %268 : vector<16x256xf32> to vector<16x256xbf16>
    %c0_103 = arith.constant 0 : index
    %c0_104 = arith.constant 0 : index
    %c0_105 = arith.constant 0 : index
    %270 = vector.load %arg20[%c0_103, %c0_104, %c0_105] : memref<1x256x128xbf16, #tpu.memory_space<vmem>>, vector<1x256x128xbf16>
    %271 = vector.shape_cast %270 : vector<1x256x128xbf16> to vector<256x128xbf16>
    %cst_106 = arith.constant dense<0.000000e+00> : vector<16x128xf32>
    %272 = tpu.matmul %269, %271, %cst_106 {dimension_numbers = #tpu.dot_dimension_numbers<[1], [0], [0], [1], [0, 0, 1, 1], [], []>} : vector<16x256xbf16>, vector<256x128xbf16>, vector<16x128xf32> -> vector<16x128xf32>
    %c0_107 = arith.constant 0 : index
    %c0_108 = arith.constant 0 : index
    %c0_109 = arith.constant 0 : index
    %273 = vector.load %arg21[%c0_107, %c0_108, %c0_109] : memref<1x1x128xf32, #tpu.memory_space<vmem>>, vector<1x1x128xf32>
    %274 = vector.shape_cast %273 : vector<1x1x128xf32> to vector<1x128xf32>
    %275 = vector.broadcast %274 : vector<1x128xf32> to vector<16x128xf32>
    %276 = arith.addf %272, %275 : vector<16x128xf32>
    %277 = arith.addf %258, %276 : vector<16x128xf32>
    %c0_110 = arith.constant 0 : index
    %c0_111 = arith.constant 0 : index
    %c0_112 = arith.constant 0 : index
    %278 = vector.load %arg22[%c0_110, %c0_111, %c0_112] : memref<1x1x128xf32, #tpu.memory_space<vmem>>, vector<1x1x128xf32>
    %279 = vector.shape_cast %278 : vector<1x1x128xf32> to vector<1x128xf32>
    %c0_113 = arith.constant 0 : index
    %c0_114 = arith.constant 0 : index
    %c0_115 = arith.constant 0 : index
    %280 = vector.load %arg23[%c0_113, %c0_114, %c0_115] : memref<1x1x128xf32, #tpu.memory_space<vmem>>, vector<1x1x128xf32>
    %281 = vector.shape_cast %280 : vector<1x1x128xf32> to vector<1x128xf32>
    %cst_116 = arith.constant dense<0.000000e+00> : vector<16xf32>
    %282 = vector.multi_reduction <add>, %277, %cst_116 [1] : vector<16x128xf32> to vector<16xf32>
    %283 = vector.shape_cast %282 : vector<16xf32> to vector<16x1xf32>
    %cst_117 = arith.constant 1.280000e+02 : f32
    %284 = vector.broadcast %cst_117 : f32 to vector<16x1xf32>
    %285 = arith.divf %283, %284 : vector<16x1xf32>
    %286 = vector.broadcast %285 : vector<16x1xf32> to vector<16x128xf32>
    %287 = arith.subf %277, %286 : vector<16x128xf32>
    %288 = arith.mulf %287, %287 : vector<16x128xf32>
    %cst_118 = arith.constant dense<0.000000e+00> : vector<16xf32>
    %289 = vector.multi_reduction <add>, %288, %cst_118 [1] : vector<16x128xf32> to vector<16xf32>
    %290 = vector.shape_cast %289 : vector<16xf32> to vector<16x1xf32>
    %cst_119 = arith.constant 1.280000e+02 : f32
    %291 = vector.broadcast %cst_119 : f32 to vector<16x1xf32>
    %292 = arith.divf %290, %291 : vector<16x1xf32>
    %cst_120 = arith.constant 9.99999974E-6 : f32
    %293 = vector.broadcast %cst_120 : f32 to vector<16x1xf32>
    %294 = arith.addf %292, %293 : vector<16x1xf32>
    %295 = math.rsqrt %294 : vector<16x1xf32>
    %296 = vector.broadcast %295 : vector<16x1xf32> to vector<16x128xf32>
    %297 = arith.mulf %287, %296 : vector<16x128xf32>
    %298 = vector.broadcast %279 : vector<1x128xf32> to vector<16x128xf32>
    %299 = arith.mulf %297, %298 : vector<16x128xf32>
    %300 = vector.broadcast %281 : vector<1x128xf32> to vector<16x128xf32>
    %301 = arith.addf %299, %300 : vector<16x128xf32>
    %c0_121 = arith.constant 0 : index
    %c0_122 = arith.constant 0 : index
    %302 = vector.load %arg25[%c0_121, %c0_122] : memref<16x128xf32, #tpu.memory_space<vmem>>, vector<16x128xf32>
    tpu.vector_store %arg25[%c0_121, %c0_122], %301 {strides = array<i32>} : memref<16x128xf32, #tpu.memory_space<vmem>>, vector<16x128xf32>,
    %c1_i32 = arith.constant 1 : i32
    %303 = arith.cmpi eq, %arg1, %c1_i32 : i32
    %304 = arith.extui %303 : i1 to i32
    %c0_i32_123 = arith.constant 0 : i32
    %305 = arith.cmpi ne, %304, %c0_i32_123 : i32
    scf.if %305 {
      %c0_124 = arith.constant 0 : index
      %c0_125 = arith.constant 0 : index
      %c0_126 = arith.constant 0 : index
      %306 = vector.load %arg24[%c0_124, %c0_125, %c0_126] : memref<1x16x128xf32, #tpu.memory_space<vmem>>, vector<1x16x128xf32>
      %307 = vector.shape_cast %306 : vector<1x16x128xf32> to vector<16x128xf32>
      %308 = vector.shape_cast %301 : vector<16x128xf32> to vector<1x16x128xf32>
      tpu.vector_store %arg24[%c0_124, %c0_125, %c0_126], %308 {strides = array<i32>} : memref<1x16x128xf32, #tpu.memory_space<vmem>>, vector<1x16x128xf32>,
    } else {
    }
    return
  }
  func.func @transform_0(%arg0: i32, %arg1: i32) -> (i32, i32, i32) {
    %c0_i32 = arith.constant 0 : i32
    %c0_i32_0 = arith.constant 0 : i32
    %c0_i32_1 = arith.constant 0 : i32
    return %arg0, %c0_i32, %c0_i32_0 : i32, i32, i32
  }
  func.func @transform_1(%arg0: i32, %arg1: i32) -> (i32, i32, i32) {
    %c0_i32 = arith.constant 0 : i32
    %c0_i32_0 = arith.constant 0 : i32
    %c0_i32_1 = arith.constant 0 : i32
    return %arg0, %c0_i32, %c0_i32_0 : i32, i32, i32
  }
  func.func @transform_2(%arg0: i32, %arg1: i32) -> (i32, i32, i32) {
    %c0_i32 = arith.constant 0 : i32
    %c0_i32_0 = arith.constant 0 : i32
    %c0_i32_1 = arith.constant 0 : i32
    return %arg1, %c0_i32, %c0_i32_0 : i32, i32, i32
  }
  func.func @transform_3(%arg0: i32, %arg1: i32) -> (i32, i32, i32) {
    %c0_i32 = arith.constant 0 : i32
    %c0_i32_0 = arith.constant 0 : i32
    %c0_i32_1 = arith.constant 0 : i32
    return %arg1, %c0_i32, %c0_i32_0 : i32, i32, i32
  }
  func.func @transform_4(%arg0: i32, %arg1: i32) -> (i32, i32, i32) {
    %c0_i32 = arith.constant 0 : i32
    %c0_i32_0 = arith.constant 0 : i32
    %c0_i32_1 = arith.constant 0 : i32
    return %arg1, %c0_i32, %c0_i32_0 : i32, i32, i32
  }
  func.func @transform_5(%arg0: i32, %arg1: i32) -> (i32, i32, i32) {
    %c0_i32 = arith.constant 0 : i32
    %c0_i32_0 = arith.constant 0 : i32
    %c0_i32_1 = arith.constant 0 : i32
    return %arg1, %c0_i32, %c0_i32_0 : i32, i32, i32
  }
  func.func @transform_6(%arg0: i32, %arg1: i32) -> (i32, i32, i32) {
    %c0_i32 = arith.constant 0 : i32
    %c0_i32_0 = arith.constant 0 : i32
    %c0_i32_1 = arith.constant 0 : i32
    return %arg1, %c0_i32, %c0_i32_0 : i32, i32, i32
  }
  func.func @transform_7(%arg0: i32, %arg1: i32) -> (i32, i32, i32) {
    %c0_i32 = arith.constant 0 : i32
    %c0_i32_0 = arith.constant 0 : i32
    %c0_i32_1 = arith.constant 0 : i32
    return %arg1, %c0_i32, %c0_i32_0 : i32, i32, i32
  }
  func.func @transform_8(%arg0: i32, %arg1: i32) -> (i32, i32, i32) {
    %c0_i32 = arith.constant 0 : i32
    %c0_i32_0 = arith.constant 0 : i32
    %c0_i32_1 = arith.constant 0 : i32
    return %arg1, %c0_i32, %c0_i32_0 : i32, i32, i32
  }
  func.func @transform_9(%arg0: i32, %arg1: i32) -> (i32, i32, i32) {
    %c0_i32 = arith.constant 0 : i32
    %c0_i32_0 = arith.constant 0 : i32
    %c0_i32_1 = arith.constant 0 : i32
    return %arg1, %c0_i32, %c0_i32_0 : i32, i32, i32
  }
  func.func @transform_10(%arg0: i32, %arg1: i32) -> (i32, i32, i32) {
    %c0_i32 = arith.constant 0 : i32
    %c0_i32_0 = arith.constant 0 : i32
    %c0_i32_1 = arith.constant 0 : i32
    return %arg1, %c0_i32, %c0_i32_0 : i32, i32, i32
  }
  func.func @transform_11(%arg0: i32, %arg1: i32) -> (i32, i32, i32) {
    %c0_i32 = arith.constant 0 : i32
    %c0_i32_0 = arith.constant 0 : i32
    %c0_i32_1 = arith.constant 0 : i32
    return %arg1, %c0_i32, %c0_i32_0 : i32, i32, i32
  }
  func.func @transform_12(%arg0: i32, %arg1: i32) -> (i32, i32, i32) {
    %c0_i32 = arith.constant 0 : i32
    %c0_i32_0 = arith.constant 0 : i32
    %c0_i32_1 = arith.constant 0 : i32
    return %arg1, %c0_i32, %c0_i32_0 : i32, i32, i32
  }
  func.func @transform_13(%arg0: i32, %arg1: i32) -> (i32, i32, i32) {
    %c0_i32 = arith.constant 0 : i32
    %c0_i32_0 = arith.constant 0 : i32
    %c0_i32_1 = arith.constant 0 : i32
    return %arg1, %c0_i32, %c0_i32_0 : i32, i32, i32
  }
  func.func @transform_14(%arg0: i32, %arg1: i32) -> (i32, i32, i32) {
    %c0_i32 = arith.constant 0 : i32
    %c0_i32_0 = arith.constant 0 : i32
    %c0_i32_1 = arith.constant 0 : i32
    return %arg1, %c0_i32, %c0_i32_0 : i32, i32, i32
  }
  func.func @transform_15(%arg0: i32, %arg1: i32) -> (i32, i32, i32) {
    %c0_i32 = arith.constant 0 : i32
    %c0_i32_0 = arith.constant 0 : i32
    %c0_i32_1 = arith.constant 0 : i32
    return %arg1, %c0_i32, %c0_i32_0 : i32, i32, i32
  }
  func.func @transform_16(%arg0: i32, %arg1: i32) -> (i32, i32, i32) {
    %c0_i32 = arith.constant 0 : i32
    %c0_i32_0 = arith.constant 0 : i32
    %c0_i32_1 = arith.constant 0 : i32
    return %arg1, %c0_i32, %c0_i32_0 : i32, i32, i32
  }
  func.func @transform_17(%arg0: i32, %arg1: i32) -> (i32, i32, i32) {
    %c0_i32 = arith.constant 0 : i32
    %c0_i32_0 = arith.constant 0 : i32
    %c0_i32_1 = arith.constant 0 : i32
    return %arg1, %c0_i32, %c0_i32_0 : i32, i32, i32
  }
  func.func @transform_18(%arg0: i32, %arg1: i32) -> (i32, i32, i32) {
    %c0_i32 = arith.constant 0 : i32
    %c0_i32_0 = arith.constant 0 : i32
    %c0_i32_1 = arith.constant 0 : i32
    return %arg1, %c0_i32, %c0_i32_0 : i32, i32, i32
  }
  func.func @transform_19(%arg0: i32, %arg1: i32) -> (i32, i32, i32) {
    %c0_i32 = arith.constant 0 : i32
    %c0_i32_0 = arith.constant 0 : i32
    %c0_i32_1 = arith.constant 0 : i32
    return %arg1, %c0_i32, %c0_i32_0 : i32, i32, i32
  }
  func.func @transform_20(%arg0: i32, %arg1: i32) -> (i32, i32, i32) {
    %c0_i32 = arith.constant 0 : i32
    %c0_i32_0 = arith.constant 0 : i32
    %c0_i32_1 = arith.constant 0 : i32
    return %arg1, %c0_i32, %c0_i32_0 : i32, i32, i32
  }
  func.func @transform_21(%arg0: i32, %arg1: i32) -> (i32, i32, i32) {
    %c0_i32 = arith.constant 0 : i32
    %c0_i32_0 = arith.constant 0 : i32
    %c0_i32_1 = arith.constant 0 : i32
    return %arg1, %c0_i32, %c0_i32_0 : i32, i32, i32
  }
  func.func @transform_22(%arg0: i32, %arg1: i32) -> (i32, i32, i32) {
    %c0_i32 = arith.constant 0 : i32
    %c0_i32_0 = arith.constant 0 : i32
    %c0_i32_1 = arith.constant 0 : i32
    return %arg0, %c0_i32, %c0_i32_0 : i32, i32, i32
  }
}

</mosaic_0001>

<bundles_post_ra>
// kernel: forward.5
= control target key start
LH: loop header
LB: loop body
LE: loop exit
PB: predicated region body
PF: predicated region fallthrough
CT: control target
= control target key end

     0   :  { %9 = vsyncpa [#allocation3], 0  ;;  %s679_s0 = inlined_call_operand.vmem [shape: f32[2,16,64], index: 0, kind: input, shape index: {}]   ;;  %s680_s1 = inlined_call_operand.hbm [shape: bf16[64,128], index: 1, kind: input, shape index: {}]   ;;  %s681_s2 = inlined_call_operand.hbm [shape: f32[1,128], index: 2, kind: input, shape index: {}]   ;;  %s682_s3 = inlined_call_operand.vmem [shape: f32[1,16,128], index: 3, kind: input, shape index: {}]   ;;  %s683_s4 = inlined_call_operand.vmem [shape: f32[2,16,128], index: 4, kind: output, shape index: {}]  }
   0x1   :  { %10 = vsyncpa [#allocation5], 0  ;;  %s579_s15 = smov 0  }
   0x2 LB: > { %s585_s16 = sadd.s32 4294967295, %s546_s15   ;;  %p401_p0 = scmp.ge.s32.totalorder %s546_s15, 1  ;;  %s546_s15 = sphi %s579_s15, %s16_s15  }
   0x3   : > { %p136_p1 = scmp.lt.s32.totalorder %s546_s15, 3  ;;  %s548_s17 = smov [#allocation2]  }
   0x4   : > { %s148_s18 = sshll.u32 %s548_s17, 4  ;;  %p684_p3 = scmp.eq.s32.totalorder %s585_s16, 0  ;;  %s149_s18 = int_to_ptr.vmem [resolvable:$true] %s148_s18 }
   0x5   : > { %p589_p2 = pnand %p401_p0, %p136_p1  ;;  %s549_s20 = smov [#allocation4]  }
   0x6   : > { %s162_s21 = sshll.u32 %s549_s20, 4  ;;  %s476_s25 = scalar_lea.hbm %s680_s1, 512  ;;  %s602_s21 = int_to_ptr.vmem [resolvable:$true] %s162_s21 }
   0x7   : > { %s686_s19 = scalar_select %p589_p2, 1, 0 }
   0x8   : > { %p447_p4 = pneg %p589_p2  ;;  %p477_p6 = scmp.ne.s32.totalorder %s680_s1, %s476_s25 }
   0x9   : > { %p483_p10 = scmp.lt.u32.totalorder %s476_s25, %s680_s1 }
   0xa   : > { %p598_p5 = pnand %p684_p3, %p447_p4 }
   0xc   : > { %p478_p7 = pneg %p598_p5 }
   0xe   : > { %p479_p8 = pnand %p478_p7, %p477_p6 }
  0x10   : > { %p480_p9 = pneg %p479_p8 }
  0x12   : > { %p485_p11 = pnand %p483_p10, %p480_p9 }
  0x14   : > { %488 = shalt.err (!%p485_p11)
}
  0x15   : > { %s489_s30 = scalar_lea.vmem %s149_s18, 512  ;;  %p497_p1 = scmp.lt.s32.totalorder %s149_s18, %s149_s18 }
  0x16   : > { %p490_p12 = scmp.ne.s32.totalorder %s149_s18, %s489_s30  ;;  %p498_p4 = scmp.lt.s32.totalorder %s489_s30, %s489_s30 }
  0x18   : > { %p492_p13 = pnand %p490_p12, %p478_p7  ;;  %p499_p3 = por %p498_p4, %p497_p1 }
  0x1a   : > { %p493_p0 = pneg %p492_p13 }
  0x1c   : > { %p500_p2 = pnand %p499_p3, %p493_p0 }
  0x1e   : > { %503 = shalt.err (!%p500_p2)
}
  0x1f   : > { %s550_s5 = smov 64   ;;  %s551_s6 = smov 4  }
  0x20   : > { %450 = dma.hbm_to_vmem [thread:$0]  (!%p598_p5), %s680_s1, 512, %s149_s18, [#allocation3], %s550_s5, %s550_s5, %s551_s6  }
  0x21   : > { %s504_s11 = scalar_lea.hbm %s681_s2, 16 }
  0x22   : > { %p505_p6 = scmp.ne.s32.totalorder %s681_s2, %s504_s11  ;;  %p511_p8 = scmp.lt.u32.totalorder %s504_s11, %s681_s2 }
  0x24   : > { %p507_p2 = pnand %p505_p6, %p478_p7 }
  0x26   : > { %p508_p3 = pneg %p507_p2 }
  0x28   : > { %p513_p9 = pnand %p511_p8, %p508_p3 }
  0x2a   : > { %516 = shalt.err (!%p513_p9)
}
  0x2b   : > { %s517_s18 = scalar_lea.vmem %s602_s21, 16  ;;  %s524_s20 = scalar_lea.vmem %s602_s21, 32 }
  0x2c   : > { %p518_p10 = scmp.ne.s32.totalorder %s602_s21, %s517_s18  ;;  %p525_p13 = scmp.lt.s32.totalorder %s602_s21, %s602_s21 }
  0x2d   : > { %p526_p0 = scmp.lt.s32.totalorder %s524_s20, %s517_s18 }
  0x2e   : > { %p520_p11 = pnand %p518_p10, %p478_p7 }
  0x2f   : > { %p527_p1 = por %p526_p0, %p525_p13 }
  0x30   : > { %p521_p12 = pneg %p520_p11 }
  0x32   : > { %p528_p4 = pnand %p527_p1, %p521_p12 }
  0x34   : > { %531 = shalt.err (!%p528_p4)
}
  0x35   : > { %453 = dma.hbm_to_vmem [thread:$0]  (!%p598_p5), %s681_s2, 16, %s602_s21, [#allocation5]  }
  0x36   : > { %p688_p6 = scmp.ne.s32.totalorder %s686_s19, 0 }
  0x37   : > { %p689_p7 = scmp.eq.s32.totalorder (!%p688_p6), %s585_s16, 0 }
  0x38   : > { %186 = sbr.rel (%p688_p6) target bundleno = 306 (0x132), region = 36 }
  0x3f   : > { %537 = dma.done.wait (%p689_p7), [#allocation3], 512   ;;  %p690_p2 = pmov %p689_p7 }
  0x41   : > { %539 = vsyncadd (%p690_p2), [#allocation3], 4294966784  ;;  %p691_p3 = pmov %p690_p2 }
  0x42   : > { %p692_p8 = pmov %p690_p2 }
  0x43   : > { %541 = dma.done.wait (%p691_p3), [#allocation5], 16  }
  0x44   : > { %543 = vsyncadd (%p692_p8), [#allocation5], 4294967280  ;;  %v552_v0 = vmov 0.0   ;;  %vm553_vm0 = vmmov 0   ;;  %p216_p5 = scmp.lt.s32.totalorder %s585_s16, 1  ;;  %v472_v1 = vld [vmem:[#allocation2] sm:$0xff]  }
  0x45   : > { %427 = vmatprep.subr.bf16.mxu0 %v552_v0  ;;  %435 = vmatprep.mubr.msk.bf16.mxu0 %vm553_vm0, %v552_v0  ;;  %v473_v2 = vld [vmem:[#allocation2 + $0x8] sm:$0xff]   ;;  %v474_v3 = vld [vmem:[#allocation2 + $0x10] sm:$0xff]   ;;  %v475_v4 = vld [vmem:[#allocation2 + $0x18] sm:$0xff]   ;;  %vm269_vm1 = vcmask 523264  }
  0x46   : > { %s694_s16 = smov (!%p216_p5, %s585_s16), 1  ;;  %428 = vmatpush3.bf16.msra.mxu0 %v472_v1  ;;  %v412_v8 = vld [vmem:[#allocation4] ss:$0 sm:$0xff]  ;;  %v317_v17 = vld [vmem:[%s682_s3 + $0x8] sm:$0xff] }
  0x47   : > { %429 = vmatprep.subr.bf16.mxu0 %v552_v0  ;;  %s420_s19 = sshll.u32 %s694_s16, 4  ;;  %v316_v12 = vld [vmem:[%s682_s3] sm:$0xff] }
  0x48   : > { %s220_s25 = scalar_lea.vmem %s679_s0, %s420_s19  ;;  %s225_s29 = scalar_lea.vmem %s683_s4, %s420_s19 }
  0x49   : > { %v227_v5 = vld [vmem:[%s220_s25] sm:$0xff]  ;;  %v228_v6 = vld [vmem:[%s220_s25 + $0x8] sm:$0xff] }
  0x4a   : > { %430 = vmatpush3.bf16.msra.mxu0 %v473_v2  ;;  %v229_v7 = vpack.c.bf16 %v228_v6, %v227_v5 }
  0x4b   : > { %431 = vmatprep.subr.bf16.mxu0 %v552_v0 }
  0x4e   : > { %432 = vmatpush3.bf16.msra.mxu0 %v474_v3 }
  0x4f   : > { %433 = vmatprep.subr.bf16.mxu0 %v552_v0 }
  0x52   : > { %434 = vmatpush3.bf16.msra.mxu0 %v475_v4 }
  0x55   : > { %436 = vmatmul.mubr.msk.bf16.vlgmr.msra.gmra.mrb[0].mxu0 %vm269_vm1, %v229_v7 }
 0x128   : > { %v307_v9 = vpop.f32.mrb[0].mxu0 }
 0x129   : > { %v308_v10 = vadd.f32 %v412_v8, %v307_v9  ;;  %v437_v11 = vpop.f32.mrb[1].mxu0 }
 0x12a   : > { %v310_v13 = vpop.f32.mrb[2].mxu0 }
 0x12b   : > { %v314_v14 = vmax.f32 %v308_v10, 0.0  ;;  %v311_v15 = vadd.f32 %v412_v8, %v310_v13  ;;  %v438_v16 = vpop.f32.mrb[3].mxu0 }
 0x12d   : > { %v318_v18 = vadd.f32 %v316_v12, %v314_v14  ;;  %v315_v19 = vmax.f32 %v311_v15, 0.0 }
 0x12f   : > { %320 = vst [vmem:[%s225_s29] sm:$0xff] %v318_v18  ;;  %v319_v20 = vadd.f32 %v317_v17, %v315_v19 }
 0x131   : > { %321 = vst [vmem:[%s225_s29 + $0x8] sm:$0xff] %v319_v20 }
 0x132 PF: > { %s16_s15 = sadd.s32 1, %s546_s15  }
 0x133   : > { %p13_p9 = scmp.ge.s32.totalorder %s16_s15, 4  }
 0x135   :  { %15 = sbr.rel (!%p13_p9) target bundleno = 2 (0x2), region = 75 }
 0x13c   :  { %343 = vsyncpa [#allocation3], 1 }
 0x13d   :  { %345 = vsyncpa [#allocation3 + $0x1], 1 }
 0x13e   :  { %346 = vsyncpa [#allocation5], 1 }

// kernel: forward.6
= control target key start
LH: loop header
LB: loop body
LE: loop exit
PB: predicated region body
PF: predicated region fallthrough
CT: control target
= control target key end

     0   :  { %s3817_s0 = inlined_call_operand.vmem [shape: f32[16,2,128], index: 0, kind: input, shape index: {}]   ;;  %s3818_s1 = inlined_call_operand.vmem [shape: bf16[2,128,384], index: 1, kind: input, shape index: {}]   ;;  %s3819_s2 = inlined_call_operand.hbm [shape: f32[2,1,384], index: 2, kind: input, shape index: {}]   ;;  %s3820_s3 = inlined_call_operand.vmem [shape: bf16[2,128,128], index: 3, kind: input, shape index: {}]   ;;  %s3821_s4 = inlined_call_operand.vmem [shape: f32[2,1,128], index: 4, kind: input, shape index: {}]   ;;  %s3822_s5 = inlined_call_operand.hbm [shape: f32[2,1,128], index: 5, kind: input, shape index: {}]   ;;  %s3823_s6 = inlined_call_operand.hbm [shape: f32[2,1,128], index: 6, kind: input, shape index: {}]   ;;  %s3824_s7 = inlined_call_operand.vmem [shape: bf16[2,128,256], index: 7, kind: input, shape index: {}]   ;;  %s3825_s8 = inlined_call_operand.hbm [shape: f32[2,1,256], index: 8, kind: input, shape index: {}]   ;;  %s3826_s9 = inlined_call_operand.hbm [shape: bf16[2,256,128], index: 9, kind: input, shape index: {}]   ;;  %s3827_s10 = inlined_call_operand.hbm [shape: f32[2,1,128], index: 10, kind: input, shape index: {}]   ;;  %s3828_s11 = inlined_call_operand.hbm [shape: f32[2,1,128], index: 11, kind: input, shape index: {}]   ;;  %s3829_s12 = inlined_call_operand.hbm [shape: f32[2,1,128], index: 12, kind: input, shape index: {}]   ;;  %s3830_s13 = inlined_call_operand.vmem [shape: f32[16,2,128], index: 13, kind: output, shape index: {}]  }
   0x1   :  { %3841 = sst [smem:[#allocation27_spill]] %s3817_s0 }
   0x2   :  { %3842 = sst [smem:[#allocation28_spill]] %s3818_s1 }
   0x3   :  { %3843 = sst [smem:[#allocation29_spill]] %s3819_s2 }
   0x4   :  { %3844 = sst [smem:[#allocation30_spill]] %s3820_s3 }
   0x5   :  { %3845 = sst [smem:[#allocation31_spill]] %s3821_s4 }
   0x6   :  { %3846 = sst [smem:[#allocation32_spill]] %s3822_s5 }
   0x7   :  { %3847 = sst [smem:[#allocation33_spill]] %s3823_s6 }
   0x8   :  { %3848 = sst [smem:[#allocation34_spill]] %s3824_s7 }
   0x9   :  { %3849 = sst [smem:[#allocation35_spill]] %s3825_s8 }
   0xa   :  { %3850 = sst [smem:[#allocation36_spill]] %s3826_s9 }
   0xb   :  { %3851 = sst [smem:[#allocation37_spill]] %s3827_s10 }
   0xc   :  { %3852 = sst [smem:[#allocation38_spill]] %s3828_s11 }
   0xd   :  { %3853 = sst [smem:[#allocation39_spill]] %s3829_s12 }
   0xe   :  { %3854 = sst [smem:[#allocation40_spill]] %s3830_s13 }
   0xf   :  { %18 = vsyncpa [#allocation4], 0 }
  0x10   :  { %20 = vsyncpa [#allocation4 + $0x1], 0 }
  0x11   :  { %21 = vsyncpa [#allocation6], 0 }
  0x12   :  { %23 = vsyncpa [#allocation6 + $0x1], 0 }
  0x13   :  { %24 = vsyncpa [#allocation9], 0 }
  0x14   :  { %26 = vsyncpa [#allocation9 + $0x1], 0 }
  0x15   :  { %27 = vsyncpa [#allocation12], 0 }
  0x16   :  { %29 = vsyncpa [#allocation12 + $0x1], 0 }
  0x17   :  { %30 = vsyncpa [#allocation15], 0 }
  0x18   :  { %32 = vsyncpa [#allocation15 + $0x1], 0  ;;  %s3191_s25 = smov 0   ;;  %s3193_s26 = smov 0  }
  0x19   :  { %s3195_s27 = smov 0   ;;  %s3197_s28 = smov 0  }
  0x1a   :  { %s3199_s29 = smov 0   ;;  %s3201_s30 = smov 0  }
  0x1b   :  { %s3203_s14 = smov 0   ;;  %s3205_s15 = smov 0  }
  0x1c LB: > { %3855 = sst [smem:[#allocation21_spill]] %s3083_s27  ;;  %s3831_s16 = sadd.s32 4294967295, %s3103_s15   ;;  %s3103_s15 = sphi %s3205_s15, %s38_s15   ;;  %s3099_s14 = sphi %s3203_s14, %s3902_s14   ;;  %s3095_s30 = sphi %s3201_s30, %s3901_s30   ;;  %s3091_s29 = sphi %s3199_s29, %s3900_s29   ;;  %s3087_s28 = sphi %s3197_s28, %s3899_s28   ;;  %s3083_s27 = sphi %s3195_s27, %s3898_s27   ;;  %s3079_s26 = sphi %s3193_s26, %s3904_s26   ;;  %s3075_s25 = sphi %s3191_s25, %s3903_s25  }
  0x1d   : > { %3856 = sst [smem:[#allocation22_spill]] %s3095_s30  ;;  %s47_s17 = sadd.s32 1, %s3095_s30 }
  0x1e   : > { %3857 = sst [smem:[#allocation23_spill]] %s3099_s14  ;;  %p48_p0 = scmp.ge.s32.totalorder %s47_s17, 2 }
  0x1f   : > { %s50_s18 = sadd.s32 1, %s3099_s14  ;;  %s109_s19 = sadd.s32 1, %s3083_s27 }
  0x20   : > { %p116_p1 = scmp.ne.s32.totalorder %s3083_s27, %s3079_s26  ;;  %s3906_s17 = smov (%p48_p0, %s47_s17), 0 }
  0x21   : > { %3858 = sst [smem:[#allocation24_spill]] %s3906_s17  ;;  %s3908_s18 = smov (!%p48_p0, %s50_s18), %s3099_s14 }
  0x22   : > { %s106_s20 = ssub.s32 %s3095_s30, %s3906_s17  ;;  %p117_p2 = scmp.eq.s32.totalorder %s3103_s15, 0 }
  0x23   : > { %p52_p3 = scmp.ge.s32.totalorder %s3908_s18, 16  ;;  %p107_p4 = scmp.eq.s32.totalorder %s106_s20, 0 }
  0x24   : > { %p118_p5 = por %p117_p2, %p116_p1  ;;  %p122_p6 = scmp.ne.s32.totalorder %s3079_s26, %s3075_s25 }
  0x25   : > { %s3910_s18 = smov (%p52_p3, %s3908_s18), 0  ;;  %p123_p7 = scmp.eq.s32.totalorder %s3831_s16, 0 }
  0x26   : > { %3859 = sst [smem:[#allocation25_spill]] %s3910_s18  ;;  %p2608_p8 = scmp.lt.s32.totalorder %s3103_s15, 32 }
  0x27   : > { %s3245_s21 = scalar_select %p107_p4, %s3083_s27, %s109_s19  }
  0x28   : > { %s3251_s22 = sand.u32 1, %s3083_s27   ;;  %p3253_p9 = por %p123_p7, %p122_p6 }
  0x29   : > { %3860 = sst [smem:[#allocation26_spill]] %s3245_s21  ;;  %s3258_s24 = sand.u32 1, %s3103_s15  }
  0x2a   : > { %s3861_s23 = scalar_select %p3253_p9, 1, 0 }
  0x2b   : > { %p3260_p10 = pnand %p2608_p8, %p118_p5  ;;  %s3265_s25 = sshll.u32 %s3095_s30, 4 }
  0x2c   : > { %s3863_s5 = sld [smem:[#allocation32_spill]]  ;;  %s483_s17 = scalar_lea.vmem [#allocation5], %s3251_s22 }
  0x2d   : > { %s3862_s20 = scalar_select %p3260_p10, 1, 0 }
  0x2e   : > { %s490_s14 = sshll.u32 %s483_s17, 4  ;;  %p3283_p0 = pneg %p3260_p10  ;;  %s3275_s14 = int_to_ptr.vmem [resolvable:$true] %s490_s14 }
  0x32   : > { %s3271_s18 = scalar_lea.hbm %s3863_s5, %s3265_s25  ;;  %s2786_s17 = scalar_lea.hbm %s3863_s5, 32 }
  0x33   : > { %s2781_s27 = scalar_lea.hbm %s3271_s18, 16  ;;  %p2787_p3 = scmp.lt.u32.totalorder %s3271_s18, %s3863_s5 }
  0x34   : > { %p2782_p13 = scmp.ne.s32.totalorder %s3271_s18, %s2781_s27  ;;  %p2788_p4 = scmp.lt.u32.totalorder %s2786_s17, %s2781_s27 }
  0x35   : > { %p2790_p6 = scmp.lt.u32.totalorder %s2781_s27, %s3271_s18 }
  0x36   : > { %p2784_p1 = pnand %p3283_p0, %p2782_p13  ;;  %p2789_p5 = por %p2788_p4, %p2787_p3 }
  0x38   : > { %p2785_p2 = pneg %p2784_p1  ;;  %p2791_p7 = por %p2790_p6, %p2789_p5 }
  0x3a   : > { %p2792_p8 = pnand %p2791_p7, %p2785_p2 }
  0x3c   : > { %2795 = shalt.err (!%p2792_p8)
}
  0x3d   : > { %s2796_s21 = scalar_lea.vmem %s3275_s14, 16  ;;  %s3105_s16 = smov [#allocation5]  }
  0x3e   : > { %p2797_p13 = scmp.ne.s32.totalorder %s3275_s14, %s2796_s21  ;;  %s2801_s19 = sshll.u32 %s3105_s16, 4  ;;  %s2802_s19 = int_to_ptr.vmem [resolvable:$false] %s2801_s19 }
  0x3f   : > { %s2803_s3 = scalar_lea.vmem %s2802_s19, 32  ;;  %p2804_p12 = scmp.lt.s32.totalorder %s3275_s14, %s2802_s19 }
  0x40   : > { %p2799_p1 = pnand %p2797_p13, %p3283_p0  ;;  %p2805_p9 = scmp.lt.s32.totalorder %s2803_s3, %s2796_s21 }
  0x42   : > { %p2800_p11 = pneg %p2799_p1  ;;  %p2806_p3 = por %p2805_p9, %p2804_p12 }
  0x44   : > { %p2807_p4 = pnand %p2806_p3, %p2800_p11 }
  0x46   : > { %2810 = shalt.err (!%p2807_p4)
}
  0x47   : > { %s3865_s13 = scalar_lea.sflag [#allocation6], %s3258_s24  ;;  %p3866_p2 = scmp.lt.s32.totalorder %s3103_s15, 33 }
  0x48   : > { %2589 = dma.hbm_to_vmem [thread:$0]  (!%p3260_p10), %s3271_s18, 16, %s3275_s14, %s3865_s13  }
  0x49   : > { %p3867_p5 = scmp.ge.s32.totalorder %s3103_s15, 1  ;;  %s2314_s21 = sshll.u32 %s3251_s22, 1 }
  0x4a   : > { %s2415_s17 = sshll.u32 %s3095_s30, 5  ;;  %s3869_s8 = sld [smem:[#allocation35_spill]] }
  0x4b   : > { %p3312_p6 = pnand %p3867_p5, %p3866_p2  ;;  %s526_s5 = scalar_lea.vmem [#allocation8], %s2314_s21 }
  0x4c   : > { %s534_s1 = sshll.u32 %s526_s5, 4  ;;  %s3838_s14 = scalar_lea.sflag [#allocation9], %s3258_s24  ;;  %s535_s1 = int_to_ptr.vmem [resolvable:$true] %s534_s1 }
  0x4d   : > { %s3868_s27 = scalar_select %p3312_p6, 1, 0 }
  0x50   : > { %s3321_s3 = scalar_lea.hbm %s3869_s8, %s2415_s17  ;;  %s2816_s0 = scalar_lea.hbm %s3869_s8, 64 }
  0x51   : > { %s2811_s18 = scalar_lea.hbm %s3321_s3, 32  ;;  %p2817_p7 = scmp.lt.u32.totalorder %s3321_s3, %s3869_s8 }
  0x52   : > { %p2812_p9 = scmp.ne.s32.totalorder %s3321_s3, %s2811_s18  ;;  %p2818_p8 = scmp.lt.u32.totalorder %s2816_s0, %s2811_s18 }
  0x53   : > { %p2820_p1 = scmp.lt.u32.totalorder %s2811_s18, %s3321_s3 }
  0x54   : > { %p2814_p11 = pnand %p2812_p9, %p3283_p0  ;;  %p2819_p13 = por %p2818_p8, %p2817_p7 }
  0x56   : > { %p2815_p12 = pneg %p2814_p11  ;;  %p2821_p3 = por %p2820_p1, %p2819_p13 }
  0x58   : > { %p2822_p4 = pnand %p2821_p3, %p2815_p12 }
  0x5a   : > { %2825 = shalt.err (!%p2822_p4)
}
  0x5b   : > { %s2826_s5 = scalar_lea.vmem %s535_s1, 32  ;;  %s3106_s21 = smov [#allocation8]  }
  0x5c   : > { %p2827_p2 = scmp.ne.s32.totalorder %s535_s1, %s2826_s5  ;;  %s2831_s19 = sshll.u32 %s3106_s21, 4  ;;  %s2832_s19 = int_to_ptr.vmem [resolvable:$false] %s2831_s19 }
  0x5d   : > { %s2833_s4 = scalar_lea.vmem %s2832_s19, 64  ;;  %p2834_p11 = scmp.lt.s32.totalorder %s535_s1, %s2832_s19 }
  0x5e   : > { %p2829_p5 = pnand %p2827_p2, %p3283_p0  ;;  %p2835_p6 = scmp.lt.s32.totalorder %s2833_s4, %s2826_s5 }
  0x60   : > { %p2830_p9 = pneg %p2829_p5  ;;  %p2836_p10 = por %p2835_p6, %p2834_p11 }
  0x62   : > { %p2837_p7 = pnand %p2836_p10, %p2830_p9 }
  0x64   : > { %2840 = shalt.err (!%p2837_p7)
}
  0x65   : > { %p3870_p8 = scmp.ne.s32.totalorder %s3862_s20, 0  ;;  %s3871_s10 = sld [smem:[#allocation37_spill]] }
  0x66   : > { %s565_s16 = scalar_lea.vmem [#allocation11], %s3251_s22  ;;  %s563_s5 = scalar_lea.sflag [#allocation12], %s3258_s24 }
  0x67   : > { %2595 = dma.hbm_to_vmem [thread:$0]  (!%p3870_p8), %s3321_s3, 32, %s535_s1, %s3838_s14  }
  0x68   : > { %s572_s17 = sshll.u32 %s565_s16, 4  ;;  %s573_s17 = int_to_ptr.vmem [resolvable:$true] %s572_s17 }
  0x6b   : > { %s3347_s13 = scalar_lea.hbm %s3871_s10, %s3265_s25  ;;  %s2846_s3 = scalar_lea.hbm %s3871_s10, 32 }
  0x6c   : > { %s2841_s21 = scalar_lea.hbm %s3347_s13, 16  ;;  %p2847_p13 = scmp.lt.u32.totalorder %s3347_s13, %s3871_s10 }
  0x6d   : > { %p2842_p10 = scmp.ne.s32.totalorder %s3347_s13, %s2841_s21  ;;  %p2848_p1 = scmp.lt.u32.totalorder %s2846_s3, %s2841_s21 }
  0x6e   : > { %p2850_p4 = scmp.lt.u32.totalorder %s2841_s21, %s3347_s13 }
  0x6f   : > { %p2844_p6 = pnand %p2842_p10, %p3283_p0  ;;  %p2849_p3 = por %p2848_p1, %p2847_p13 }
  0x71   : > { %p2845_p12 = pneg %p2844_p6  ;;  %p2851_p2 = por %p2850_p4, %p2849_p3 }
  0x73   : > { %p2852_p5 = pnand %p2851_p2, %p2845_p12 }
  0x75   : > { %2855 = shalt.err (!%p2852_p5)
}
  0x76   : > { %s2856_s18 = scalar_lea.vmem %s573_s17, 16  ;;  %s3107_s16 = smov [#allocation11]  }
  0x77   : > { %p2857_p9 = scmp.ne.s32.totalorder %s573_s17, %s2856_s18  ;;  %s2861_s14 = sshll.u32 %s3107_s16, 4  ;;  %s2862_s14 = int_to_ptr.vmem [resolvable:$false] %s2861_s14 }
  0x78   : > { %s2863_s19 = scalar_lea.vmem %s2862_s14, 32  ;;  %p2864_p10 = scmp.lt.s32.totalorder %s573_s17, %s2862_s14 }
  0x79   : > { %p2859_p11 = pnand %p2857_p9, %p3283_p0  ;;  %p2865_p6 = scmp.lt.s32.totalorder %s2863_s19, %s2856_s18 }
  0x7b   : > { %p2860_p7 = pneg %p2859_p11  ;;  %p2866_p8 = por %p2865_p6, %p2864_p10 }
  0x7d   : > { %p2867_p1 = pnand %p2866_p8, %p2860_p7 }
  0x7f   : > { %2870 = shalt.err (!%p2867_p1)
}
  0x80   : > { %p3872_p13 = scmp.ne.s32.totalorder %s3862_s20, 0  ;;  %s2563_s21 = smul.u32 3, %s3251_s22 }
  0x81   : > { %s2564_s1 = smul.u32 48, %s3095_s30  ;;  %s3873_s6 = sld [smem:[#allocation33_spill]] }
  0x82   : > { %2601 = dma.hbm_to_vmem [thread:$0]  (!%p3872_p13), %s3347_s13, 16, %s573_s17, %s563_s5  }
  0x83   : > { %s500_s0 = scalar_lea.vmem [#allocation7], %s3251_s22  ;;  %s3874_s2 = sld [smem:[#allocation29_spill]] }
  0x84   : > { %s507_s18 = sshll.u32 %s500_s0, 4  ;;  %s451_s10 = scalar_lea.vmem [#allocation3], %s2563_s21  ;;  %s3386_s18 = int_to_ptr.vmem [resolvable:$true] %s507_s18 }
  0x85   : > { %s459_s13 = sshll.u32 %s451_s10, 4  ;;  %s448_s17 = scalar_lea.sflag [#allocation4], %s3251_s22  ;;  %s3384_s13 = int_to_ptr.vmem [resolvable:$true] %s459_s13 }
  0x87   : > { %s3376_s4 = scalar_lea.hbm %s3873_s6, %s3265_s25 }
  0x89   : > { %s3382_s8 = scalar_lea.hbm %s3874_s2, %s2564_s1  ;;  %s2876_s1 = scalar_lea.hbm %s3874_s2, 96 }
  0x8a   : > { %s2871_s3 = scalar_lea.hbm %s3382_s8, 48  ;;  %p2877_p4 = scmp.lt.u32.totalorder %s3382_s8, %s3874_s2 }
  0x8b   : > { %p2872_p8 = scmp.ne.s32.totalorder %s3382_s8, %s2871_s3  ;;  %p2878_p2 = scmp.lt.u32.totalorder %s2876_s1, %s2871_s3 }
  0x8c   : > { %p2880_p9 = scmp.lt.u32.totalorder %s2871_s3, %s3382_s8 }
  0x8d   : > { %p2874_p12 = pnand %p2872_p8, %p3283_p0  ;;  %p2879_p5 = por %p2878_p2, %p2877_p4 }
  0x8f   : > { %p2875_p3 = pneg %p2874_p12  ;;  %p2881_p11 = por %p2880_p9, %p2879_p5 }
  0x91   : > { %p2882_p7 = pnand %p2881_p11, %p2875_p3 }
  0x93   : > { %2885 = shalt.err (!%p2882_p7)
}
  0x94   : > { %s2886_s10 = scalar_lea.vmem %s3384_s13, 48  ;;  %s3108_s21 = smov [#allocation3]  }
  0x95   : > { %p2887_p10 = scmp.ne.s32.totalorder %s3384_s13, %s2886_s10  ;;  %s2891_s14 = sshll.u32 %s3108_s21, 4  ;;  %s2892_s14 = int_to_ptr.vmem [resolvable:$false] %s2891_s14 }
  0x96   : > { %s2893_s0 = scalar_lea.vmem %s2892_s14, 96  ;;  %p2894_p8 = scmp.lt.s32.totalorder %s3384_s13, %s2892_s14 }
  0x97   : > { %p2889_p6 = pnand %p2887_p10, %p3283_p0  ;;  %p2895_p12 = scmp.lt.s32.totalorder %s2893_s0, %s2886_s10 }
  0x99   : > { %p2890_p1 = pneg %p2889_p6  ;;  %p2896_p4 = por %p2895_p12, %p2894_p8 }
  0x9b   : > { %p2897_p2 = pnand %p2896_p4, %p2890_p1 }
  0x9d   : > { %2900 = shalt.err (!%p2897_p2)
}
  0x9e   : > { %2586 = dma.hbm_to_vmem [thread:$0]  (!%p3872_p13), %s3382_s8, 48, %s3384_s13, %s448_s17  }
  0x9f   : > { %s2901_s3 = scalar_lea.hbm %s3376_s4, 16  ;;  %s2906_s19 = scalar_lea.hbm %s3873_s6, 32 }
  0xa0   : > { %p2902_p3 = scmp.ne.s32.totalorder %s3376_s4, %s2901_s3  ;;  %p2907_p11 = scmp.lt.u32.totalorder %s3376_s4, %s3873_s6 }
  0xa1   : > { %p2908_p7 = scmp.lt.u32.totalorder %s2906_s19, %s2901_s3  ;;  %p2910_p6 = scmp.lt.u32.totalorder %s2901_s3, %s3376_s4 }
  0xa2   : > { %p2904_p5 = pnand %p2902_p3, %p3283_p0 }
  0xa3   : > { %p2909_p10 = por %p2908_p7, %p2907_p11 }
  0xa4   : > { %p2905_p9 = pneg %p2904_p5 }
  0xa5   : > { %p2911_p1 = por %p2910_p6, %p2909_p10 }
  0xa7   : > { %p2912_p8 = pnand %p2911_p1, %p2905_p9 }
  0xa9   : > { %2915 = shalt.err (!%p2912_p8)
}
  0xaa   : > { %s2916_s8 = scalar_lea.vmem %s3386_s18, 16  ;;  %s3109_s13 = smov [#allocation7]  }
  0xab   : > { %p2917_p12 = scmp.ne.s32.totalorder %s3386_s18, %s2916_s8  ;;  %s2921_s17 = sshll.u32 %s3109_s13, 4  ;;  %s2922_s17 = int_to_ptr.vmem [resolvable:$false] %s2921_s17 }
  0xac   : > { %s2923_s14 = scalar_lea.vmem %s2922_s17, 32  ;;  %p2924_p3 = scmp.lt.s32.totalorder %s3386_s18, %s2922_s17 }
  0xad   : > { %p2919_p4 = pnand %p2917_p12, %p3283_p0  ;;  %p2925_p5 = scmp.lt.s32.totalorder %s2923_s14, %s2916_s8 }
  0xaf   : > { %p2920_p2 = pneg %p2919_p4  ;;  %p2926_p11 = por %p2925_p5, %p2924_p3 }
  0xb1   : > { %p2927_p7 = pnand %p2926_p11, %p2920_p2 }
  0xb3   : > { %2930 = shalt.err (!%p2927_p7)
}
  0xb4   : > { %s3875_s0 = scalar_lea.sflag [#allocation6], %s3258_s24  ;;  %s2317_s3 = sshll.u32 %s3251_s22, 7 }
  0xb5   : > { %2592 = dma.hbm_to_vmem [thread:$0]  (!%p3872_p13), %s3376_s4, 16, %s3386_s18, %s3875_s0  }
  0xb6   : > { %s2416_s1 = sshll.u32 %s3095_s30, 11  ;;  %s3876_s9 = sld [smem:[#allocation36_spill]] }
  0xb7   : > { %s545_s21 = scalar_lea.vmem [#allocation10], %s2317_s3 }
  0xb8   : > { %s552_s8 = sshll.u32 %s545_s21, 4  ;;  %s3440_s8 = int_to_ptr.vmem [resolvable:$true] %s552_s8 }
  0xbc   : > { %s3438_s10 = scalar_lea.hbm %s3876_s9, %s2416_s1  ;;  %s2936_s17 = scalar_lea.hbm %s3876_s9, 4096 }
  0xbd   : > { %s2931_s13 = scalar_lea.hbm %s3438_s10, 2048  ;;  %p2937_p1 = scmp.lt.u32.totalorder %s3438_s10, %s3876_s9 }
  0xbe   : > { %p2932_p9 = scmp.ne.s32.totalorder %s3438_s10, %s2931_s13  ;;  %p2938_p8 = scmp.lt.u32.totalorder %s2936_s17, %s2931_s13 }
  0xbf   : > { %p2940_p4 = scmp.lt.u32.totalorder %s2931_s13, %s3438_s10 }
  0xc0   : > { %p2934_p10 = pnand %p2932_p9, %p3283_p0  ;;  %p2939_p12 = por %p2938_p8, %p2937_p1 }
  0xc2   : > { %p2935_p6 = pneg %p2934_p10  ;;  %p2941_p2 = por %p2940_p4, %p2939_p12 }
  0xc4   : > { %p2942_p3 = pnand %p2941_p2, %p2935_p6 }
  0xc6   : > { %2945 = shalt.err (!%p2942_p3)
}
  0xc7   : > { %s2946_s3 = scalar_lea.vmem %s3440_s8, 2048  ;;  %s3110_s1 = smov [#allocation10]  }
  0xc8   : > { %p2947_p5 = scmp.ne.s32.totalorder %s3440_s8, %s2946_s3  ;;  %s2951_s16 = sshll.u32 %s3110_s1, 4  ;;  %s2952_s16 = int_to_ptr.vmem [resolvable:$false] %s2951_s16 }
  0xc9   : > { %s2953_s19 = scalar_lea.vmem %s2952_s16, 4096  ;;  %p2954_p9 = scmp.lt.s32.totalorder %s3440_s8, %s2952_s16 }
  0xca   : > { %p2949_p11 = pnand %p2947_p5, %p3283_p0  ;;  %p2955_p10 = scmp.lt.s32.totalorder %s2953_s19, %s2946_s3 }
  0xcc   : > { %p2950_p7 = pneg %p2949_p11  ;;  %p2956_p1 = por %p2955_p10, %p2954_p9 }
  0xce   : > { %p2957_p8 = pnand %p2956_p1, %p2950_p7 }
  0xd0   : > { %2960 = shalt.err (!%p2957_p8)
}
  0xd1   : > { %s3111_s21 = smov 64   ;;  %s3112_s13 = smov 4  }
  0xd2   : > { %s3877_s4 = scalar_lea.sflag [#allocation9], %s3258_s24  ;;  %s3878_s11 = sld [smem:[#allocation38_spill]] }
  0xd3   : > { %2598 = dma.hbm_to_vmem [thread:$0]  (!%p3872_p13), %s3438_s10, 2048, %s3440_s8, %s3877_s4, %s3111_s21, %s3111_s21, %s3112_s13  }
  0xd4   : > { %s582_s0 = scalar_lea.vmem [#allocation13], %s3251_s22 }
  0xd5   : > { %s589_s3 = sshll.u32 %s582_s0, 4  ;;  %s590_s3 = int_to_ptr.vmem [resolvable:$true] %s589_s3 }
  0xd8   : > { %s3469_s14 = scalar_lea.hbm %s3878_s11, %s3265_s25  ;;  %s2966_s10 = scalar_lea.hbm %s3878_s11, 32 }
  0xd9   : > { %s2961_s1 = scalar_lea.hbm %s3469_s14, 16  ;;  %p2967_p2 = scmp.lt.u32.totalorder %s3469_s14, %s3878_s11 }
  0xda   : > { %p2962_p6 = scmp.ne.s32.totalorder %s3469_s14, %s2961_s1  ;;  %p2968_p3 = scmp.lt.u32.totalorder %s2966_s10, %s2961_s1 }
  0xdb   : > { %p2970_p11 = scmp.lt.u32.totalorder %s2961_s1, %s3469_s14 }
  0xdc   : > { %p2964_p12 = pnand %p2962_p6, %p3283_p0  ;;  %p2969_p5 = por %p2968_p3, %p2967_p2 }
  0xde   : > { %p2965_p4 = pneg %p2964_p12  ;;  %p2971_p7 = por %p2970_p11, %p2969_p5 }
  0xe0   : > { %p2972_p9 = pnand %p2971_p7, %p2965_p4 }
  0xe2   : > { %2975 = shalt.err (!%p2972_p9)
}
  0xe3   : > { %s2976_s13 = scalar_lea.vmem %s590_s3, 16  ;;  %s3113_s4 = smov [#allocation13]  }
  0xe4   : > { %p2977_p10 = scmp.ne.s32.totalorder %s590_s3, %s2976_s13  ;;  %s2981_s18 = sshll.u32 %s3113_s4, 4  ;;  %s2982_s18 = int_to_ptr.vmem [resolvable:$false] %s2981_s18 }
  0xe5   : > { %s2983_s17 = scalar_lea.vmem %s2982_s18, 32  ;;  %p2984_p6 = scmp.lt.s32.totalorder %s590_s3, %s2982_s18 }
  0xe6   : > { %p2979_p1 = pnand %p2977_p10, %p3283_p0  ;;  %p2985_p12 = scmp.lt.s32.totalorder %s2983_s17, %s2976_s13 }
  0xe8   : > { %p2980_p8 = pneg %p2979_p1  ;;  %p2986_p13 = por %p2985_p12, %p2984_p6 }
  0xea   : > { %p2987_p2 = pnand %p2986_p13, %p2980_p8 }
  0xec   : > { %2990 = shalt.err (!%p2987_p2)
}
  0xed   : > { %p3879_p3 = scmp.ne.s32.totalorder %s3862_s20, 0  ;;  %s3880_s12 = sld [smem:[#allocation39_spill]] }
  0xee   : > { %s599_s19 = scalar_lea.vmem [#allocation14], %s3251_s22  ;;  %s597_s8 = scalar_lea.sflag [#allocation15], %s3251_s22 }
  0xef   : > { %2604 = dma.hbm_to_vmem [thread:$0]  (!%p3879_p3), %s3469_s14, 16, %s590_s3, %s563_s5  }
  0xf0   : > { %s606_s10 = sshll.u32 %s599_s19, 4  ;;  %s607_s10 = int_to_ptr.vmem [resolvable:$true] %s606_s10 }
  0xf3   : > { %s3495_s16 = scalar_lea.hbm %s3880_s12, %s3265_s25  ;;  %s2996_s14 = scalar_lea.hbm %s3880_s12, 32 }
  0xf4   : > { %s2991_s24 = scalar_lea.hbm %s3495_s16, 16  ;;  %p2997_p11 = scmp.lt.u32.totalorder %s3495_s16, %s3880_s12 }
  0xf5   : > { %p2992_p13 = scmp.ne.s32.totalorder %s3495_s16, %s2991_s24  ;;  %p2998_p7 = scmp.lt.u32.totalorder %s2996_s14, %s2991_s24 }
  0xf6   : > { %p3000_p10 = scmp.lt.u32.totalorder %s2991_s24, %s3495_s16 }
  0xf7   : > { %p2994_p4 = pnand %p2992_p13, %p3283_p0  ;;  %p2999_p9 = por %p2998_p7, %p2997_p11 }
  0xf9   : > { %p2995_p5 = pneg %p2994_p4  ;;  %p3001_p1 = por %p3000_p10, %p2999_p9 }
  0xfb   : > { %p3002_p8 = pnand %p3001_p1, %p2995_p5 }
  0xfd   : > { %3005 = shalt.err (!%p3002_p8)
}
  0xfe   : > { %s3006_s22 = scalar_lea.vmem %s607_s10, 16  ;;  %s3114_s13 = smov [#allocation14]  }
  0xff   : > { %p3007_p6 = scmp.ne.s32.totalorder %s607_s10, %s3006_s22  ;;  %s3011_s4 = sshll.u32 %s3114_s13, 4  ;;  %s3012_s4 = int_to_ptr.vmem [resolvable:$false] %s3011_s4 }
 0x100   : > { %s3013_s18 = scalar_lea.vmem %s3012_s4, 32  ;;  %p3014_p13 = scmp.lt.s32.totalorder %s607_s10, %s3012_s4 }
 0x101   : > { %p3009_p12 = pnand %p3007_p6, %p3283_p0  ;;  %p3015_p4 = scmp.lt.s32.totalorder %s3013_s18, %s3006_s22 }
 0x103   : > { %p3010_p2 = pneg %p3009_p12  ;;  %p3016_p3 = por %p3015_p4, %p3014_p13 }
 0x105   : > { %p3017_p7 = pnand %p3016_p3, %p3010_p2 }
 0x107   : > { %3020 = shalt.err (!%p3017_p7)
}
 0x108   : > { %p3881_p11 = scmp.ne.s32.totalorder %s3862_s20, 0  ;;  %p3882_p5 = scmp.ne.s32.totalorder %s3868_s27, 0 }
 0x109   : > { %s3519_s7 = sand.u32 (!%p3882_p5), 1, %s3079_s26   ;;  %p3883_p0 = scmp.ne.s32.totalorder (!%p3882_p5), %s3861_s23, 0 }
 0x10a   : > { %2607 = dma.hbm_to_vmem [thread:$0]  (!%p3881_p11), %s3495_s16, 16, %s607_s10, %s597_s8  }
 0x10b   : > { %615 = sbr.rel (%p3882_p5) target bundleno = 3266 (0xcc2), region = 72  ;;  %s618_s0 = scalar_lea.sflag (!%p3882_p5), [#allocation4], %s3519_s7 }
 0x10c   : > { %s2565_s17 = smul.u32 (!%p3882_p5), 3, %s3519_s7 }
 0x10e   : > { %s3523_s1 = scalar_lea.vmem (!%p3882_p5), [#allocation3], %s2565_s17 }
 0x112   : > { %3054 = dma.done.wait (%p3883_p0), %s618_s0, 48  }
 0x113   : > { %3056 = vsyncadd (%p3883_p0), %s618_s0, 4294967248  ;;  %s3884_s20 = sadd.s32 4294967295, %s3103_s15  }
 0x114   : > { %s626_s27 = sand.u32 1, %s3884_s20  }
 0x115   : > { %s627_s16 = scalar_lea.sflag [#allocation6], %s626_s27 }
 0x116   : > { %3058 = dma.done.wait (%p3883_p0), %s627_s16, 32  }
 0x117   : > { %3060 = vsyncadd (%p3883_p0), %s627_s16, 4294967264  ;;  %s2324_s10 = sshll.u32 %s3519_s7, 1  ;;  %s643_s24 = scalar_lea.sflag [#allocation9], %s626_s27 }
 0x118   : > { %s3538_s21 = scalar_lea.vmem [#allocation8], %s2324_s10 }
 0x119   : > { %3062 = dma.done.wait (%p3883_p0), %s643_s24, 2080  }
 0x11a   : > { %3064 = vsyncadd (%p3883_p0), %s643_s24, 4294965216  ;;  %s2325_s5 = sshll.u32 %s3519_s7, 7  ;;  %s661_s3 = scalar_lea.sflag [#allocation12], %s626_s27 }
 0x11b   : > { %s3545_s14 = scalar_lea.vmem [#allocation10], %s2325_s5 }
 0x11c   : > { %3066 = dma.done.wait (%p3883_p0), %s661_s3, 32  }
 0x11d   : > { %3068 = vsyncadd (%p3883_p0), %s661_s3, 4294967264  ;;  %s677_s13 = scalar_lea.sflag [#allocation15], %s3519_s7 }
 0x11e   : > { %3070 = dma.done.wait (%p3883_p0), %s677_s13, 16  }
 0x11f   : > { %3072 = vsyncadd (%p3883_p0), %s677_s13, 4294967280  ;;  %p773_p3 = scmp.lt.s32.totalorder %s3091_s29, 15  ;;  %p777_p9 = scmp.lt.s32.totalorder %s3087_s28, 1 }
 0x120   : > { %s3885_s27 = sld [smem:[#allocation27_spill]]  ;;  %s3886_s3 = sld [smem:[#allocation31_spill]] }
 0x121   : > { %s3912_s29 = smov (!%p773_p3, %s3091_s29), 15  ;;  %s3887_s25 = sld [smem:[#allocation28_spill]] }
 0x122   : > { %s3563_s18 = scalar_select %p777_p9, %s3087_s28, 1 }
 0x123   : > { %s2326_s17 = sshll.u32 %s3912_s29, 1  ;;  %s3888_s6 = sld [smem:[#allocation30_spill]] }
 0x124   : > { %s2566_s23 = smul.u32 192, %s3563_s18  ;;  %s2417_s10 = sshll.u32 %s3563_s18, 6 }
 0x125   : > { %s2418_s29 = sshll.u32 %s3563_s18, 7  ;;  %s3889_s20 = sld [smem:[#allocation40_spill]] }
 0x126   : > { %s776_s16 = scalar_lea.vmem %s3885_s27, %s2326_s17  ;;  %s789_s13 = scalar_lea.vmem %s3886_s3, %s3563_s18 }
 0x127   : > { %s3577_s8 = scalar_lea.vmem %s3887_s25, %s2566_s23  ;;  %s3890_s24 = sld [smem:[#allocation34_spill]] }
 0x128   : > { %p2333_p10 = scmp.ne.s32.totalorder %s3087_s28, 0 }
 0x129   : > { %s3582_s9 = scalar_lea.vmem %s3888_s6, %s2417_s10  ;;  %v804_v0 = vld [vmem:[%s776_s16] sm:$0x3] (!%p2333_p10) }
 0x12a   : > { %803 = sbr.rel (%p2333_p10) target bundleno = 305 (0x131), region = 108  ;;  %805 = vst [vmem:[#allocation2] sm:$0x3] (!%p2333_p10), %v804_v0 }
 0x12b   : > { %s3588_s27 = scalar_lea.vmem %s3889_s20, %s2326_s17 }
 0x12d   : > { %s3593_s5 = scalar_lea.vmem %s3890_s24, %s2418_s29 }
 0x131 PF: > { %v2681_v1 = vld [vmem:[%s3577_s8 + $0x4] ss:$12 sps:$4 sm:$0xff]   ;;  %v2683_v2 = vld [vmem:[%s3577_s8] ss:$12 sps:$4 sm:$0xff]   ;;  %v3115_v3 = vmov 0   ;;  %v3116_v4 = vmov 0.0   ;;  %v913_v29 = vlaneseq }
 0x132   : > { %1088 = vmatprep.mubr.bf16.mxu0 %v3115_v3  ;;  %2475 = vmatprep.subr.bf16.mxu1 %v3116_v4  ;;  %v2684_v5 = vld [vmem:[%s3577_s8 + $0x1c] ss:$12 sps:$4 sm:$0xff]   ;;  %v2686_v6 = vld [vmem:[%s3577_s8 + $0x18] ss:$12 sps:$4 sm:$0xff]   ;;  %v2687_v7 = vld [vmem:[%s3577_s8 + $0x34] ss:$12 sps:$4 sm:$0xff]  }
 0x133   : > { %1056 = vmatprep.subr.bf16.mxu0 %v2681_v1  ;;  %v2689_v8 = vld [vmem:[%s3577_s8 + $0x30] ss:$12 sps:$4 sm:$0xff]   ;;  %v2690_v9 = vld [vmem:[%s3577_s8 + $0x4c] ss:$12 sps:$4 sm:$0xff]   ;;  %v2692_v10 = vld [vmem:[%s3577_s8 + $0x48] ss:$12 sps:$4 sm:$0xff]  }
 0x134   : > { %1057 = vmatpush1.bf16.msra.mxu0 %v2683_v2  ;;  %v2705_v11 = vld [vmem:[%s3577_s8 + $0x8] ss:$12 sps:$4 sm:$0xff]   ;;  %v2693_v12 = vld [vmem:[%s3577_s8 + $0x64] ss:$12 sps:$4 sm:$0xff]   ;;  %v2706_v13 = vld [vmem:[%s3577_s8 + $0x20] ss:$12 sps:$4 sm:$0xff]  }
 0x135   : > { %1058 = vmatprep.subr.bf16.mxu0 %v2684_v5  ;;  %2476 = vmatpush3.bf16.msra.mxu1 %v2705_v11  ;;  %v2695_v14 = vld [vmem:[%s3577_s8 + $0x60] ss:$12 sps:$4 sm:$0xff]   ;;  %v2696_v15 = vld [vmem:[%s3577_s8 + $0x7c] ss:$12 sps:$4 sm:$0xff]   ;;  %v2698_v16 = vld [vmem:[%s3577_s8 + $0x78] ss:$12 sps:$4 sm:$0xff]  }
 0x136   : > { %2477 = vmatprep.subr.bf16.mxu1 %v3116_v4  ;;  %v2707_v17 = vld [vmem:[%s3577_s8 + $0x38] ss:$12 sps:$4 sm:$0xff]   ;;  %v2699_v18 = vld [vmem:[%s3577_s8 + $0x94] ss:$12 sps:$4 sm:$0xff]   ;;  %v2708_v19 = vld [vmem:[%s3577_s8 + $0x50] ss:$12 sps:$4 sm:$0xff]  }
 0x137   : > { %v2701_v20 = vld [vmem:[%s3577_s8 + $0x90] ss:$12 sps:$4 sm:$0xff]   ;;  %v2702_v21 = vld [vmem:[%s3577_s8 + $0xac] ss:$12 sps:$4 sm:$0xff]   ;;  %v2709_v22 = vld [vmem:[%s3577_s8 + $0x68] ss:$12 sps:$4 sm:$0xff]  }
 0x138   : > { %1059 = vmatpush1.bf16.msra.mxu0 %v2686_v6  ;;  %v2704_v23 = vld [vmem:[%s3577_s8 + $0xa8] ss:$12 sps:$4 sm:$0xff]   ;;  %v3622_v24 = vld [vmem:[#allocation2] sm:$0x3]  ;;  %v2711_v27 = vld [vmem:[%s3577_s8 + $0x98] ss:$12 sps:$4 sm:$0xff]  }
 0x139   : > { %1060 = vmatprep.subr.bf16.mxu0 %v2687_v7  ;;  %2478 = vmatpush3.bf16.msra.mxu1 %v2706_v13  ;;  %v2710_v25 = vld [vmem:[%s3577_s8 + $0x80] ss:$12 sps:$4 sm:$0xff]   ;;  %v911_v26 = vpack.c.bf16 %v3622_v24, %v3622_v24  ;;  %v2712_v28 = vld [vmem:[%s3577_s8 + $0xb0] ss:$12 sps:$4 sm:$0xff]   ;;  %vm3117_vm0 = vmmov 0   ;;  %v3641_v30 = vshrl.u32 %v913_v29, 7 }
 0x13a   : > { %2479 = vmatprep.subr.bf16.mxu1 %v3116_v4  ;;  %2491 = vmatprep.mubr.msk.bf16.mxu1 %vm3117_vm0, %v3116_v4  ;;  %v839_v32 = vld [vmem:[%s3523_s1] sm:$0x7]  ;;  %vm1141_vm1 = vcmask 261120   ;;  %s3118_s2 = smov 96   ;;  %s3119_s6 = smov 64   ;;  %vm1205_vm2 = vcmask 1040384  }
 0x13b   : > { %v915_v31 = vsub.s32 0, %v3641_v30  ;;  %v919_v33 = vsub.s32 1, %v3641_v30  ;;  %s3120_s11 = smov 32   ;;  %v923_v46 = vsub.s32 2, %v3641_v30  ;;  %vm1188_vm3 = vcmask 9216   ;;  %s3892_s1 = scalar_lea.vmem [#allocation5], %s3519_s7 }
 0x13c   : > { %1061 = vmatpush1.bf16.msra.mxu0 %v2689_v8  ;;  %vm1201_vm4 = vcmask 15360   ;;  %vm1595_vm5 = vcmask 523264   ;;  %vm1597_vm6 = vcmask 785408   ;;  %vm1695_vm7 = vcmask 1041408   ;;  %s3893_s19 = scalar_lea.vmem [#allocation7], %s3519_s7  ;;  %s3894_s8 = scalar_lea.vmem [#allocation11], %s3519_s7 }
 0x13d   : > { %1062 = vmatprep.subr.bf16.mxu0 %v2690_v9  ;;  %2480 = vmatpush3.bf16.msra.mxu1 %v2707_v17  ;;  %v916_v34 = vrot.slane %v839_v32, %v915_v31  ;;  %v920_v35 = vrot.slane %v839_v32, %v919_v33  ;;  %v924_v47 = vrot.slane %v839_v32, %v923_v46  ;;  %p2412_p1 = scmp.ne.s32.totalorder %s3087_s28, 1 }
 0x13e   : > { %2481 = vmatprep.subr.bf16.mxu1 %v3116_v4 }
 0x140   : > { %1063 = vmatpush1.bf16.msra.mxu0 %v2692_v10 }
 0x141   : > { %1064 = vmatprep.subr.bf16.mxu0 %v2693_v12  ;;  %2482 = vmatpush3.bf16.msra.mxu1 %v2708_v19 }
 0x142   : > { %2483 = vmatprep.subr.bf16.mxu1 %v3116_v4 }
 0x144   : > { %1065 = vmatpush1.bf16.msra.mxu0 %v2695_v14 }
 0x145   : > { %1066 = vmatprep.subr.bf16.mxu0 %v2696_v15  ;;  %2484 = vmatpush3.bf16.msra.mxu1 %v2709_v22 }
 0x146   : > { %2485 = vmatprep.subr.bf16.mxu1 %v3116_v4 }
 0x148   : > { %1067 = vmatpush1.bf16.msra.mxu0 %v2698_v16 }
 0x149   : > { %1068 = vmatprep.subr.bf16.mxu0 %v2699_v18  ;;  %2486 = vmatpush3.bf16.msra.mxu1 %v2710_v25 }
 0x14a   : > { %2487 = vmatprep.subr.bf16.mxu1 %v3116_v4 }
 0x14c   : > { %1069 = vmatpush1.bf16.msra.mxu0 %v2701_v20 }
 0x14d   : > { %1070 = vmatprep.subr.bf16.mxu0 %v2702_v21  ;;  %2488 = vmatpush3.bf16.msra.mxu1 %v2711_v27 }
 0x14e   : > { %2489 = vmatprep.subr.bf16.mxu1 %v3116_v4 }
 0x150   : > { %1071 = vmatpush1.bf16.msra.mxu0 %v2704_v23 }
 0x151   : > { %2519 = vmatprep.subr.bf16.mxu0 %v3116_v4  ;;  %2490 = vmatpush3.bf16.msra.mxu1 %v2712_v28 }
 0x152   : > { %2495 = vmatprep.subr.bf16.mxu1 %v3116_v4 }
 0x153   : > { %1089 = vmatmul.mubr.bf16.vlgmr.msra.gmra.mrb[0].mxu0 %v911_v26 }
 0x154   : > { %2521 = vmatprep.mubr.msk.bf16.mxu0 %vm3117_vm0, %v3116_v4  ;;  %2492 = vmatmul.mubr.bf16.vlgmr.msra.gmra.mrb[0].mxu1 %v911_v26 }
 0x155   : > { %2497 = vmatprep.mubr.msk.bf16.mxu1 %vm3117_vm0, %v3116_v4 }
 0x226   : > { %v1090_v36 = vpop.f32.mrb[0].mxu0 }
 0x227   : > { %v1091_v37 = vadd.f32 %v1090_v36, %v916_v34  ;;  %v1092_v38 = vpop.f32.mrb[1].mxu0  ;;  %v1131_v48 = vpop.f32.mrb[0].mxu1 }
 0x228   : > { %v1093_v39 = vadd.f32 %v1092_v38, %v920_v35  ;;  %v1094_v40 = vpop.f32.mrb[2].mxu0  ;;  %v1132_v49 = vadd.f32 %v1131_v48, %v924_v47  ;;  %v2493_v50 = vpop.f32.mrb[1].mxu1 }
 0x229   : > { %v1095_v41 = vpop.f32.mrb[3].mxu0  ;;  %v1137_v42 = vmul.f32 0.17677669, %v1091_v37  ;;  %v1134_v51 = vpop.f32.mrb[2].mxu1 }
 0x22a   : > { %v1139_v43 = vpack.c.bf16 %v1093_v39, %v1093_v39  ;;  %v3661_v52 = vpack.c.bf16 %v1132_v49, %v1132_v49  ;;  %v2494_v53 = vpop.f32.mrb[3].mxu1 }
 0x22b   : > { %v1138_v45 = vpack.c.bf16 %v1137_v42, %v1137_v42 }
 0x22c   : > { %1253 = vrot.lane.b32.xlu1 %v1139_v43, %s3118_s2  ;;  %v1146_v44 = vsel %vm1141_vm1, %v1139_v43, 0  ;;  %v1207_v54 = vsel %vm1205_vm2, %v3661_v52, 0 }
 0x22d   : > { %2496 = vmatpush3.bf16.xpose.msra.mxu1 %v1146_v44 }
 0x22e   : > { %2501 = vmatprep.subr.bf16.mxu1 %v3116_v4 }
 0x230   : > { %1250 = vrot.lane.b32.xlu1 %v1138_v45, %s3118_s2 }
 0x234   : > { %1362 = vrot.lane.b32.xlu1 %v1138_v45, %s3119_s6  ;;  %2498 = vmatmul.mubr.msk.bf16.vlgmr.msra.gmra.mrb[4].mxu1 %vm1141_vm1, %v1138_v45 }
 0x235   : > { %2503 = vmatprep.mubr.msk.bf16.mxu1 %vm3117_vm0, %v3116_v4  ;;  %2502 = vmatpush3.bf16.msra.mxu1 %v1207_v54 }
 0x236   : > { %2507 = vmatprep.subr.bf16.mxu1 %v3116_v4 }
 0x238   : > { %1474 = vrot.lane.b32.xlu1 %v1139_v43, %s3120_s11 }
 0x23c   : > { %1472 = vrot.lane.b32.xlu1 %v1138_v45, %s3120_s11 }
 0x29e   : > { %v1254_v1 = vpop.permute.xlu1 %1253 }
 0x29f   : > { %v1259_v14 = vsel %vm1141_vm1, %v1254_v1, 0 }
 0x2a2   : > { %v1251_v2 = vpop.permute.xlu1 %1250 }
 0x2a6   : > { %v1363_v6 = vpop.permute.xlu1 %1362 }
 0x2aa   : > { %v1475_v9 = vpop.permute.xlu1 %1474 }
 0x2ab   : > { %v1480_v12 = vsel %vm1141_vm1, %v1475_v9, 0 }
 0x2ae   : > { %v1473_v15 = vpop.permute.xlu1 %1472 }
 0x307   : > { %v1182_v55 = vpop.f32.mrb[4].mxu1 }
 0x308   : > { %v2499_v56 = vpop.f32.mrb[5].mxu1  ;;  %v1189_v57 = vsel %vm1188_vm3, %v1182_v55, -inf }
 0x309   : > { %1190 = vmax.xlane.f32.xlu0 %v1189_v57  ;;  %v1185_v58 = vpop.f32.mrb[6].mxu1 }
 0x30a   : > { %v2500_v59 = vpop.f32.mrb[7].mxu1 }
 0x396   : > { %v1191_v60 = vpop.xlane.xlu0 %1190 }
 0x397   : > { %v1192_v61 = vsub.f32 %v1182_v55, %v1191_v60 }
 0x399   : > { %v1193_v62 = vmul.f32 1.442695, %v1192_v61 }
 0x39b   : > { %2761 = vpow2.f32 %v1193_v62 }
 0x3a5   : > { %v2762_v63 = vpop.eup %2761 }
 0x3a6   : > { %v1195_v0 = vsel %vm1188_vm3, %v2762_v63, 0.0 }
 0x3a7   : > { %1196 = vadd.xlane.f32.xlu0 %v1195_v0 }
 0x3bd   : > { %1364 = vrot.lane.b32.xlu0 %v1139_v43, %s3119_s6 }
 0x434   : > { %v1197_v5 = vpop.xlane.xlu0 %1196 }
 0x435   : > { %2763 = vrcp.f32 %v1197_v5 }
 0x438   : > { %v1365_v7 = vpop.permute.xlu0 %1364 }
 0x439   : > { %v1370_v8 = vsel %vm1141_vm1, %v1365_v7, 0 }
 0x43a   : > { %2520 = vmatpush3.bf16.xpose.msra.mxu0 %v1370_v8 }
 0x43b   : > { %2531 = vmatprep.subr.bf16.mxu0 %v3116_v4 }
 0x43f   : > { %v2764_v10 = vpop.eup %2763 }
 0x440   : > { %v1199_v11 = vmul.f32 %v2764_v10, %v2762_v63  ;;  %v2713_v10 = vld [vmem:[%s3582_s9] sm:$0xff]  }
 0x441   : > { %2522 = vmatmul.mubr.msk.bf16.vlgmr.msra.gmra.mrb[4].mxu0 %vm1141_vm1, %v1363_v6 }
 0x442   : > { %2532 = vmatpush3.bf16.xpose.msra.mxu0 %v1480_v12  ;;  %v1200_v13 = vpack.c.bf16 %v1199_v11, %v1199_v11  ;;  %2533 = vmatprep.mubr.msk.bf16.mxu0 %vm3117_vm0, %v3116_v4  ;;  %v2714_v11 = vld [vmem:[%s3582_s9 + $0x8] sm:$0xff]   ;;  %v2715_v12 = vld [vmem:[%s3582_s9 + $0x10] sm:$0xff]  }
 0x443   : > { %2543 = vmatprep.subr.bf16.mxu0 %v3116_v4 }
 0x444   : > { %2504 = vmatmul.mubr.msk.bf16.vlgmr.msra.gmra.mrb[8].mxu1 %vm1201_vm4, %v1200_v13  ;;  %v2716_v13 = vld [vmem:[%s3582_s9 + $0x18] sm:$0xff]  }
 0x445   : > { %2508 = vmatpush3.bf16.xpose.msra.mxu1 %v1259_v14  ;;  %2509 = vmatprep.mubr.msk.bf16.mxu1 %vm3117_vm0, %v3116_v4  ;;  %v2717_v14 = vld [vmem:[%s3582_s9 + $0x20] sm:$0xff]  }
 0x446   : > { %2513 = vmatprep.subr.bf16.mxu1 %v3116_v4 }
 0x449   : > { %2534 = vmatmul.mubr.msk.bf16.vlgmr.msra.gmra.mrb[8].mxu0 %vm1141_vm1, %v1473_v15  ;;  %v2719_v15 = vld [vmem:[%s3582_s9 + $0x30] sm:$0xff]  }
 0x44a   : > { %2559 = vmatprep.mubr.msk.bf16.mxu0 %vm3117_vm0, %v3116_v4  ;;  %2544 = vmatpush3.bf16.msra.mxu0 %v2713_v10  ;;  %v2750_v10 = vld [vmem:[%s3545_s14 + $0x10] sm:$0xff]  }
 0x44b   : > { %2545 = vmatprep.subr.bf16.mxu0 %v3116_v4 }
 0x44c   : > { %2510 = vmatmul.mubr.msk.bf16.vlgmr.msra.gmra.mrb[12].mxu1 %vm1141_vm1, %v1251_v2 }
 0x44d   : > { %2515 = vmatprep.mubr.msk.bf16.mxu1 %vm3117_vm0, %v3116_v4 }
 0x44e   : > { %2546 = vmatpush3.bf16.msra.mxu0 %v2714_v11  ;;  %v2751_v11 = vld [vmem:[%s3545_s14 + $0x58] sm:$0xff]  }
 0x44f   : > { %2547 = vmatprep.subr.bf16.mxu0 %v3116_v4 }
 0x452   : > { %2548 = vmatpush3.bf16.msra.mxu0 %v2715_v12  ;;  %v2752_v12 = vld [vmem:[%s3545_s14 + $0x18] sm:$0xff]  }
 0x453   : > { %2549 = vmatprep.subr.bf16.mxu0 %v3116_v4 }
 0x456   : > { %2550 = vmatpush3.bf16.msra.mxu0 %v2716_v13  ;;  %v2753_v13 = vld [vmem:[%s3545_s14 + $0x60] sm:$0xff]  }
 0x457   : > { %2551 = vmatprep.subr.bf16.mxu0 %v3116_v4 }
 0x45a   : > { %2552 = vmatpush3.bf16.msra.mxu0 %v2717_v14  ;;  %v2754_v14 = vld [vmem:[%s3545_s14 + $0x20] sm:$0xff]  }
 0x45b   : > { %2553 = vmatprep.subr.bf16.mxu0 %v3116_v4 }
 0x514   : > { %v1406_v16 = vpop.f32.mrb[4].mxu0 }
 0x515   : > { %v2523_v17 = vpop.f32.mrb[5].mxu0  ;;  %v1412_v18 = vsel %vm1188_vm3, %v1406_v16, -inf }
 0x516   : > { %1413 = vmax.xlane.f32.xlu0 %v1412_v18  ;;  %v1409_v19 = vpop.f32.mrb[6].mxu0 }
 0x517   : > { %v3688_v20 = vpop.f32.mrb[8].mxu1  ;;  %v2524_v21 = vpop.f32.mrb[7].mxu0 }
 0x518   : > { %v2505_v22 = vpop.f32.mrb[9].mxu1  ;;  %v2720_v21 = vld [vmem:[%s3582_s9 + $0x38] sm:$0xff]  }
 0x519   : > { %v1246_v23 = vpop.f32.mrb[10].mxu1 }
 0x51a   : > { %v2506_v25 = vpop.f32.mrb[11].mxu1 }
 0x51c   : > { %v1516_v26 = vpop.f32.mrb[8].mxu0 }
 0x51d   : > { %v2535_v27 = vpop.f32.mrb[9].mxu0  ;;  %v1522_v38 = vsel %vm1188_vm3, %v1516_v26, -inf }
 0x51e   : > { %v1519_v28 = vpop.f32.mrb[10].mxu0 }
 0x51f   : > { %v1295_v29 = vpop.f32.mrb[12].mxu1  ;;  %v2536_v32 = vpop.f32.mrb[11].mxu0 }
 0x520   : > { %v2511_v34 = vpop.f32.mrb[13].mxu1  ;;  %v1301_v35 = vsel %vm1188_vm3, %v1295_v29, -inf }
 0x521   : > { %1302 = vmax.xlane.f32.xlu1 %v1301_v35  ;;  %v1298_v36 = vpop.f32.mrb[14].mxu1 }
 0x522   : > { %v2512_v37 = vpop.f32.mrb[15].mxu1 }
 0x525   : > { %1523 = vmax.xlane.f32.xlu1 %v1522_v38 }
 0x5a3   : > { %v1414_v39 = vpop.xlane.xlu0 %1413 }
 0x5a4   : > { %v1415_v40 = vsub.f32 %v1406_v16, %v1414_v39 }
 0x5a6   : > { %v1416_v41 = vmul.f32 1.442695, %v1415_v40  ;;  %v2366_v40 = vld [vmem:[%s789_s13] ss:$0 sm:$0xff] }
 0x5a8   : > { %2765 = vpow2.f32 %v1416_v41 }
 0x5ae   : > { %v1303_v42 = vpop.xlane.xlu1 %1302 }
 0x5af   : > { %v1304_v43 = vsub.f32 %v1295_v29, %v1303_v42 }
 0x5b1   : > { %v1305_v48 = vmul.f32 1.442695, %v1304_v43 }
 0x5b2   : > { %v2766_v44 = vpop.eup %2765  ;;  %v1524_v45 = vpop.xlane.xlu1 %1523 }
 0x5b3   : > { %v1525_v46 = vsub.f32 %v1516_v26, %v1524_v45  ;;  %v1418_v47 = vsel %vm1188_vm3, %v2766_v44, 0.0 }
 0x5b4   : > { %1419 = vadd.xlane.f32.xlu0 %v1418_v47  ;;  %v2721_v47 = vld [vmem:[%s3593_s5] ss:$8 sps:$4 sm:$0xff]  }
 0x5b5   : > { %v1526_v49 = vmul.f32 1.442695, %v1525_v46 }
 0x5b7   : > { %2767 = vpow2.f32 %v1526_v49  ;;  %v2726_v49 = vld [vmem:[%s3593_s5 + $0x14] ss:$8 sps:$4 sm:$0xff]  }
 0x5b8   : > { %2769 = vpow2.f32 %v1305_v48  ;;  %v2723_v48 = vld [vmem:[%s3593_s5 + $0x4] ss:$8 sps:$4 sm:$0xff]  }
 0x5c1   : > { %v2768_v50 = vpop.eup %2767 }
 0x5c2   : > { %v1528_v51 = vsel %vm1188_vm3, %v2768_v50, 0.0  ;;  %v2770_v53 = vpop.eup %2769 }
 0x5c3   : > { %1529 = vadd.xlane.f32.xlu1 %v1528_v51  ;;  %v1307_v54 = vsel %vm1188_vm3, %v2770_v53, 0.0  ;;  %v2729_v51 = vld [vmem:[%s3593_s5 + $0x24] ss:$8 sps:$4 sm:$0xff]  }
 0x5c7   : > { %1308 = vadd.xlane.f32.xlu1 %v1307_v54 }
 0x5ca   : > { %1314 = vrot.lane.b32.xlu0 %v3661_v52, %s3118_s2 }
 0x5d8   : > { %1424 = vrot.lane.b32.xlu1 %v3661_v52, %s3119_s6 }
 0x5dc   : > { %1534 = vrot.lane.b32.xlu1 %v3661_v52, %s3120_s11 }
 0x641   : > { %v1420_v55 = vpop.xlane.xlu0 %1419 }
 0x645   : > { %v1315_v56 = vpop.permute.xlu0 %1314 }
 0x646   : > { %v1320_v57 = vsel %vm1205_vm2, %v1315_v56, 0 }
 0x647   : > { %2514 = vmatpush3.bf16.msra.mxu1 %v1320_v57 }
 0x648   : > { %2525 = vmatprep.subr.bf16.mxu1 %v3116_v4 }
 0x650   : > { %v1530_v58 = vpop.xlane.xlu1 %1529 }
 0x654   : > { %v1309_v59 = vpop.xlane.xlu1 %1308 }
 0x655   : > { %2771 = vrcp.f32 %v1309_v59  ;;  %v2730_v59 = vld [vmem:[%s3593_s5 + $0x30] ss:$8 sps:$4 sm:$0xff]  }
 0x656   : > { %2773 = vrcp.f32 %v1420_v55 }
 0x657   : > { %2775 = vrcp.f32 %v1530_v58  ;;  %v2732_v58 = vld [vmem:[%s3593_s5 + $0x34] ss:$8 sps:$4 sm:$0xff]  }
 0x658   : > { %v1425_v62 = vpop.permute.xlu1 %1424 }
 0x659   : > { %v1430_v1 = vsel %vm1205_vm2, %v1425_v62, 0  ;;  %v2738_v62 = vld [vmem:[%s3593_s5 + $0x54] ss:$8 sps:$4 sm:$0xff]  }
 0x65c   : > { %v1535_v2 = vpop.permute.xlu1 %1534 }
 0x65d   : > { %v1540_v7 = vsel %vm1205_vm2, %v1535_v2, 0  ;;  %v2742_v2 = vld [vmem:[%s3593_s5 + $0x70] ss:$8 sps:$4 sm:$0xff]  }
 0x65f   : > { %v2772_v60 = vpop.eup %2771 }
 0x660   : > { %v1311_v61 = vmul.f32 %v2772_v60, %v2770_v53  ;;  %v2774_v0 = vpop.eup %2773  ;;  %v2727_v53 = vld [vmem:[%s3593_s5 + $0x20] ss:$8 sps:$4 sm:$0xff]   ;;  %v2735_v60 = vld [vmem:[%s3593_s5 + $0x44] ss:$8 sps:$4 sm:$0xff]  }
 0x661   : > { %v1422_v52 = vmul.f32 %v2774_v0, %v2766_v44  ;;  %v2776_v6 = vpop.eup %2775  ;;  %v2741_v0 = vld [vmem:[%s3593_s5 + $0x64] ss:$8 sps:$4 sm:$0xff]  }
 0x662   : > { %v1312_v63 = vpack.c.bf16 %v1311_v61, %v1311_v61  ;;  %v1532_v8 = vmul.f32 %v2776_v6, %v2768_v50  ;;  %v2724_v50 = vld [vmem:[%s3593_s5 + $0x10] ss:$8 sps:$4 sm:$0xff]   ;;  %v2733_v61 = vld [vmem:[%s3593_s5 + $0x40] ss:$8 sps:$4 sm:$0xff]  }
 0x663   : > { %v1423_v5 = vpack.c.bf16 %v1422_v52, %v1422_v52  ;;  %v2744_v52 = vld [vmem:[%s3593_s5 + $0x74] ss:$8 sps:$4 sm:$0xff]  }
 0x664   : > { %2516 = vmatmul.mubr.msk.bf16.vlgmr.msra.gmra.mrb[16].mxu1 %vm1201_vm4, %v1312_v63  ;;  %v1533_v9 = vpack.c.bf16 %v1532_v8, %v1532_v8  ;;  %v2736_v63 = vld [vmem:[%s3593_s5 + $0x50] ss:$8 sps:$4 sm:$0xff]  }
 0x665   : > { %2526 = vmatpush3.bf16.msra.mxu1 %v1430_v1  ;;  %2527 = vmatprep.mubr.msk.bf16.mxu1 %vm3117_vm0, %v3116_v4  ;;  %v2739_v1 = vld [vmem:[%s3593_s5 + $0x60] ss:$8 sps:$4 sm:$0xff]   ;;  %v2746_v6 = vld [vmem:[%s3545_s14] sm:$0xff]   ;;  %v2748_v8 = vld [vmem:[%s3545_s14 + $0x8] sm:$0xff]  }
 0x666   : > { %2537 = vmatprep.subr.bf16.mxu1 %v3116_v4 }
 0x66c   : > { %2528 = vmatmul.mubr.msk.bf16.vlgmr.msra.gmra.mrb[20].mxu1 %vm1201_vm4, %v1423_v5  ;;  %v2745_v5 = vld [vmem:[%s3545_s14 + $0x40] sm:$0xff]  }
 0x66d   : > { %2538 = vmatpush3.bf16.msra.mxu1 %v1540_v7  ;;  %2539 = vmatprep.mubr.msk.bf16.mxu1 %vm3117_vm0, %v3116_v4  ;;  %v2747_v7 = vld [vmem:[%s3545_s14 + $0x48] sm:$0xff]  }
 0x66e   : > { %1816 = vmatprep.subr.bf16.mxu1 %v2723_v48 }
 0x674   : > { %2540 = vmatmul.mubr.msk.bf16.vlgmr.msra.gmra.mrb[24].mxu1 %vm1201_vm4, %v1533_v9  ;;  %v2749_v9 = vld [vmem:[%s3545_s14 + $0x50] sm:$0xff]  }
 0x675   : > { %1848 = vmatprep.mubr.bf16.mxu1 %v3115_v3  ;;  %v2718_v3 = vld [vmem:[%s3582_s9 + $0x28] sm:$0xff]   ;;  %1817 = vmatpush1.bf16.msra.mxu1 %v2721_v47  ;;  %v2393_v47 = vld [vmem:[%s3894_s8] ss:$0 sm:$0xff] }
 0x676   : > { %2554 = vmatpush3.bf16.msra.mxu0 %v2718_v3  ;;  %1818 = vmatprep.subr.bf16.mxu1 %v2726_v49  ;;  %v2755_v3 = vld [vmem:[%s3545_s14 + $0x68] sm:$0xff]  }
 0x677   : > { %2555 = vmatprep.subr.bf16.mxu0 %v3116_v4 }
 0x679   : > { %1819 = vmatpush1.bf16.msra.mxu1 %v2724_v50 }
 0x67a   : > { %2556 = vmatpush3.bf16.msra.mxu0 %v2719_v15  ;;  %1820 = vmatprep.subr.bf16.mxu1 %v2729_v51  ;;  %v2756_v15 = vld [vmem:[%s3545_s14 + $0x28] sm:$0xff]  }
 0x67b   : > { %2557 = vmatprep.subr.bf16.mxu0 %v3116_v4 }
 0x67d   : > { %1821 = vmatpush1.bf16.msra.mxu1 %v2727_v53 }
 0x67e   : > { %2558 = vmatpush3.bf16.msra.mxu0 %v2720_v21  ;;  %1822 = vmatprep.subr.bf16.mxu1 %v2732_v58  ;;  %v2375_v21 = vld [vmem:[%s3892_s1] ss:$0 sm:$0xff] }
 0x67f   : > { %2453 = vmatprep.subr.bf16.mxu0 %v2745_v5 }
 0x681   : > { %1823 = vmatpush1.bf16.msra.mxu1 %v2730_v59 }
 0x682   : > { %1824 = vmatprep.subr.bf16.mxu1 %v2735_v60 }
 0x685   : > { %1825 = vmatpush1.bf16.msra.mxu1 %v2733_v61 }
 0x686   : > { %1826 = vmatprep.subr.bf16.mxu1 %v2738_v62 }
 0x689   : > { %1827 = vmatpush1.bf16.msra.mxu1 %v2736_v63 }
 0x68a   : > { %1828 = vmatprep.subr.bf16.mxu1 %v2741_v0 }
 0x68d   : > { %1829 = vmatpush1.bf16.msra.mxu1 %v2739_v1 }
 0x68e   : > { %1830 = vmatprep.subr.bf16.mxu1 %v2744_v52 }
 0x691   : > { %1831 = vmatpush1.bf16.msra.mxu1 %v2742_v2 }
 0x737   : > { %v1356_v16 = vpop.f32.mrb[16].mxu1 }
 0x738   : > { %1583 = vrot.lane.b32.xlu0 %v1356_v16, %s3120_s11  ;;  %v2517_v17 = vpop.f32.mrb[17].mxu1 }
 0x739   : > { %v1359_v18 = vpop.f32.mrb[18].mxu1 }
 0x73a   : > { %v2518_v19 = vpop.f32.mrb[19].mxu1 }
 0x73f   : > { %v1466_v22 = vpop.f32.mrb[20].mxu1 }
 0x740   : > { %1587 = vrot.lane.b32.xlu1 %v1466_v22, %s3119_s6  ;;  %v2529_v23 = vpop.f32.mrb[21].mxu1 }
 0x741   : > { %v1469_v25 = vpop.f32.mrb[22].mxu1  ;;  %v2376_v23 = vld [vmem:[%s3893_s19] ss:$0 sm:$0xff] }
 0x742   : > { %v2530_v26 = vpop.f32.mrb[23].mxu1 }
 0x747   : > { %v1576_v27 = vpop.f32.mrb[24].mxu1 }
 0x748   : > { %1591 = vrot.lane.b32.xlu0 %v1576_v27, %s3118_s2  ;;  %v2541_v28 = vpop.f32.mrb[25].mxu1 }
 0x749   : > { %v1579_v29 = vpop.f32.mrb[26].mxu1  ;;  %v2757_v28 = vld [vmem:[%s3545_s14 + $0x70] sm:$0xff]  }
 0x74a   : > { %v2542_v32 = vpop.f32.mrb[27].mxu1  ;;  %v2758_v29 = vld [vmem:[%s3545_s14 + $0x30] sm:$0xff]  }
 0x74b   : > { %v2759_v32 = vld [vmem:[%s3545_s14 + $0x78] sm:$0xff]  }
 0x7aa   : > { %v1584_v34 = vpop.permute.xlu0 %1583 }
 0x7ab   : > { %v1594_v4 = vsel %vm1141_vm1, %v3688_v20, %v1584_v34  ;;  %v2760_v34 = vld [vmem:[%s3545_s14 + $0x38] sm:$0xff]   ;;  %s3896_s14 = scalar_lea.vmem [#allocation14], %s3519_s7 }
 0x7ac   : > { %v2411_v63 = vld [vmem:[%s3896_s14] ss:$0 sm:$0xff] }
 0x7b2   : > { %v1588_v35 = vpop.permute.xlu1 %1587 }
 0x7b3   : > { %v1596_v36 = vsel %vm1595_vm5, %v1594_v4, %v1588_v35  ;;  %v875_v35 = vld [vmem:[%s3538_s21] sm:$0x3]  ;;  %s3895_s21 = scalar_lea.vmem [#allocation13], %s3519_s7 }
 0x7b4   : > { %v1729_v4 = vrot.slane %v875_v35, %v915_v31  ;;  %v2410_v61 = vld [vmem:[%s3895_s21] ss:$0 sm:$0xff] }
 0x7ba   : > { %v1592_v37 = vpop.permute.xlu0 %1591 }
 0x7bb   : > { %v1598_v38 = vsel %vm1597_vm6, %v1596_v36, %v1592_v37  ;;  %v1733_v36 = vrot.slane %v875_v35, %v919_v33 }
 0x7bc   : > { %v1599_v39 = vpack.c.bf16 %v1598_v38, %v1598_v38 }
 0x7be   : > { %2560 = vmatmul.mubr.bf16.vlgmr.msra.gmra.mrb[12].mxu0 %v1599_v39 }
 0x7bf   : > { %2454 = vmatpush3.bf16.msra.mxu0 %v2746_v6 }
 0x7c0   : > { %2455 = vmatprep.subr.bf16.mxu0 %v2747_v7 }
 0x7c3   : > { %2456 = vmatpush3.bf16.msra.mxu0 %v2748_v8 }
 0x7c4   : > { %2457 = vmatprep.subr.bf16.mxu0 %v2749_v9 }
 0x7c7   : > { %2458 = vmatpush3.bf16.msra.mxu0 %v2750_v10 }
 0x7c8   : > { %2459 = vmatprep.subr.bf16.mxu0 %v2751_v11 }
 0x7cb   : > { %2460 = vmatpush3.bf16.msra.mxu0 %v2752_v12 }
 0x7cc   : > { %2461 = vmatprep.subr.bf16.mxu0 %v2753_v13 }
 0x7cf   : > { %2462 = vmatpush3.bf16.msra.mxu0 %v2754_v14 }
 0x7d0   : > { %2463 = vmatprep.subr.bf16.mxu0 %v2755_v3 }
 0x7d3   : > { %2464 = vmatpush3.bf16.msra.mxu0 %v2756_v15 }
 0x7d4   : > { %2465 = vmatprep.subr.bf16.mxu0 %v2757_v28 }
 0x7d7   : > { %2466 = vmatpush3.bf16.msra.mxu0 %v2758_v29 }
 0x7d8   : > { %2467 = vmatprep.subr.bf16.mxu0 %v2759_v32 }
 0x7db   : > { %2468 = vmatpush3.bf16.msra.mxu0 %v2760_v34 }
 0x891   : > { %v1688_v41 = vpop.f32.mrb[12].mxu0 }
 0x892   : > { %v1689_v42 = vadd.f32 %v2366_v40, %v1688_v41  ;;  %v2561_v43 = vpop.f32.mrb[13].mxu0 }
 0x893   : > { %v1691_v20 = vpop.f32.mrb[14].mxu0 }
 0x894   : > { %v2562_v44 = vpop.f32.mrb[15].mxu0  ;;  %v1694_v45 = vadd.f32 %v1689_v42, %v3622_v24 }
 0x896   : > { %v1696_v46 = vsel %vm1695_vm7, %v1694_v45, 0.0 }
 0x897   : > { %1697 = vadd.xlane.f32.xlu1 %v1696_v46 }
 0x924   : > { %v1698_v24 = vpop.xlane.xlu1 %1697 }
 0x925   : > { %v1700_v54 = vmul.f32 0.0078125, %v1698_v24 }
 0x927   : > { %v1701_v55 = vsub.f32 %v1694_v45, %v1700_v54 }
 0x929   : > { %v1702_v56 = vmul.f32 %v1701_v55, %v1701_v55 }
 0x92b   : > { %v1703_v57 = vsel %vm1695_vm7, %v1702_v56, 0.0 }
 0x92c   : > { %1704 = vadd.xlane.f32.xlu0 %v1703_v57 }
 0x9b9   : > { %v1705_v16 = vpop.xlane.xlu0 %1704 }
 0x9ba   : > { %v1706_v17 = vmul.f32 0.0078125, %v1705_v16 }
 0x9bc   : > { %v1707_v18 = vadd.f32 1e-05, %v1706_v17 }
 0x9be   : > { %2777 = vrsqrt.f32 %v1707_v18 }
 0x9c8   : > { %v2778_v19 = vpop.eup %2777 }
 0x9c9   : > { %v1709_v22 = vmul.f32 %v2778_v19, %v1701_v55 }
 0x9cb   : > { %v1716_v25 = vmul.f32 %v2375_v21, %v1709_v22 }
 0x9cd   : > { %v1723_v26 = vadd.f32 %v2376_v23, %v1716_v25 }
 0x9cf   : > { %v1724_v27 = vpack.c.bf16 %v1723_v26, %v1723_v26 }
 0x9d1   : > { %1849 = vmatmul.mubr.bf16.vlgmr.msra.gmra.mrb[28].mxu1 %v1724_v27 }
 0xaa4   : > { %v1850_v37 = vpop.f32.mrb[28].mxu1 }
 0xaa5   : > { %v1851_v38 = vadd.f32 %v1850_v37, %v1729_v4  ;;  %v1852_v39 = vpop.f32.mrb[29].mxu1 }
 0xaa6   : > { %v1853_v40 = vadd.f32 %v1852_v39, %v1733_v36  ;;  %v1854_v41 = vpop.f32.mrb[30].mxu1 }
 0xaa7   : > { %v1857_v42 = vmax.f32 %v1851_v38, 0.0  ;;  %v1855_v43 = vpop.f32.mrb[31].mxu1 }
 0xaa8   : > { %v1858_v20 = vmax.f32 %v1853_v40, 0.0 }
 0xaa9   : > { %v1859_v45 = vpack.c.bf16 %v1857_v42, %v1857_v42 }
 0xaaa   : > { %v1860_v44 = vpack.c.bf16 %v1858_v20, %v1858_v20 }
 0xaac   : > { %1995 = vmatprep.mubr.bf16.mxu0 %v1860_v44 }
 0xaad   : > { %1996 = vmatmul.mubr.bf16.vlgmr.msra.gmra.mrb[16].mxu0 %v1859_v45 }
 0xb80   : > { %v2469_v46 = vpop.f32.mrb[16].mxu0 }
 0xb81   : > { %v2470_v48 = vpop.f32.mrb[17].mxu0 }
 0xb82   : > { %v2471_v31 = vadd.f32 %v2470_v48, %v2469_v46  ;;  %v2472_v49 = vpop.f32.mrb[18].mxu0 }
 0xb83   : > { %v2473_v30 = vpop.f32.mrb[19].mxu0 }
 0xb84   : > { %v1998_v33 = vadd.f32 %v2471_v31, %v2393_v47 }
 0xb86   : > { %v2003_v50 = vadd.f32 %v1998_v33, %v1723_v26 }
 0xb88   : > { %v2004_v51 = vsel %vm1695_vm7, %v2003_v50, 0.0 }
 0xb89   : > { %2005 = vadd.xlane.f32.xlu0 %v2004_v51 }
 0xc16   : > { %v2006_v53 = vpop.xlane.xlu0 %2005 }
 0xc17   : > { %v2007_v24 = vmul.f32 0.0078125, %v2006_v53 }
 0xc19   : > { %v2008_v54 = vsub.f32 %v2003_v50, %v2007_v24 }
 0xc1b   : > { %v2009_v55 = vmul.f32 %v2008_v54, %v2008_v54 }
 0xc1d   : > { %v2010_v56 = vsel %vm1695_vm7, %v2009_v55, 0.0 }
 0xc1e   : > { %2011 = vadd.xlane.f32.xlu1 %v2010_v56 }
 0xcab   : > { %v2012_v57 = vpop.xlane.xlu1 %2011 }
 0xcac   : > { %v2013_v58 = vmul.f32 0.0078125, %v2012_v57 }
 0xcae   : > { %v2014_v59 = vadd.f32 1e-05, %v2013_v58 }
 0xcb0   : > { %2779 = vrsqrt.f32 %v2014_v59 }
 0xcba   : > { %v2780_v60 = vpop.eup %2779 }
 0xcbb   : > { %v2016_v62 = vmul.f32 %v2780_v60, %v2008_v54  ;;  %2035 = sbr.rel (%p2412_p1) target bundleno = 3266 (0xcc2), region = 112 }
 0xcbd   : > { %v2023_v0 = vmul.f32 %v2410_v61, %v2016_v62 }
 0xcbf   : > { %v2030_v1 = vadd.f32 %v2411_v63, %v2023_v0 }
 0xcc1   : > { %2031 = vst [vmem:[#allocation2] sm:$0x3] %v2030_v1  ;;  %2036 = vst [vmem:[%s3588_s27] sm:$0x3] (!%p2412_p1), %v2030_v1 }
 0xcc2 PF: > { %s38_s15 = sadd.s32 1, %s3103_s15   ;;  %s3897_s22 = sld [smem:[#allocation21_spill]] }
 0xcc3   : > { %p35_p8 = scmp.ge.s32.totalorder %s38_s15, 34   ;;  %s3898_s27 = sld [smem:[#allocation26_spill]] }
 0xcc4   : > { %s3899_s28 = sld [smem:[#allocation22_spill]]  ;;  %s3900_s29 = sld [smem:[#allocation23_spill]] }
 0xcc5   : > { %s3901_s30 = sld [smem:[#allocation24_spill]]  ;;  %s3902_s14 = sld [smem:[#allocation25_spill]] }
 0xcc6   : > { %s3903_s25 = smov %s3079_s26  ;;  %37 = sbr.rel (!%p35_p8) target bundleno = 28 (0x1c), region = 220 }
 0xcc8   : > { %s3904_s26 = smov %s3897_s22 }
 0xccd   :  { %2056 = vsyncpa [#allocation4], 1 }
 0xcce   :  { %2058 = vsyncpa [#allocation4 + $0x1], 1 }
 0xccf   :  { %2059 = vsyncpa [#allocation6], 1 }
 0xcd0   :  { %2061 = vsyncpa [#allocation6 + $0x1], 1 }
 0xcd1   :  { %2062 = vsyncpa [#allocation9], 1 }
 0xcd2   :  { %2064 = vsyncpa [#allocation9 + $0x1], 1 }
 0xcd3   :  { %2065 = vsyncpa [#allocation12], 1 }
 0xcd4   :  { %2067 = vsyncpa [#allocation12 + $0x1], 1 }
 0xcd5   :  { %2068 = vsyncpa [#allocation15], 1 }
 0xcd6   :  { %2070 = vsyncpa [#allocation15 + $0x1], 1 }

// kernel: forward.9
= control target key start
LH: loop header
LB: loop body
LE: loop exit
PB: predicated region body
PF: predicated region fallthrough
CT: control target
= control target key end

     0   :  { %s663_s18 = smov 0   ;;  %s665_s19 = smov 0   ;;  %s733_s0 = inlined_call_operand.vmem [shape: f32[2,8,128], index: 0, kind: input, shape index: {}]   ;;  %s734_s1 = inlined_call_operand.vmem [shape: f32[1,128], index: 1, kind: input, shape index: {}]   ;;  %s735_s2 = inlined_call_operand.vmem [shape: f32[1,128], index: 2, kind: input, shape index: {}]   ;;  %s736_s3 = inlined_call_operand.vmem [shape: bf16[128,128], index: 3, kind: input, shape index: {}]   ;;  %s737_s4 = inlined_call_operand.vmem [shape: f32[1,128], index: 4, kind: input, shape index: {}]   ;;  %s738_s5 = inlined_call_operand.vmem [shape: bf16[2,8,128], index: 5, kind: output, shape index: {}]  }
   0x1   :  { %s667_s20 = smov 0  }
   0x2 LB: > { %s27_s21 = sadd.s32 1, %s625_s19  ;;  %p526_p0 = scmp.ge.s32.totalorder %s629_s20, 1  ;;  %s629_s20 = sphi %s667_s20, %s15_s20   ;;  %s625_s19 = sphi %s665_s19, %s740_s19   ;;  %s621_s18 = sphi %s663_s18, %s739_s18  }
   0x3   : > { %p29_p1 = scmp.ge.s32.totalorder %s27_s21, 2  ;;  %p217_p2 = scmp.lt.s32.totalorder %s629_s20, 3 }
   0x5   : > { %s742_s21 = smov (%p29_p1, %s27_s21), 0  ;;  %p218_p3 = pnand %p526_p0, %p217_p2 }
   0x6   : > { %p253_p4 = scmp.lt.s32.totalorder (!%p218_p3), %s621_s18, 1  ;;  %v631_v1 = vmov (!%p218_p3), 0.0   ;;  %v597_v6 = vld [vmem:[%s736_s3] sm:$0xff] (!%p218_p3)   ;;  %v598_v7 = vld [vmem:[%s736_s3 + $0x8] sm:$0xff] (!%p218_p3)   ;;  %v599_v8 = vld [vmem:[%s736_s3 + $0x10] sm:$0xff] (!%p218_p3)   ;;  %vm632_vm0 = vmmov (!%p218_p3), 0  }
   0x7   : > { %221 = sbr.rel (%p218_p3) target bundleno = 556 (0x22c), region = 40  ;;  %551 = vmatprep.subr.bf16.mxu0 (!%p218_p3), %v631_v1  ;;  %v600_v9 = vld [vmem:[%s736_s3 + $0x18] sm:$0xff] (!%p218_p3)   ;;  %v601_v10 = vld [vmem:[%s736_s3 + $0x20] sm:$0xff] (!%p218_p3)   ;;  %v602_v11 = vld [vmem:[%s736_s3 + $0x28] sm:$0xff] (!%p218_p3)   ;;  %567 = vmatprep.mubr.msk.bf16.mxu0 (!%p218_p3), %vm632_vm0, %v631_v1 }
   0x8   : > { %552 = vmatpush3.bf16.msra.mxu0 (!%p218_p3), %v597_v6  ;;  %v603_v12 = vld [vmem:[%s736_s3 + $0x30] sm:$0xff] (!%p218_p3)   ;;  %v604_v13 = vld [vmem:[%s736_s3 + $0x38] sm:$0xff] (!%p218_p3)   ;;  %v529_v18 = vld [vmem:[%s734_s1] ss:$0 sm:$0xff] (!%p218_p3) }
   0x9   : > { %553 = vmatprep.subr.bf16.mxu0 (!%p218_p3), %v631_v1  ;;  %v530_v20 = vld [vmem:[%s735_s2] ss:$0 sm:$0xff] (!%p218_p3) }
   0xa   : > { %v531_v25 = vld [vmem:[%s737_s4] ss:$0 sm:$0xff] (!%p218_p3) }
   0xc   : > { %554 = vmatpush3.bf16.msra.mxu0 (!%p218_p3), %v598_v7 }
   0xd   : > { %555 = vmatprep.subr.bf16.mxu0 (!%p218_p3), %v631_v1 }
   0xe   : > { %s744_s18 = smov (!%p253_p4, %s621_s18), 1 }
   0xf   : > { %s527_s22 = sshll.u32 %s744_s18, 3  ;;  %s528_s27 = sshll.u32 %s744_s18, 2 }
  0x10   : > { %s256_s25 = scalar_lea.vmem %s733_s0, %s527_s22  ;;  %556 = vmatpush3.bf16.msra.mxu0 %v599_v8  ;;  %s270_s30 = scalar_lea.vmem %s738_s5, %s528_s27 }
  0x11   : > { %v276_v0 = vld [vmem:[%s256_s25] sm:$0xff]  ;;  %557 = vmatprep.subr.bf16.mxu0 %v631_v1 }
  0x12   : > { %279 = vadd.xlane.f32.xlu0 %v276_v0 }
  0x14   : > { %558 = vmatpush3.bf16.msra.mxu0 %v600_v9 }
  0x15   : > { %559 = vmatprep.subr.bf16.mxu0 %v631_v1 }
  0x18   : > { %560 = vmatpush3.bf16.msra.mxu0 %v601_v10 }
  0x19   : > { %561 = vmatprep.subr.bf16.mxu0 %v631_v1 }
  0x1c   : > { %562 = vmatpush3.bf16.msra.mxu0 %v602_v11 }
  0x1d   : > { %563 = vmatprep.subr.bf16.mxu0 %v631_v1 }
  0x20   : > { %564 = vmatpush3.bf16.msra.mxu0 %v603_v12 }
  0x21   : > { %565 = vmatprep.subr.bf16.mxu0 %v631_v1 }
  0x24   : > { %566 = vmatpush3.bf16.msra.mxu0 %v604_v13 }
  0x9f   : > { %v280_v2 = vpop.xlane.xlu0 %279 }
  0xa0   : > { %v282_v3 = vmul.f32 0.0078125, %v280_v2 }
  0xa2   : > { %v283_v4 = vsub.f32 %v276_v0, %v282_v3 }
  0xa4   : > { %v284_v5 = vmul.f32 %v283_v4, %v283_v4 }
  0xa6   : > { %285 = vadd.xlane.f32.xlu0 %v284_v5 }
 0x133   : > { %v286_v14 = vpop.xlane.xlu0 %285 }
 0x134   : > { %v287_v15 = vmul.f32 0.0078125, %v286_v14 }
 0x136   : > { %v288_v16 = vadd.f32 1e-05, %v287_v15 }
 0x138   : > { %605 = vrsqrt.f32 %v288_v16 }
 0x142   : > { %v606_v17 = vpop.eup %605 }
 0x143   : > { %v290_v19 = vmul.f32 %v606_v17, %v283_v4 }
 0x145   : > { %v297_v21 = vmul.f32 %v529_v18, %v290_v19 }
 0x147   : > { %v304_v22 = vadd.f32 %v530_v20, %v297_v21 }
 0x149   : > { %v305_v23 = vpack.c.bf16 %v304_v22, %v304_v22 }
 0x14b   : > { %306 = vst [vmem:[#allocation2] sm:$0xf] %v305_v23 }
 0x152   : > { %v307_v24 = vld [vmem:[#allocation2] sm:$0xf] }
 0x153   : > { %568 = vmatmul.mubr.bf16.vlgmr.msra.gmra.mrb[0].mxu0 %v307_v24 }
 0x226   : > { %v413_v26 = vpop.f32.mrb[0].mxu0 }
 0x227   : > { %v414_v27 = vadd.f32 %v531_v25, %v413_v26  ;;  %v569_v28 = vpop.f32.mrb[1].mxu0 }
 0x228   : > { %v416_v29 = vpop.f32.mrb[2].mxu0 }
 0x229   : > { %v419_v30 = vpack.c.bf16 %v414_v27, %v414_v27  ;;  %v570_v31 = vpop.f32.mrb[3].mxu0 }
 0x22b   : > { %420 = vst [vmem:[%s270_s30] sm:$0xf] %v419_v30 }
 0x22c PF: > { %s15_s20 = sadd.s32 1, %s629_s20   ;;  %s739_s18 = smov %s625_s19 }
 0x22d   : > { %p12_p5 = scmp.ge.s32.totalorder %s15_s20, 4   ;;  %s740_s19 = smov %s742_s21 }
 0x22f   :  { %14 = sbr.rel (!%p12_p5) target bundleno = 2 (0x2), region = 80 }

// kernel: forward.7
= control target key start
LH: loop header
LB: loop body
LE: loop exit
PB: predicated region body
PF: predicated region fallthrough
CT: control target
= control target key end

     0   :  { %s4087_s0 = inlined_call_operand.vmem [shape: f32[2,8,128], index: 0, kind: input, shape index: {}]   ;;  %s4088_s1 = inlined_call_operand.vmem [shape: bf16[6,128,384], index: 1, kind: input, shape index: {}]   ;;  %s4089_s2 = inlined_call_operand.hbm [shape: f32[6,1,384], index: 2, kind: input, shape index: {}]   ;;  %s4090_s3 = inlined_call_operand.vmem [shape: bf16[6,128,128], index: 3, kind: input, shape index: {}]   ;;  %s4091_s4 = inlined_call_operand.hbm [shape: f32[6,1,128], index: 4, kind: input, shape index: {}]   ;;  %s4092_s5 = inlined_call_operand.hbm [shape: f32[6,1,128], index: 5, kind: input, shape index: {}]   ;;  %s4093_s6 = inlined_call_operand.hbm [shape: f32[6,1,128], index: 6, kind: input, shape index: {}]   ;;  %s4094_s7 = inlined_call_operand.vmem [shape: bf16[6,128,256], index: 7, kind: input, shape index: {}]   ;;  %s4095_s8 = inlined_call_operand.hbm [shape: f32[6,1,256], index: 8, kind: input, shape index: {}]   ;;  %s4096_s9 = inlined_call_operand.vmem [shape: bf16[6,256,128], index: 9, kind: input, shape index: {}]   ;;  %s4097_s10 = inlined_call_operand.hbm [shape: f32[6,1,128], index: 10, kind: input, shape index: {}]   ;;  %s4098_s11 = inlined_call_operand.hbm [shape: f32[6,1,128], index: 11, kind: input, shape index: {}]   ;;  %s4099_s12 = inlined_call_operand.hbm [shape: f32[6,1,128], index: 12, kind: input, shape index: {}]   ;;  %s4100_s13 = inlined_call_operand.hbm [shape: f32[1,128], index: 13, kind: input, shape index: {}]   ;;  %s4101_s14 = inlined_call_operand.hbm [shape: f32[1,128], index: 14, kind: input, shape index: {}]   ;;  %s4102_s15 = inlined_call_operand.vmem [shape: f32[2,8,128], index: 15, kind: output, shape index: {}]  }
   0x1   :  { %4124 = sst [smem:[#allocation33_spill]] %s4087_s0 }
   0x2   :  { %4125 = sst [smem:[#allocation34_spill]] %s4088_s1 }
   0x3   :  { %4126 = sst [smem:[#allocation35_spill]] %s4089_s2 }
   0x4   :  { %4127 = sst [smem:[#allocation36_spill]] %s4090_s3 }
   0x5   :  { %4128 = sst [smem:[#allocation37_spill]] %s4091_s4 }
   0x6   :  { %4129 = sst [smem:[#allocation38_spill]] %s4092_s5 }
   0x7   :  { %4130 = sst [smem:[#allocation39_spill]] %s4093_s6 }
   0x8   :  { %4131 = sst [smem:[#allocation40_spill]] %s4094_s7 }
   0x9   :  { %4132 = sst [smem:[#allocation41_spill]] %s4095_s8 }
   0xa   :  { %4133 = sst [smem:[#allocation42_spill]] %s4096_s9 }
   0xb   :  { %4134 = sst [smem:[#allocation43_spill]] %s4097_s10 }
   0xc   :  { %4135 = sst [smem:[#allocation44_spill]] %s4098_s11 }
   0xd   :  { %4136 = sst [smem:[#allocation45_spill]] %s4099_s12 }
   0xe   :  { %4137 = sst [smem:[#allocation46_spill]] %s4100_s13 }
   0xf   :  { %4138 = sst [smem:[#allocation47_spill]] %s4101_s14 }
  0x10   :  { %4139 = sst [smem:[#allocation48_spill]] %s4102_s15 }
  0x11   :  { %20 = vsyncpa [#allocation4], 0 }
  0x12   :  { %22 = vsyncpa [#allocation4 + $0x1], 0 }
  0x13   :  { %23 = vsyncpa [#allocation6], 0 }
  0x14   :  { %25 = vsyncpa [#allocation6 + $0x1], 0 }
  0x15   :  { %26 = vsyncpa [#allocation9], 0 }
  0x16   :  { %28 = vsyncpa [#allocation9 + $0x1], 0 }
  0x17   :  { %29 = vsyncpa [#allocation12], 0 }
  0x18   :  { %31 = vsyncpa [#allocation12 + $0x1], 0 }
  0x19   :  { %32 = vsyncpa [#allocation15], 0 }
  0x1a   :  { %34 = vsyncpa [#allocation15 + $0x1], 0 }
  0x1b   :  { %35 = vsyncpa [#allocation18], 0  ;;  %s3410_s18 = smov 0   ;;  %s3412_s19 = smov 0  }
  0x1c   :  { %s3414_s20 = smov 0   ;;  %s3416_s21 = smov 0  }
  0x1d   :  { %s3418_s22 = smov 0   ;;  %s3420_s23 = smov 0  }
  0x1e   :  { %s3422_s24 = smov 0   ;;  %s3424_s25 = smov 0  }
  0x1f LB: > { %4140 = sst [smem:[#allocation26_spill]] %s3296_s21  ;;  %s4103_s26 = sadd.s32 4294967295, %s3312_s25   ;;  %s3312_s25 = sphi %s3424_s25, %s41_s25   ;;  %s3308_s24 = sphi %s3422_s24, %s4202_s24   ;;  %s3304_s23 = sphi %s3420_s23, %s4207_s23   ;;  %s3300_s22 = sphi %s3418_s22, %s4200_s22   ;;  %s3296_s21 = sphi %s3416_s21, %s4206_s21   ;;  %s3292_s20 = sphi %s3414_s20, %s4205_s20   ;;  %s3288_s19 = sphi %s3412_s19, %s4204_s19   ;;  %s3284_s18 = sphi %s3410_s18, %s4203_s18  }
  0x20   : > { %4141 = sst [smem:[#allocation27_spill]] %s3300_s22  ;;  %p119_p0 = scmp.ne.s32.totalorder %s3292_s20, %s3288_s19 }
  0x21   : > { %4142 = sst [smem:[#allocation28_spill]] %s3308_s24  ;;  %p120_p1 = scmp.eq.s32.totalorder %s3312_s25, 0 }
  0x22   : > { %p125_p2 = scmp.ne.s32.totalorder %s3288_s19, %s3284_s18  ;;  %p3456_p3 = scmp.eq.s32.totalorder %s4103_s26, 0 }
  0x23   : > { %p121_p4 = por %p120_p1, %p119_p0  ;;  %p2428_p5 = scmp.ge.s32.totalorder %s3312_s25, 1 }
  0x24   : > { %s4143_s28 = scalar_select %p3456_p3, 1, 0 }
  0x25   : > { %p3463_p6 = por %p3456_p3, %p125_p2  ;;  %p464_p7 = scmp.lt.s32.totalorder %s3312_s25, 13 }
  0x26   : > { %4144 = sst [smem:[#allocation29_spill]] %s4143_s28  ;;  %s3314_s16 = smov [#allocation16]  }
  0x27   : > { %s4145_s29 = scalar_select %p3463_p6, 1, 0 }
  0x28   : > { %p3468_p8 = pnand %p2428_p5, %p464_p7  ;;  %s477_s17 = sshll.u32 %s3314_s16, 4  ;;  %s478_s17 = int_to_ptr.vmem [resolvable:$true] %s477_s17 }
  0x29   : > { %p2749_p10 = scmp.lt.s32.totalorder %s3312_s25, 12  ;;  %s3476_s18 = sand.u32 1, %s3292_s20  }
  0x2a   : > { %s4146_s30 = scalar_select %p3468_p8, 1, 0 }
  0x2b   : > { %p2715_p9 = pneg %p3468_p8  ;;  %p3484_p12 = pnand %p2749_p10, %p121_p4 }
  0x2c   : > { %s4149_s13 = sld [smem:[#allocation46_spill]] }
  0x2d   : > { %p3480_p11 = pnand %p2715_p9, %p3456_p3 }
  0x2e   : > { %s4148_s27 = scalar_select %p3484_p12, 1, 0 }
  0x2f   : > { %s4147_s26 = scalar_select %p3480_p11, 1, 0 }
  0x30   : > { %p4115_p0 = pneg %p3480_p11 }
  0x32   : > { %s2926_s16 = scalar_lea.hbm %s4149_s13, 16 }
  0x33   : > { %p2927_p13 = scmp.ne.s32.totalorder %s4149_s13, %s2926_s16  ;;  %p2933_p4 = scmp.lt.u32.totalorder %s2926_s16, %s4149_s13 }
  0x35   : > { %p2929_p1 = pnand %p4115_p0, %p2927_p13 }
  0x37   : > { %p2930_p2 = pneg %p2929_p1 }
  0x39   : > { %p2935_p5 = pnand %p2933_p4, %p2930_p2 }
  0x3b   : > { %2938 = shalt.err (!%p2935_p5)
}
  0x3c   : > { %s2939_s21 = scalar_lea.vmem %s478_s17, 16  ;;  %s2946_s3 = scalar_lea.vmem %s478_s17, 32 }
  0x3d   : > { %p2940_p7 = scmp.ne.s32.totalorder %s478_s17, %s2939_s21  ;;  %p2947_p3 = scmp.lt.s32.totalorder %s478_s17, %s478_s17 }
  0x3e   : > { %p2948_p6 = scmp.lt.s32.totalorder %s2946_s3, %s2939_s21 }
  0x3f   : > { %p2942_p9 = pnand %p2940_p7, %p4115_p0 }
  0x40   : > { %p2949_p8 = por %p2948_p6, %p2947_p3 }
  0x41   : > { %p2943_p10 = pneg %p2942_p9 }
  0x43   : > { %p2950_p12 = pnand %p2949_p8, %p2943_p10 }
  0x45   : > { %2953 = shalt.err (!%p2950_p12)
}
  0x46   : > { %2718 = dma.hbm_to_vmem [thread:$0]  (!%p3480_p11), %s4149_s13, 16, %s478_s17, [#allocation15]  }
  0x47   : > { %s50_s1 = sadd.s32 1, %s3304_s23  ;;  %s53_s9 = sadd.s32 1, %s3308_s24 }
  0x48   : > { %p51_p13 = scmp.ge.s32.totalorder %s50_s1, 6  ;;  %s3513_s15 = sand.u32 1, %s3312_s25  }
  0x49   : > { %s3521_s16 = sshll.u32 %s3304_s23, 4  ;;  %s544_s3 = scalar_lea.vmem [#allocation5], %s3476_s18 }
  0x4a   : > { %s4209_s1 = smov (%p51_p13, %s50_s1), 0  ;;  %s4211_s9 = smov (!%p51_p13, %s53_s9), %s3308_s24 }
  0x4b   : > { %4150 = sst [smem:[#allocation30_spill]] %s4209_s1  ;;  %s109_s21 = ssub.s32 %s3304_s23, %s4209_s1 }
  0x4c   : > { %p55_p3 = scmp.ge.s32.totalorder %s4211_s9, 2  ;;  %p110_p6 = scmp.eq.s32.totalorder %s109_s21, 0 }
  0x4d   : > { %s551_s7 = sshll.u32 %s544_s3, 4  ;;  %s4152_s17 = sadd.s32 1, %s3292_s20  ;;  %s3537_s7 = int_to_ptr.vmem [resolvable:$true] %s551_s7 }
  0x4e   : > { %s4213_s9 = smov (%p55_p3, %s4211_s9), 0  ;;  %s4154_s4 = sld [smem:[#allocation37_spill]] }
  0x4f   : > { %4151 = sst [smem:[#allocation31_spill]] %s4213_s9  ;;  %p4155_p12 = scmp.ne.s32.totalorder %s4148_s27, 0 }
  0x50   : > { %s3529_s0 = scalar_select %p110_p6, %s3292_s20, %s4152_s17  }
  0x51   : > { %p3544_p1 = pneg %p4155_p12 }
  0x52   : > { %4153 = sst [smem:[#allocation32_spill]] %s3529_s0 }
  0x53   : > { %s4156_s3 = scalar_select %p3544_p1, 1, 0 }
  0x54   : > { %s3535_s28 = scalar_lea.hbm %s4154_s4, %s3521_s16  ;;  %s2959_s17 = scalar_lea.hbm %s4154_s4, 96 }
  0x55   : > { %s2954_s1 = scalar_lea.hbm %s3535_s28, 16  ;;  %p2960_p5 = scmp.lt.u32.totalorder %s3535_s28, %s4154_s4 }
  0x56   : > { %p2955_p8 = scmp.ne.s32.totalorder %s3535_s28, %s2954_s1  ;;  %p2961_p7 = scmp.lt.u32.totalorder %s2959_s17, %s2954_s1 }
  0x57   : > { %p2963_p10 = scmp.lt.u32.totalorder %s2954_s1, %s3535_s28 }
  0x58   : > { %p2957_p2 = pnand %p3544_p1, %p2955_p8  ;;  %p2962_p9 = por %p2961_p7, %p2960_p5 }
  0x5a   : > { %p2958_p4 = pneg %p2957_p2  ;;  %p2964_p13 = por %p2963_p10, %p2962_p9 }
  0x5c   : > { %p2965_p3 = pnand %p2964_p13, %p2958_p4 }
  0x5e   : > { %2968 = shalt.err (!%p2965_p3)
}
  0x5f   : > { %s2969_s21 = scalar_lea.vmem %s3537_s7, 16  ;;  %s3315_s13 = smov [#allocation5]  }
  0x60   : > { %p2970_p6 = scmp.ne.s32.totalorder %s3537_s7, %s2969_s21  ;;  %s2974_s22 = sshll.u32 %s3315_s13, 4  ;;  %s2975_s22 = int_to_ptr.vmem [resolvable:$false] %s2974_s22 }
  0x61   : > { %s2976_s24 = scalar_lea.vmem %s2975_s22, 32  ;;  %p2977_p0 = scmp.lt.s32.totalorder %s3537_s7, %s2975_s22 }
  0x62   : > { %p2972_p8 = pnand %p2970_p6, %p3544_p1  ;;  %p2978_p11 = scmp.lt.s32.totalorder %s2976_s24, %s2969_s21 }
  0x64   : > { %p2973_p2 = pneg %p2972_p8  ;;  %p2979_p5 = por %p2978_p11, %p2977_p0 }
  0x66   : > { %p2980_p7 = pnand %p2979_p5, %p2973_p2 }
  0x68   : > { %2983 = shalt.err (!%p2980_p7)
}
  0x69   : > { %s4157_s1 = scalar_lea.sflag [#allocation6], %s3513_s15  ;;  %s4158_s6 = sld [smem:[#allocation39_spill]] }
  0x6a   : > { %2728 = dma.hbm_to_vmem [thread:$0]  (!%p4155_p12), %s3535_s28, 16, %s3537_s7, %s4157_s1  }
  0x6b   : > { %s578_s21 = scalar_lea.vmem [#allocation8], %s3476_s18 }
  0x6c   : > { %s585_s22 = sshll.u32 %s578_s21, 4  ;;  %s586_s22 = int_to_ptr.vmem [resolvable:$true] %s585_s22 }
  0x6f   : > { %s3573_s13 = scalar_lea.hbm %s4158_s6, %s3521_s16  ;;  %s2989_s7 = scalar_lea.hbm %s4158_s6, 96 }
  0x70   : > { %s2984_s4 = scalar_lea.hbm %s3573_s13, 16  ;;  %p2990_p9 = scmp.lt.u32.totalorder %s3573_s13, %s4158_s6 }
  0x71   : > { %p2985_p11 = scmp.ne.s32.totalorder %s3573_s13, %s2984_s4  ;;  %p2991_p10 = scmp.lt.u32.totalorder %s2989_s7, %s2984_s4 }
  0x72   : > { %p2993_p3 = scmp.lt.u32.totalorder %s2984_s4, %s3573_s13 }
  0x73   : > { %p2987_p0 = pnand %p2985_p11, %p3544_p1  ;;  %p2992_p13 = por %p2991_p10, %p2990_p9 }
  0x75   : > { %p2988_p4 = pneg %p2987_p0  ;;  %p2994_p6 = por %p2993_p3, %p2992_p13 }
  0x77   : > { %p2995_p8 = pnand %p2994_p6, %p2988_p4 }
  0x79   : > { %2998 = shalt.err (!%p2995_p8)
}
  0x7a   : > { %s2999_s17 = scalar_lea.vmem %s586_s22, 16  ;;  %s3316_s21 = smov [#allocation8]  }
  0x7b   : > { %p3000_p2 = scmp.ne.s32.totalorder %s586_s22, %s2999_s17  ;;  %s3004_s24 = sshll.u32 %s3316_s21, 4  ;;  %s3005_s24 = int_to_ptr.vmem [resolvable:$false] %s3004_s24 }
  0x7c   : > { %s3006_s0 = scalar_lea.vmem %s3005_s24, 32  ;;  %p3007_p11 = scmp.lt.s32.totalorder %s586_s22, %s3005_s24 }
  0x7d   : > { %p3002_p5 = pnand %p3000_p2, %p3544_p1  ;;  %p3008_p0 = scmp.lt.s32.totalorder %s3006_s0, %s2999_s17 }
  0x7f   : > { %p3003_p7 = pneg %p3002_p5  ;;  %p3009_p12 = por %p3008_p0, %p3007_p11 }
  0x81   : > { %p3010_p9 = pnand %p3009_p12, %p3003_p7 }
  0x83   : > { %3013 = shalt.err (!%p3010_p9)
}
  0x84   : > { %p4159_p10 = scmp.ne.s32.totalorder %s4148_s27, 0  ;;  %s4160_s4 = scalar_lea.sflag [#allocation9], %s3513_s15 }
  0x85   : > { %s4161_s10 = sld [smem:[#allocation43_spill]]  ;;  %s630_s24 = scalar_lea.vmem [#allocation11], %s3476_s18 }
  0x86   : > { %2734 = dma.hbm_to_vmem [thread:$0]  (!%p4159_p10), %s3573_s13, 16, %s586_s22, %s4160_s4  }
  0x87   : > { %s637_s9 = sshll.u32 %s630_s24, 4  ;;  %s3317_s17 = smov [#allocation17]   ;;  %s3603_s9 = int_to_ptr.vmem [resolvable:$true] %s637_s9 }
  0x88   : > { %s3605_s21 = sshll.u32 %s3317_s17, 4  ;;  %s4122_s0 = scalar_lea.sflag [#allocation12], %s3513_s15  ;;  %s489_s21 = int_to_ptr.vmem [resolvable:$true] %s3605_s21 }
  0x8b   : > { %s3600_s1 = scalar_lea.hbm %s4161_s10, %s3521_s16  ;;  %s3019_s4 = scalar_lea.hbm %s4161_s10, 96 }
  0x8c   : > { %s3014_s6 = scalar_lea.hbm %s3600_s1, 16  ;;  %p3020_p3 = scmp.lt.u32.totalorder %s3600_s1, %s4161_s10 }
  0x8d   : > { %p3015_p12 = scmp.ne.s32.totalorder %s3600_s1, %s3014_s6  ;;  %p3021_p6 = scmp.lt.u32.totalorder %s3019_s4, %s3014_s6 }
  0x8e   : > { %p3023_p2 = scmp.lt.u32.totalorder %s3014_s6, %s3600_s1 }
  0x8f   : > { %p3017_p4 = pnand %p3015_p12, %p3544_p1  ;;  %p3022_p8 = por %p3021_p6, %p3020_p3 }
  0x91   : > { %p3018_p13 = pneg %p3017_p4  ;;  %p3024_p5 = por %p3023_p2, %p3022_p8 }
  0x93   : > { %p3025_p7 = pnand %p3024_p5, %p3018_p13 }
  0x95   : > { %3028 = shalt.err (!%p3025_p7)
}
  0x96   : > { %s3029_s24 = scalar_lea.vmem %s3603_s9, 16  ;;  %s3318_s17 = smov [#allocation11]  }
  0x97   : > { %p3030_p11 = scmp.ne.s32.totalorder %s3603_s9, %s3029_s24  ;;  %s3034_s13 = sshll.u32 %s3318_s17, 4  ;;  %s3035_s13 = int_to_ptr.vmem [resolvable:$false] %s3034_s13 }
  0x98   : > { %s3036_s22 = scalar_lea.vmem %s3035_s13, 32  ;;  %p3037_p12 = scmp.lt.s32.totalorder %s3603_s9, %s3035_s13 }
  0x99   : > { %p3032_p0 = pnand %p3030_p11, %p3544_p1  ;;  %p3038_p4 = scmp.lt.s32.totalorder %s3036_s22, %s3029_s24 }
  0x9b   : > { %p3033_p9 = pneg %p3032_p0  ;;  %p3039_p3 = por %p3038_p4, %p3037_p12 }
  0x9d   : > { %p3040_p6 = pnand %p3039_p3, %p3033_p9 }
  0x9f   : > { %3043 = shalt.err (!%p3040_p6)
}
  0xa0   : > { %2740 = dma.hbm_to_vmem [thread:$0]  (!%p4159_p10), %s3600_s1, 16, %s3603_s9, %s4122_s0  }
  0xa1   : > { %s4162_s14 = sld [smem:[#allocation47_spill]]  ;;  %p4163_p8 = scmp.ne.s32.totalorder %s4147_s26, 0 }
  0xa3   : > { %p4164_p2 = pneg %p4163_p8 }
  0xa7   : > { %s3044_s28 = scalar_lea.hbm %s4162_s14, 16 }
  0xa8   : > { %p3045_p13 = scmp.ne.s32.totalorder %s4162_s14, %s3044_s28  ;;  %p3051_p11 = scmp.lt.u32.totalorder %s3044_s28, %s4162_s14 }
  0xaa   : > { %p3047_p5 = pnand %p3045_p13, %p4164_p2 }
  0xac   : > { %p3048_p7 = pneg %p3047_p5 }
  0xae   : > { %p3053_p0 = pnand %p3051_p11, %p3048_p7 }
  0xb0   : > { %3056 = shalt.err (!%p3053_p0)
}
  0xb1   : > { %s3057_s1 = scalar_lea.vmem %s489_s21, 16  ;;  %p4165_p12 = pmov %p4164_p2 }
  0xb2   : > { %p3058_p9 = scmp.ne.s32.totalorder %s489_s21, %s3057_s1  ;;  %s3064_s9 = scalar_lea.vmem %s489_s21, 32 }
  0xb3   : > { %p3065_p6 = scmp.lt.s32.totalorder %s489_s21, %s489_s21  ;;  %p3066_p10 = scmp.lt.s32.totalorder %s3064_s9, %s3057_s1 }
  0xb4   : > { %p3060_p4 = pnand %p3058_p9, %p4165_p12 }
  0xb5   : > { %p3067_p1 = por %p3066_p10, %p3065_p6 }
  0xb6   : > { %p3061_p3 = pneg %p3060_p4 }
  0xb8   : > { %p3068_p2 = pnand %p3067_p1, %p3061_p3 }
  0xba   : > { %3071 = shalt.err (!%p3068_p2)
}
  0xbb   : > { %2721 = dma.hbm_to_vmem [thread:$0]  (!%p4163_p8), %s4162_s14, 16, %s489_s21, [#allocation18]  }
  0xbc   : > { %s2687_s4 = smul.u32 3, %s3476_s18  ;;  %s4166_s5 = sld [smem:[#allocation38_spill]] }
  0xbd   : > { %s2688_s28 = smul.u32 48, %s3304_s23  ;;  %s561_s13 = scalar_lea.vmem [#allocation7], %s3476_s18 }
  0xbe   : > { %s568_s1 = sshll.u32 %s561_s13, 4  ;;  %s4167_s2 = sld [smem:[#allocation35_spill]]  ;;  %s3668_s1 = int_to_ptr.vmem [resolvable:$true] %s568_s1 }
  0xbf   : > { %s518_s6 = scalar_lea.vmem [#allocation3], %s2687_s4  ;;  %s515_s7 = scalar_lea.sflag [#allocation4], %s3476_s18 }
  0xc0   : > { %s526_s21 = sshll.u32 %s518_s6, 4  ;;  %p4168_p10 = scmp.ne.s32.totalorder %s4156_s3, 0  ;;  %s3666_s21 = int_to_ptr.vmem [resolvable:$true] %s526_s21 }
  0xc2   : > { %s3658_s24 = scalar_lea.hbm %s4166_s5, %s3521_s16 }
  0xc4   : > { %s3664_s22 = scalar_lea.hbm %s4167_s2, %s2688_s28  ;;  %s3077_s28 = scalar_lea.hbm %s4167_s2, 288 }
  0xc5   : > { %s3072_s17 = scalar_lea.hbm %s3664_s22, 48  ;;  %p3078_p5 = scmp.lt.u32.totalorder %s3664_s22, %s4167_s2 }
  0xc6   : > { %p3073_p1 = scmp.ne.s32.totalorder %s3664_s22, %s3072_s17  ;;  %p3079_p7 = scmp.lt.u32.totalorder %s3077_s28, %s3072_s17 }
  0xc7   : > { %p3081_p0 = scmp.lt.u32.totalorder %s3072_s17, %s3664_s22 }
  0xc8   : > { %p3075_p13 = pnand %p3073_p1, %p4168_p10  ;;  %p3080_p11 = por %p3079_p7, %p3078_p5 }
  0xca   : > { %p3076_p8 = pneg %p3075_p13  ;;  %p3082_p9 = por %p3081_p0, %p3080_p11 }
  0xcc   : > { %p3083_p12 = pnand %p3082_p9, %p3076_p8 }
  0xce   : > { %3086 = shalt.err (!%p3083_p12)
}
  0xcf   : > { %s3087_s4 = scalar_lea.vmem %s3666_s21, 48  ;;  %s3319_s6 = smov [#allocation3]  }
  0xd0   : > { %p3088_p4 = scmp.ne.s32.totalorder %s3666_s21, %s3087_s4  ;;  %s3092_s13 = sshll.u32 %s3319_s6, 4  ;;  %s3093_s13 = int_to_ptr.vmem [resolvable:$false] %s3092_s13 }
  0xd1   : > { %s3094_s0 = scalar_lea.vmem %s3093_s13, 96  ;;  %p3095_p2 = scmp.lt.s32.totalorder %s3666_s21, %s3093_s13 }
  0xd2   : > { %p3090_p3 = pnand %p3088_p4, %p4168_p10  ;;  %p3096_p1 = scmp.lt.s32.totalorder %s3094_s0, %s3087_s4 }
  0xd4   : > { %p3091_p6 = pneg %p3090_p3  ;;  %p3097_p13 = por %p3096_p1, %p3095_p2 }
  0xd6   : > { %p3098_p5 = pnand %p3097_p13, %p3091_p6 }
  0xd8   : > { %3101 = shalt.err (!%p3098_p5)
}
  0xd9   : > { %p4169_p8 = scmp.ne.s32.totalorder %s4148_s27, 0  ;;  %s3102_s17 = scalar_lea.hbm %s3658_s24, 16 }
  0xda   : > { %p3103_p7 = scmp.ne.s32.totalorder %s3658_s24, %s3102_s17  ;;  %s3107_s9 = scalar_lea.hbm %s4166_s5, 96 }
  0xdb   : > { %2725 = dma.hbm_to_vmem [thread:$0]  (!%p4169_p8), %s3664_s22, 48, %s3666_s21, %s515_s7  }
  0xdc   : > { %p3105_p11 = pnand %p3103_p7, %p4168_p10  ;;  %p3108_p9 = scmp.lt.u32.totalorder %s3658_s24, %s4166_s5 }
  0xdd   : > { %p3109_p12 = scmp.lt.u32.totalorder %s3107_s9, %s3102_s17  ;;  %p3111_p3 = scmp.lt.u32.totalorder %s3102_s17, %s3658_s24 }
  0xde   : > { %p3106_p0 = pneg %p3105_p11 }
  0xdf   : > { %p3110_p4 = por %p3109_p12, %p3108_p9 }
  0xe1   : > { %p3112_p6 = por %p3111_p3, %p3110_p4 }
  0xe3   : > { %p3113_p2 = pnand %p3112_p6, %p3106_p0 }
  0xe5   : > { %3116 = shalt.err (!%p3113_p2)
}
  0xe6   : > { %s3117_s22 = scalar_lea.vmem %s3668_s1, 16  ;;  %s3320_s21 = smov [#allocation7]  }
  0xe7   : > { %p3118_p1 = scmp.ne.s32.totalorder %s3668_s1, %s3117_s22  ;;  %s3122_s7 = sshll.u32 %s3320_s21, 4  ;;  %s3123_s7 = int_to_ptr.vmem [resolvable:$false] %s3122_s7 }
  0xe8   : > { %s3124_s13 = scalar_lea.vmem %s3123_s7, 32  ;;  %p3125_p7 = scmp.lt.s32.totalorder %s3668_s1, %s3123_s7 }
  0xe9   : > { %p3120_p13 = pnand %p3118_p1, %p4168_p10  ;;  %p3126_p11 = scmp.lt.s32.totalorder %s3124_s13, %s3117_s22 }
  0xeb   : > { %p3121_p5 = pneg %p3120_p13  ;;  %p3127_p9 = por %p3126_p11, %p3125_p7 }
  0xed   : > { %p3128_p12 = pnand %p3127_p9, %p3121_p5 }
  0xef   : > { %3131 = shalt.err (!%p3128_p12)
}
  0xf0   : > { %s4170_s0 = scalar_lea.sflag [#allocation6], %s3513_s15  ;;  %s2436_s17 = sshll.u32 %s3476_s18, 1 }
  0xf1   : > { %2731 = dma.hbm_to_vmem [thread:$0]  (!%p4169_p8), %s3658_s24, 16, %s3668_s1, %s4170_s0  }
  0xf2   : > { %s2539_s26 = sshll.u32 %s3304_s23, 5  ;;  %s4171_s8 = sld [smem:[#allocation41_spill]] }
  0xf3   : > { %s604_s6 = scalar_lea.vmem [#allocation10], %s2436_s17  ;;  %s4172_s11 = sld [smem:[#allocation44_spill]] }
  0xf4   : > { %s612_s22 = sshll.u32 %s604_s6, 4  ;;  %s613_s22 = int_to_ptr.vmem [resolvable:$true] %s612_s22 }
  0xf8   : > { %s3720_s4 = scalar_lea.hbm %s4171_s8, %s2539_s26  ;;  %s3137_s26 = scalar_lea.hbm %s4171_s8, 192 }
  0xf9   : > { %s3726_s13 = scalar_lea.hbm %s4172_s11, %s3521_s16  ;;  %s3132_s24 = scalar_lea.hbm %s3720_s4, 32 }
  0xfa   : > { %p3133_p0 = scmp.ne.s32.totalorder %s3720_s4, %s3132_s24  ;;  %p3138_p6 = scmp.lt.u32.totalorder %s3720_s4, %s4171_s8 }
  0xfb   : > { %p3139_p2 = scmp.lt.u32.totalorder %s3137_s26, %s3132_s24  ;;  %p3141_p13 = scmp.lt.u32.totalorder %s3132_s24, %s3720_s4 }
  0xfc   : > { %p3135_p4 = pnand %p3133_p0, %p4168_p10 }
  0xfd   : > { %p3140_p1 = por %p3139_p2, %p3138_p6 }
  0xfe   : > { %p3136_p3 = pneg %p3135_p4 }
  0xff   : > { %p3142_p5 = por %p3141_p13, %p3140_p1 }
 0x101   : > { %p3143_p7 = pnand %p3142_p5, %p3136_p3 }
 0x103   : > { %3146 = shalt.err (!%p3143_p7)
}
 0x104   : > { %s3147_s17 = scalar_lea.vmem %s613_s22, 32  ;;  %s3321_s6 = smov [#allocation10]  }
 0x105   : > { %p3148_p11 = scmp.ne.s32.totalorder %s613_s22, %s3147_s17  ;;  %s3152_s21 = sshll.u32 %s3321_s6, 4  ;;  %s3153_s21 = int_to_ptr.vmem [resolvable:$false] %s3152_s21 }
 0x106   : > { %s3154_s7 = scalar_lea.vmem %s3153_s21, 64  ;;  %p3155_p0 = scmp.lt.s32.totalorder %s613_s22, %s3153_s21 }
 0x107   : > { %p3150_p9 = pnand %p3148_p11, %p4168_p10  ;;  %p3156_p4 = scmp.lt.s32.totalorder %s3154_s7, %s3147_s17 }
 0x109   : > { %p3151_p12 = pneg %p3150_p9  ;;  %p3157_p8 = por %p3156_p4, %p3155_p0 }
 0x10b   : > { %p3158_p2 = pnand %p3157_p8, %p3151_p12 }
 0x10d   : > { %3161 = shalt.err (!%p3158_p2)
}
 0x10e   : > { %p4173_p6 = scmp.ne.s32.totalorder %s4148_s27, 0  ;;  %s4174_s24 = scalar_lea.sflag [#allocation9], %s3513_s15 }
 0x10f   : > { %s647_s1 = scalar_lea.vmem [#allocation13], %s3476_s18  ;;  %s3162_s26 = scalar_lea.hbm %s3726_s13, 16 }
 0x110   : > { %2737 = dma.hbm_to_vmem [thread:$0]  (!%p4173_p6), %s3720_s4, 32, %s613_s22, %s4174_s24  }
 0x111   : > { %s654_s0 = sshll.u32 %s647_s1, 4  ;;  %p3163_p3 = scmp.ne.s32.totalorder %s3726_s13, %s3162_s26  ;;  %s655_s0 = int_to_ptr.vmem [resolvable:$true] %s654_s0 }
 0x112   : > { %s3167_s17 = scalar_lea.hbm %s4172_s11, 96  ;;  %p3168_p13 = scmp.lt.u32.totalorder %s3726_s13, %s4172_s11 }
 0x113   : > { %p3165_p8 = pnand %p3163_p3, %p4168_p10  ;;  %p3169_p5 = scmp.lt.u32.totalorder %s3167_s17, %s3162_s26 }
 0x114   : > { %p3171_p11 = scmp.lt.u32.totalorder %s3162_s26, %s3726_s13 }
 0x115   : > { %p3166_p1 = pneg %p3165_p8  ;;  %p3170_p7 = por %p3169_p5, %p3168_p13 }
 0x117   : > { %p3172_p9 = por %p3171_p11, %p3170_p7 }
 0x119   : > { %p3173_p12 = pnand %p3172_p9, %p3166_p1 }
 0x11b   : > { %3176 = shalt.err (!%p3173_p12)
}
 0x11c   : > { %s3177_s4 = scalar_lea.vmem %s655_s0, 16  ;;  %s3322_s22 = smov [#allocation13]  }
 0x11d   : > { %p3178_p0 = scmp.ne.s32.totalorder %s655_s0, %s3177_s4  ;;  %s3182_s7 = sshll.u32 %s3322_s22, 4  ;;  %s3183_s7 = int_to_ptr.vmem [resolvable:$false] %s3182_s7 }
 0x11e   : > { %s3184_s24 = scalar_lea.vmem %s3183_s7, 32  ;;  %p3185_p3 = scmp.lt.s32.totalorder %s655_s0, %s3183_s7 }
 0x11f   : > { %p3180_p4 = pnand %p3178_p0, %p4168_p10  ;;  %p3186_p8 = scmp.lt.s32.totalorder %s3184_s24, %s3177_s4 }
 0x121   : > { %p3181_p2 = pneg %p3180_p4  ;;  %p3187_p6 = por %p3186_p8, %p3185_p3 }
 0x123   : > { %p3188_p5 = pnand %p3187_p6, %p3181_p2 }
 0x125   : > { %3191 = shalt.err (!%p3188_p5)
}
 0x126   : > { %p4175_p13 = scmp.ne.s32.totalorder %s4148_s27, 0  ;;  %s4176_s1 = scalar_lea.sflag [#allocation12], %s3513_s15 }
 0x127   : > { %s4177_s12 = sld [smem:[#allocation45_spill]]  ;;  %s664_s17 = scalar_lea.vmem [#allocation14], %s3476_s18 }
 0x128   : > { %2743 = dma.hbm_to_vmem [thread:$0]  (!%p4175_p13), %s3726_s13, 16, %s655_s0, %s4176_s1  }
 0x129   : > { %s671_s6 = sshll.u32 %s664_s17, 4  ;;  %s662_s21 = scalar_lea.sflag [#allocation15], %s3513_s15  ;;  %s672_s6 = int_to_ptr.vmem [resolvable:$true] %s671_s6 }
 0x12d   : > { %s3771_s9 = scalar_lea.hbm %s4177_s12, %s3521_s16  ;;  %s3197_s0 = scalar_lea.hbm %s4177_s12, 96 }
 0x12e   : > { %s3192_s4 = scalar_lea.hbm %s3771_s9, 16  ;;  %p3198_p11 = scmp.lt.u32.totalorder %s3771_s9, %s4177_s12 }
 0x12f   : > { %p3193_p6 = scmp.ne.s32.totalorder %s3771_s9, %s3192_s4  ;;  %p3199_p9 = scmp.lt.u32.totalorder %s3197_s0, %s3192_s4 }
 0x130   : > { %p3201_p0 = scmp.lt.u32.totalorder %s3192_s4, %s3771_s9 }
 0x131   : > { %p3195_p1 = pnand %p3193_p6, %p4168_p10  ;;  %p3200_p12 = por %p3199_p9, %p3198_p11 }
 0x133   : > { %p3196_p7 = pneg %p3195_p1  ;;  %p3202_p4 = por %p3201_p0, %p3200_p12 }
 0x135   : > { %p3203_p2 = pnand %p3202_p4, %p3196_p7 }
 0x137   : > { %3206 = shalt.err (!%p3203_p2)
}
 0x138   : > { %s3207_s18 = scalar_lea.vmem %s672_s6, 16  ;;  %s3323_s15 = smov [#allocation14]  }
 0x139   : > { %p3208_p3 = scmp.ne.s32.totalorder %s672_s6, %s3207_s18  ;;  %s3212_s24 = sshll.u32 %s3323_s15, 4  ;;  %s3213_s24 = int_to_ptr.vmem [resolvable:$false] %s3212_s24 }
 0x13a   : > { %s3214_s1 = scalar_lea.vmem %s3213_s24, 32  ;;  %p3215_p6 = scmp.lt.s32.totalorder %s672_s6, %s3213_s24 }
 0x13b   : > { %p3210_p8 = pnand %p3208_p3, %p4168_p10  ;;  %p3216_p1 = scmp.lt.s32.totalorder %s3214_s1, %s3207_s18 }
 0x13d   : > { %p3211_p5 = pneg %p3210_p8  ;;  %p3217_p13 = por %p3216_p1, %p3215_p6 }
 0x13f   : > { %p3218_p9 = pnand %p3217_p13, %p3211_p5 }
 0x141   : > { %3221 = shalt.err (!%p3218_p9)
}
 0x142   : > { %p4178_p11 = scmp.ne.s32.totalorder %s4148_s27, 0  ;;  %p4179_p7 = scmp.ne.s32.totalorder %s4146_s30, 0 }
 0x143   : > { %s3795_s3 = sand.u32 (!%p4179_p7), 1, %s3288_s19   ;;  %p4180_p10 = scmp.ne.s32.totalorder (!%p4179_p7), %s4145_s29, 0 }
 0x144   : > { %2746 = dma.hbm_to_vmem [thread:$0]  (!%p4178_p11), %s3771_s9, 16, %s672_s6, %s662_s21  }
 0x145   : > { %680 = sbr.rel (%p4179_p7) target bundleno = 3645 (0xe3d), region = 80  ;;  %s683_s28 = scalar_lea.sflag (!%p4179_p7), [#allocation4], %s3795_s3 }
 0x146   : > { %s2689_s26 = smul.u32 (!%p4179_p7), 3, %s3795_s3 }
 0x148   : > { %s3799_s17 = scalar_lea.vmem (!%p4179_p7), [#allocation3], %s2689_s26 }
 0x14c   : > { %3255 = dma.done.wait (%p4180_p10), %s683_s28, 48  }
 0x14d   : > { %3257 = vsyncadd (%p4180_p10), %s683_s28, 4294967248  ;;  %s4181_s27 = sadd.s32 4294967295, %s3312_s25  }
 0x14e   : > { %s691_s30 = sand.u32 1, %s4181_s27  }
 0x14f   : > { %s692_s9 = scalar_lea.sflag [#allocation6], %s691_s30 }
 0x150   : > { %3259 = dma.done.wait (%p4180_p10), %s692_s9, 32  }
 0x151   : > { %3261 = vsyncadd (%p4180_p10), %s692_s9, 4294967264  ;;  %s708_s4 = scalar_lea.sflag [#allocation9], %s691_s30 }
 0x152   : > { %3263 = dma.done.wait (%p4180_p10), %s708_s4, 48  }
 0x153   : > { %3265 = vsyncadd (%p4180_p10), %s708_s4, 4294967248  ;;  %s2443_s13 = sshll.u32 %s3795_s3, 1  ;;  %s725_s7 = scalar_lea.sflag [#allocation12], %s691_s30 }
 0x154   : > { %s3819_s0 = scalar_lea.vmem [#allocation10], %s2443_s13 }
 0x155   : > { %3267 = dma.done.wait (%p4180_p10), %s725_s7, 32  }
 0x156   : > { %3269 = vsyncadd (%p4180_p10), %s725_s7, 4294967264  ;;  %s741_s15 = scalar_lea.sflag [#allocation15], %s691_s30 }
 0x157   : > { %3271 = dma.done.wait (%p4180_p10), %s741_s15, 16  }
 0x158   : > { %3273 = vsyncadd (%p4180_p10), %s741_s15, 4294967280  ;;  %s4182_s1 = sld [smem:[#allocation29_spill]] }
 0x15e   : > { %p4183_p13 = scmp.ne.s32.totalorder %s4182_s1, 0 }
 0x160   : > { %3275 = dma.done.wait (%p4183_p13), [#allocation15], 16  }
 0x161   : > { %3277 = vsyncadd (%p4183_p13), [#allocation15], 4294967280 }
 0x162   : > { %3279 = dma.done.wait (%p4183_p13), [#allocation18], 16  }
 0x163   : > { %3281 = vsyncadd (%p4183_p13), [#allocation18], 4294967280  ;;  %s4184_s26 = sld [smem:[#allocation27_spill]]  ;;  %s4185_s28 = sld [smem:[#allocation26_spill]] }
 0x164   : > { %s4186_s4 = sld [smem:[#allocation33_spill]]  ;;  %s4187_s1 = sld [smem:[#allocation34_spill]] }
 0x165   : > { %s4188_s2 = sld [smem:[#allocation36_spill]]  ;;  %s4191_s16 = sld [smem:[#allocation48_spill]] }
 0x169   : > { %p850_p12 = scmp.lt.s32.totalorder %s4184_s26, 1  ;;  %p854_p0 = scmp.lt.s32.totalorder %s4185_s28, 5 }
 0x16a   : > { %p2455_p4 = scmp.ne.s32.totalorder %s4185_s28, 0 }
 0x16b   : > { %s4215_s26 = smov (!%p850_p12, %s4184_s26), 1 }
 0x16c   : > { %s855_s29 = scalar_select %p854_p0, %s4185_s28, 5 }
 0x16d   : > { %s2446_s27 = sshll.u32 %s4215_s26, 3  ;;  %s4189_s26 = sld [smem:[#allocation40_spill]] }
 0x16e   : > { %s853_s13 = scalar_lea.vmem %s4186_s4, %s2446_s27  ;;  %s2690_s7 = smul.u32 192, %s855_s29 }
 0x16f   : > { %s2540_s15 = sshll.u32 %s855_s29, 6  ;;  %s2541_s24 = sshll.u32 %s855_s29, 7  ;;  %v883_v0 = vld [vmem:[%s853_s13] sm:$0xff] (!%p2455_p4) }
 0x170   : > { %s3850_s22 = scalar_lea.vmem %s4187_s1, %s2690_s7  ;;  %s3855_s5 = scalar_lea.vmem %s4188_s2, %s2540_s15  ;;  %884 = vst [vmem:[#allocation2] sm:$0xff] (!%p2455_p4), %v883_v0 }
 0x171   : > { %s4190_s4 = sld [smem:[#allocation42_spill]]  ;;  %s3870_s18 = scalar_lea.vmem %s4191_s16, %s2446_s27 }
 0x172   : > { %882 = sbr.rel (%p2455_p4) target bundleno = 377 (0x179), region = 124 }
 0x173   : > { %s3860_s11 = scalar_lea.vmem %s4189_s26, %s2541_s24 }
 0x177   : > { %s3865_s12 = scalar_lea.vmem %s4190_s4, %s2541_s24 }
 0x179 PF: > { %v2824_v1 = vld [vmem:[%s3850_s22 + $0x4] ss:$12 sps:$4 sm:$0xff]   ;;  %v2826_v2 = vld [vmem:[%s3850_s22] ss:$12 sps:$4 sm:$0xff]   ;;  %v3324_v3 = vmov 0   ;;  %v3325_v4 = vmov 0.0   ;;  %v992_v29 = vlaneseq }
 0x17a   : > { %1167 = vmatprep.mubr.bf16.mxu0 %v3324_v3  ;;  %2599 = vmatprep.subr.bf16.mxu1 %v3325_v4  ;;  %v2827_v5 = vld [vmem:[%s3850_s22 + $0x1c] ss:$12 sps:$4 sm:$0xff]   ;;  %v2829_v6 = vld [vmem:[%s3850_s22 + $0x18] ss:$12 sps:$4 sm:$0xff]   ;;  %v2830_v7 = vld [vmem:[%s3850_s22 + $0x34] ss:$12 sps:$4 sm:$0xff]  }
 0x17b   : > { %1135 = vmatprep.subr.bf16.mxu0 %v2824_v1  ;;  %v2832_v8 = vld [vmem:[%s3850_s22 + $0x30] ss:$12 sps:$4 sm:$0xff]   ;;  %v2833_v9 = vld [vmem:[%s3850_s22 + $0x4c] ss:$12 sps:$4 sm:$0xff]   ;;  %v2835_v10 = vld [vmem:[%s3850_s22 + $0x48] ss:$12 sps:$4 sm:$0xff]  }
 0x17c   : > { %1136 = vmatpush1.bf16.msra.mxu0 %v2826_v2  ;;  %v2848_v11 = vld [vmem:[%s3850_s22 + $0x8] ss:$12 sps:$4 sm:$0xff]   ;;  %v2836_v12 = vld [vmem:[%s3850_s22 + $0x64] ss:$12 sps:$4 sm:$0xff]   ;;  %v2849_v13 = vld [vmem:[%s3850_s22 + $0x20] ss:$12 sps:$4 sm:$0xff]  }
 0x17d   : > { %1137 = vmatprep.subr.bf16.mxu0 %v2827_v5  ;;  %2600 = vmatpush3.bf16.msra.mxu1 %v2848_v11  ;;  %v2838_v14 = vld [vmem:[%s3850_s22 + $0x60] ss:$12 sps:$4 sm:$0xff]   ;;  %v2839_v15 = vld [vmem:[%s3850_s22 + $0x7c] ss:$12 sps:$4 sm:$0xff]   ;;  %v2841_v16 = vld [vmem:[%s3850_s22 + $0x78] ss:$12 sps:$4 sm:$0xff]  }
 0x17e   : > { %2601 = vmatprep.subr.bf16.mxu1 %v3325_v4  ;;  %v2850_v17 = vld [vmem:[%s3850_s22 + $0x38] ss:$12 sps:$4 sm:$0xff]   ;;  %v2842_v18 = vld [vmem:[%s3850_s22 + $0x94] ss:$12 sps:$4 sm:$0xff]   ;;  %v2851_v19 = vld [vmem:[%s3850_s22 + $0x50] ss:$12 sps:$4 sm:$0xff]  }
 0x17f   : > { %v2844_v20 = vld [vmem:[%s3850_s22 + $0x90] ss:$12 sps:$4 sm:$0xff]   ;;  %v2845_v21 = vld [vmem:[%s3850_s22 + $0xac] ss:$12 sps:$4 sm:$0xff]   ;;  %v2852_v22 = vld [vmem:[%s3850_s22 + $0x68] ss:$12 sps:$4 sm:$0xff]  }
 0x180   : > { %1138 = vmatpush1.bf16.msra.mxu0 %v2829_v6  ;;  %v2847_v23 = vld [vmem:[%s3850_s22 + $0xa8] ss:$12 sps:$4 sm:$0xff]   ;;  %v3899_v24 = vld [vmem:[#allocation2] sm:$0xff]  ;;  %v2855_v28 = vld [vmem:[%s3850_s22 + $0xb0] ss:$12 sps:$4 sm:$0xff]   ;;  %vm3326_vm0 = vmmov 0  }
 0x181   : > { %1139 = vmatprep.subr.bf16.mxu0 %v2830_v7  ;;  %2602 = vmatpush3.bf16.msra.mxu1 %v2849_v13  ;;  %v2853_v25 = vld [vmem:[%s3850_s22 + $0x80] ss:$12 sps:$4 sm:$0xff]   ;;  %v990_v26 = vpack.c.bf16 %v3899_v24, %v3899_v24  ;;  %v2854_v27 = vld [vmem:[%s3850_s22 + $0x98] ss:$12 sps:$4 sm:$0xff]   ;;  %v3918_v30 = vshrl.u32 %v992_v29, 7  ;;  %vm1220_vm1 = vcmask 261120  }
 0x182   : > { %2603 = vmatprep.subr.bf16.mxu1 %v3325_v4  ;;  %2615 = vmatprep.mubr.msk.bf16.mxu1 %vm3326_vm0, %v3325_v4  ;;  %v918_v32 = vld [vmem:[%s3799_s17] sm:$0x7]  ;;  %s3327_s2 = smov 96   ;;  %s3328_s8 = smov 64   ;;  %vm1283_vm2 = vcmask 1043456   ;;  %vm1267_vm3 = vcmask 64512  }
 0x183   : > { %v994_v31 = vsub.s32 0, %v3918_v30  ;;  %v998_v33 = vsub.s32 1, %v3918_v30  ;;  %s3329_s10 = smov 32   ;;  %v1002_v46 = vsub.s32 2, %v3918_v30  ;;  %vm1673_vm4 = vcmask 523264   ;;  %s4194_s14 = scalar_lea.vmem [#allocation8], %s3795_s3 }
 0x184   : > { %1140 = vmatpush1.bf16.msra.mxu0 %v2832_v8  ;;  %vm1675_vm5 = vcmask 785408   ;;  %s4196_s17 = scalar_lea.vmem [#allocation13], %s3795_s3  ;;  %s4197_s6 = scalar_lea.vmem [#allocation14], %s3795_s3 }
 0x185   : > { %1141 = vmatprep.subr.bf16.mxu0 %v2833_v9  ;;  %2604 = vmatpush3.bf16.msra.mxu1 %v2850_v17  ;;  %v995_v34 = vrot.slane %v918_v32, %v994_v31  ;;  %v999_v35 = vrot.slane %v918_v32, %v998_v33  ;;  %v1003_v47 = vrot.slane %v918_v32, %v1002_v46  ;;  %s4198_s21 = sld [smem:[#allocation26_spill]] }
 0x186   : > { %2605 = vmatprep.subr.bf16.mxu1 %v3325_v4 }
 0x188   : > { %1142 = vmatpush1.bf16.msra.mxu0 %v2835_v10 }
 0x189   : > { %1143 = vmatprep.subr.bf16.mxu0 %v2836_v12  ;;  %2606 = vmatpush3.bf16.msra.mxu1 %v2851_v19 }
 0x18a   : > { %2607 = vmatprep.subr.bf16.mxu1 %v3325_v4 }
 0x18b   : > { %p2534_p2 = scmp.ne.s32.totalorder %s4198_s21, 5 }
 0x18c   : > { %1144 = vmatpush1.bf16.msra.mxu0 %v2838_v14 }
 0x18d   : > { %1145 = vmatprep.subr.bf16.mxu0 %v2839_v15  ;;  %2608 = vmatpush3.bf16.msra.mxu1 %v2852_v22 }
 0x18e   : > { %2609 = vmatprep.subr.bf16.mxu1 %v3325_v4 }
 0x190   : > { %1146 = vmatpush1.bf16.msra.mxu0 %v2841_v16 }
 0x191   : > { %1147 = vmatprep.subr.bf16.mxu0 %v2842_v18  ;;  %2610 = vmatpush3.bf16.msra.mxu1 %v2853_v25 }
 0x192   : > { %2611 = vmatprep.subr.bf16.mxu1 %v3325_v4 }
 0x194   : > { %1148 = vmatpush1.bf16.msra.mxu0 %v2844_v20 }
 0x195   : > { %1149 = vmatprep.subr.bf16.mxu0 %v2845_v21  ;;  %2612 = vmatpush3.bf16.msra.mxu1 %v2854_v27 }
 0x196   : > { %2613 = vmatprep.subr.bf16.mxu1 %v3325_v4 }
 0x198   : > { %1150 = vmatpush1.bf16.msra.mxu0 %v2847_v23 }
 0x199   : > { %2643 = vmatprep.subr.bf16.mxu0 %v3325_v4  ;;  %2614 = vmatpush3.bf16.msra.mxu1 %v2855_v28 }
 0x19a   : > { %2619 = vmatprep.subr.bf16.mxu1 %v3325_v4 }
 0x19b   : > { %1168 = vmatmul.mubr.bf16.vlgmr.msra.gmra.mrb[0].mxu0 %v990_v26 }
 0x19c   : > { %2645 = vmatprep.mubr.msk.bf16.mxu0 %vm3326_vm0, %v3325_v4  ;;  %2616 = vmatmul.mubr.bf16.vlgmr.msra.gmra.mrb[0].mxu1 %v990_v26 }
 0x19d   : > { %2621 = vmatprep.mubr.msk.bf16.mxu1 %vm3326_vm0, %v3325_v4 }
 0x26e   : > { %v1169_v36 = vpop.f32.mrb[0].mxu0 }
 0x26f   : > { %v1170_v37 = vadd.f32 %v1169_v36, %v995_v34  ;;  %v1171_v38 = vpop.f32.mrb[1].mxu0  ;;  %v1210_v48 = vpop.f32.mrb[0].mxu1 }
 0x270   : > { %v1172_v39 = vadd.f32 %v1171_v38, %v999_v35  ;;  %v1173_v40 = vpop.f32.mrb[2].mxu0  ;;  %v1211_v49 = vadd.f32 %v1210_v48, %v1003_v47  ;;  %v2617_v50 = vpop.f32.mrb[1].mxu1 }
 0x271   : > { %v1174_v41 = vpop.f32.mrb[3].mxu0  ;;  %v1216_v42 = vmul.f32 0.17677669, %v1170_v37  ;;  %v1213_v51 = vpop.f32.mrb[2].mxu1 }
 0x272   : > { %v1218_v43 = vpack.c.bf16 %v1172_v39, %v1172_v39  ;;  %v3938_v52 = vpack.c.bf16 %v1211_v49, %v1211_v49  ;;  %v2618_v53 = vpop.f32.mrb[3].mxu1 }
 0x273   : > { %v1217_v45 = vpack.c.bf16 %v1216_v42, %v1216_v42 }
 0x274   : > { %1331 = vrot.lane.b32.xlu1 %v1218_v43, %s3327_s2  ;;  %v1225_v44 = vsel %vm1220_vm1, %v1218_v43, 0  ;;  %v1285_v54 = vsel %vm1283_vm2, %v3938_v52, 0 }
 0x275   : > { %2620 = vmatpush3.bf16.xpose.msra.mxu1 %v1225_v44 }
 0x276   : > { %2625 = vmatprep.subr.bf16.mxu1 %v3325_v4 }
 0x278   : > { %1328 = vrot.lane.b32.xlu1 %v1217_v45, %s3327_s2 }
 0x27c   : > { %1440 = vrot.lane.b32.xlu1 %v1217_v45, %s3328_s8  ;;  %2622 = vmatmul.mubr.msk.bf16.vlgmr.msra.gmra.mrb[4].mxu1 %vm1220_vm1, %v1217_v45 }
 0x27d   : > { %2627 = vmatprep.mubr.msk.bf16.mxu1 %vm3326_vm0, %v3325_v4  ;;  %2626 = vmatpush3.bf16.msra.mxu1 %v1285_v54 }
 0x27e   : > { %2631 = vmatprep.subr.bf16.mxu1 %v3325_v4 }
 0x280   : > { %1552 = vrot.lane.b32.xlu1 %v1218_v43, %s3329_s10 }
 0x284   : > { %1550 = vrot.lane.b32.xlu1 %v1217_v45, %s3329_s10 }
 0x2e6   : > { %v1332_v1 = vpop.permute.xlu1 %1331 }
 0x2e7   : > { %v1337_v14 = vsel %vm1220_vm1, %v1332_v1, 0 }
 0x2ea   : > { %v1329_v2 = vpop.permute.xlu1 %1328 }
 0x2ee   : > { %v1441_v6 = vpop.permute.xlu1 %1440 }
 0x2f2   : > { %v1553_v9 = vpop.permute.xlu1 %1552 }
 0x2f3   : > { %v1558_v12 = vsel %vm1220_vm1, %v1553_v9, 0 }
 0x2f6   : > { %v1551_v15 = vpop.permute.xlu1 %1550 }
 0x34f   : > { %v1261_v55 = vpop.f32.mrb[4].mxu1 }
 0x350   : > { %v2623_v56 = vpop.f32.mrb[5].mxu1  ;;  %v1268_v57 = vsel %vm1267_vm3, %v1261_v55, -inf }
 0x351   : > { %1269 = vmax.xlane.f32.xlu0 %v1268_v57  ;;  %v1264_v58 = vpop.f32.mrb[6].mxu1 }
 0x352   : > { %v2624_v59 = vpop.f32.mrb[7].mxu1 }
 0x3de   : > { %v1270_v60 = vpop.xlane.xlu0 %1269 }
 0x3df   : > { %v1271_v61 = vsub.f32 %v1261_v55, %v1270_v60 }
 0x3e1   : > { %v1272_v62 = vmul.f32 1.442695, %v1271_v61 }
 0x3e3   : > { %2904 = vpow2.f32 %v1272_v62 }
 0x3ed   : > { %v2905_v63 = vpop.eup %2904 }
 0x3ee   : > { %v1274_v0 = vsel %vm1267_vm3, %v2905_v63, 0.0 }
 0x3ef   : > { %1275 = vadd.xlane.f32.xlu0 %v1274_v0 }
 0x405   : > { %1442 = vrot.lane.b32.xlu0 %v1218_v43, %s3328_s8 }
 0x47c   : > { %v1276_v5 = vpop.xlane.xlu0 %1275 }
 0x47d   : > { %2906 = vrcp.f32 %v1276_v5 }
 0x480   : > { %v1443_v7 = vpop.permute.xlu0 %1442 }
 0x481   : > { %v1448_v8 = vsel %vm1220_vm1, %v1443_v7, 0 }
 0x482   : > { %2644 = vmatpush3.bf16.xpose.msra.mxu0 %v1448_v8 }
 0x483   : > { %2655 = vmatprep.subr.bf16.mxu0 %v3325_v4 }
 0x487   : > { %v2907_v10 = vpop.eup %2906 }
 0x488   : > { %v1278_v11 = vmul.f32 %v2907_v10, %v2905_v63  ;;  %v2856_v10 = vld [vmem:[%s3855_s5] sm:$0xff]  }
 0x489   : > { %2646 = vmatmul.mubr.msk.bf16.vlgmr.msra.gmra.mrb[4].mxu0 %vm1220_vm1, %v1441_v6 }
 0x48a   : > { %2656 = vmatpush3.bf16.xpose.msra.mxu0 %v1558_v12  ;;  %v1279_v13 = vpack.c.bf16 %v1278_v11, %v1278_v11  ;;  %2657 = vmatprep.mubr.msk.bf16.mxu0 %vm3326_vm0, %v3325_v4  ;;  %v2857_v11 = vld [vmem:[%s3855_s5 + $0x8] sm:$0xff]   ;;  %v2858_v12 = vld [vmem:[%s3855_s5 + $0x10] sm:$0xff]  }
 0x48b   : > { %2667 = vmatprep.subr.bf16.mxu0 %v3325_v4 }
 0x48c   : > { %2628 = vmatmul.mubr.msk.bf16.vlgmr.msra.gmra.mrb[8].mxu1 %vm1267_vm3, %v1279_v13  ;;  %v2859_v13 = vld [vmem:[%s3855_s5 + $0x18] sm:$0xff]  }
 0x48d   : > { %2632 = vmatpush3.bf16.xpose.msra.mxu1 %v1337_v14  ;;  %2633 = vmatprep.mubr.msk.bf16.mxu1 %vm3326_vm0, %v3325_v4  ;;  %v2860_v14 = vld [vmem:[%s3855_s5 + $0x20] sm:$0xff]  }
 0x48e   : > { %2637 = vmatprep.subr.bf16.mxu1 %v3325_v4 }
 0x491   : > { %2658 = vmatmul.mubr.msk.bf16.vlgmr.msra.gmra.mrb[8].mxu0 %vm1220_vm1, %v1551_v15  ;;  %v2862_v15 = vld [vmem:[%s3855_s5 + $0x30] sm:$0xff]  }
 0x492   : > { %2683 = vmatprep.mubr.msk.bf16.mxu0 %vm3326_vm0, %v3325_v4  ;;  %2668 = vmatpush3.bf16.msra.mxu0 %v2856_v10  ;;  %v2895_v10 = vld [vmem:[%s3865_s12 + $0x18] sm:$0xff]  }
 0x493   : > { %2669 = vmatprep.subr.bf16.mxu0 %v3325_v4 }
 0x494   : > { %2634 = vmatmul.mubr.msk.bf16.vlgmr.msra.gmra.mrb[12].mxu1 %vm1220_vm1, %v1329_v2 }
 0x495   : > { %2639 = vmatprep.mubr.msk.bf16.mxu1 %vm3326_vm0, %v3325_v4 }
 0x496   : > { %2670 = vmatpush3.bf16.msra.mxu0 %v2857_v11  ;;  %v2896_v11 = vld [vmem:[%s3865_s12 + $0x60] sm:$0xff]  }
 0x497   : > { %2671 = vmatprep.subr.bf16.mxu0 %v3325_v4 }
 0x49a   : > { %2672 = vmatpush3.bf16.msra.mxu0 %v2858_v12  ;;  %v2897_v12 = vld [vmem:[%s3865_s12 + $0x20] sm:$0xff]  }
 0x49b   : > { %2673 = vmatprep.subr.bf16.mxu0 %v3325_v4 }
 0x49e   : > { %2674 = vmatpush3.bf16.msra.mxu0 %v2859_v13  ;;  %v2898_v13 = vld [vmem:[%s3865_s12 + $0x68] sm:$0xff]  }
 0x49f   : > { %2675 = vmatprep.subr.bf16.mxu0 %v3325_v4 }
 0x4a2   : > { %2676 = vmatpush3.bf16.msra.mxu0 %v2860_v14  ;;  %v2899_v14 = vld [vmem:[%s3865_s12 + $0x28] sm:$0xff]  }
 0x4a3   : > { %2677 = vmatprep.subr.bf16.mxu0 %v3325_v4 }
 0x55c   : > { %v1484_v16 = vpop.f32.mrb[4].mxu0 }
 0x55d   : > { %v2647_v17 = vpop.f32.mrb[5].mxu0  ;;  %v1490_v18 = vsel %vm1267_vm3, %v1484_v16, -inf }
 0x55e   : > { %1491 = vmax.xlane.f32.xlu0 %v1490_v18  ;;  %v1487_v19 = vpop.f32.mrb[6].mxu0 }
 0x55f   : > { %v3965_v20 = vpop.f32.mrb[8].mxu1  ;;  %v2648_v21 = vpop.f32.mrb[7].mxu0 }
 0x560   : > { %v2629_v22 = vpop.f32.mrb[9].mxu1  ;;  %v2863_v21 = vld [vmem:[%s3855_s5 + $0x38] sm:$0xff]  }
 0x561   : > { %v1324_v23 = vpop.f32.mrb[10].mxu1 }
 0x562   : > { %v2630_v25 = vpop.f32.mrb[11].mxu1 }
 0x564   : > { %v1594_v26 = vpop.f32.mrb[8].mxu0 }
 0x565   : > { %v2659_v27 = vpop.f32.mrb[9].mxu0  ;;  %v1600_v38 = vsel %vm1267_vm3, %v1594_v26, -inf }
 0x566   : > { %v1597_v28 = vpop.f32.mrb[10].mxu0 }
 0x567   : > { %v1373_v29 = vpop.f32.mrb[12].mxu1  ;;  %v2660_v32 = vpop.f32.mrb[11].mxu0 }
 0x568   : > { %v2635_v34 = vpop.f32.mrb[13].mxu1  ;;  %v1379_v35 = vsel %vm1267_vm3, %v1373_v29, -inf }
 0x569   : > { %1380 = vmax.xlane.f32.xlu1 %v1379_v35  ;;  %v1376_v36 = vpop.f32.mrb[14].mxu1 }
 0x56a   : > { %v2636_v37 = vpop.f32.mrb[15].mxu1 }
 0x56d   : > { %1601 = vmax.xlane.f32.xlu1 %v1600_v38 }
 0x5eb   : > { %v1492_v39 = vpop.xlane.xlu0 %1491 }
 0x5ec   : > { %v1493_v40 = vsub.f32 %v1484_v16, %v1492_v39 }
 0x5ee   : > { %v1494_v41 = vmul.f32 1.442695, %v1493_v40 }
 0x5f0   : > { %2908 = vpow2.f32 %v1494_v41 }
 0x5f6   : > { %v1381_v42 = vpop.xlane.xlu1 %1380 }
 0x5f7   : > { %v1382_v43 = vsub.f32 %v1373_v29, %v1381_v42 }
 0x5f9   : > { %v1383_v48 = vmul.f32 1.442695, %v1382_v43 }
 0x5fa   : > { %v2909_v44 = vpop.eup %2908  ;;  %v1602_v45 = vpop.xlane.xlu1 %1601 }
 0x5fb   : > { %v1603_v46 = vsub.f32 %v1594_v26, %v1602_v45  ;;  %v1496_v47 = vsel %vm1267_vm3, %v2909_v44, 0.0 }
 0x5fc   : > { %1497 = vadd.xlane.f32.xlu0 %v1496_v47  ;;  %v2866_v47 = vld [vmem:[%s3860_s11 + $0x4] ss:$8 sps:$4 sm:$0xff]  }
 0x5fd   : > { %v1604_v49 = vmul.f32 1.442695, %v1603_v46 }
 0x5ff   : > { %2910 = vpow2.f32 %v1604_v49  ;;  %v2867_v49 = vld [vmem:[%s3860_s11 + $0x10] ss:$8 sps:$4 sm:$0xff]  }
 0x600   : > { %2912 = vpow2.f32 %v1383_v48  ;;  %v2869_v48 = vld [vmem:[%s3860_s11 + $0x14] ss:$8 sps:$4 sm:$0xff]  }
 0x609   : > { %v2911_v50 = vpop.eup %2910 }
 0x60a   : > { %v1606_v51 = vsel %vm1267_vm3, %v2911_v50, 0.0  ;;  %v2913_v53 = vpop.eup %2912 }
 0x60b   : > { %1607 = vadd.xlane.f32.xlu1 %v1606_v51  ;;  %v1385_v54 = vsel %vm1267_vm3, %v2913_v53, 0.0  ;;  %v2870_v51 = vld [vmem:[%s3860_s11 + $0x20] ss:$8 sps:$4 sm:$0xff]  }
 0x60f   : > { %1386 = vadd.xlane.f32.xlu1 %v1385_v54 }
 0x612   : > { %1392 = vrot.lane.b32.xlu0 %v3938_v52, %s3327_s2 }
 0x620   : > { %1502 = vrot.lane.b32.xlu1 %v3938_v52, %s3328_s8 }
 0x624   : > { %1612 = vrot.lane.b32.xlu1 %v3938_v52, %s3329_s10 }
 0x689   : > { %v1498_v55 = vpop.xlane.xlu0 %1497 }
 0x68d   : > { %v1393_v56 = vpop.permute.xlu0 %1392 }
 0x68e   : > { %v1398_v57 = vsel %vm1283_vm2, %v1393_v56, 0  ;;  %v2875_v56 = vld [vmem:[%s3860_s11 + $0x34] ss:$8 sps:$4 sm:$0xff]  }
 0x68f   : > { %2638 = vmatpush3.bf16.msra.mxu1 %v1398_v57  ;;  %v2873_v57 = vld [vmem:[%s3860_s11 + $0x30] ss:$8 sps:$4 sm:$0xff]  }
 0x690   : > { %2649 = vmatprep.subr.bf16.mxu1 %v3325_v4 }
 0x698   : > { %v1608_v58 = vpop.xlane.xlu1 %1607 }
 0x69c   : > { %v1387_v59 = vpop.xlane.xlu1 %1386 }
 0x69d   : > { %2914 = vrcp.f32 %v1387_v59  ;;  %v2876_v59 = vld [vmem:[%s3860_s11 + $0x40] ss:$8 sps:$4 sm:$0xff]  }
 0x69e   : > { %2916 = vrcp.f32 %v1498_v55 }
 0x69f   : > { %2918 = vrcp.f32 %v1608_v58  ;;  %v2878_v58 = vld [vmem:[%s3860_s11 + $0x44] ss:$8 sps:$4 sm:$0xff]  }
 0x6a0   : > { %v1503_v62 = vpop.permute.xlu1 %1502 }
 0x6a1   : > { %v1508_v1 = vsel %vm1283_vm2, %v1503_v62, 0  ;;  %v2884_v62 = vld [vmem:[%s3860_s11 + $0x64] ss:$8 sps:$4 sm:$0xff]  }
 0x6a4   : > { %v1613_v2 = vpop.permute.xlu1 %1612 }
 0x6a5   : > { %v1618_v7 = vsel %vm1283_vm2, %v1613_v2, 0  ;;  %v2889_v2 = vld [vmem:[%s3865_s12] sm:$0xff]  }
 0x6a7   : > { %v2915_v60 = vpop.eup %2914 }
 0x6a8   : > { %v1389_v61 = vmul.f32 %v2915_v60, %v2913_v53  ;;  %v2917_v0 = vpop.eup %2916  ;;  %v2881_v60 = vld [vmem:[%s3860_s11 + $0x54] ss:$8 sps:$4 sm:$0xff]  }
 0x6a9   : > { %v1500_v52 = vmul.f32 %v2917_v0, %v2909_v44  ;;  %v2919_v6 = vpop.eup %2918  ;;  %v2887_v0 = vld [vmem:[%s3860_s11 + $0x74] ss:$8 sps:$4 sm:$0xff]  }
 0x6aa   : > { %v1390_v63 = vpack.c.bf16 %v1389_v61, %v1389_v61  ;;  %v1610_v8 = vmul.f32 %v2919_v6, %v2911_v50  ;;  %v2872_v50 = vld [vmem:[%s3860_s11 + $0x24] ss:$8 sps:$4 sm:$0xff]   ;;  %v2879_v61 = vld [vmem:[%s3860_s11 + $0x50] ss:$8 sps:$4 sm:$0xff]  }
 0x6ab   : > { %v1501_v5 = vpack.c.bf16 %v1500_v52, %v1500_v52  ;;  %v2888_v52 = vld [vmem:[%s3865_s12 + $0x40] sm:$0xff]   ;;  %v2891_v6 = vld [vmem:[%s3865_s12 + $0x8] sm:$0xff]  }
 0x6ac   : > { %2640 = vmatmul.mubr.msk.bf16.vlgmr.msra.gmra.mrb[16].mxu1 %vm1267_vm3, %v1390_v63  ;;  %v1611_v9 = vpack.c.bf16 %v1610_v8, %v1610_v8  ;;  %v2882_v63 = vld [vmem:[%s3860_s11 + $0x60] ss:$8 sps:$4 sm:$0xff]   ;;  %v2893_v8 = vld [vmem:[%s3865_s12 + $0x10] sm:$0xff]  }
 0x6ad   : > { %2650 = vmatpush3.bf16.msra.mxu1 %v1508_v1  ;;  %2651 = vmatprep.mubr.msk.bf16.mxu1 %vm3326_vm0, %v3325_v4  ;;  %v2885_v1 = vld [vmem:[%s3860_s11 + $0x70] ss:$8 sps:$4 sm:$0xff]  }
 0x6ae   : > { %2661 = vmatprep.subr.bf16.mxu1 %v3325_v4 }
 0x6b4   : > { %2652 = vmatmul.mubr.msk.bf16.vlgmr.msra.gmra.mrb[20].mxu1 %vm1267_vm3, %v1501_v5  ;;  %v2890_v5 = vld [vmem:[%s3865_s12 + $0x48] sm:$0xff]  }
 0x6b5   : > { %2662 = vmatpush3.bf16.msra.mxu1 %v1618_v7  ;;  %2663 = vmatprep.mubr.msk.bf16.mxu1 %vm3326_vm0, %v3325_v4  ;;  %v2892_v7 = vld [vmem:[%s3865_s12 + $0x50] sm:$0xff]  }
 0x6b6   : > { %1891 = vmatprep.subr.bf16.mxu1 %v2866_v47 }
 0x6bc   : > { %2664 = vmatmul.mubr.msk.bf16.vlgmr.msra.gmra.mrb[24].mxu1 %vm1267_vm3, %v1611_v9  ;;  %v2894_v9 = vld [vmem:[%s3865_s12 + $0x58] sm:$0xff]  }
 0x6bd   : > { %1923 = vmatprep.mubr.bf16.mxu1 %v3324_v3  ;;  %v2861_v3 = vld [vmem:[%s3855_s5 + $0x28] sm:$0xff]   ;;  %s4192_s5 = scalar_lea.vmem [#allocation5], %s3795_s3 }
 0x6be   : > { %2678 = vmatpush3.bf16.msra.mxu0 %v2861_v3  ;;  %v2488_v40 = vld [vmem:[%s4192_s5] ss:$0 sm:$0xff] }
 0x6bf   : > { %2679 = vmatprep.subr.bf16.mxu0 %v3325_v4 }
 0x6c2   : > { %2680 = vmatpush3.bf16.msra.mxu0 %v2862_v15 }
 0x6c3   : > { %2681 = vmatprep.subr.bf16.mxu0 %v3325_v4 }
 0x6c6   : > { %2682 = vmatpush3.bf16.msra.mxu0 %v2863_v21  ;;  %v2498_v21 = vld [vmem:[%s4194_s14] ss:$0 sm:$0xff] }
 0x6c7   : > { %2577 = vmatprep.subr.bf16.mxu0 %v2888_v52 }
 0x77f   : > { %v1434_v16 = vpop.f32.mrb[16].mxu1 }
 0x780   : > { %1661 = vrot.lane.b32.xlu0 %v1434_v16, %s3329_s10  ;;  %v2641_v17 = vpop.f32.mrb[17].mxu1 }
 0x781   : > { %v1437_v18 = vpop.f32.mrb[18].mxu1 }
 0x782   : > { %v2642_v19 = vpop.f32.mrb[19].mxu1 }
 0x787   : > { %v1544_v22 = vpop.f32.mrb[20].mxu1 }
 0x788   : > { %1665 = vrot.lane.b32.xlu1 %v1544_v22, %s3328_s8  ;;  %v2653_v23 = vpop.f32.mrb[21].mxu1 }
 0x789   : > { %v1547_v25 = vpop.f32.mrb[22].mxu1 }
 0x78a   : > { %v2654_v26 = vpop.f32.mrb[23].mxu1 }
 0x78b   : > { %v2900_v26 = vld [vmem:[%s3865_s12 + $0x70] sm:$0xff]  }
 0x78f   : > { %v1654_v27 = vpop.f32.mrb[24].mxu1 }
 0x790   : > { %1669 = vrot.lane.b32.xlu0 %v1654_v27, %s3327_s2  ;;  %v2665_v28 = vpop.f32.mrb[25].mxu1  ;;  %v2901_v27 = vld [vmem:[%s3865_s12 + $0x30] sm:$0xff]  }
 0x791   : > { %v1657_v29 = vpop.f32.mrb[26].mxu1  ;;  %v2902_v28 = vld [vmem:[%s3865_s12 + $0x78] sm:$0xff]  }
 0x792   : > { %v2666_v32 = vpop.f32.mrb[27].mxu1  ;;  %v2903_v29 = vld [vmem:[%s3865_s12 + $0x38] sm:$0xff]   ;;  %s4195_s12 = scalar_lea.vmem [#allocation11], %s3795_s3 }
 0x793   : > { %v954_v32 = vld [vmem:[%s3819_s0] sm:$0x3] }
 0x7f2   : > { %v1662_v34 = vpop.permute.xlu0 %1661 }
 0x7f3   : > { %v1672_v4 = vsel %vm1220_vm1, %v3965_v20, %v1662_v34  ;;  %v2864_v20 = vld [vmem:[%s3860_s11] ss:$8 sps:$4 sm:$0xff]   ;;  %s4193_s11 = scalar_lea.vmem [#allocation7], %s3795_s3  ;;  %v1804_v34 = vrot.slane %v954_v32, %v994_v31 }
 0x7f4   : > { %1892 = vmatpush1.bf16.msra.mxu1 %v2864_v20  ;;  %v2497_v18 = vld [vmem:[%s4193_s11] ss:$0 sm:$0xff] }
 0x7f5   : > { %1893 = vmatprep.subr.bf16.mxu1 %v2869_v48 }
 0x7f8   : > { %1894 = vmatpush1.bf16.msra.mxu1 %v2867_v49 }
 0x7f9   : > { %1895 = vmatprep.subr.bf16.mxu1 %v2872_v50 }
 0x7fa   : > { %v1666_v35 = vpop.permute.xlu1 %1665 }
 0x7fb   : > { %v1674_v36 = vsel %vm1673_vm4, %v1672_v4, %v1666_v35  ;;  %v1808_v35 = vrot.slane %v954_v32, %v998_v33 }
 0x7fc   : > { %1896 = vmatpush1.bf16.msra.mxu1 %v2870_v51 }
 0x7fd   : > { %1897 = vmatprep.subr.bf16.mxu1 %v2875_v56 }
 0x800   : > { %1898 = vmatpush1.bf16.msra.mxu1 %v2873_v57  ;;  %v2532_v57 = vld [vmem:[%s4196_s17] ss:$0 sm:$0xff] }
 0x801   : > { %1899 = vmatprep.subr.bf16.mxu1 %v2878_v58 }
 0x802   : > { %v1670_v37 = vpop.permute.xlu0 %1669 }
 0x803   : > { %v1676_v38 = vsel %vm1675_vm5, %v1674_v36, %v1670_v37 }
 0x804   : > { %v1677_v39 = vpack.c.bf16 %v1676_v38, %v1676_v38  ;;  %1900 = vmatpush1.bf16.msra.mxu1 %v2876_v59  ;;  %v2533_v59 = vld [vmem:[%s4197_s6] ss:$0 sm:$0xff] }
 0x805   : > { %1901 = vmatprep.subr.bf16.mxu1 %v2881_v60 }
 0x806   : > { %2684 = vmatmul.mubr.bf16.vlgmr.msra.gmra.mrb[12].mxu0 %v1677_v39 }
 0x807   : > { %2578 = vmatpush3.bf16.msra.mxu0 %v2889_v2 }
 0x808   : > { %1902 = vmatpush1.bf16.msra.mxu1 %v2879_v61  ;;  %2579 = vmatprep.subr.bf16.mxu0 %v2890_v5 }
 0x809   : > { %1903 = vmatprep.subr.bf16.mxu1 %v2884_v62 }
 0x80b   : > { %2580 = vmatpush3.bf16.msra.mxu0 %v2891_v6 }
 0x80c   : > { %1904 = vmatpush1.bf16.msra.mxu1 %v2882_v63  ;;  %2581 = vmatprep.subr.bf16.mxu0 %v2892_v7  ;;  %v2535_v7 = vld [vmem:[#allocation16] ss:$0 sm:$0xff] (!%p2534_p2) }
 0x80d   : > { %1905 = vmatprep.subr.bf16.mxu1 %v2887_v0 }
 0x80f   : > { %2582 = vmatpush3.bf16.msra.mxu0 %v2893_v8 }
 0x810   : > { %1906 = vmatpush1.bf16.msra.mxu1 %v2885_v1  ;;  %2583 = vmatprep.subr.bf16.mxu0 %v2894_v9  ;;  %v2536_v9 = vld [vmem:[#allocation17] ss:$0 sm:$0xff] (!%p2534_p2) }
 0x813   : > { %2584 = vmatpush3.bf16.msra.mxu0 %v2895_v10 }
 0x814   : > { %2585 = vmatprep.subr.bf16.mxu0 %v2896_v11 }
 0x817   : > { %2586 = vmatpush3.bf16.msra.mxu0 %v2897_v12 }
 0x818   : > { %2587 = vmatprep.subr.bf16.mxu0 %v2898_v13 }
 0x81b   : > { %2588 = vmatpush3.bf16.msra.mxu0 %v2899_v14 }
 0x81c   : > { %2589 = vmatprep.subr.bf16.mxu0 %v2900_v26 }
 0x81f   : > { %2590 = vmatpush3.bf16.msra.mxu0 %v2901_v27 }
 0x820   : > { %2591 = vmatprep.subr.bf16.mxu0 %v2902_v28 }
 0x823   : > { %2592 = vmatpush3.bf16.msra.mxu0 %v2903_v29 }
 0x8d9   : > { %v1766_v41 = vpop.f32.mrb[12].mxu0 }
 0x8da   : > { %v1767_v42 = vadd.f32 %v2488_v40, %v1766_v41  ;;  %v2685_v43 = vpop.f32.mrb[13].mxu0 }
 0x8db   : > { %v1769_v44 = vpop.f32.mrb[14].mxu0 }
 0x8dc   : > { %v2686_v45 = vpop.f32.mrb[15].mxu0  ;;  %v1772_v46 = vadd.f32 %v1767_v42, %v3899_v24 }
 0x8de   : > { %1773 = vadd.xlane.f32.xlu1 %v1772_v46 }
 0x96b   : > { %v1774_v24 = vpop.xlane.xlu1 %1773 }
 0x96c   : > { %v1776_v53 = vmul.f32 0.0078125, %v1774_v24 }
 0x96e   : > { %v1777_v54 = vsub.f32 %v1772_v46, %v1776_v53  ;;  %v2515_v46 = vld [vmem:[%s4195_s12] ss:$0 sm:$0xff] }
 0x970   : > { %v1778_v55 = vmul.f32 %v1777_v54, %v1777_v54 }
 0x972   : > { %1779 = vadd.xlane.f32.xlu0 %v1778_v55 }
 0x9ff   : > { %v1780_v3 = vpop.xlane.xlu0 %1779 }
 0xa00   : > { %v1781_v15 = vmul.f32 0.0078125, %v1780_v3 }
 0xa02   : > { %v1782_v16 = vadd.f32 1e-05, %v1781_v15 }
 0xa04   : > { %2920 = vrsqrt.f32 %v1782_v16 }
 0xa0e   : > { %v2921_v17 = vpop.eup %2920 }
 0xa0f   : > { %v1784_v19 = vmul.f32 %v2921_v17, %v1777_v54 }
 0xa11   : > { %v1791_v22 = vmul.f32 %v2497_v18, %v1784_v19 }
 0xa13   : > { %v1798_v23 = vadd.f32 %v2498_v21, %v1791_v22 }
 0xa15   : > { %v1799_v25 = vpack.c.bf16 %v1798_v23, %v1798_v23 }
 0xa17   : > { %1924 = vmatmul.mubr.bf16.vlgmr.msra.gmra.mrb[28].mxu1 %v1799_v25 }
 0xaea   : > { %v1925_v4 = vpop.f32.mrb[28].mxu1 }
 0xaeb   : > { %v1926_v36 = vadd.f32 %v1925_v4, %v1804_v34  ;;  %v1927_v37 = vpop.f32.mrb[29].mxu1 }
 0xaec   : > { %v1928_v38 = vadd.f32 %v1927_v37, %v1808_v35  ;;  %v1929_v39 = vpop.f32.mrb[30].mxu1 }
 0xaed   : > { %v1932_v40 = vmax.f32 %v1926_v36, 0.0  ;;  %v1930_v41 = vpop.f32.mrb[31].mxu1 }
 0xaee   : > { %v1933_v42 = vmax.f32 %v1928_v38, 0.0 }
 0xaef   : > { %v1934_v44 = vpack.c.bf16 %v1932_v40, %v1932_v40 }
 0xaf0   : > { %v1935_v43 = vpack.c.bf16 %v1933_v42, %v1933_v42 }
 0xaf2   : > { %2070 = vmatprep.mubr.bf16.mxu0 %v1935_v43 }
 0xaf3   : > { %2071 = vmatmul.mubr.bf16.vlgmr.msra.gmra.mrb[16].mxu0 %v1934_v44 }
 0xbc6   : > { %v2593_v45 = vpop.f32.mrb[16].mxu0 }
 0xbc7   : > { %v2594_v20 = vpop.f32.mrb[17].mxu0 }
 0xbc8   : > { %v2595_v31 = vadd.f32 %v2594_v20, %v2593_v45  ;;  %v2596_v30 = vpop.f32.mrb[18].mxu0 }
 0xbc9   : > { %v2597_v33 = vpop.f32.mrb[19].mxu0 }
 0xbca   : > { %v2073_v47 = vadd.f32 %v2595_v31, %v2515_v46 }
 0xbcc   : > { %v2078_v48 = vadd.f32 %v2073_v47, %v1798_v23 }
 0xbce   : > { %2079 = vadd.xlane.f32.xlu0 %v2078_v48 }
 0xc5b   : > { %v2080_v49 = vpop.xlane.xlu0 %2079 }
 0xc5c   : > { %v2081_v50 = vmul.f32 0.0078125, %v2080_v49 }
 0xc5e   : > { %v2082_v51 = vsub.f32 %v2078_v48, %v2081_v50 }
 0xc60   : > { %v2083_v24 = vmul.f32 %v2082_v51, %v2082_v51 }
 0xc62   : > { %2084 = vadd.xlane.f32.xlu1 %v2083_v24 }
 0xcef   : > { %v2085_v53 = vpop.xlane.xlu1 %2084 }
 0xcf0   : > { %v2086_v54 = vmul.f32 0.0078125, %v2085_v53 }
 0xcf2   : > { %v2087_v55 = vadd.f32 1e-05, %v2086_v54 }
 0xcf4   : > { %2922 = vrsqrt.f32 %v2087_v55 }
 0xcfe   : > { %v2923_v56 = vpop.eup %2922 }
 0xcff   : > { %v2089_v58 = vmul.f32 %v2923_v56, %v2082_v51  ;;  %2108 = sbr.rel (%p2534_p2) target bundleno = 3645 (0xe3d), region = 128 }
 0xd01   : > { %v2096_v60 = vmul.f32 %v2532_v57, %v2089_v58 }
 0xd03   : > { %v2103_v61 = vadd.f32 %v2533_v59, %v2096_v60 }
 0xd05   : > { %2104 = vst [vmem:[#allocation2] sm:$0xff] %v2103_v61  ;;  %2111 = vadd.xlane.f32.xlu0 (!%p2534_p2), %v2103_v61 }
 0xd92   : > { %v2112_v62 = vpop.xlane.xlu0 %2111 }
 0xd93   : > { %v2113_v63 = vmul.f32 0.0078125, %v2112_v62 }
 0xd95   : > { %v2114_v0 = vsub.f32 %v2103_v61, %v2113_v63 }
 0xd97   : > { %v2115_v1 = vmul.f32 %v2114_v0, %v2114_v0 }
 0xd99   : > { %2116 = vadd.xlane.f32.xlu0 %v2115_v1 }
 0xe26   : > { %v2117_v52 = vpop.xlane.xlu0 %2116 }
 0xe27   : > { %v2118_v2 = vmul.f32 0.0078125, %v2117_v52 }
 0xe29   : > { %v2119_v5 = vadd.f32 1e-05, %v2118_v2 }
 0xe2b   : > { %2924 = vrsqrt.f32 %v2119_v5 }
 0xe35   : > { %v2925_v6 = vpop.eup %2924 }
 0xe36   : > { %v2121_v8 = vmul.f32 %v2925_v6, %v2114_v0 }
 0xe38   : > { %v2128_v10 = vmul.f32 %v2535_v7, %v2121_v8 }
 0xe3a   : > { %v2135_v11 = vadd.f32 %v2536_v9, %v2128_v10 }
 0xe3c   : > { %2136 = vst [vmem:[%s3870_s18] sm:$0xff] %v2135_v11 }
 0xe3d PF: > { %s41_s25 = sadd.s32 1, %s3312_s25   ;;  %s4199_s3 = sld [smem:[#allocation32_spill]] }
 0xe3e   : > { %p38_p3 = scmp.ge.s32.totalorder %s41_s25, 14   ;;  %s4200_s22 = sld [smem:[#allocation28_spill]] }
 0xe3f   : > { %s4201_s0 = sld [smem:[#allocation30_spill]]  ;;  %s4202_s24 = sld [smem:[#allocation31_spill]] }
 0xe40   : > { %s4203_s18 = smov %s3288_s19  ;;  %s4204_s19 = smov %s3292_s20 }
 0xe41   : > { %s4206_s21 = smov %s3304_s23  ;;  %40 = sbr.rel (!%p38_p3) target bundleno = 31 (0x1f), region = 236 }
 0xe43   : > { %s4205_s20 = smov %s4199_s3 }
 0xe45   : > { %s4207_s23 = smov %s4201_s0 }
 0xe48   :  { %2156 = vsyncpa [#allocation4], 1 }
 0xe49   :  { %2158 = vsyncpa [#allocation4 + $0x1], 1 }
 0xe4a   :  { %2159 = vsyncpa [#allocation6], 1 }
 0xe4b   :  { %2161 = vsyncpa [#allocation6 + $0x1], 1 }
 0xe4c   :  { %2162 = vsyncpa [#allocation9], 1 }
 0xe4d   :  { %2164 = vsyncpa [#allocation9 + $0x1], 1 }
 0xe4e   :  { %2165 = vsyncpa [#allocation12], 1 }
 0xe4f   :  { %2167 = vsyncpa [#allocation12 + $0x1], 1 }
 0xe50   :  { %2168 = vsyncpa [#allocation15], 1 }
 0xe51   :  { %2170 = vsyncpa [#allocation15 + $0x1], 1 }
 0xe52   :  { %2171 = vsyncpa [#allocation18], 1 }

// kernel: forward.8
= control target key start
LH: loop header
LB: loop body
LE: loop exit
PB: predicated region body
PF: predicated region fallthrough
CT: control target
= control target key end

     0   :  { %s4471_s28 = smov 0   ;;  %s4473_s29 = smov 0   ;;  %s5041_s0 = inlined_call_operand.vmem [shape: f32[2,16,128], index: 0, kind: input, shape index: {}]   ;;  %s5042_s1 = inlined_call_operand.vmem [shape: f32[2,8,128], index: 1, kind: input, shape index: {}]   ;;  %s5043_s2 = inlined_call_operand.vmem [shape: bf16[2,128,384], index: 2, kind: input, shape index: {}]   ;;  %s5044_s3 = inlined_call_operand.vmem [shape: f32[2,1,384], index: 3, kind: input, shape index: {}]   ;;  %s5045_s4 = inlined_call_operand.vmem [shape: bf16[2,128,128], index: 4, kind: input, shape index: {}]   ;;  %s5046_s5 = inlined_call_operand.vmem [shape: f32[2,1,128], index: 5, kind: input, shape index: {}]   ;;  %s5047_s6 = inlined_call_operand.vmem [shape: f32[2,1,128], index: 6, kind: input, shape index: {}]   ;;  %s5048_s7 = inlined_call_operand.vmem [shape: f32[2,1,128], index: 7, kind: input, shape index: {}]   ;;  %s5049_s8 = inlined_call_operand.vmem [shape: bf16[2,128,128], index: 8, kind: input, shape index: {}]   ;;  %s5050_s9 = inlined_call_operand.vmem [shape: f32[2,1,128], index: 9, kind: input, shape index: {}]   ;;  %s5051_s10 = inlined_call_operand.vmem [shape: bf16[2,128,256], index: 10, kind: input, shape index: {}]   ;;  %s5052_s11 = inlined_call_operand.vmem [shape: f32[2,1,256], index: 11, kind: input, shape index: {}]   ;;  %s5053_s12 = inlined_call_operand.vmem [shape: bf16[2,128,128], index: 12, kind: input, shape index: {}]   ;;  %s5054_s13 = inlined_call_operand.vmem [shape: f32[2,1,128], index: 13, kind: input, shape index: {}]   ;;  %s5055_s14 = inlined_call_operand.vmem [shape: f32[2,1,128], index: 14, kind: input, shape index: {}]   ;;  %s5056_s15 = inlined_call_operand.vmem [shape: f32[2,1,128], index: 15, kind: input, shape index: {}]   ;;  %s5057_s16 = inlined_call_operand.vmem [shape: bf16[2,128,256], index: 16, kind: input, shape index: {}]   ;;  %s5058_s17 = inlined_call_operand.vmem [shape: f32[2,1,256], index: 17, kind: input, shape index: {}]   ;;  %s5059_s18 = inlined_call_operand.vmem [shape: bf16[2,256,128], index: 18, kind: input, shape index: {}]   ;;  %s5060_s19 = inlined_call_operand.vmem [shape: f32[2,1,128], index: 19, kind: input, shape index: {}]   ;;  %s5061_s20 = inlined_call_operand.vmem [shape: f32[2,1,128], index: 20, kind: input, shape index: {}]   ;;  %s5062_s21 = inlined_call_operand.vmem [shape: f32[2,1,128], index: 21, kind: input, shape index: {}]   ;;  %s5063_s22 = inlined_call_operand.vmem [shape: f32[2,16,128], index: 22, kind: output, shape index: {}]  }
   0x1   :  { %5072 = sst [smem:[#allocation14_spill]] %s5041_s0  ;;  %s4475_s30 = smov 0  }
   0x2   :  { %5073 = sst [smem:[#allocation15_spill]] %s5042_s1 }
   0x3   :  { %5074 = sst [smem:[#allocation16_spill]] %s5043_s2 }
   0x4   :  { %5075 = sst [smem:[#allocation17_spill]] %s5044_s3  ;;  %s4469_s3 = smov 0  }
   0x5   :  { %5076 = sst [smem:[#allocation18_spill]] %s5045_s4  ;;  %s4477_s4 = smov 0  }
   0x6   :  { %5077 = sst [smem:[#allocation19_spill]] %s5046_s5 }
   0x7   :  { %5078 = sst [smem:[#allocation20_spill]] %s5047_s6 }
   0x8   :  { %5079 = sst [smem:[#allocation21_spill]] %s5049_s8 }
   0x9   :  { %5080 = sst [smem:[#allocation22_spill]] %s5050_s9 }
   0xa   :  { %5081 = sst [smem:[#allocation23_spill]] %s5051_s10 }
   0xb   :  { %5082 = sst [smem:[#allocation24_spill]] %s5052_s11 }
   0xc   :  { %5083 = sst [smem:[#allocation25_spill]] %s5053_s12 }
   0xd   :  { %5084 = sst [smem:[#allocation26_spill]] %s5054_s13 }
   0xe   :  { %5085 = sst [smem:[#allocation27_spill]] %s5055_s14 }
   0xf   :  { %5086 = sst [smem:[#allocation28_spill]] %s5056_s15 }
  0x10   :  { %5087 = sst [smem:[#allocation29_spill]] %s5057_s16 }
  0x11   :  { %5088 = sst [smem:[#allocation30_spill]] %s5058_s17 }
  0x12   :  { %5089 = sst [smem:[#allocation31_spill]] %s5059_s18 }
  0x13   :  { %5090 = sst [smem:[#allocation32_spill]] %s5060_s19 }
  0x14   :  { %5091 = sst [smem:[#allocation33_spill]] %s5061_s20 }
  0x15   :  { %5092 = sst [smem:[#allocation34_spill]] %s5062_s21 }
  0x16   :  { %5093 = sst [smem:[#allocation35_spill]] %s5063_s22 }
  0x17 LB: > { %5094 = sst [smem:[#allocation3_spill]] %s4330_s3  ;;  %s41_s0 = sadd.s32 1, %s4338_s29  ;;  %s4346_s4 = sphi %s4477_s4, %s32_s4   ;;  %s4342_s30 = sphi %s4475_s30, %s5155_s30   ;;  %s4338_s29 = sphi %s4473_s29, %s5154_s29   ;;  %s4334_s28 = sphi %s4471_s28, %s5153_s28   ;;  %s4330_s3 = sphi %s4469_s3, %s5152_s3  }
  0x18   : > { %5095 = sst [smem:[#allocation4_spill]] %s4338_s29  ;;  %s44_s23 = sadd.s32 1, %s4342_s30 }
  0x19   : > { %5096 = sst [smem:[#allocation5_spill]] %s4342_s30  ;;  %p42_p0 = scmp.ge.s32.totalorder %s41_s0, 2 }
  0x1a   : > { %5097 = sst [smem:[#allocation6_spill]] %s4346_s4  ;;  %p3613_p1 = scmp.ge.s32.totalorder %s4346_s4, 1 }
  0x1b   : > { %p810_p2 = scmp.lt.s32.totalorder %s4346_s4, 5  ;;  %s5157_s0 = smov (%p42_p0, %s41_s0), 0 }
  0x1c   : > { %5098 = sst [smem:[#allocation7_spill]] %s5157_s0  ;;  %s5159_s23 = smov (!%p42_p0, %s44_s23), %s4342_s30 }
  0x1d   : > { %p811_p3 = pnand %p3613_p1, %p810_p2  ;;  %p46_p4 = scmp.ge.s32.totalorder %s5159_s23, 2 }
  0x1f   : > { %s5161_s23 = smov (%p46_p4, %s5159_s23), 0  ;;  %814 = sbr.rel (%p811_p3) target bundleno = 5250 (0x1482), region = 108 }
  0x20   : > { %5099 = sst [smem:[#allocation8_spill]] %s5161_s23 }
  0x26   : > { %p953_p5 = scmp.lt.s32.totalorder %s4334_s28, 1  ;;  %p962_p6 = scmp.lt.s32.totalorder %s4330_s3, 1 }
  0x27   : > { %s5100_s26 = sld [smem:[#allocation14_spill]]  ;;  %s5102_s0 = sld [smem:[#allocation15_spill]] }
  0x28   : > { %s5163_s28 = smov (!%p953_p5, %s4334_s28), 1  ;;  %s5104_s20 = sld [smem:[#allocation18_spill]] }
  0x29   : > { %s4505_s1 = scalar_select %p962_p6, %s4330_s3, 1 }
  0x2a   : > { %s5068_s5 = sshll.u32 %s5163_s28, 4  ;;  %s3616_s24 = sshll.u32 %s5163_s28, 3 }
  0x2b   : > { %s4034_s29 = smul.u32 192, %s4505_s1  ;;  %s3761_s4 = sshll.u32 %s4505_s1, 6 }
  0x2c   : > { %s4035_s3 = smul.u32 3, %s4505_s1  ;;  %s5108_s18 = sld [smem:[#allocation17_spill]] }
  0x2d   : > { %s4514_s2 = scalar_lea.vmem %s5100_s26, %s5068_s5  ;;  %s4519_s30 = scalar_lea.vmem %s5102_s0, %s3616_s24 }
  0x2e   : > { %5101 = sst [smem:[#allocation9_spill]] %s4514_s2  ;;  %s4527_s19 = scalar_lea.vmem %s5104_s20, %s3761_s4 }
  0x2f   : > { %5103 = sst [smem:[#allocation10_spill]] %s4519_s30  ;;  %s5106_s26 = sld [smem:[#allocation16_spill]] }
  0x30   : > { %5105 = sst [smem:[#allocation11_spill]] %s4527_s19  ;;  %s5110_s8 = sld [smem:[#allocation21_spill]] }
  0x31   : > { %s5112_s10 = sld [smem:[#allocation23_spill]]  ;;  %s3624_s19 = sshll.u32 %s4505_s1, 1 }
  0x32   : > { %s4541_s17 = scalar_lea.vmem %s5108_s18, %s4035_s3  ;;  %s3763_s3 = sshll.u32 %s4505_s1, 7 }
  0x33   : > { %s5113_s11 = sld [smem:[#allocation24_spill]]  ;;  %s5114_s12 = sld [smem:[#allocation25_spill]] }
  0x34   : > { %s5120_s6 = sld [smem:[#allocation30_spill]]  ;;  %s5122_s18 = sld [smem:[#allocation31_spill]] }
  0x35   : > { %s4532_s5 = scalar_lea.vmem %s5106_s26, %s4034_s29  ;;  %s5123_s15 = sld [smem:[#allocation32_spill]] }
  0x36   : > { %s4554_s2 = scalar_lea.vmem %s5110_s8, %s3761_s4  ;;  %s5125_s14 = sld [smem:[#allocation34_spill]] }
  0x37   : > { %s4564_s23 = scalar_lea.vmem %s5112_s10, %s3763_s3  ;;  %s5124_s10 = sld [smem:[#allocation33_spill]] }
  0x38   : > { %s5126_s22 = sshll.u32 %s5163_s28, 4 }
  0x39   : > { %s4570_s21 = scalar_lea.vmem %s5113_s11, %s3624_s19  ;;  %s4575_s25 = scalar_lea.vmem %s5114_s12, %s3761_s4 }
  0x3a   : > { %s5118_s11 = sld [smem:[#allocation29_spill]]  ;;  %s4597_s12 = scalar_lea.vmem %s5120_s6, %s3624_s19 }
  0x3b   : > { %5121 = sst [smem:[#allocation13_spill]] %s4597_s12  ;;  %s4602_s13 = scalar_lea.vmem %s5122_s18, %s3763_s3 }
  0x3c   : > { %s1032_s24 = scalar_lea.vmem %s5123_s15, %s4505_s1  ;;  %s5127_s6 = sld [smem:[#allocation35_spill]] }
  0x3d   : > { %s1035_s0 = scalar_lea.vmem %s5124_s10, %s4505_s1  ;;  %s5128_s18 = sld [smem:[#allocation3_spill]] }
  0x40   : > { %s4592_s9 = scalar_lea.vmem %s5118_s11, %s3763_s3 }
  0x41   : > { %5119 = sst [smem:[#allocation12_spill]] %s4592_s9  ;;  %s1038_s9 = scalar_lea.vmem %s5125_s14, %s4505_s1 }
  0x42   : > { %s4621_s12 = scalar_lea.vmem %s5127_s6, %s5126_s22 }
  0x43   : > { %p3634_p7 = scmp.ne.s32.totalorder %s5128_s18, 0 }
  0x44   : > { %s5129_s3 = sld [smem:[#allocation9_spill]] (!%p3634_p7) }
  0x45   : > { %1048 = sbr.rel (%p3634_p7) target bundleno = 76 (0x4c), region = 112 }
  0x4a   : > { %v1049_v0 = vld [vmem:[%s5129_s3] sm:$0xff] (!%p3634_p7)  ;;  %v1050_v1 = vld [vmem:[%s5129_s3 + $0x8] sm:$0xff] (!%p3634_p7) }
  0x4b   : > { %1051 = vst [vmem:[#allocation2] sm:$0xff] (!%p3634_p7), %v1049_v0  ;;  %1052 = vst [vmem:[#allocation2 + $0x8] sm:$0xff] (!%p3634_p7), %v1050_v1 }
  0x4c PF: > { %v4112_v2 = vld [vmem:[%s4532_s5 + $0x4] ss:$12 sps:$4 sm:$0xff]   ;;  %v4114_v3 = vld [vmem:[%s4532_s5] ss:$12 sps:$4 sm:$0xff]   ;;  %v4348_v4 = vmov 0   ;;  %v4349_v5 = vmov 0.0   ;;  %v1091_v31 = vlaneseq  ;;  %s5136_s27 = scalar_lea.vmem %s5048_s7, %s4505_s1 }
  0x4d   : > { %1266 = vmatprep.mubr.bf16.mxu0 %v4348_v4  ;;  %3858 = vmatprep.subr.bf16.mxu1 %v4349_v5  ;;  %v4115_v6 = vld [vmem:[%s4532_s5 + $0x1c] ss:$12 sps:$4 sm:$0xff]   ;;  %v4117_v7 = vld [vmem:[%s4532_s5 + $0x18] ss:$12 sps:$4 sm:$0xff]   ;;  %v4118_v8 = vld [vmem:[%s4532_s5 + $0x34] ss:$12 sps:$4 sm:$0xff]  }
  0x4e   : > { %1234 = vmatprep.subr.bf16.mxu0 %v4112_v2  ;;  %v4120_v9 = vld [vmem:[%s4532_s5 + $0x30] ss:$12 sps:$4 sm:$0xff]   ;;  %v4121_v10 = vld [vmem:[%s4532_s5 + $0x4c] ss:$12 sps:$4 sm:$0xff]   ;;  %v4123_v11 = vld [vmem:[%s4532_s5 + $0x48] ss:$12 sps:$4 sm:$0xff]  }
  0x4f   : > { %1235 = vmatpush1.bf16.msra.mxu0 %v4114_v3  ;;  %v4124_v12 = vld [vmem:[%s4532_s5 + $0x64] ss:$12 sps:$4 sm:$0xff]   ;;  %v4136_v13 = vld [vmem:[%s4532_s5 + $0x8] ss:$12 sps:$4 sm:$0xff]   ;;  %v4137_v14 = vld [vmem:[%s4532_s5 + $0x20] ss:$12 sps:$4 sm:$0xff]  }
  0x50   : > { %1236 = vmatprep.subr.bf16.mxu0 %v4115_v6  ;;  %3859 = vmatpush3.bf16.msra.mxu1 %v4136_v13  ;;  %v4126_v15 = vld [vmem:[%s4532_s5 + $0x60] ss:$12 sps:$4 sm:$0xff]   ;;  %v4127_v16 = vld [vmem:[%s4532_s5 + $0x7c] ss:$12 sps:$4 sm:$0xff]   ;;  %v4129_v17 = vld [vmem:[%s4532_s5 + $0x78] ss:$12 sps:$4 sm:$0xff]  }
  0x51   : > { %3860 = vmatprep.subr.bf16.mxu1 %v4349_v5  ;;  %v4130_v18 = vld [vmem:[%s4532_s5 + $0x94] ss:$12 sps:$4 sm:$0xff]   ;;  %v4138_v19 = vld [vmem:[%s4532_s5 + $0x38] ss:$12 sps:$4 sm:$0xff]   ;;  %v4139_v20 = vld [vmem:[%s4532_s5 + $0x50] ss:$12 sps:$4 sm:$0xff]  }
  0x52   : > { %v4132_v21 = vld [vmem:[%s4532_s5 + $0x90] ss:$12 sps:$4 sm:$0xff]   ;;  %v4133_v22 = vld [vmem:[%s4532_s5 + $0xac] ss:$12 sps:$4 sm:$0xff]   ;;  %v4140_v23 = vld [vmem:[%s4532_s5 + $0x68] ss:$12 sps:$4 sm:$0xff]  }
  0x53   : > { %1237 = vmatpush1.bf16.msra.mxu0 %v4117_v7  ;;  %v4135_v24 = vld [vmem:[%s4532_s5 + $0xa8] ss:$12 sps:$4 sm:$0xff]   ;;  %v4652_v25 = vld [vmem:[#allocation2] sm:$0xff]  ;;  %v4143_v30 = vld [vmem:[%s4532_s5 + $0xb0] ss:$12 sps:$4 sm:$0xff]   ;;  %vm4350_vm0 = vmmov 0  }
  0x54   : > { %1238 = vmatprep.subr.bf16.mxu0 %v4118_v8  ;;  %3861 = vmatpush3.bf16.msra.mxu1 %v4137_v14  ;;  %v4654_v26 = vld [vmem:[#allocation2 + $0x8] sm:$0xff]  ;;  %v4142_v29 = vld [vmem:[%s4532_s5 + $0x98] ss:$12 sps:$4 sm:$0xff]   ;;  %v1092_v32 = vshrl.u32 %v1091_v31, 7  ;;  %v1089_v34 = vld [vmem:[%s4541_s17] sm:$0x7] }
  0x55   : > { %3862 = vmatprep.subr.bf16.mxu1 %v4349_v5  ;;  %v4141_v27 = vld [vmem:[%s4532_s5 + $0x80] ss:$12 sps:$4 sm:$0xff]   ;;  %v1056_v28 = vpack.c.bf16 %v4654_v26, %v4652_v25  ;;  %3874 = vmatprep.mubr.msk.bf16.mxu1 %vm4350_vm0, %v4349_v5  ;;  %vm1340_vm1 = vcmask 261120   ;;  %vm1388_vm2 = vcmask 130048   ;;  %s4351_s10 = smov 96   ;;  %s4352_s14 = smov 32  }
  0x56   : > { %v4673_v33 = vsub.s32 0, %v1092_v32  ;;  %v4676_v35 = vsub.s32 1, %v1092_v32  ;;  %v1101_v51 = vsub.s32 2, %v1092_v32  ;;  %s4353_s17 = smov 64   ;;  %s5130_s28 = sld [smem:[#allocation11_spill]]  ;;  %vm1848_vm3 = vcmask 523264  }
  0x57   : > { %1239 = vmatpush1.bf16.msra.mxu0 %v4120_v9  ;;  %vm1851_vm4 = vcmask 785408   ;;  %s5131_s26 = sld [smem:[#allocation19_spill]]  ;;  %s5133_s20 = sld [smem:[#allocation10_spill]]  ;;  %vm2352_vm5 = vcmask 1043456   ;;  %vm2325_vm6 = vcmask 64512  }
  0x58   : > { %1240 = vmatprep.subr.bf16.mxu0 %v4121_v10  ;;  %3863 = vmatpush3.bf16.msra.mxu1 %v4138_v19  ;;  %v1094_v36 = vrot.slane %v1089_v34, %v4673_v33  ;;  %v1098_v38 = vrot.slane %v1089_v34, %v4676_v35  ;;  %v1102_v52 = vrot.slane %v1089_v34, %v1101_v51  ;;  %s5134_s29 = sld [smem:[#allocation20_spill]]  ;;  %s5137_s4 = sld [smem:[#allocation22_spill]] }
  0x59   : > { %3864 = vmatprep.subr.bf16.mxu1 %v4349_v5  ;;  %s5140_s3 = sld [smem:[#allocation26_spill]]  ;;  %s5150_s19 = sld [smem:[#allocation3_spill]] }
  0x5b   : > { %1241 = vmatpush1.bf16.msra.mxu0 %v4123_v11 }
  0x5c   : > { %1242 = vmatprep.subr.bf16.mxu0 %v4124_v12  ;;  %3865 = vmatpush3.bf16.msra.mxu1 %v4139_v20 }
  0x5d   : > { %3866 = vmatprep.subr.bf16.mxu1 %v4349_v5  ;;  %s5132_s30 = scalar_lea.vmem %s5131_s26, %s4505_s1 }
  0x5e   : > { %s5135_s8 = scalar_lea.vmem %s5134_s29, %s4505_s1  ;;  %s5138_s6 = scalar_lea.vmem %s5137_s4, %s4505_s1 }
  0x5f   : > { %1243 = vmatpush1.bf16.msra.mxu0 %v4126_v15  ;;  %p3757_p8 = scmp.ne.s32.totalorder %s5150_s19, 1 }
  0x60   : > { %1244 = vmatprep.subr.bf16.mxu0 %v4127_v16  ;;  %3867 = vmatpush3.bf16.msra.mxu1 %v4140_v23 }
  0x61   : > { %3868 = vmatprep.subr.bf16.mxu1 %v4349_v5 }
  0x63   : > { %1245 = vmatpush1.bf16.msra.mxu0 %v4129_v17 }
  0x64   : > { %1246 = vmatprep.subr.bf16.mxu0 %v4130_v18  ;;  %3869 = vmatpush3.bf16.msra.mxu1 %v4141_v27 }
  0x65   : > { %3870 = vmatprep.subr.bf16.mxu1 %v4349_v5 }
  0x67   : > { %1247 = vmatpush1.bf16.msra.mxu0 %v4132_v21 }
  0x68   : > { %1248 = vmatprep.subr.bf16.mxu0 %v4133_v22  ;;  %3871 = vmatpush3.bf16.msra.mxu1 %v4142_v29 }
  0x69   : > { %3872 = vmatprep.subr.bf16.mxu1 %v4349_v5 }
  0x6b   : > { %1249 = vmatpush1.bf16.msra.mxu0 %v4135_v24 }
  0x6c   : > { %3902 = vmatprep.subr.bf16.mxu0 %v4349_v5  ;;  %3873 = vmatpush3.bf16.msra.mxu1 %v4143_v30 }
  0x6d   : > { %3878 = vmatprep.subr.bf16.mxu1 %v4349_v5 }
  0x6e   : > { %1267 = vmatmul.mubr.bf16.vlgmr.msra.gmra.mrb[0].mxu0 %v1056_v28 }
  0x6f   : > { %3904 = vmatprep.mubr.msk.bf16.mxu0 %vm4350_vm0, %v4349_v5  ;;  %3875 = vmatmul.mubr.bf16.vlgmr.msra.gmra.mrb[0].mxu1 %v1056_v28 }
  0x70   : > { %3880 = vmatprep.mubr.msk.bf16.mxu1 %vm4350_vm0, %v4349_v5 }
 0x141   : > { %v1268_v37 = vpop.f32.mrb[0].mxu0 }
 0x142   : > { %v1269_v39 = vadd.f32 %v1268_v37, %v1094_v36  ;;  %v1270_v40 = vpop.f32.mrb[1].mxu0  ;;  %v1311_v53 = vpop.f32.mrb[0].mxu1 }
 0x143   : > { %v1272_v41 = vpop.f32.mrb[2].mxu0  ;;  %v1271_v44 = vadd.f32 %v1270_v40, %v1098_v38  ;;  %v1312_v54 = vadd.f32 %v1311_v53, %v1102_v52  ;;  %v3876_v55 = vpop.f32.mrb[1].mxu1 }
 0x144   : > { %v1273_v42 = vadd.f32 %v1272_v41, %v1094_v36  ;;  %v1274_v43 = vpop.f32.mrb[3].mxu0  ;;  %v1318_v46 = vmul.f32 0.17677669, %v1269_v39  ;;  %v1314_v56 = vpop.f32.mrb[2].mxu1 }
 0x145   : > { %v1275_v45 = vadd.f32 %v1274_v43, %v1098_v38  ;;  %v1315_v57 = vadd.f32 %v1314_v56, %v1102_v52  ;;  %v3877_v58 = vpop.f32.mrb[3].mxu1 }
 0x146   : > { %v1319_v47 = vmul.f32 0.17677669, %v1273_v42 }
 0x147   : > { %v1338_v48 = vpack.c.bf16 %v1275_v45, %v1271_v44  ;;  %v4685_v59 = vpack.c.bf16 %v1315_v57, %v1312_v54 }
 0x148   : > { %v1337_v49 = vpack.c.bf16 %v1319_v47, %v1318_v46 }
 0x149   : > { %v1345_v50 = vsel %vm1340_vm1, %v1338_v48, 0 }
 0x14a   : > { %3879 = vmatpush3.bf16.xpose.msra.mxu1 %v1345_v50 }
 0x14b   : > { %3884 = vmatprep.subr.bf16.mxu1 %v4349_v5 }
 0x151   : > { %3881 = vmatmul.mubr.msk.bf16.vlgmr.msra.gmra.mrb[4].mxu1 %vm1340_vm1, %v1337_v49 }
 0x152   : > { %3886 = vmatprep.mubr.msk.bf16.mxu1 %vm4350_vm0, %v4349_v5  ;;  %3885 = vmatpush3.bf16.msra.mxu1 %v4685_v59 }
 0x153   : > { %3890 = vmatprep.subr.bf16.mxu1 %v4349_v5 }
 0x224   : > { %v1381_v60 = vpop.f32.mrb[4].mxu1 }
 0x225   : > { %v3882_v61 = vpop.f32.mrb[5].mxu1  ;;  %v1389_v62 = vsel %vm1388_vm2, %v1381_v60, -inf }
 0x226   : > { %1390 = vmax.xlane.f32.xlu0 %v1389_v62  ;;  %v1384_v63 = vpop.f32.mrb[6].mxu1 }
 0x227   : > { %v3883_v0 = vpop.f32.mrb[7].mxu1  ;;  %v1392_v1 = vsel %vm1388_vm2, %v1384_v63, -inf }
 0x22a   : > { %1393 = vmax.xlane.f32.xlu0 %v1392_v1 }
 0x240   : > { %1460 = vrot.lane.b32.xlu0 %v1338_v48, %s4351_s10 }
 0x244   : > { %1703 = vrot.lane.b32.xlu0 %v1338_v48, %s4352_s14 }
 0x2b3   : > { %v1391_v2 = vpop.xlane.xlu0 %1390 }
 0x2b4   : > { %v1395_v3 = vsub.f32 %v1381_v60, %v1391_v2 }
 0x2b6   : > { %v1397_v6 = vmul.f32 1.442695, %v1395_v3 }
 0x2b7   : > { %v1394_v7 = vpop.xlane.xlu0 %1393 }
 0x2b8   : > { %4232 = vpow2.f32 %v1397_v6  ;;  %v1396_v8 = vsub.f32 %v1384_v63, %v1394_v7 }
 0x2ba   : > { %v1399_v9 = vmul.f32 1.442695, %v1396_v8 }
 0x2bb   : > { %v1461_v17 = vpop.permute.xlu0 %1460 }
 0x2bc   : > { %4234 = vpow2.f32 %v1399_v9  ;;  %v1466_v28 = vsel %vm1340_vm1, %v1461_v17, 0 }
 0x2bf   : > { %v1704_v24 = vpop.permute.xlu0 %1703 }
 0x2c0   : > { %v1709_v30 = vsel %vm1340_vm1, %v1704_v24, 0 }
 0x2c2   : > { %v4233_v10 = vpop.eup %4232 }
 0x2c3   : > { %v1401_v11 = vsel %vm1388_vm2, %v4233_v10, 0.0 }
 0x2c4   : > { %1402 = vadd.xlane.f32.xlu1 %v1401_v11 }
 0x2c6   : > { %v4235_v12 = vpop.eup %4234 }
 0x2c7   : > { %v1404_v13 = vsel %vm1388_vm2, %v4235_v12, 0.0 }
 0x2c8   : > { %1405 = vadd.xlane.f32.xlu1 %v1404_v13 }
 0x2d9   : > { %1457 = vrot.lane.b32.xlu1 %v1337_v49, %s4351_s10 }
 0x2dd   : > { %1582 = vrot.lane.b32.xlu1 %v1338_v48, %s4353_s17 }
 0x2e1   : > { %1580 = vrot.lane.b32.xlu1 %v1337_v49, %s4353_s17 }
 0x2e5   : > { %1701 = vrot.lane.b32.xlu1 %v1337_v49, %s4352_s14 }
 0x351   : > { %v1403_v14 = vpop.xlane.xlu1 %1402 }
 0x352   : > { %4236 = vrcp.f32 %v1403_v14 }
 0x355   : > { %v1406_v15 = vpop.xlane.xlu1 %1405 }
 0x356   : > { %4238 = vrcp.f32 %v1406_v15 }
 0x359   : > { %v1458_v16 = vpop.permute.xlu1 %1457 }
 0x35c   : > { %v4237_v19 = vpop.eup %4236 }
 0x35d   : > { %v1583_v18 = vpop.permute.xlu1 %1582  ;;  %v1409_v22 = vmul.f32 %v4237_v19, %v4233_v10 }
 0x35e   : > { %v1588_v20 = vsel %vm1340_vm1, %v1583_v18, 0 }
 0x35f   : > { %3903 = vmatpush3.bf16.xpose.msra.mxu0 %v1588_v20 }
 0x360   : > { %v4239_v21 = vpop.eup %4238  ;;  %3914 = vmatprep.subr.bf16.mxu0 %v4349_v5 }
 0x361   : > { %v1410_v23 = vmul.f32 %v4239_v21, %v4235_v12  ;;  %v1581_v29 = vpop.permute.xlu1 %1580 }
 0x363   : > { %v1411_v27 = vpack.c.bf16 %v1410_v23, %v1409_v22 }
 0x365   : > { %3887 = vmatmul.mubr.msk.bf16.vlgmr.msra.gmra.mrb[8].mxu1 %vm1388_vm2, %v1411_v27  ;;  %v1702_v31 = vpop.permute.xlu1 %1701 }
 0x366   : > { %3891 = vmatpush3.bf16.xpose.msra.mxu1 %v1466_v28  ;;  %3905 = vmatmul.mubr.msk.bf16.vlgmr.msra.gmra.mrb[4].mxu0 %vm1340_vm1, %v1581_v29 }
 0x367   : > { %3915 = vmatpush3.bf16.xpose.msra.mxu0 %v1709_v30  ;;  %3892 = vmatprep.mubr.msk.bf16.mxu1 %vm4350_vm0, %v4349_v5 }
 0x368   : > { %3916 = vmatprep.mubr.msk.bf16.mxu0 %vm4350_vm0, %v4349_v5  ;;  %3896 = vmatprep.subr.bf16.mxu1 %v4349_v5 }
 0x369   : > { %3926 = vmatprep.subr.bf16.mxu0 %v4349_v5 }
 0x36d   : > { %3893 = vmatmul.mubr.msk.bf16.vlgmr.msra.gmra.mrb[12].mxu1 %vm1340_vm1, %v1458_v16 }
 0x36e   : > { %3917 = vmatmul.mubr.msk.bf16.vlgmr.msra.gmra.mrb[8].mxu0 %vm1340_vm1, %v1702_v31  ;;  %3898 = vmatprep.mubr.msk.bf16.mxu1 %vm4350_vm0, %v4349_v5 }
 0x36f   : > { %3942 = vmatprep.mubr.msk.bf16.mxu0 %vm4350_vm0, %v4349_v5 }
 0x438   : > { %v4717_v32 = vpop.f32.mrb[8].mxu1 }
 0x439   : > { %v3888_v34 = vpop.f32.mrb[9].mxu1  ;;  %v1624_v36 = vpop.f32.mrb[4].mxu0 }
 0x43a   : > { %v4719_v37 = vpop.f32.mrb[10].mxu1  ;;  %v3906_v38 = vpop.f32.mrb[5].mxu0  ;;  %v1631_v52 = vsel %vm1388_vm2, %v1624_v36, -inf }
 0x43b   : > { %v3889_v39 = vpop.f32.mrb[11].mxu1  ;;  %v1627_v40 = vpop.f32.mrb[6].mxu0 }
 0x43c   : > { %v3907_v41 = vpop.f32.mrb[7].mxu0  ;;  %v1634_v54 = vsel %vm1388_vm2, %v1627_v40, -inf }
 0x440   : > { %v1502_v42 = vpop.f32.mrb[12].mxu1 }
 0x441   : > { %v3894_v43 = vpop.f32.mrb[13].mxu1  ;;  %v1745_v44 = vpop.f32.mrb[8].mxu0  ;;  %v1509_v45 = vsel %vm1388_vm2, %v1502_v42, -inf }
 0x442   : > { %v3918_v46 = vpop.f32.mrb[9].mxu0  ;;  %1510 = vmax.xlane.f32.xlu0 %v1509_v45  ;;  %v1505_v47 = vpop.f32.mrb[14].mxu1  ;;  %v1752_v55 = vsel %vm1388_vm2, %v1745_v44, -inf }
 0x443   : > { %v3895_v48 = vpop.f32.mrb[15].mxu1  ;;  %v1748_v49 = vpop.f32.mrb[10].mxu0  ;;  %v1512_v50 = vsel %vm1388_vm2, %v1505_v47, -inf }
 0x444   : > { %v3919_v51 = vpop.f32.mrb[11].mxu0  ;;  %1513 = vmax.xlane.f32.xlu1 %v1512_v50  ;;  %v1755_v53 = vsel %vm1388_vm2, %v1748_v49, -inf }
 0x446   : > { %1632 = vmax.xlane.f32.xlu0 %v1631_v52 }
 0x448   : > { %1756 = vmax.xlane.f32.xlu1 %v1755_v53 }
 0x44a   : > { %1635 = vmax.xlane.f32.xlu0 %v1634_v54  ;;  %v4144_v54 = vld [vmem:[%s5130_s28] sm:$0xff]  }
 0x44b   : > { %3927 = vmatpush3.bf16.msra.mxu0 %v4144_v54 }
 0x44c   : > { %3928 = vmatprep.subr.bf16.mxu0 %v4349_v5 }
 0x44e   : > { %1753 = vmax.xlane.f32.xlu0 %v1752_v55  ;;  %v4145_v55 = vld [vmem:[%s5130_s28 + $0x8] sm:$0xff]  }
 0x44f   : > { %3929 = vmatpush3.bf16.msra.mxu0 %v4145_v55 }
 0x450   : > { %3930 = vmatprep.subr.bf16.mxu0 %v4349_v5 }
 0x4cf   : > { %v1511_v56 = vpop.xlane.xlu0 %1510 }
 0x4d0   : > { %v1515_v2 = vsub.f32 %v1502_v42, %v1511_v56  ;;  %v4146_v56 = vld [vmem:[%s5130_s28 + $0x10] sm:$0xff]  }
 0x4d1   : > { %v1514_v57 = vpop.xlane.xlu1 %1513  ;;  %3931 = vmatpush3.bf16.msra.mxu0 %v4146_v56 }
 0x4d2   : > { %v1516_v3 = vsub.f32 %v1505_v47, %v1514_v57  ;;  %v1517_v10 = vmul.f32 1.442695, %v1515_v2  ;;  %3932 = vmatprep.subr.bf16.mxu0 %v4349_v5  ;;  %v4147_v57 = vld [vmem:[%s5130_s28 + $0x18] sm:$0xff]   ;;  %v4150_v2 = vld [vmem:[%s5130_s28 + $0x30] sm:$0xff]  }
 0x4d3   : > { %v1633_v58 = vpop.xlane.xlu0 %1632 }
 0x4d4   : > { %v1637_v60 = vsub.f32 %v1624_v36, %v1633_v58  ;;  %v1519_v11 = vmul.f32 1.442695, %v1516_v3  ;;  %v4148_v58 = vld [vmem:[%s5130_s28 + $0x20] sm:$0xff]  }
 0x4d5   : > { %v1757_v61 = vpop.xlane.xlu1 %1756  ;;  %3933 = vmatpush3.bf16.msra.mxu0 %v4147_v57  ;;  %v4162_v57 = vld [vmem:[%s4554_s2 + $0x8] sm:$0xff]  }
 0x4d6   : > { %v1639_v62 = vmul.f32 1.442695, %v1637_v60  ;;  %v1759_v63 = vsub.f32 %v1748_v49, %v1757_v61  ;;  %3934 = vmatprep.subr.bf16.mxu0 %v4349_v5 }
 0x4d7   : > { %v1636_v0 = vpop.xlane.xlu0 %1635 }
 0x4d8   : > { %4240 = vpow2.f32 %v1639_v62  ;;  %v1638_v1 = vsub.f32 %v1627_v40, %v1636_v0  ;;  %v1762_v6 = vmul.f32 1.442695, %v1759_v63  ;;  %v4149_v62 = vld [vmem:[%s5130_s28 + $0x28] sm:$0xff]  }
 0x4d9   : > { %3935 = vmatpush3.bf16.msra.mxu0 %v4148_v58  ;;  %v4165_v58 = vld [vmem:[%s4564_s23 + $0x34] ss:$8 sps:$4 sm:$0xff]  }
 0x4da   : > { %v1641_v7 = vmul.f32 1.442695, %v1638_v1  ;;  %3936 = vmatprep.subr.bf16.mxu0 %v4349_v5 }
 0x4db   : > { %v1754_v8 = vpop.xlane.xlu0 %1753 }
 0x4dc   : > { %4242 = vpow2.f32 %v1641_v7  ;;  %v1758_v9 = vsub.f32 %v1745_v44, %v1754_v8  ;;  %v4151_v7 = vld [vmem:[%s5130_s28 + $0x38] sm:$0xff]   ;;  %s5142_s28 = sld [smem:[#allocation27_spill]] }
 0x4dd   : > { %4244 = vpow2.f32 %v1762_v6  ;;  %3937 = vmatpush3.bf16.msra.mxu0 %v4149_v62  ;;  %v4169_v62 = vld [vmem:[%s4564_s23 + $0x44] ss:$8 sps:$4 sm:$0xff]  }
 0x4de   : > { %v1760_v12 = vmul.f32 1.442695, %v1758_v9  ;;  %3938 = vmatprep.subr.bf16.mxu0 %v4349_v5 }
 0x4e0   : > { %4246 = vpow2.f32 %v1760_v12 }
 0x4e1   : > { %4248 = vpow2.f32 %v1517_v10  ;;  %3939 = vmatpush3.bf16.msra.mxu0 %v4150_v2  ;;  %v4171_v2 = vld [vmem:[%s4564_s23 + $0x50] ss:$8 sps:$4 sm:$0xff]  }
 0x4e2   : > { %v4241_v13 = vpop.eup %4240  ;;  %4250 = vpow2.f32 %v1519_v11  ;;  %3940 = vmatprep.subr.bf16.mxu0 %v4349_v5  ;;  %s5143_s5 = scalar_lea.vmem %s5142_s28, %s4505_s1 }
 0x4e3   : > { %v1643_v14 = vsel %vm1388_vm2, %v4241_v13, 0.0 }
 0x4e4   : > { %1644 = vadd.xlane.f32.xlu0 %v1643_v14 }
 0x4e5   : > { %3941 = vmatpush3.bf16.msra.mxu0 %v4151_v7  ;;  %v4175_v7 = vld [vmem:[%s4564_s23 + $0x60] ss:$8 sps:$4 sm:$0xff]  }
 0x4e6   : > { %v4243_v15 = vpop.eup %4242 }
 0x4e7   : > { %v1646_v16 = vsel %vm1388_vm2, %v4243_v15, 0.0  ;;  %v4245_v17 = vpop.eup %4244 }
 0x4e8   : > { %1647 = vadd.xlane.f32.xlu1 %v1646_v16  ;;  %v1767_v21 = vsel %vm1388_vm2, %v4245_v17, 0.0 }
 0x4ea   : > { %v4247_v18 = vpop.eup %4246 }
 0x4eb   : > { %v4249_v19 = vpop.eup %4248  ;;  %v1764_v20 = vsel %vm1388_vm2, %v4247_v18, 0.0 }
 0x4ec   : > { %v4251_v22 = vpop.eup %4250  ;;  %1765 = vadd.xlane.f32.xlu0 %v1764_v20  ;;  %1768 = vadd.xlane.f32.xlu1 %v1767_v21  ;;  %v1521_v23 = vsel %vm1388_vm2, %v4249_v19, 0.0 }
 0x4ed   : > { %v1524_v24 = vsel %vm1388_vm2, %v4251_v22, 0.0 }
 0x4f0   : > { %1522 = vadd.xlane.f32.xlu0 %v1521_v23  ;;  %1525 = vadd.xlane.f32.xlu1 %v1524_v24 }
 0x501   : > { %1654 = vrot.lane.b32.xlu1 %v4685_v59, %s4353_s17 }
 0x505   : > { %1775 = vrot.lane.b32.xlu1 %v4685_v59, %s4352_s14 }
 0x506   : > { %1533 = vrot.lane.b32.xlu0 %v4685_v59, %s4351_s10 }
 0x571   : > { %v1645_v27 = vpop.xlane.xlu0 %1644 }
 0x575   : > { %v1648_v28 = vpop.xlane.xlu1 %1647 }
 0x579   : > { %v1766_v29 = vpop.xlane.xlu0 %1765  ;;  %v1769_v30 = vpop.xlane.xlu1 %1768 }
 0x57d   : > { %v1523_v31 = vpop.xlane.xlu0 %1522  ;;  %v1526_v34 = vpop.xlane.xlu1 %1525 }
 0x57e   : > { %4252 = vrcp.f32 %v1523_v31 }
 0x57f   : > { %4254 = vrcp.f32 %v1526_v34 }
 0x580   : > { %4256 = vrcp.f32 %v1648_v28 }
 0x581   : > { %v1534_v36 = vpop.permute.xlu0 %1533  ;;  %4258 = vrcp.f32 %v1645_v27  ;;  %v1655_v43 = vpop.permute.xlu1 %1654 }
 0x582   : > { %3897 = vmatpush3.bf16.msra.mxu1 %v1534_v36  ;;  %4260 = vrcp.f32 %v1766_v29 }
 0x583   : > { %3908 = vmatprep.subr.bf16.mxu1 %v4349_v5  ;;  %4262 = vrcp.f32 %v1769_v30 }
 0x585   : > { %v1776_v50 = vpop.permute.xlu1 %1775 }
 0x588   : > { %v4253_v38 = vpop.eup %4252 }
 0x589   : > { %v4255_v39 = vpop.eup %4254  ;;  %v1529_v40 = vmul.f32 %v4253_v38, %v4249_v19 }
 0x58a   : > { %v1530_v41 = vmul.f32 %v4255_v39, %v4251_v22  ;;  %v4257_v42 = vpop.eup %4256 }
 0x58b   : > { %v4259_v44 = vpop.eup %4258  ;;  %v1652_v45 = vmul.f32 %v4257_v42, %v4243_v15 }
 0x58c   : > { %v1531_v59 = vpack.c.bf16 %v1530_v41, %v1529_v40  ;;  %v1651_v46 = vmul.f32 %v4259_v44, %v4241_v13  ;;  %v4261_v47 = vpop.eup %4260  ;;  %v4152_v44 = vld [vmem:[%s4564_s23] ss:$8 sps:$4 sm:$0xff]  }
 0x58d   : > { %v4263_v49 = vpop.eup %4262  ;;  %v1772_v51 = vmul.f32 %v4261_v47, %v4247_v18  ;;  %v4158_v47 = vld [vmem:[%s4554_s2] sm:$0xff]  }
 0x58e   : > { %3899 = vmatmul.mubr.msk.bf16.vlgmr.msra.gmra.mrb[16].mxu1 %vm1388_vm2, %v1531_v59  ;;  %v1653_v48 = vpack.c.bf16 %v1652_v45, %v1651_v46  ;;  %v1773_v52 = vmul.f32 %v4263_v49, %v4245_v17  ;;  %v4154_v45 = vld [vmem:[%s4564_s23 + $0x4] ss:$8 sps:$4 sm:$0xff]   ;;  %v4157_v46 = vld [vmem:[%s4564_s23 + $0x14] ss:$8 sps:$4 sm:$0xff]  }
 0x58f   : > { %3909 = vmatpush3.bf16.msra.mxu1 %v1655_v43  ;;  %3910 = vmatprep.mubr.msk.bf16.mxu1 %vm4350_vm0, %v4349_v5  ;;  %v4161_v49 = vld [vmem:[%s4564_s23 + $0x24] ss:$8 sps:$4 sm:$0xff]  }
 0x590   : > { %3920 = vmatprep.subr.bf16.mxu1 %v4349_v5  ;;  %v1774_v53 = vpack.c.bf16 %v1773_v52, %v1772_v51  ;;  %2217 = vmatprep.subr.bf16.mxu0 %v4154_v45  ;;  %v3678_v45 = vld [vmem:[%s5138_s6] ss:$0 sm:$0xff] }
 0x596   : > { %3911 = vmatmul.mubr.msk.bf16.vlgmr.msra.gmra.mrb[20].mxu1 %vm1388_vm2, %v1653_v48  ;;  %v4155_v48 = vld [vmem:[%s4564_s23 + $0x10] ss:$8 sps:$4 sm:$0xff]  }
 0x597   : > { %3921 = vmatpush3.bf16.msra.mxu1 %v1776_v50  ;;  %3922 = vmatprep.mubr.msk.bf16.mxu1 %vm4350_vm0, %v4349_v5 }
 0x598   : > { %3946 = vmatprep.subr.bf16.mxu1 %v4349_v5 }
 0x59e   : > { %3923 = vmatmul.mubr.msk.bf16.vlgmr.msra.gmra.mrb[24].mxu1 %vm1388_vm2, %v1774_v53 }
 0x59f   : > { %3962 = vmatprep.mubr.msk.bf16.mxu1 %vm4350_vm0, %v4349_v5  ;;  %3947 = vmatpush3.bf16.msra.mxu1 %v4158_v47 }
 0x5a0   : > { %3948 = vmatprep.subr.bf16.mxu1 %v4349_v5 }
 0x5a3   : > { %3949 = vmatpush3.bf16.msra.mxu1 %v4162_v57 }
 0x5a4   : > { %3950 = vmatprep.subr.bf16.mxu1 %v4349_v5 }
 0x661   : > { %v1573_v60 = vpop.f32.mrb[16].mxu1 }
 0x662   : > { %v3900_v61 = vpop.f32.mrb[17].mxu1 }
 0x663   : > { %v1576_v63 = vpop.f32.mrb[18].mxu1  ;;  %v4166_v61 = vld [vmem:[%s4554_s2 + $0x10] sm:$0xff]  }
 0x664   : > { %v4082_v0 = vpack.i.bf16 %v1576_v63, %v1573_v60  ;;  %v3901_v1 = vpop.f32.mrb[19].mxu1  ;;  %v4163_v60 = vld [vmem:[%s4564_s23 + $0x30] ss:$8 sps:$4 sm:$0xff]   ;;  %v4167_v63 = vld [vmem:[%s4564_s23 + $0x40] ss:$8 sps:$4 sm:$0xff]   ;;  %3951 = vmatpush3.bf16.msra.mxu1 %v4166_v61 }
 0x665   : > { %3952 = vmatprep.subr.bf16.mxu1 %v4349_v5  ;;  %v4173_v1 = vld [vmem:[%s4564_s23 + $0x54] ss:$8 sps:$4 sm:$0xff]  }
 0x666   : > { %4083 = vrot.lane.b32.xlu1 %v4082_v0, %s4352_s14  ;;  %v4170_v0 = vld [vmem:[%s4554_s2 + $0x18] sm:$0xff]  }
 0x668   : > { %3953 = vmatpush3.bf16.msra.mxu1 %v4170_v0 }
 0x669   : > { %v1694_v3 = vpop.f32.mrb[20].mxu1  ;;  %3954 = vmatprep.subr.bf16.mxu1 %v4349_v5 }
 0x66a   : > { %v3912_v6 = vpop.f32.mrb[21].mxu1 }
 0x66b   : > { %v1697_v8 = vpop.f32.mrb[22].mxu1  ;;  %v4177_v6 = vld [vmem:[%s4564_s23 + $0x64] ss:$8 sps:$4 sm:$0xff]  }
 0x66c   : > { %v4087_v9 = vpack.i.bf16 %v1697_v8, %v1694_v3  ;;  %v3913_v10 = vpop.f32.mrb[23].mxu1  ;;  %v4174_v3 = vld [vmem:[%s4554_s2 + $0x20] sm:$0xff]   ;;  %v4178_v8 = vld [vmem:[%s4554_s2 + $0x28] sm:$0xff]  }
 0x66d   : > { %3955 = vmatpush3.bf16.msra.mxu1 %v4174_v3  ;;  %v4179_v10 = vld [vmem:[%s4564_s23 + $0x70] ss:$8 sps:$4 sm:$0xff]  }
 0x66e   : > { %4088 = vrot.lane.b32.xlu0 %v4087_v9, %s4353_s17  ;;  %3956 = vmatprep.subr.bf16.mxu1 %v4349_v5  ;;  %v4181_v9 = vld [vmem:[%s4564_s23 + $0x74] ss:$8 sps:$4 sm:$0xff]  }
 0x671   : > { %v1815_v11 = vpop.f32.mrb[24].mxu1  ;;  %3957 = vmatpush3.bf16.msra.mxu1 %v4178_v8 }
 0x672   : > { %v3924_v12 = vpop.f32.mrb[25].mxu1  ;;  %3958 = vmatprep.subr.bf16.mxu1 %v4349_v5 }
 0x673   : > { %v1818_v13 = vpop.f32.mrb[26].mxu1  ;;  %v4182_v12 = vld [vmem:[%s4554_s2 + $0x30] sm:$0xff]  }
 0x674   : > { %v4092_v14 = vpack.i.bf16 %v1818_v13, %v1815_v11  ;;  %v3925_v15 = vpop.f32.mrb[27].mxu1  ;;  %v1055_v11 = vld [vmem:[%s5133_s20] sm:$0xff] }
 0x675   : > { %v2108_v13 = vpack.c.bf16 %v1055_v11, %v1055_v11  ;;  %3959 = vmatpush3.bf16.msra.mxu1 %v4182_v12 }
 0x676   : > { %4093 = vrot.lane.b32.xlu1 %v4092_v14, %s4351_s10  ;;  %v4183_v14 = vld [vmem:[%s4554_s2 + $0x38] sm:$0xff]   ;;  %3960 = vmatprep.subr.bf16.mxu1 %v4349_v5  ;;  %s5146_s2 = sld [smem:[#allocation13_spill]] }
 0x679   : > { %3961 = vmatpush3.bf16.msra.mxu1 %v4183_v14 }
 0x67a   : > { %3966 = vmatprep.subr.bf16.mxu1 %v4349_v5 }
 0x6d8   : > { %v4084_v16 = vpop.permute.xlu1 %4083 }
 0x6d9   : > { %v4086_v18 = vunpack.i.h.bf16 %v4084_v16  ;;  %v4085_v19 = vunpack.i.l.bf16 %v4084_v16 }
 0x6db   : > { %v1847_v23 = vsel %vm1340_vm1, %v4719_v37, %v4086_v18  ;;  %v1846_v24 = vsel %vm1340_vm1, %v4717_v32, %v4085_v19  ;;  %v3667_v32 = vld [vmem:[%s5132_s30] ss:$0 sm:$0xff]  ;;  %s5144_s30 = sld [smem:[#allocation28_spill]] }
 0x6e0   : > { %v4089_v17 = vpop.permute.xlu0 %4088 }
 0x6e1   : > { %v4091_v20 = vunpack.i.h.bf16 %v4089_v17  ;;  %v4090_v21 = vunpack.i.l.bf16 %v4089_v17  ;;  %s5145_s20 = scalar_lea.vmem %s5144_s30, %s4505_s1 }
 0x6e3   : > { %v1850_v29 = vsel %vm1848_vm3, %v1847_v23, %v4091_v20  ;;  %v1849_v30 = vsel %vm1848_vm3, %v1846_v24, %v4090_v21  ;;  %v3676_v23 = vld [vmem:[%s5135_s8] ss:$0 sm:$0xff] }
 0x6e8   : > { %v4094_v22 = vpop.permute.xlu1 %4093 }
 0x6e9   : > { %v4096_v27 = vunpack.i.h.bf16 %v4094_v22  ;;  %v4095_v28 = vunpack.i.l.bf16 %v4094_v22 }
 0x6eb   : > { %v1853_v31 = vsel %vm1851_vm4, %v1850_v29, %v4096_v27  ;;  %v1852_v34 = vsel %vm1851_vm4, %v1849_v30, %v4095_v28  ;;  %v3677_v29 = vld [vmem:[%s5136_s27] ss:$0 sm:$0xff] }
 0x6ec   : > { %v1854_v36 = vpack.c.bf16 %v1853_v31, %v1852_v34 }
 0x6ee   : > { %3943 = vmatmul.mubr.bf16.vlgmr.msra.gmra.mrb[12].mxu0 %v1854_v36 }
 0x6ef   : > { %2249 = vmatprep.mubr.bf16.mxu0 %v4348_v4  ;;  %2218 = vmatpush1.bf16.msra.mxu0 %v4152_v44 }
 0x6f0   : > { %2219 = vmatprep.subr.bf16.mxu0 %v4157_v46 }
 0x6f3   : > { %2220 = vmatpush1.bf16.msra.mxu0 %v4155_v48 }
 0x6f4   : > { %2221 = vmatprep.subr.bf16.mxu0 %v4161_v49 }
 0x7c1   : > { %v1943_v37 = vpop.f32.mrb[12].mxu0 }
 0x7c2   : > { %v1944_v38 = vadd.f32 %v3667_v32, %v1943_v37  ;;  %v3944_v39 = vpop.f32.mrb[13].mxu0 }
 0x7c3   : > { %v1946_v40 = vpop.f32.mrb[14].mxu0 }
 0x7c4   : > { %v1947_v41 = vadd.f32 %v3667_v32, %v1946_v40  ;;  %v3945_v59 = vpop.f32.mrb[15].mxu0  ;;  %v1950_v42 = vadd.f32 %v1944_v38, %v4652_v25  ;;  %v4159_v25 = vld [vmem:[%s4564_s23 + $0x20] ss:$8 sps:$4 sm:$0xff]  }
 0x7c5   : > { %2222 = vmatpush1.bf16.msra.mxu0 %v4159_v25  ;;  %v2125_v32 = vld [vmem:[%s4570_s21] sm:$0x3]  ;;  %s5139_s21 = sld [smem:[#allocation12_spill]] }
 0x7c6   : > { %1954 = vadd.xlane.f32.xlu0 %v1950_v42  ;;  %v1951_v43 = vadd.f32 %v1947_v41, %v4654_v26  ;;  %2223 = vmatprep.subr.bf16.mxu0 %v4165_v58  ;;  %v2130_v37 = vrot.slane %v2125_v32, %v4673_v33  ;;  %v2134_v44 = vrot.slane %v2125_v32, %v4676_v35 }
 0x7c8   : > { %1956 = vadd.xlane.f32.xlu1 %v1951_v43 }
 0x7c9   : > { %2224 = vmatpush1.bf16.msra.mxu0 %v4163_v60 }
 0x7ca   : > { %2225 = vmatprep.subr.bf16.mxu0 %v4169_v62 }
 0x7cd   : > { %2226 = vmatpush1.bf16.msra.mxu0 %v4167_v63 }
 0x7ce   : > { %2227 = vmatprep.subr.bf16.mxu0 %v4173_v1 }
 0x7d1   : > { %2228 = vmatpush1.bf16.msra.mxu0 %v4171_v2 }
 0x7d2   : > { %2229 = vmatprep.subr.bf16.mxu0 %v4177_v6 }
 0x7d5   : > { %2230 = vmatpush1.bf16.msra.mxu0 %v4175_v7 }
 0x7d6   : > { %2231 = vmatprep.subr.bf16.mxu0 %v4181_v9 }
 0x7d9   : > { %2232 = vmatpush1.bf16.msra.mxu0 %v4179_v10 }
 0x7da   : > { %3990 = vmatprep.subr.bf16.mxu0 %v4349_v5 }
 0x7dc   : > { %2250 = vmatmul.mubr.bf16.vlgmr.msra.gmra.mrb[16].mxu0 %v2108_v13 }
 0x7dd   : > { %3992 = vmatprep.mubr.msk.bf16.mxu0 %vm4350_vm0, %v4349_v5 }
 0x853   : > { %v1955_v26 = vpop.xlane.xlu0 %1954 }
 0x854   : > { %v1959_v50 = vmul.f32 0.0078125, %v1955_v26 }
 0x855   : > { %v1957_v51 = vpop.xlane.xlu1 %1956 }
 0x856   : > { %v1961_v52 = vsub.f32 %v1950_v42, %v1959_v50  ;;  %v1960_v53 = vmul.f32 0.0078125, %v1957_v51 }
 0x858   : > { %v4793_v54 = vsub.f32 %v1951_v43, %v1960_v53  ;;  %v1963_v55 = vmul.f32 %v1961_v52, %v1961_v52 }
 0x85a   : > { %1965 = vadd.xlane.f32.xlu0 %v1963_v55  ;;  %v1964_v56 = vmul.f32 %v4793_v54, %v4793_v54 }
 0x85e   : > { %1967 = vadd.xlane.f32.xlu0 %v1964_v56 }
 0x8af   : > { %v2251_v38 = vpop.f32.mrb[16].mxu0 }
 0x8b0   : > { %v2252_v39 = vadd.f32 %v2251_v38, %v2130_v37  ;;  %v2253_v40 = vpop.f32.mrb[17].mxu0 }
 0x8b1   : > { %v2255_v41 = vpop.f32.mrb[18].mxu0  ;;  %v2254_v47 = vadd.f32 %v2253_v40, %v2134_v44 }
 0x8b2   : > { %v2276_v59 = vpack.c.bf16 %v2252_v39, %v2252_v39  ;;  %v2256_v42 = vpop.f32.mrb[19].mxu0 }
 0x8b3   : > { %v4854_v51 = vpack.c.bf16 %v2254_v47, %v2254_v47 }
 0x8b4   : > { %v2282_v43 = vsel %vm1340_vm1, %v2276_v59, 0 }
 0x8b5   : > { %v2354_v55 = vsel %vm2352_vm5, %v4854_v51, 0 }
 0x8e7   : > { %v1966_v15 = vpop.xlane.xlu0 %1965 }
 0x8e8   : > { %v1969_v16 = vmul.f32 0.0078125, %v1966_v15 }
 0x8ea   : > { %v1971_v17 = vadd.f32 1e-05, %v1969_v16 }
 0x8eb   : > { %v1968_v18 = vpop.xlane.xlu0 %1967 }
 0x8ec   : > { %4264 = vrsqrt.f32 %v1971_v17  ;;  %v1970_v19 = vmul.f32 0.0078125, %v1968_v18 }
 0x8ee   : > { %v1972_v20 = vadd.f32 1e-05, %v1970_v19 }
 0x8f0   : > { %4266 = vrsqrt.f32 %v1972_v20 }
 0x8f6   : > { %v4265_v21 = vpop.eup %4264 }
 0x8f7   : > { %v1975_v22 = vmul.f32 %v4265_v21, %v1961_v52 }
 0x8f9   : > { %v1983_v28 = vmul.f32 %v3676_v23, %v1975_v22 }
 0x8fa   : > { %v4267_v24 = vpop.eup %4266 }
 0x8fb   : > { %v1976_v27 = vmul.f32 %v4267_v24, %v4793_v54  ;;  %v4836_v31 = vadd.f32 %v3677_v29, %v1983_v28 }
 0x8fd   : > { %v1984_v30 = vmul.f32 %v3676_v23, %v1976_v27 }
 0x8ff   : > { %v4838_v34 = vadd.f32 %v3677_v29, %v1984_v30 }
 0x901   : > { %v1993_v36 = vpack.c.bf16 %v4838_v34, %v4836_v31 }
 0x903   : > { %3963 = vmatmul.mubr.bf16.vlgmr.msra.gmra.mrb[28].mxu1 %v1993_v36 }
 0x904   : > { %3968 = vmatprep.mubr.msk.bf16.mxu1 %vm4350_vm0, %v4349_v5  ;;  %3967 = vmatpush3.bf16.xpose.msra.mxu1 %v2282_v43 }
 0x905   : > { %3972 = vmatprep.subr.bf16.mxu1 %v4349_v5 }
 0x9d6   : > { %v2099_v46 = vpop.f32.mrb[28].mxu1 }
 0x9d7   : > { %v2100_v48 = vadd.f32 %v3678_v45, %v2099_v46  ;;  %v3964_v49 = vpop.f32.mrb[29].mxu1 }
 0x9d8   : > { %v2102_v25 = vpop.f32.mrb[30].mxu1 }
 0x9d9   : > { %v2103_v26 = vadd.f32 %v3678_v45, %v2102_v25  ;;  %v3965_v50 = vpop.f32.mrb[31].mxu1  ;;  %v2106_v52 = vmul.f32 0.17677669, %v2100_v48 }
 0x9db   : > { %v2107_v53 = vmul.f32 0.17677669, %v2103_v26 }
 0x9dd   : > { %v2275_v54 = vpack.c.bf16 %v2107_v53, %v2106_v52 }
 0x9df   : > { %3969 = vmatmul.mubr.msk.bf16.vlgmr.msra.gmra.mrb[32].mxu1 %vm1340_vm1, %v2275_v54 }
 0x9e0   : > { %3973 = vmatpush3.bf16.msra.mxu1 %v2354_v55  ;;  %3974 = vmatprep.mubr.msk.bf16.mxu1 %vm4350_vm0, %v4349_v5 }
 0x9e1   : > { %3978 = vmatprep.subr.bf16.mxu1 %v4349_v5 }
 0xab2   : > { %v2318_v56 = vpop.f32.mrb[32].mxu1 }
 0xab3   : > { %v3970_v57 = vpop.f32.mrb[33].mxu1  ;;  %v2326_v58 = vsel %vm2325_vm6, %v2318_v56, -inf }
 0xab4   : > { %2327 = vmax.xlane.f32.xlu0 %v2326_v58  ;;  %v2321_v60 = vpop.f32.mrb[34].mxu1 }
 0xab5   : > { %v3971_v61 = vpop.f32.mrb[35].mxu1  ;;  %v2329_v62 = vsel %vm2325_vm6, %v2321_v60, -inf }
 0xab6   : > { %2330 = vmax.xlane.f32.xlu1 %v2329_v62 }
 0xb41   : > { %v2328_v63 = vpop.xlane.xlu0 %2327 }
 0xb42   : > { %v2332_v0 = vsub.f32 %v2318_v56, %v2328_v63 }
 0xb43   : > { %v2331_v1 = vpop.xlane.xlu1 %2330 }
 0xb44   : > { %v2334_v2 = vmul.f32 1.442695, %v2332_v0  ;;  %v2333_v3 = vsub.f32 %v2321_v60, %v2331_v1 }
 0xb46   : > { %4268 = vpow2.f32 %v2334_v2  ;;  %v2336_v6 = vmul.f32 1.442695, %v2333_v3 }
 0xb48   : > { %4270 = vpow2.f32 %v2336_v6 }
 0xb50   : > { %v4269_v7 = vpop.eup %4268 }
 0xb51   : > { %v2338_v8 = vsel %vm2325_vm6, %v4269_v7, 0.0 }
 0xb52   : > { %v4271_v9 = vpop.eup %4270  ;;  %2339 = vadd.xlane.f32.xlu0 %v2338_v8 }
 0xb53   : > { %v2341_v10 = vsel %vm2325_vm6, %v4271_v9, 0.0 }
 0xb54   : > { %2342 = vadd.xlane.f32.xlu1 %v2341_v10 }
 0xb65   : > { %2398 = vrot.lane.b32.xlu1 %v2275_v54, %s4351_s10 }
 0xb68   : > { %2401 = vrot.lane.b32.xlu0 %v2276_v59, %s4351_s10 }
 0xb69   : > { %2525 = vrot.lane.b32.xlu1 %v2276_v59, %s4353_s17 }
 0xb6c   : > { %2648 = vrot.lane.b32.xlu0 %v2276_v59, %s4352_s14 }
 0xb6d   : > { %2523 = vrot.lane.b32.xlu1 %v2275_v54, %s4353_s17 }
 0xb71   : > { %2646 = vrot.lane.b32.xlu1 %v2275_v54, %s4352_s14 }
 0xbdf   : > { %v2340_v11 = vpop.xlane.xlu0 %2339 }
 0xbe0   : > { %4272 = vrcp.f32 %v2340_v11 }
 0xbe1   : > { %v2343_v12 = vpop.xlane.xlu1 %2342 }
 0xbe2   : > { %4274 = vrcp.f32 %v2343_v12 }
 0xbe3   : > { %v2402_v14 = vpop.permute.xlu0 %2401 }
 0xbe4   : > { %v2407_v23 = vsel %vm1340_vm1, %v2402_v14, 0 }
 0xbe5   : > { %v2399_v13 = vpop.permute.xlu1 %2398 }
 0xbe7   : > { %v2649_v21 = vpop.permute.xlu0 %2648 }
 0xbe8   : > { %v2654_v27 = vsel %vm1340_vm1, %v2649_v21, 0 }
 0xbe9   : > { %v2526_v15 = vpop.permute.xlu1 %2525 }
 0xbea   : > { %v4273_v16 = vpop.eup %4272  ;;  %v2531_v17 = vsel %vm1340_vm1, %v2526_v15, 0 }
 0xbeb   : > { %3991 = vmatpush3.bf16.xpose.msra.mxu0 %v2531_v17  ;;  %v2346_v19 = vmul.f32 %v4273_v16, %v4269_v7 }
 0xbec   : > { %v4275_v18 = vpop.eup %4274  ;;  %4002 = vmatprep.subr.bf16.mxu0 %v4349_v5 }
 0xbed   : > { %v2347_v20 = vmul.f32 %v4275_v18, %v4271_v9  ;;  %v2524_v24 = vpop.permute.xlu1 %2523 }
 0xbef   : > { %v2348_v22 = vpack.c.bf16 %v2347_v20, %v2346_v19 }
 0xbf1   : > { %3975 = vmatmul.mubr.msk.bf16.vlgmr.msra.gmra.mrb[36].mxu1 %vm2325_vm6, %v2348_v22  ;;  %v2647_v28 = vpop.permute.xlu1 %2646 }
 0xbf2   : > { %3979 = vmatpush3.bf16.xpose.msra.mxu1 %v2407_v23  ;;  %3993 = vmatmul.mubr.msk.bf16.vlgmr.msra.gmra.mrb[20].mxu0 %vm1340_vm1, %v2524_v24 }
 0xbf3   : > { %4003 = vmatpush3.bf16.xpose.msra.mxu0 %v2654_v27  ;;  %3980 = vmatprep.mubr.msk.bf16.mxu1 %vm4350_vm0, %v4349_v5 }
 0xbf4   : > { %4004 = vmatprep.mubr.msk.bf16.mxu0 %vm4350_vm0, %v4349_v5  ;;  %3984 = vmatprep.subr.bf16.mxu1 %v4349_v5 }
 0xbf5   : > { %4014 = vmatprep.subr.bf16.mxu0 %v4349_v5 }
 0xbf9   : > { %3981 = vmatmul.mubr.msk.bf16.vlgmr.msra.gmra.mrb[40].mxu1 %vm1340_vm1, %v2399_v13 }
 0xbfa   : > { %4005 = vmatmul.mubr.msk.bf16.vlgmr.msra.gmra.mrb[24].mxu0 %vm1340_vm1, %v2647_v28  ;;  %3986 = vmatprep.mubr.msk.bf16.mxu1 %vm4350_vm0, %v4349_v5 }
 0xbfb   : > { %4030 = vmatprep.mubr.msk.bf16.mxu0 %vm4350_vm0, %v4349_v5 }
 0xcc4   : > { %v4890_v29 = vpop.f32.mrb[36].mxu1 }
 0xcc5   : > { %v3976_v30 = vpop.f32.mrb[37].mxu1  ;;  %v2567_v36 = vpop.f32.mrb[20].mxu0 }
 0xcc6   : > { %v4892_v32 = vpop.f32.mrb[38].mxu1  ;;  %v3994_v37 = vpop.f32.mrb[21].mxu0  ;;  %v2574_v25 = vsel %vm2325_vm6, %v2567_v36, -inf }
 0xcc7   : > { %v3977_v38 = vpop.f32.mrb[39].mxu1  ;;  %v2570_v39 = vpop.f32.mrb[22].mxu0 }
 0xcc8   : > { %v3995_v40 = vpop.f32.mrb[23].mxu0  ;;  %v2577_v50 = vsel %vm2325_vm6, %v2570_v39, -inf }
 0xccc   : > { %v2443_v41 = vpop.f32.mrb[40].mxu1 }
 0xccd   : > { %v3982_v59 = vpop.f32.mrb[41].mxu1  ;;  %v2690_v42 = vpop.f32.mrb[24].mxu0  ;;  %v2450_v43 = vsel %vm2325_vm6, %v2443_v41, -inf }
 0xcce   : > { %v4006_v44 = vpop.f32.mrb[25].mxu0  ;;  %2451 = vmax.xlane.f32.xlu0 %v2450_v43  ;;  %v2446_v45 = vpop.f32.mrb[42].mxu1  ;;  %v2697_v52 = vsel %vm2325_vm6, %v2690_v42, -inf }
 0xccf   : > { %v3983_v46 = vpop.f32.mrb[43].mxu1  ;;  %v2693_v47 = vpop.f32.mrb[26].mxu0  ;;  %v2453_v48 = vsel %vm2325_vm6, %v2446_v45, -inf }
 0xcd0   : > { %v4007_v49 = vpop.f32.mrb[27].mxu0  ;;  %2454 = vmax.xlane.f32.xlu1 %v2453_v48  ;;  %v2700_v26 = vsel %vm2325_vm6, %v2693_v47, -inf }
 0xcd2   : > { %2575 = vmax.xlane.f32.xlu0 %v2574_v25 }
 0xcd4   : > { %2701 = vmax.xlane.f32.xlu1 %v2700_v26 }
 0xcd6   : > { %2578 = vmax.xlane.f32.xlu0 %v2577_v50 }
 0xcda   : > { %2698 = vmax.xlane.f32.xlu0 %v2697_v52 }
 0xd5b   : > { %v2452_v53 = vpop.xlane.xlu0 %2451 }
 0xd5c   : > { %v2456_v63 = vsub.f32 %v2443_v41, %v2452_v53 }
 0xd5d   : > { %v2455_v54 = vpop.xlane.xlu1 %2454 }
 0xd5e   : > { %v2457_v0 = vsub.f32 %v2446_v45, %v2455_v54  ;;  %v2458_v7 = vmul.f32 1.442695, %v2456_v63  ;;  %v4184_v54 = vld [vmem:[%s4575_s25] sm:$0xff]  }
 0xd5f   : > { %v2576_v55 = vpop.xlane.xlu0 %2575  ;;  %4015 = vmatpush3.bf16.msra.mxu0 %v4184_v54  ;;  %v4203_v54 = vld [vmem:[%s5139_s21 + $0x34] ss:$8 sps:$4 sm:$0xff]  }
 0xd60   : > { %v2580_v56 = vsub.f32 %v2567_v36, %v2576_v55  ;;  %v2460_v8 = vmul.f32 1.442695, %v2457_v0  ;;  %v4185_v55 = vld [vmem:[%s4575_s25 + $0x8] sm:$0xff]   ;;  %4016 = vmatprep.subr.bf16.mxu0 %v4349_v5 }
 0xd61   : > { %v2702_v57 = vpop.xlane.xlu1 %2701 }
 0xd62   : > { %v2582_v58 = vmul.f32 1.442695, %v2580_v56  ;;  %v2704_v60 = vsub.f32 %v2693_v47, %v2702_v57  ;;  %v4186_v56 = vld [vmem:[%s4575_s25 + $0x10] sm:$0xff]   ;;  %v4187_v57 = vld [vmem:[%s4575_s25 + $0x18] sm:$0xff]  }
 0xd63   : > { %v2579_v61 = vpop.xlane.xlu0 %2578  ;;  %4017 = vmatpush3.bf16.msra.mxu0 %v4185_v55  ;;  %v4201_v55 = vld [vmem:[%s5139_s21 + $0x30] ss:$8 sps:$4 sm:$0xff]  }
 0xd64   : > { %4276 = vpow2.f32 %v2582_v58  ;;  %v2581_v62 = vsub.f32 %v2570_v39, %v2579_v61  ;;  %v2707_v1 = vmul.f32 1.442695, %v2704_v60  ;;  %4018 = vmatprep.subr.bf16.mxu0 %v4349_v5  ;;  %v4188_v58 = vld [vmem:[%s4575_s25 + $0x20] sm:$0xff]   ;;  %v4189_v61 = vld [vmem:[%s4575_s25 + $0x28] sm:$0xff]  }
 0xd66   : > { %v2584_v2 = vmul.f32 1.442695, %v2581_v62 }
 0xd67   : > { %v2699_v3 = vpop.xlane.xlu0 %2698  ;;  %4019 = vmatpush3.bf16.msra.mxu0 %v4186_v56  ;;  %v4206_v56 = vld [vmem:[%s5139_s21 + $0x44] ss:$8 sps:$4 sm:$0xff]  }
 0xd68   : > { %4278 = vpow2.f32 %v2584_v2  ;;  %v2703_v6 = vsub.f32 %v2690_v42, %v2699_v3  ;;  %4020 = vmatprep.subr.bf16.mxu0 %v4349_v5 }
 0xd69   : > { %4280 = vpow2.f32 %v2707_v1  ;;  %v4190_v1 = vld [vmem:[%s4575_s25 + $0x30] sm:$0xff]  }
 0xd6a   : > { %v2705_v9 = vmul.f32 1.442695, %v2703_v6  ;;  %v4191_v6 = vld [vmem:[%s4575_s25 + $0x38] sm:$0xff]  }
 0xd6b   : > { %4021 = vmatpush3.bf16.msra.mxu0 %v4187_v57  ;;  %v4204_v57 = vld [vmem:[%s5139_s21 + $0x40] ss:$8 sps:$4 sm:$0xff]  }
 0xd6c   : > { %4282 = vpow2.f32 %v2705_v9  ;;  %4022 = vmatprep.subr.bf16.mxu0 %v4349_v5 }
 0xd6d   : > { %4284 = vpow2.f32 %v2458_v7 }
 0xd6e   : > { %v4277_v10 = vpop.eup %4276  ;;  %4286 = vpow2.f32 %v2460_v8 }
 0xd6f   : > { %v2586_v11 = vsel %vm2325_vm6, %v4277_v10, 0.0  ;;  %4023 = vmatpush3.bf16.msra.mxu0 %v4188_v58  ;;  %v4209_v58 = vld [vmem:[%s5139_s21 + $0x54] ss:$8 sps:$4 sm:$0xff]  }
 0xd70   : > { %2587 = vadd.xlane.f32.xlu0 %v2586_v11  ;;  %4024 = vmatprep.subr.bf16.mxu0 %v4349_v5 }
 0xd72   : > { %v4279_v12 = vpop.eup %4278 }
 0xd73   : > { %v2589_v13 = vsel %vm2325_vm6, %v4279_v12, 0.0  ;;  %v4281_v14 = vpop.eup %4280  ;;  %4025 = vmatpush3.bf16.msra.mxu0 %v4189_v61  ;;  %v4210_v61 = vld [vmem:[%s5139_s21 + $0x60] ss:$8 sps:$4 sm:$0xff]  }
 0xd74   : > { %2590 = vadd.xlane.f32.xlu1 %v2589_v13  ;;  %v2712_v18 = vsel %vm2325_vm6, %v4281_v14, 0.0  ;;  %4026 = vmatprep.subr.bf16.mxu0 %v4349_v5 }
 0xd76   : > { %v4283_v15 = vpop.eup %4282 }
 0xd77   : > { %v4285_v16 = vpop.eup %4284  ;;  %v2709_v17 = vsel %vm2325_vm6, %v4283_v15, 0.0  ;;  %4027 = vmatpush3.bf16.msra.mxu0 %v4190_v1  ;;  %v4217_v1 = vld [vmem:[%s4602_s13] sm:$0xff]  }
 0xd78   : > { %v4287_v19 = vpop.eup %4286  ;;  %2710 = vadd.xlane.f32.xlu0 %v2709_v17  ;;  %2713 = vadd.xlane.f32.xlu1 %v2712_v18  ;;  %v2462_v20 = vsel %vm2325_vm6, %v4285_v16, 0.0 }
 0xd79   : > { %v2465_v21 = vsel %vm2325_vm6, %v4287_v19, 0.0  ;;  %4028 = vmatprep.subr.bf16.mxu0 %v4349_v5 }
 0xd7b   : > { %4029 = vmatpush3.bf16.msra.mxu0 %v4191_v6  ;;  %v4220_v6 = vld [vmem:[%s4602_s13 + $0x50] sm:$0xff]  }
 0xd7c   : > { %2463 = vadd.xlane.f32.xlu0 %v2462_v20  ;;  %2466 = vadd.xlane.f32.xlu1 %v2465_v21 }
 0xd8d   : > { %2597 = vrot.lane.b32.xlu1 %v4854_v51, %s4353_s17 }
 0xd91   : > { %2720 = vrot.lane.b32.xlu1 %v4854_v51, %s4352_s14 }
 0xd92   : > { %2474 = vrot.lane.b32.xlu0 %v4854_v51, %s4351_s10 }
 0xdfd   : > { %v2588_v22 = vpop.xlane.xlu0 %2587 }
 0xe01   : > { %v2591_v23 = vpop.xlane.xlu1 %2590 }
 0xe05   : > { %v2711_v24 = vpop.xlane.xlu0 %2710  ;;  %v2714_v27 = vpop.xlane.xlu1 %2713 }
 0xe09   : > { %v2464_v28 = vpop.xlane.xlu0 %2463  ;;  %v2467_v30 = vpop.xlane.xlu1 %2466 }
 0xe0a   : > { %4288 = vrcp.f32 %v2464_v28 }
 0xe0b   : > { %4290 = vrcp.f32 %v2467_v30 }
 0xe0c   : > { %4292 = vrcp.f32 %v2591_v23 }
 0xe0d   : > { %v2475_v36 = vpop.permute.xlu0 %2474  ;;  %4294 = vrcp.f32 %v2588_v22  ;;  %v2598_v41 = vpop.permute.xlu1 %2597 }
 0xe0e   : > { %v2480_v37 = vsel %vm2352_vm5, %v2475_v36, 0  ;;  %4296 = vrcp.f32 %v2711_v24  ;;  %v2603_v43 = vsel %vm2352_vm5, %v2598_v41, 0 }
 0xe0f   : > { %3985 = vmatpush3.bf16.msra.mxu1 %v2480_v37  ;;  %4298 = vrcp.f32 %v2714_v27 }
 0xe10   : > { %3996 = vmatprep.subr.bf16.mxu1 %v4349_v5 }
 0xe11   : > { %v2721_v47 = vpop.permute.xlu1 %2720 }
 0xe12   : > { %v2726_v26 = vsel %vm2352_vm5, %v2721_v47, 0 }
 0xe14   : > { %v4289_v38 = vpop.eup %4288 }
 0xe15   : > { %v4291_v39 = vpop.eup %4290  ;;  %v2470_v40 = vmul.f32 %v4289_v38, %v4285_v16 }
 0xe16   : > { %v2471_v51 = vmul.f32 %v4291_v39, %v4287_v19  ;;  %v4293_v42 = vpop.eup %4292 }
 0xe17   : > { %v4295_v44 = vpop.eup %4294  ;;  %v2595_v45 = vmul.f32 %v4293_v42, %v4279_v12 }
 0xe18   : > { %v2472_v59 = vpack.c.bf16 %v2471_v51, %v2470_v40  ;;  %v2594_v46 = vmul.f32 %v4295_v44, %v4277_v10  ;;  %v4297_v48 = vpop.eup %4296  ;;  %v4194_v44 = vld [vmem:[%s5139_s21 + $0x4] ss:$8 sps:$4 sm:$0xff]  }
 0xe19   : > { %v4299_v25 = vpop.eup %4298  ;;  %v2717_v50 = vmul.f32 %v4297_v48, %v4283_v15 }
 0xe1a   : > { %3987 = vmatmul.mubr.msk.bf16.vlgmr.msra.gmra.mrb[44].mxu1 %vm2325_vm6, %v2472_v59  ;;  %v2596_v49 = vpack.c.bf16 %v2595_v45, %v2594_v46  ;;  %v2718_v52 = vmul.f32 %v4299_v25, %v4281_v14  ;;  %v4197_v45 = vld [vmem:[%s5139_s21 + $0x14] ss:$8 sps:$4 sm:$0xff]   ;;  %v4195_v46 = vld [vmem:[%s5139_s21 + $0x10] ss:$8 sps:$4 sm:$0xff]  }
 0xe1b   : > { %3997 = vmatpush3.bf16.msra.mxu1 %v2603_v43  ;;  %3998 = vmatprep.mubr.msk.bf16.mxu1 %vm4350_vm0, %v4349_v5  ;;  %v4192_v43 = vld [vmem:[%s5139_s21] ss:$8 sps:$4 sm:$0xff]  }
 0xe1c   : > { %4008 = vmatprep.subr.bf16.mxu1 %v4349_v5  ;;  %v2719_v53 = vpack.c.bf16 %v2718_v52, %v2717_v50  ;;  %v4200_v52 = vld [vmem:[%s5139_s21 + $0x24] ss:$8 sps:$4 sm:$0xff]  }
 0xe22   : > { %3999 = vmatmul.mubr.msk.bf16.vlgmr.msra.gmra.mrb[48].mxu1 %vm2325_vm6, %v2596_v49 }
 0xe23   : > { %4009 = vmatpush3.bf16.msra.mxu1 %v2726_v26  ;;  %4010 = vmatprep.mubr.msk.bf16.mxu1 %vm4350_vm0, %v4349_v5 }
 0xe24   : > { %3046 = vmatprep.subr.bf16.mxu1 %v4194_v44 }
 0xe2a   : > { %4011 = vmatmul.mubr.msk.bf16.vlgmr.msra.gmra.mrb[52].mxu1 %vm2325_vm6, %v2719_v53  ;;  %v4198_v53 = vld [vmem:[%s5139_s21 + $0x20] ss:$8 sps:$4 sm:$0xff]  }
 0xe2b   : > { %3078 = vmatprep.mubr.bf16.mxu1 %v4348_v4  ;;  %3047 = vmatpush1.bf16.msra.mxu1 %v4192_v43 }
 0xe2c   : > { %3048 = vmatprep.subr.bf16.mxu1 %v4197_v45 }
 0xe2f   : > { %3049 = vmatpush1.bf16.msra.mxu1 %v4195_v46 }
 0xe30   : > { %3050 = vmatprep.subr.bf16.mxu1 %v4200_v52 }
 0xe33   : > { %3051 = vmatpush1.bf16.msra.mxu1 %v4198_v53 }
 0xe34   : > { %3052 = vmatprep.subr.bf16.mxu1 %v4203_v54 }
 0xe37   : > { %3053 = vmatpush1.bf16.msra.mxu1 %v4201_v55 }
 0xe38   : > { %3054 = vmatprep.subr.bf16.mxu1 %v4206_v56 }
 0xe3b   : > { %3055 = vmatpush1.bf16.msra.mxu1 %v4204_v57 }
 0xe3c   : > { %3056 = vmatprep.subr.bf16.mxu1 %v4209_v58 }
 0xeed   : > { %v2516_v4 = vpop.f32.mrb[44].mxu1 }
 0xeee   : > { %v3988_v60 = vpop.f32.mrb[45].mxu1 }
 0xeef   : > { %v2519_v62 = vpop.f32.mrb[46].mxu1  ;;  %v4212_v60 = vld [vmem:[%s5139_s21 + $0x64] ss:$8 sps:$4 sm:$0xff]  }
 0xef0   : > { %v4097_v63 = vpack.i.bf16 %v2519_v62, %v2516_v4  ;;  %v3989_v0 = vpop.f32.mrb[47].mxu1  ;;  %v4207_v4 = vld [vmem:[%s5139_s21 + $0x50] ss:$8 sps:$4 sm:$0xff]   ;;  %v4215_v62 = vld [vmem:[%s5139_s21 + $0x74] ss:$8 sps:$4 sm:$0xff]  }
 0xef1   : > { %3057 = vmatpush1.bf16.msra.mxu1 %v4207_v4  ;;  %v4216_v0 = vld [vmem:[%s4602_s13 + $0x40] sm:$0xff]  }
 0xef2   : > { %4098 = vrot.lane.b32.xlu1 %v4097_v63, %s4352_s14  ;;  %3058 = vmatprep.subr.bf16.mxu1 %v4212_v60  ;;  %v4213_v63 = vld [vmem:[%s5139_s21 + $0x70] ss:$8 sps:$4 sm:$0xff]  }
 0xef3   : > { %3836 = vmatprep.subr.bf16.mxu0 %v4216_v0 }
 0xef5   : > { %v2639_v2 = vpop.f32.mrb[48].mxu1  ;;  %3059 = vmatpush1.bf16.msra.mxu1 %v4210_v61 }
 0xef6   : > { %v4000_v3 = vpop.f32.mrb[49].mxu1  ;;  %3060 = vmatprep.subr.bf16.mxu1 %v4215_v62 }
 0xef7   : > { %v2642_v7 = vpop.f32.mrb[50].mxu1  ;;  %v4219_v3 = vld [vmem:[%s4602_s13 + $0x8] sm:$0xff]  }
 0xef8   : > { %v4102_v8 = vpack.i.bf16 %v2642_v7, %v2639_v2  ;;  %v4001_v9 = vpop.f32.mrb[51].mxu1  ;;  %v4218_v2 = vld [vmem:[%s4602_s13 + $0x48] sm:$0xff]   ;;  %v4221_v7 = vld [vmem:[%s4602_s13 + $0x10] sm:$0xff]  }
 0xef9   : > { %3061 = vmatpush1.bf16.msra.mxu1 %v4213_v63  ;;  %v4223_v9 = vld [vmem:[%s4602_s13 + $0x18] sm:$0xff]  }
 0xefa   : > { %4103 = vrot.lane.b32.xlu0 %v4102_v8, %s4353_s17  ;;  %v4222_v8 = vld [vmem:[%s4602_s13 + $0x58] sm:$0xff]  }
 0xefd   : > { %v2762_v10 = vpop.f32.mrb[52].mxu1 }
 0xefe   : > { %v4012_v11 = vpop.f32.mrb[53].mxu1 }
 0xeff   : > { %v2765_v12 = vpop.f32.mrb[54].mxu1  ;;  %v4225_v11 = vld [vmem:[%s4602_s13 + $0x20] sm:$0xff]  }
 0xf00   : > { %v4107_v13 = vpack.i.bf16 %v2765_v12, %v2762_v10  ;;  %v4013_v14 = vpop.f32.mrb[55].mxu1  ;;  %v4224_v10 = vld [vmem:[%s4602_s13 + $0x60] sm:$0xff]   ;;  %v4226_v12 = vld [vmem:[%s4602_s13 + $0x68] sm:$0xff]  }
 0xf02   : > { %4108 = vrot.lane.b32.xlu1 %v4107_v13, %s4351_s10  ;;  %s5141_s10 = scalar_lea.vmem %s5140_s3, %s4505_s1 }
 0xf64   : > { %v4099_v15 = vpop.permute.xlu1 %4098 }
 0xf65   : > { %v4101_v17 = vunpack.i.h.bf16 %v4099_v15  ;;  %v4100_v5 = vunpack.i.l.bf16 %v4099_v15 }
 0xf67   : > { %v2794_v21 = vsel %vm1340_vm1, %v4892_v32, %v4101_v17  ;;  %v2793_v22 = vsel %vm1340_vm1, %v4890_v29, %v4100_v5  ;;  %v3711_v29 = vld [vmem:[%s5141_s10] ss:$0 sm:$0xff] }
 0xf6c   : > { %v4104_v16 = vpop.permute.xlu0 %4103 }
 0xf6d   : > { %v4106_v18 = vunpack.i.h.bf16 %v4104_v16  ;;  %v4105_v19 = vunpack.i.l.bf16 %v4104_v16 }
 0xf6f   : > { %v2796_v27 = vsel %vm1848_vm3, %v2794_v21, %v4106_v18  ;;  %v2795_v28 = vsel %vm1848_vm3, %v2793_v22, %v4105_v19 }
 0xf74   : > { %v4109_v20 = vpop.permute.xlu1 %4108 }
 0xf75   : > { %v4111_v23 = vunpack.i.h.bf16 %v4109_v20  ;;  %v4110_v24 = vunpack.i.l.bf16 %v4109_v20  ;;  %v3720_v20 = vld [vmem:[%s5143_s5] ss:$0 sm:$0xff] }
 0xf77   : > { %v2798_v30 = vsel %vm1851_vm4, %v2796_v27, %v4111_v23  ;;  %v2797_v36 = vsel %vm1851_vm4, %v2795_v28, %v4110_v24  ;;  %v3721_v24 = vld [vmem:[%s5145_s20] ss:$0 sm:$0xff] }
 0xf78   : > { %v2799_v37 = vpack.c.bf16 %v2798_v30, %v2797_v36 }
 0xf7a   : > { %4031 = vmatmul.mubr.bf16.vlgmr.msra.gmra.mrb[28].mxu0 %v2799_v37  ;;  %v4227_v37 = vld [vmem:[%s4602_s13 + $0x28] sm:$0xff]  }
 0xf7b   : > { %3837 = vmatpush3.bf16.msra.mxu0 %v4217_v1 }
 0xf7c   : > { %3838 = vmatprep.subr.bf16.mxu0 %v4218_v2 }
 0xf7f   : > { %3839 = vmatpush3.bf16.msra.mxu0 %v4219_v3 }
 0xf80   : > { %3840 = vmatprep.subr.bf16.mxu0 %v4220_v6 }
 0xf83   : > { %3841 = vmatpush3.bf16.msra.mxu0 %v4221_v7 }
 0xf84   : > { %3842 = vmatprep.subr.bf16.mxu0 %v4222_v8 }
 0xf87   : > { %3843 = vmatpush3.bf16.msra.mxu0 %v4223_v9 }
 0xf88   : > { %3844 = vmatprep.subr.bf16.mxu0 %v4224_v10 }
 0xf8b   : > { %3845 = vmatpush3.bf16.msra.mxu0 %v4225_v11 }
 0xf8c   : > { %3846 = vmatprep.subr.bf16.mxu0 %v4226_v12 }
 0xf8f   : > { %3847 = vmatpush3.bf16.msra.mxu0 %v4227_v37 }
0x104d   : > { %v2888_v32 = vpop.f32.mrb[28].mxu0 }
0x104e   : > { %v2889_v38 = vadd.f32 %v3711_v29, %v2888_v32  ;;  %v4032_v39 = vpop.f32.mrb[29].mxu0  ;;  %v4229_v32 = vld [vmem:[%s4602_s13 + $0x30] sm:$0xff]  }
0x104f   : > { %v2891_v40 = vpop.f32.mrb[30].mxu0  ;;  %v4231_v39 = vld [vmem:[%s4602_s13 + $0x38] sm:$0xff]  }
0x1050   : > { %v2892_v51 = vadd.f32 %v3711_v29, %v2891_v40  ;;  %v4033_v41 = vpop.f32.mrb[31].mxu0  ;;  %v2895_v59 = vadd.f32 %v2889_v38, %v4836_v31  ;;  %v4228_v29 = vld [vmem:[%s4602_s13 + $0x70] sm:$0xff]   ;;  %v4230_v38 = vld [vmem:[%s4602_s13 + $0x78] sm:$0xff]   ;;  %v2954_v40 = vld [vmem:[%s5146_s2] sm:$0x3] }
0x1051   : > { %3848 = vmatprep.subr.bf16.mxu0 %v4228_v29  ;;  %v2963_v41 = vrot.slane %v2954_v40, %v4676_v35  ;;  %v3738_v35 = vld [vmem:[%s1032_s24] ss:$0 sm:$0xff] }
0x1052   : > { %2899 = vadd.xlane.f32.xlu0 %v2895_v59  ;;  %v2896_v42 = vadd.f32 %v2892_v51, %v4838_v34  ;;  %3849 = vmatpush3.bf16.msra.mxu0 %v4229_v32  ;;  %v2959_v51 = vrot.slane %v2954_v40, %v4673_v33 }
0x1053   : > { %3850 = vmatprep.subr.bf16.mxu0 %v4230_v38 }
0x1054   : > { %2901 = vadd.xlane.f32.xlu1 %v2896_v42 }
0x1056   : > { %3851 = vmatpush3.bf16.msra.mxu0 %v4231_v39 }
0x10df   : > { %v2900_v47 = vpop.xlane.xlu0 %2899 }
0x10e0   : > { %v2903_v48 = vmul.f32 0.0078125, %v2900_v47 }
0x10e1   : > { %v2902_v49 = vpop.xlane.xlu1 %2901 }
0x10e2   : > { %v2905_v31 = vsub.f32 %v2895_v59, %v2903_v48  ;;  %v2904_v34 = vmul.f32 0.0078125, %v2902_v49 }
0x10e4   : > { %v4962_v25 = vsub.f32 %v2896_v42, %v2904_v34  ;;  %v2907_v26 = vmul.f32 %v2905_v31, %v2905_v31 }
0x10e6   : > { %2909 = vadd.xlane.f32.xlu0 %v2907_v26  ;;  %v2908_v50 = vmul.f32 %v4962_v25, %v4962_v25 }
0x10ea   : > { %2911 = vadd.xlane.f32.xlu0 %v2908_v50 }
0x1173   : > { %v2910_v13 = vpop.xlane.xlu0 %2909 }
0x1174   : > { %v2913_v14 = vmul.f32 0.0078125, %v2910_v13 }
0x1176   : > { %v2915_v15 = vadd.f32 1e-05, %v2913_v14  ;;  %v3755_v14 = vld [vmem:[%s1035_s0] ss:$0 sm:$0xff] }
0x1177   : > { %v2912_v16 = vpop.xlane.xlu0 %2911 }
0x1178   : > { %4300 = vrsqrt.f32 %v2915_v15  ;;  %v2914_v17 = vmul.f32 0.0078125, %v2912_v16 }
0x117a   : > { %v2916_v5 = vadd.f32 1e-05, %v2914_v17  ;;  %v3756_v17 = vld [vmem:[%s1038_s9] ss:$0 sm:$0xff] }
0x117c   : > { %4302 = vrsqrt.f32 %v2916_v5 }
0x1182   : > { %v4301_v18 = vpop.eup %4300 }
0x1183   : > { %v2919_v19 = vmul.f32 %v4301_v18, %v2905_v31 }
0x1185   : > { %v2927_v23 = vmul.f32 %v3720_v20, %v2919_v19 }
0x1186   : > { %v4303_v21 = vpop.eup %4302 }
0x1187   : > { %v2920_v22 = vmul.f32 %v4303_v21, %v4962_v25  ;;  %v2935_v28 = vadd.f32 %v3721_v24, %v2927_v23 }
0x1189   : > { %v2928_v27 = vmul.f32 %v3720_v20, %v2920_v22 }
0x118b   : > { %v2936_v30 = vadd.f32 %v3721_v24, %v2928_v27 }
0x118d   : > { %v2937_v36 = vpack.c.bf16 %v2936_v30, %v2935_v28 }
0x118f   : > { %3079 = vmatmul.mubr.bf16.vlgmr.msra.gmra.mrb[56].mxu1 %v2937_v36 }
0x1262   : > { %v3080_v59 = vpop.f32.mrb[56].mxu1 }
0x1263   : > { %v3081_v42 = vadd.f32 %v3080_v59, %v2959_v51  ;;  %v3082_v43 = vpop.f32.mrb[57].mxu1 }
0x1264   : > { %v3083_v44 = vadd.f32 %v3082_v43, %v2963_v41  ;;  %v3084_v45 = vpop.f32.mrb[58].mxu1 }
0x1265   : > { %v3085_v46 = vadd.f32 %v3084_v45, %v2959_v51  ;;  %v3086_v47 = vpop.f32.mrb[59].mxu1  ;;  %v3089_v49 = vmax.f32 %v3081_v42, 0.0 }
0x1266   : > { %v3087_v48 = vadd.f32 %v3086_v47, %v2963_v41  ;;  %v3090_v34 = vmax.f32 %v3083_v44, 0.0 }
0x1267   : > { %v3091_v31 = vmax.f32 %v3085_v46, 0.0 }
0x1268   : > { %v3092_v25 = vmax.f32 %v3087_v48, 0.0 }
0x1269   : > { %v3093_v26 = vpack.c.bf16 %v3091_v31, %v3089_v49 }
0x126a   : > { %v3094_v50 = vpack.c.bf16 %v3092_v25, %v3090_v34 }
0x126c   : > { %3262 = vmatprep.mubr.bf16.mxu0 %v3094_v50 }
0x126d   : > { %3263 = vmatmul.mubr.bf16.vlgmr.msra.gmra.mrb[32].mxu0 %v3093_v26 }
0x1340   : > { %v3852_v33 = vpop.f32.mrb[32].mxu0 }
0x1341   : > { %v3853_v52 = vpop.f32.mrb[33].mxu0 }
0x1342   : > { %v3854_v53 = vadd.f32 %v3853_v52, %v3852_v33  ;;  %v3855_v54 = vpop.f32.mrb[34].mxu0 }
0x1343   : > { %v3856_v55 = vpop.f32.mrb[35].mxu0 }
0x1344   : > { %v3265_v56 = vadd.f32 %v3854_v53, %v3738_v35  ;;  %v3857_v57 = vadd.f32 %v3856_v55, %v3855_v54 }
0x1346   : > { %v3268_v58 = vadd.f32 %v3857_v57, %v3738_v35  ;;  %v3271_v4 = vadd.f32 %v3265_v56, %v2935_v28 }
0x1348   : > { %3275 = vadd.xlane.f32.xlu0 %v3271_v4  ;;  %v3272_v60 = vadd.f32 %v3268_v58, %v2936_v30 }
0x134a   : > { %3277 = vadd.xlane.f32.xlu1 %v3272_v60 }
0x13d5   : > { %v3276_v61 = vpop.xlane.xlu0 %3275 }
0x13d6   : > { %v3279_v62 = vmul.f32 0.0078125, %v3276_v61 }
0x13d7   : > { %v3278_v63 = vpop.xlane.xlu1 %3277 }
0x13d8   : > { %v3281_v0 = vsub.f32 %v3271_v4, %v3279_v62  ;;  %v3280_v1 = vmul.f32 0.0078125, %v3278_v63 }
0x13da   : > { %v3282_v2 = vsub.f32 %v3272_v60, %v3280_v1  ;;  %v3283_v3 = vmul.f32 %v3281_v0, %v3281_v0 }
0x13dc   : > { %3285 = vadd.xlane.f32.xlu0 %v3283_v3  ;;  %v3284_v6 = vmul.f32 %v3282_v2, %v3282_v2 }
0x13de   : > { %3287 = vadd.xlane.f32.xlu1 %v3284_v6 }
0x1469   : > { %v3286_v7 = vpop.xlane.xlu0 %3285 }
0x146a   : > { %v3289_v8 = vmul.f32 0.0078125, %v3286_v7 }
0x146b   : > { %v3288_v9 = vpop.xlane.xlu1 %3287 }
0x146c   : > { %v3291_v10 = vadd.f32 1e-05, %v3289_v8  ;;  %v3290_v11 = vmul.f32 0.0078125, %v3288_v9 }
0x146e   : > { %4304 = vrsqrt.f32 %v3291_v10  ;;  %v3292_v12 = vadd.f32 1e-05, %v3290_v11 }
0x1470   : > { %4306 = vrsqrt.f32 %v3292_v12 }
0x1478   : > { %v4305_v13 = vpop.eup %4304 }
0x1479   : > { %v3295_v15 = vmul.f32 %v4305_v13, %v3281_v0 }
0x147a   : > { %v4307_v16 = vpop.eup %4306 }
0x147b   : > { %v3303_v5 = vmul.f32 %v3755_v14, %v3295_v15  ;;  %v3296_v18 = vmul.f32 %v4307_v16, %v3282_v2  ;;  %3318 = sbr.rel (%p3757_p8) target bundleno = 5250 (0x1482), region = 116 }
0x147d   : > { %v3311_v19 = vadd.f32 %v3756_v17, %v3303_v5  ;;  %v3304_v20 = vmul.f32 %v3755_v14, %v3296_v18 }
0x147f   : > { %3313 = vst [vmem:[#allocation2] sm:$0xff] %v3311_v19  ;;  %v3312_v21 = vadd.f32 %v3756_v17, %v3304_v20  ;;  %3319 = vst [vmem:[%s4621_s12] sm:$0xff] (!%p3757_p8), %v3311_v19 }
0x1481   : > { %3314 = vst [vmem:[#allocation2 + $0x8] sm:$0xff] %v3312_v21  ;;  %3320 = vst [vmem:[%s4621_s12 + $0x8] sm:$0xff] (!%p3757_p8), %v3312_v21 }
0x1482 PF: > { %s5151_s0 = sld [smem:[#allocation6_spill]]  ;;  %s5152_s3 = sld [smem:[#allocation4_spill]] }
0x1483   : > { %s5153_s28 = sld [smem:[#allocation5_spill]]  ;;  %s5154_s29 = sld [smem:[#allocation7_spill]] }
0x1484   : > { %s5155_s30 = sld [smem:[#allocation8_spill]] }
0x1488   : > { %s32_s4 = sadd.s32 1, %s5151_s0  }
0x1489   : > { %p29_p9 = scmp.ge.s32.totalorder %s32_s4, 6  }
0x148b   :  { %31 = sbr.rel (!%p29_p9) target bundleno = 23 (0x17), region = 209 }

</bundles_post_ra>
